<compile_context>
chip_gen: v5e
topology: v5e:2x2
jax: 0.10.0
libtpu: 0.0.40
codegen_flags: <defaults>
</compile_context>

<pallas_src>
import jax
import jax.numpy as jnp
from jax import lax
from jax.experimental import pallas as pl
from jax.experimental.pallas import tpu as pltpu


TILE_N = 512   # points per grid step (lane dim of every conv matmul)
LANE = 128     # vreg lane width


def _stn3d_kernel(x_ref, w1_ref, b1_ref, w2_ref, b2_ref, w3_ref, b3_ref,
                  fw1_ref, fb1_ref, fw2_ref, fb2_ref, fw3_ref, fb3_ref,
                  out_ref, acc_ref):
    nt = pl.program_id(1)

    # init lane-dense running-max accumulator for this batch element
    @pl.when(nt == 0)
    def _():
        acc_ref[...] = jnp.full(acc_ref.shape, -jnp.inf, jnp.float32)

    x = x_ref[0]                                     # (3, TILE_N) f32, lane-dense
    w1 = w1_ref[...]                                 # (64, 3)

    # conv1: K=3 contraction as 3 broadcast FMAs on the VPU (keeps the MXU free)
    h = (w1[:, 0:1] * x[0:1, :]
         + w1[:, 1:2] * x[1:2, :]
         + w1[:, 2:3] * x[2:3, :]
         + b1_ref[...])                              # (64, TILE_N)
    h = jnp.maximum(h, 0.0)

    # conv2: (128, 64) @ (64, TILE_N) -- bf16 inputs, f32 accumulation on MXU
    h = jnp.dot(w2_ref[...], h.astype(jnp.bfloat16),
                preferred_element_type=jnp.float32)
    h = jnp.maximum(h + b2_ref[...], 0.0)            # (128, TILE_N)

    # conv3: (1024, 128) @ (128, TILE_N) -- the hot matmul.
    # Bias + ReLU are deferred past the max-pool (applied once in finalize).
    h = jnp.dot(w3_ref[...], h.astype(jnp.bfloat16),
                preferred_element_type=jnp.float32)  # (1024, TILE_N)

    # fold TILE_N lanes down to a lane-dense (1024, 128) partial max (pure VPU,
    # no per-tile cross-lane reduce). All columns are real points (edge padding).
    m = h[:, 0:LANE]
    for j in range(1, TILE_N // LANE):
        m = jnp.maximum(m, h[:, j * LANE:(j + 1) * LANE])
    acc_ref[...] = jnp.maximum(acc_ref[...], m)

    # fused FC head: runs once per batch element, on its last point tile
    @pl.when(nt == pl.num_programs(1) - 1)
    def _():
        # single cross-lane reduce per batch element, then deferred conv3 bias+relu
        feat = jnp.max(acc_ref[...], axis=1, keepdims=True)          # (1024, 1)
        feat = jnp.maximum(feat + b3_ref[...], 0.0)                  # (1024, 1)

        # fc1/fc2: bf16 column matmuls on the MXU (f32 accumulation)
        z = jnp.dot(fw1_ref[...], feat.astype(jnp.bfloat16),
                    preferred_element_type=jnp.float32) + fb1_ref[...]   # (512, 1)
        z = jnp.maximum(z, 0.0)
        z = jnp.dot(fw2_ref[...], z.astype(jnp.bfloat16),
                    preferred_element_type=jnp.float32) + fb2_ref[...]   # (256, 1)
        z = jnp.maximum(z, 0.0)
        z = jnp.dot(fw3_ref[...], z,
                    preferred_element_type=jnp.float32) + fb3_ref[...]   # (9, 1)
        out_ref[...] = z[None, :, :]                                     # (1, 9, 1)


def stn3d_forward(x_bcn, params):
    """x_bcn: (B, 3, N) float32 -- same layout as the PyTorch module."""
    B, C, N = x_bcn.shape
    assert C == 3
    (w1, b1, w2, b2, w3, b3, fw1, fb1, fw2, fb2, fw3, fb3) = params

    n_tiles = (N + TILE_N - 1) // TILE_N
    n_pad = n_tiles * TILE_N
    if n_pad != N:
        # replicate the last valid point: max over duplicated real points is
        # unchanged, so no in-kernel padding mask is needed.
        x_bcn = jnp.pad(x_bcn, ((0, 0), (0, 0), (0, n_pad - N)), mode="edge")

    # bf16 weights for all MXU layers (f32 accumulation in-kernel)
    w2b = w2.astype(jnp.bfloat16)
    w3b = w3.astype(jnp.bfloat16)
    fw1b = fw1.astype(jnp.bfloat16)
    fw2b = fw2.astype(jnp.bfloat16)

    const = lambda b, n: (0, 0)
    out = pl.pallas_call(
        _stn3d_kernel,
        out_shape=jax.ShapeDtypeStruct((B, 9, 1), jnp.float32),
        grid_spec=pltpu.PrefetchScalarGridSpec(
            num_scalar_prefetch=0,
            grid=(B, n_tiles),
            in_specs=[
                pl.BlockSpec((1, 3, TILE_N), lambda b, n: (b, 0, n)),  # x
                pl.BlockSpec((64, 3), const),       # conv1 w (out, in)  f32
                pl.BlockSpec((64, 1), const),       # conv1 b (out, 1)
                pl.BlockSpec((128, 64), const),     # conv2 w  bf16
                pl.BlockSpec((128, 1), const),      # conv2 b
                pl.BlockSpec((1024, 128), const),   # conv3 w  bf16
                pl.BlockSpec((1024, 1), const),     # conv3 b (applied post-pool)
                pl.BlockSpec((512, 1024), const),   # fc1 w (out, in)  bf16
                pl.BlockSpec((512, 1), const),      # fc1 b
                pl.BlockSpec((256, 512), const),    # fc2 w  bf16
                pl.BlockSpec((256, 1), const),      # fc2 b
                pl.BlockSpec((9, 256), const),      # fc3 w  f32
                pl.BlockSpec((9, 1), const),        # fc3 b
            ],
            out_specs=pl.BlockSpec((1, 9, 1), lambda b, n: (b, 0, 0)),
            scratch_shapes=[pltpu.VMEM((1024, LANE), jnp.float32)],
        ),
        compiler_params=pltpu.CompilerParams(
            dimension_semantics=("parallel", "arbitrary"),
            vmem_limit_bytes=32 * 1024 * 1024),
    )(x_bcn, w1, b1, w2b, b2, w3b, b3, fw1b, fb1, fw2b, fb2, fw3, fb3)

    # identity add + reshape (glue)
    iden = jnp.array([1, 0, 0, 0, 1, 0, 0, 0, 1], dtype=jnp.float32)
    return (out[..., 0] + iden[None, :]).reshape(B, 3, 3)


# -----------------------------------------------------------------------------
# Deterministic parameter construction
#   conv weights (out, in), conv biases (out, 1)
#   fc   weights (out, in), fc   biases (out, 1)   (matches nn.Linear storage)
# -----------------------------------------------------------------------------
def init_params(key):
    shapes = [
        ((64, 3), (64, 1), 3),
        ((128, 64), (128, 1), 64),
        ((1024, 128), (1024, 1), 128),
        ((512, 1024), (512, 1), 1024),
        ((256, 512), (256, 1), 512),
        ((9, 256), (9, 1), 256),
    ]
    params = []
    for i, (ws, bs, fan_in) in enumerate(shapes):
        kw, kb = jax.random.split(jax.random.fold_in(key, i))
        scale = 1.0 / jnp.sqrt(jnp.float32(fan_in))
        params.append(jax.random.uniform(kw, ws, jnp.float32, -scale, scale))
        params.append(jax.random.uniform(kb, bs, jnp.float32, -scale, scale))
    return tuple(params)


# -----------------------------------------------------------------------------
# Pure-JAX reference (mirrors the kernel's mixed precision: bf16 inputs with
# f32 accumulation on conv2/conv3/fc1/fc2, f32 everywhere else).
# -----------------------------------------------------------------------------
def stn3d_reference(x_bcn, params):
    (w1, b1, w2, b2, w3, b3, fw1, fb1, fw2, fb2, fw3, fb3) = params
    B = x_bcn.shape[0]
    xT = jnp.transpose(x_bcn, (0, 2, 1))            # (B, N, 3)
    h = (xT[..., 0:1] * w1[:, 0]
         + xT[..., 1:2] * w1[:, 1]
         + xT[..., 2:3] * w1[:, 2]
         + b1[:, 0])
    h = jax.nn.relu(h)                              # (B, N, 64)
    h = jax.nn.relu(
        jnp.matmul(h.astype(jnp.bfloat16), w2.T.astype(jnp.bfloat16),
                   preferred_element_type=jnp.float32) + b2[:, 0])
    h = jax.nn.relu(
        jnp.matmul(h.astype(jnp.bfloat16), w3.T.astype(jnp.bfloat16),
                   preferred_element_type=jnp.float32) + b3[:, 0])
    f = jnp.max(h, axis=1)                          # (B, 1024)
    z = jax.nn.relu(
        jnp.matmul(f.astype(jnp.bfloat16), fw1.T.astype(jnp.bfloat16),
                   preferred_element_type=jnp.float32) + fb1[:, 0])
    z = jax.nn.relu(
        jnp.matmul(z.astype(jnp.bfloat16), fw2.T.astype(jnp.bfloat16),
                   preferred_element_type=jnp.float32) + fb2[:, 0])
    o = jnp.matmul(z, fw3.T, precision=lax.Precision.HIGHEST) + fb3[:, 0]
    iden = jnp.array([1, 0, 0, 0, 1, 0, 0, 0, 1], dtype=jnp.float32)
    return (o + iden[None, :]).reshape(B, 3, 3)


if __name__ == "__main__":
    key = jax.random.PRNGKey(0)
    k_x, k_p = jax.random.split(key)

    # batch=2, 3 channels, 1000 points: exercises multi-tile accumulation
    # (2 point tiles at TILE_N=512) plus edge-replicated padding (1000 -> 1024).
    B, N = 2, 1000
    x = jax.random.normal(k_x, (B, 3, N), dtype=jnp.float32)
    params = init_params(k_p)

    out = jax.block_until_ready(stn3d_forward(x, params))
    assert out.shape == (B, 3, 3)

    ref = jax.block_until_ready(stn3d_reference(x, params))
    assert jnp.allclose(out, ref, atol=1e-2, rtol=1e-2), (
        f"mismatch vs reference: max abs err {jnp.max(jnp.abs(out - ref))}")

    print("KERNEL_OK")
</pallas_src>

<mosaic_0001>
module attributes {stable_mosaic.version = 11 : i64} {
  func.func @_stn3d_kernel(%arg0: i32, %arg1: i32, %arg2: memref<1x3x512xf32, #tpu.memory_space<vmem>>, %arg3: memref<64x3xf32, #tpu.memory_space<vmem>>, %arg4: memref<64x1xf32, #tpu.memory_space<vmem>>, %arg5: memref<128x64xbf16, #tpu.memory_space<vmem>>, %arg6: memref<128x1xf32, #tpu.memory_space<vmem>>, %arg7: memref<1024x128xbf16, #tpu.memory_space<vmem>>, %arg8: memref<1024x1xf32, #tpu.memory_space<vmem>>, %arg9: memref<512x1024xbf16, #tpu.memory_space<vmem>>, %arg10: memref<512x1xf32, #tpu.memory_space<vmem>>, %arg11: memref<256x512xbf16, #tpu.memory_space<vmem>>, %arg12: memref<256x1xf32, #tpu.memory_space<vmem>>, %arg13: memref<9x256xf32, #tpu.memory_space<vmem>>, %arg14: memref<9x1xf32, #tpu.memory_space<vmem>>, %arg15: memref<1x9x1xf32, #tpu.memory_space<vmem>>, %arg16: memref<1024x128xf32, #tpu.memory_space<vmem>>) attributes {dimension_semantics = [#tpu.dimension_semantics<parallel>, #tpu.dimension_semantics<arbitrary>], iteration_bounds = array<i64: 2, 2>, scalar_prefetch = 0 : i64, scratch_operands = 1 : i64, tpu.core_type = #tpu.core_type<tc>, window_params = [{transform_indices = @transform_0, window_bounds = array<i64: 1, 3, 512>}, {pipeline_mode = #tpu.pipeline_mode<synchronous>, transform_indices = @transform_1, window_bounds = array<i64: 64, 3>}, {pipeline_mode = #tpu.pipeline_mode<synchronous>, transform_indices = @transform_2, window_bounds = array<i64: 64, 1>}, {pipeline_mode = #tpu.pipeline_mode<synchronous>, transform_indices = @transform_3, window_bounds = array<i64: 128, 64>}, {pipeline_mode = #tpu.pipeline_mode<synchronous>, transform_indices = @transform_4, window_bounds = array<i64: 128, 1>}, {pipeline_mode = #tpu.pipeline_mode<synchronous>, transform_indices = @transform_5, window_bounds = array<i64: 1024, 128>}, {pipeline_mode = #tpu.pipeline_mode<synchronous>, transform_indices = @transform_6, window_bounds = array<i64: 1024, 1>}, {pipeline_mode = #tpu.pipeline_mode<synchronous>, transform_indices = @transform_7, window_bounds = array<i64: 512, 1024>}, {pipeline_mode = #tpu.pipeline_mode<synchronous>, transform_indices = @transform_8, window_bounds = array<i64: 512, 1>}, {pipeline_mode = #tpu.pipeline_mode<synchronous>, transform_indices = @transform_9, window_bounds = array<i64: 256, 512>}, {pipeline_mode = #tpu.pipeline_mode<synchronous>, transform_indices = @transform_10, window_bounds = array<i64: 256, 1>}, {pipeline_mode = #tpu.pipeline_mode<synchronous>, transform_indices = @transform_11, window_bounds = array<i64: 9, 256>}, {pipeline_mode = #tpu.pipeline_mode<synchronous>, transform_indices = @transform_12, window_bounds = array<i64: 9, 1>}, {transform_indices = @transform_13, window_bounds = array<i64: 1, 9, 1>}]} {
    %c0_i32 = arith.constant 0 : i32
    %0 = arith.cmpi eq, %arg1, %c0_i32 : i32
    %1 = arith.extui %0 : i1 to i32
    %c0_i32_0 = arith.constant 0 : i32
    %2 = arith.cmpi ne, %1, %c0_i32_0 : i32
    scf.if %2 {
      %cst_21 = arith.constant 0xFF800000 : f32
      %52 = vector.broadcast %cst_21 : f32 to vector<1024x128xf32>
      %c0_22 = arith.constant 0 : index
      %c0_23 = arith.constant 0 : index
      %53 = vector.load %arg16[%c0_22, %c0_23] : memref<1024x128xf32, #tpu.memory_space<vmem>>, vector<1024x128xf32>
      tpu.vector_store %arg16[%c0_22, %c0_23], %52 {strides = array<i32>} : memref<1024x128xf32, #tpu.memory_space<vmem>>, vector<1024x128xf32>,
    } else {
    }
    %c0 = arith.constant 0 : index
    %c0_1 = arith.constant 0 : index
    %c0_2 = arith.constant 0 : index
    %3 = vector.load %arg2[%c0, %c0_1, %c0_2] : memref<1x3x512xf32, #tpu.memory_space<vmem>>, vector<1x3x512xf32>
    %4 = vector.shape_cast %3 : vector<1x3x512xf32> to vector<3x512xf32>
    %c0_3 = arith.constant 0 : index
    %c0_4 = arith.constant 0 : index
    %5 = vector.load %arg3[%c0_3, %c0_4] : memref<64x3xf32, #tpu.memory_space<vmem>>, vector<64x3xf32>
    %6 = vector.extract_strided_slice %5 {offsets = [0, 0], sizes = [64, 1], strides = [1, 1]} : vector<64x3xf32> to vector<64x1xf32>
    %7 = vector.extract_strided_slice %4 {offsets = [0, 0], sizes = [1, 512], strides = [1, 1]} : vector<3x512xf32> to vector<1x512xf32>
    %8 = vector.broadcast %6 : vector<64x1xf32> to vector<64x512xf32>
    %9 = vector.broadcast %7 : vector<1x512xf32> to vector<64x512xf32>
    %10 = arith.mulf %8, %9 : vector<64x512xf32>
    %11 = vector.extract_strided_slice %5 {offsets = [0, 1], sizes = [64, 1], strides = [1, 1]} : vector<64x3xf32> to vector<64x1xf32>
    %12 = vector.extract_strided_slice %4 {offsets = [1, 0], sizes = [1, 512], strides = [1, 1]} : vector<3x512xf32> to vector<1x512xf32>
    %13 = vector.broadcast %11 : vector<64x1xf32> to vector<64x512xf32>
    %14 = vector.broadcast %12 : vector<1x512xf32> to vector<64x512xf32>
    %15 = arith.mulf %13, %14 : vector<64x512xf32>
    %16 = arith.addf %10, %15 : vector<64x512xf32>
    %17 = vector.extract_strided_slice %5 {offsets = [0, 2], sizes = [64, 1], strides = [1, 1]} : vector<64x3xf32> to vector<64x1xf32>
    %18 = vector.extract_strided_slice %4 {offsets = [2, 0], sizes = [1, 512], strides = [1, 1]} : vector<3x512xf32> to vector<1x512xf32>
    %19 = vector.broadcast %17 : vector<64x1xf32> to vector<64x512xf32>
    %20 = vector.broadcast %18 : vector<1x512xf32> to vector<64x512xf32>
    %21 = arith.mulf %19, %20 : vector<64x512xf32>
    %22 = arith.addf %16, %21 : vector<64x512xf32>
    %c0_5 = arith.constant 0 : index
    %c0_6 = arith.constant 0 : index
    %23 = vector.load %arg4[%c0_5, %c0_6] : memref<64x1xf32, #tpu.memory_space<vmem>>, vector<64x1xf32>
    %24 = vector.broadcast %23 : vector<64x1xf32> to vector<64x512xf32>
    %25 = arith.addf %22, %24 : vector<64x512xf32>
    %cst = arith.constant 0.000000e+00 : f32
    %26 = vector.broadcast %cst : f32 to vector<64x512xf32>
    %27 = arith.maximumf %25, %26 : vector<64x512xf32>
    %c0_7 = arith.constant 0 : index
    %c0_8 = arith.constant 0 : index
    %28 = vector.load %arg5[%c0_7, %c0_8] : memref<128x64xbf16, #tpu.memory_space<vmem>>, vector<128x64xbf16>
    %29 = arith.truncf %27 : vector<64x512xf32> to vector<64x512xbf16>
    %cst_9 = arith.constant dense<0.000000e+00> : vector<128x512xf32>
    %30 = tpu.matmul %28, %29, %cst_9 {dimension_numbers = #tpu.dot_dimension_numbers<[1], [0], [0], [1], [0, 0, 1, 1], [], []>} : vector<128x64xbf16>, vector<64x512xbf16>, vector<128x512xf32> -> vector<128x512xf32>
    %c0_10 = arith.constant 0 : index
    %c0_11 = arith.constant 0 : index
    %31 = vector.load %arg6[%c0_10, %c0_11] : memref<128x1xf32, #tpu.memory_space<vmem>>, vector<128x1xf32>
    %32 = vector.broadcast %31 : vector<128x1xf32> to vector<128x512xf32>
    %33 = arith.addf %30, %32 : vector<128x512xf32>
    %cst_12 = arith.constant 0.000000e+00 : f32
    %34 = vector.broadcast %cst_12 : f32 to vector<128x512xf32>
    %35 = arith.maximumf %33, %34 : vector<128x512xf32>
    %c0_13 = arith.constant 0 : index
    %c0_14 = arith.constant 0 : index
    %36 = vector.load %arg7[%c0_13, %c0_14] : memref<1024x128xbf16, #tpu.memory_space<vmem>>, vector<1024x128xbf16>
    %37 = arith.truncf %35 : vector<128x512xf32> to vector<128x512xbf16>
    %cst_15 = arith.constant dense<0.000000e+00> : vector<1024x512xf32>
    %38 = tpu.matmul %36, %37, %cst_15 {dimension_numbers = #tpu.dot_dimension_numbers<[1], [0], [0], [1], [0, 0, 1, 1], [], []>} : vector<1024x128xbf16>, vector<128x512xbf16>, vector<1024x512xf32> -> vector<1024x512xf32>
    %39 = vector.extract_strided_slice %38 {offsets = [0, 0], sizes = [1024, 128], strides = [1, 1]} : vector<1024x512xf32> to vector<1024x128xf32>
    %40 = vector.extract_strided_slice %38 {offsets = [0, 128], sizes = [1024, 128], strides = [1, 1]} : vector<1024x512xf32> to vector<1024x128xf32>
    %41 = arith.maximumf %39, %40 : vector<1024x128xf32>
    %42 = vector.extract_strided_slice %38 {offsets = [0, 256], sizes = [1024, 128], strides = [1, 1]} : vector<1024x512xf32> to vector<1024x128xf32>
    %43 = arith.maximumf %41, %42 : vector<1024x128xf32>
    %44 = vector.extract_strided_slice %38 {offsets = [0, 384], sizes = [1024, 128], strides = [1, 1]} : vector<1024x512xf32> to vector<1024x128xf32>
    %45 = arith.maximumf %43, %44 : vector<1024x128xf32>
    %c0_16 = arith.constant 0 : index
    %c0_17 = arith.constant 0 : index
    %46 = vector.load %arg16[%c0_16, %c0_17] : memref<1024x128xf32, #tpu.memory_space<vmem>>, vector<1024x128xf32>
    %47 = arith.maximumf %46, %45 : vector<1024x128xf32>
    %c0_18 = arith.constant 0 : index
    %c0_19 = arith.constant 0 : index
    %48 = vector.load %arg16[%c0_18, %c0_19] : memref<1024x128xf32, #tpu.memory_space<vmem>>, vector<1024x128xf32>
    tpu.vector_store %arg16[%c0_18, %c0_19], %47 {strides = array<i32>} : memref<1024x128xf32, #tpu.memory_space<vmem>>, vector<1024x128xf32>,
    %c1_i32 = arith.constant 1 : i32
    %49 = arith.cmpi eq, %arg1, %c1_i32 : i32
    %50 = arith.extui %49 : i1 to i32
    %c0_i32_20 = arith.constant 0 : i32
    %51 = arith.cmpi ne, %50, %c0_i32_20 : i32
    scf.if %51 {
      %c0_21 = arith.constant 0 : index
      %c0_22 = arith.constant 0 : index
      %52 = vector.load %arg16[%c0_21, %c0_22] : memref<1024x128xf32, #tpu.memory_space<vmem>>, vector<1024x128xf32>
      %cst_23 = arith.constant dense<0xFF800000> : vector<1024xf32>
      %53 = vector.multi_reduction <maximumf>, %52, %cst_23 [1] : vector<1024x128xf32> to vector<1024xf32>
      %54 = vector.shape_cast %53 : vector<1024xf32> to vector<1024x1xf32>
      %c0_24 = arith.constant 0 : index
      %c0_25 = arith.constant 0 : index
      %55 = vector.load %arg8[%c0_24, %c0_25] : memref<1024x1xf32, #tpu.memory_space<vmem>>, vector<1024x1xf32>
      %56 = arith.addf %54, %55 : vector<1024x1xf32>
      %cst_26 = arith.constant 0.000000e+00 : f32
      %57 = vector.broadcast %cst_26 : f32 to vector<1024x1xf32>
      %58 = arith.maximumf %56, %57 : vector<1024x1xf32>
      %c0_27 = arith.constant 0 : index
      %c0_28 = arith.constant 0 : index
      %59 = vector.load %arg9[%c0_27, %c0_28] : memref<512x1024xbf16, #tpu.memory_space<vmem>>, vector<512x1024xbf16>
      %60 = arith.truncf %58 : vector<1024x1xf32> to vector<1024x1xbf16>
      %cst_29 = arith.constant dense<0.000000e+00> : vector<512x1xf32>
      %61 = tpu.matmul %59, %60, %cst_29 {dimension_numbers = #tpu.dot_dimension_numbers<[1], [0], [0], [1], [0, 0, 1, 1], [], []>} : vector<512x1024xbf16>, vector<1024x1xbf16>, vector<512x1xf32> -> vector<512x1xf32>
      %c0_30 = arith.constant 0 : index
      %c0_31 = arith.constant 0 : index
      %62 = vector.load %arg10[%c0_30, %c0_31] : memref<512x1xf32, #tpu.memory_space<vmem>>, vector<512x1xf32>
      %63 = arith.addf %61, %62 : vector<512x1xf32>
      %cst_32 = arith.constant 0.000000e+00 : f32
      %64 = vector.broadcast %cst_32 : f32 to vector<512x1xf32>
      %65 = arith.maximumf %63, %64 : vector<512x1xf32>
      %c0_33 = arith.constant 0 : index
      %c0_34 = arith.constant 0 : index
      %66 = vector.load %arg11[%c0_33, %c0_34] : memref<256x512xbf16, #tpu.memory_space<vmem>>, vector<256x512xbf16>
      %67 = arith.truncf %65 : vector<512x1xf32> to vector<512x1xbf16>
      %cst_35 = arith.constant dense<0.000000e+00> : vector<256x1xf32>
      %68 = tpu.matmul %66, %67, %cst_35 {dimension_numbers = #tpu.dot_dimension_numbers<[1], [0], [0], [1], [0, 0, 1, 1], [], []>} : vector<256x512xbf16>, vector<512x1xbf16>, vector<256x1xf32> -> vector<256x1xf32>
      %c0_36 = arith.constant 0 : index
      %c0_37 = arith.constant 0 : index
      %69 = vector.load %arg12[%c0_36, %c0_37] : memref<256x1xf32, #tpu.memory_space<vmem>>, vector<256x1xf32>
      %70 = arith.addf %68, %69 : vector<256x1xf32>
      %cst_38 = arith.constant 0.000000e+00 : f32
      %71 = vector.broadcast %cst_38 : f32 to vector<256x1xf32>
      %72 = arith.maximumf %70, %71 : vector<256x1xf32>
      %c0_39 = arith.constant 0 : index
      %c0_40 = arith.constant 0 : index
      %73 = vector.load %arg13[%c0_39, %c0_40] : memref<9x256xf32, #tpu.memory_space<vmem>>, vector<9x256xf32>
      %cst_41 = arith.constant dense<0.000000e+00> : vector<9x1xf32>
      %74 = tpu.matmul %73, %72, %cst_41 {dimension_numbers = #tpu.dot_dimension_numbers<[1], [0], [0], [1], [0, 0, 1, 1], [], []>} : vector<9x256xf32>, vector<256x1xf32>, vector<9x1xf32> -> vector<9x1xf32>
      %c0_42 = arith.constant 0 : index
      %c0_43 = arith.constant 0 : index
      %75 = vector.load %arg14[%c0_42, %c0_43] : memref<9x1xf32, #tpu.memory_space<vmem>>, vector<9x1xf32>
      %76 = arith.addf %74, %75 : vector<9x1xf32>
      %77 = vector.shape_cast %76 : vector<9x1xf32> to vector<1x9x1xf32>
      %c0_44 = arith.constant 0 : index
      %c0_45 = arith.constant 0 : index
      %c0_46 = arith.constant 0 : index
      %78 = vector.load %arg15[%c0_44, %c0_45, %c0_46] : memref<1x9x1xf32, #tpu.memory_space<vmem>>, vector<1x9x1xf32>
      tpu.vector_store %arg15[%c0_44, %c0_45, %c0_46], %77 {strides = array<i32>} : memref<1x9x1xf32, #tpu.memory_space<vmem>>, vector<1x9x1xf32>,
    } else {
    }
    return
  }
  func.func @transform_0(%arg0: i32, %arg1: i32) -> (i32, i32, i32) {
    %c0_i32 = arith.constant 0 : i32
    %c0_i32_0 = arith.constant 0 : i32
    return %arg0, %c0_i32, %arg1 : i32, i32, i32
  }
  func.func @transform_1(%arg0: i32, %arg1: i32) -> (i32, i32) {
    %c0_i32 = arith.constant 0 : i32
    %c0_i32_0 = arith.constant 0 : i32
    %c0_i32_1 = arith.constant 0 : i32
    return %c0_i32, %c0_i32_0 : i32, i32
  }
  func.func @transform_2(%arg0: i32, %arg1: i32) -> (i32, i32) {
    %c0_i32 = arith.constant 0 : i32
    %c0_i32_0 = arith.constant 0 : i32
    %c0_i32_1 = arith.constant 0 : i32
    return %c0_i32, %c0_i32_0 : i32, i32
  }
  func.func @transform_3(%arg0: i32, %arg1: i32) -> (i32, i32) {
    %c0_i32 = arith.constant 0 : i32
    %c0_i32_0 = arith.constant 0 : i32
    %c0_i32_1 = arith.constant 0 : i32
    return %c0_i32, %c0_i32_0 : i32, i32
  }
  func.func @transform_4(%arg0: i32, %arg1: i32) -> (i32, i32) {
    %c0_i32 = arith.constant 0 : i32
    %c0_i32_0 = arith.constant 0 : i32
    %c0_i32_1 = arith.constant 0 : i32
    return %c0_i32, %c0_i32_0 : i32, i32
  }
  func.func @transform_5(%arg0: i32, %arg1: i32) -> (i32, i32) {
    %c0_i32 = arith.constant 0 : i32
    %c0_i32_0 = arith.constant 0 : i32
    %c0_i32_1 = arith.constant 0 : i32
    return %c0_i32, %c0_i32_0 : i32, i32
  }
  func.func @transform_6(%arg0: i32, %arg1: i32) -> (i32, i32) {
    %c0_i32 = arith.constant 0 : i32
    %c0_i32_0 = arith.constant 0 : i32
    %c0_i32_1 = arith.constant 0 : i32
    return %c0_i32, %c0_i32_0 : i32, i32
  }
  func.func @transform_7(%arg0: i32, %arg1: i32) -> (i32, i32) {
    %c0_i32 = arith.constant 0 : i32
    %c0_i32_0 = arith.constant 0 : i32
    %c0_i32_1 = arith.constant 0 : i32
    return %c0_i32, %c0_i32_0 : i32, i32
  }
  func.func @transform_8(%arg0: i32, %arg1: i32) -> (i32, i32) {
    %c0_i32 = arith.constant 0 : i32
    %c0_i32_0 = arith.constant 0 : i32
    %c0_i32_1 = arith.constant 0 : i32
    return %c0_i32, %c0_i32_0 : i32, i32
  }
  func.func @transform_9(%arg0: i32, %arg1: i32) -> (i32, i32) {
    %c0_i32 = arith.constant 0 : i32
    %c0_i32_0 = arith.constant 0 : i32
    %c0_i32_1 = arith.constant 0 : i32
    return %c0_i32, %c0_i32_0 : i32, i32
  }
  func.func @transform_10(%arg0: i32, %arg1: i32) -> (i32, i32) {
    %c0_i32 = arith.constant 0 : i32
    %c0_i32_0 = arith.constant 0 : i32
    %c0_i32_1 = arith.constant 0 : i32
    return %c0_i32, %c0_i32_0 : i32, i32
  }
  func.func @transform_11(%arg0: i32, %arg1: i32) -> (i32, i32) {
    %c0_i32 = arith.constant 0 : i32
    %c0_i32_0 = arith.constant 0 : i32
    %c0_i32_1 = arith.constant 0 : i32
    return %c0_i32, %c0_i32_0 : i32, i32
  }
  func.func @transform_12(%arg0: i32, %arg1: i32) -> (i32, i32) {
    %c0_i32 = arith.constant 0 : i32
    %c0_i32_0 = arith.constant 0 : i32
    %c0_i32_1 = arith.constant 0 : i32
    return %c0_i32, %c0_i32_0 : i32, i32
  }
  func.func @transform_13(%arg0: i32, %arg1: i32) -> (i32, i32, i32) {
    %c0_i32 = arith.constant 0 : i32
    %c0_i32_0 = arith.constant 0 : i32
    %c0_i32_1 = arith.constant 0 : i32
    return %arg0, %c0_i32, %c0_i32_0 : i32, i32, i32
  }
}

</mosaic_0001>

<bundles_post_ra>
// kernel: tpu_custom_call.1
= control target key start
LH: loop header
LB: loop body
LE: loop exit
PB: predicated region body
PF: predicated region fallthrough
CT: control target
= control target key end

     0   :  { %s13913_s0 = inlined_call_operand.vmem [shape: f32[2,3,1024], index: 0, kind: input, shape index: {}]   ;;  %s13914_s1 = inlined_call_operand.vmem [shape: f32[64,3], index: 1, kind: input, shape index: {}]   ;;  %s13915_s2 = inlined_call_operand.vmem [shape: f32[64,1], index: 2, kind: input, shape index: {}]   ;;  %s13916_s3 = inlined_call_operand.vmem [shape: bf16[128,64], index: 3, kind: input, shape index: {}]   ;;  %s13917_s4 = inlined_call_operand.vmem [shape: f32[128,1], index: 4, kind: input, shape index: {}]   ;;  %s13918_s5 = inlined_call_operand.vmem [shape: bf16[1024,128], index: 5, kind: input, shape index: {}]   ;;  %s13919_s6 = inlined_call_operand.vmem [shape: f32[1024,1], index: 6, kind: input, shape index: {}]   ;;  %s13920_s7 = inlined_call_operand.hbm [shape: bf16[512,1024], index: 7, kind: input, shape index: {}]   ;;  %s13921_s8 = inlined_call_operand.vmem [shape: f32[512,1], index: 8, kind: input, shape index: {}]   ;;  %s13922_s9 = inlined_call_operand.vmem [shape: bf16[256,512], index: 9, kind: input, shape index: {}]   ;;  %s13923_s10 = inlined_call_operand.vmem [shape: f32[256,1], index: 10, kind: input, shape index: {}]   ;;  %s13924_s11 = inlined_call_operand.vmem [shape: f32[9,256], index: 11, kind: input, shape index: {}]   ;;  %s13925_s12 = inlined_call_operand.vmem [shape: f32[9,1], index: 12, kind: input, shape index: {}]   ;;  %s13926_s13 = inlined_call_operand.vmem [shape: f32[2,9,1], index: 13, kind: output, shape index: {}]  }
   0x1   :  { %13938 = sst [smem:[#allocation59_spill]] %s13920_s7 }
   0x2   :  { %18 = vsyncpa [#allocation4], 0  ;;  %s11223_s25 = smov 0   ;;  %s11225_s26 = smov 0  }
   0x3   :  { %s11227_s27 = smov 0   ;;  %s11229_s28 = smov 0  }
   0x4   :  { %s11231_s29 = smov 0  }
   0x5 LB: > { %s8953_s30 = sadd.s32 4294967295, %s11144_s29   ;;  %s33_s14 = sadd.s32 1, %s11136_s27  ;;  %s11144_s29 = sphi %s11231_s29, %s24_s29   ;;  %s11140_s28 = sphi %s11229_s28, %s14065_s28   ;;  %s11136_s27 = sphi %s11227_s27, %s14064_s27   ;;  %s11132_s26 = sphi %s11225_s26, %s14063_s26   ;;  %s11128_s25 = sphi %s11223_s25, %s14062_s25  }
   0x6   : > { %p34_p0 = scmp.ge.s32.totalorder %s33_s14, 2  ;;  %s36_s15 = sadd.s32 1, %s11140_s28 }
   0x7   : > { %p8955_p1 = scmp.ge.s32.totalorder %s11144_s29, 1  ;;  %p347_p2 = scmp.lt.s32.totalorder %s11144_s29, 5 }
   0x8   : > { %s14067_s14 = smov (%p34_p0, %s33_s14), 0  ;;  %s14069_s15 = smov (!%p34_p0, %s36_s15), %s11140_s28 }
   0x9   : > { %p11256_p3 = pnand %p8955_p1, %p347_p2  ;;  %p38_p4 = scmp.ge.s32.totalorder %s14069_s15, 2 }
   0xa   : > { %p11260_p5 = scmp.eq.s32.totalorder %s8953_s30, 0  ;;  %s13941_s7 = sld [smem:[#allocation59_spill]] }
   0xb   : > { %p10998_p6 = pneg %p11256_p3  ;;  %s14071_s15 = smov (%p38_p4, %s14069_s15), 0 }
   0xc   : > { %s11146_s21 = smov [#allocation3]   ;;  %s11147_s23 = smov 512  }
   0xd   : > { %s378_s22 = sshll.u32 %s11146_s21, 4  ;;  %p10999_p7 = pnand %p11260_p5, %p10998_p6  ;;  %s379_s22 = int_to_ptr.vmem [resolvable:$true] %s378_s22 }
   0xe   : > { %s11148_s24 = smov 32   ;;  %422 = sbr.rel (%p11256_p3) target bundleno = 3855 (0xf0f), region = 72 }
  0x10   : > { %s376_s20 = sshll.u32 %s13941_s7, 4  ;;  %s377_s20 = int_to_ptr.hbm [resolvable:$true] %s376_s20 }
  0x11   : > { %11001 = dma.hbm_to_vmem [thread:$0]  (!%p10999_p7), %s377_s20, 32768, %s379_s22, [#allocation4], %s11147_s23, %s11147_s23, %s11148_s24  }
  0x13   : > { %11123 = dma.done.wait (%p11260_p5), [#allocation4], 32768  }
  0x14   : > { %11125 = vsyncadd (%p11260_p5), [#allocation4], 4294934528  ;;  %s8960_s30 = sshll.u32 %s11128_s25, 2  ;;  %p472_p8 = scmp.lt.s32.totalorder %s11132_s26, 1 }
  0x15   : > { %p474_p9 = scmp.lt.s32.totalorder %s8960_s30, 7  ;;  %p8965_p10 = scmp.ne.s32.totalorder %s11128_s25, 0 }
  0x16   : > { %s14073_s26 = smov (!%p472_p8, %s11132_s26), 1 }
  0x17   : > { %s14075_s30 = smov (!%p474_p9, %s8960_s30), 7  ;;  %s8961_s18 = sshll.u32 %s14073_s26, 3 }
  0x18   : > { %s10569_s19 = sshll.u32 %s14073_s26, 4  ;;  %s477_s20 = sadd.s32 %s8961_s18, %s14075_s30 }
  0x19   : > { %s11285_s22 = scalar_lea.vmem %s13926_s13, %s10569_s19  ;;  %s8962_s23 = sshll.u32 %s477_s20, 2 }
  0x1a   : > { %s11290_s7 = scalar_lea.vmem %s13913_s0, %s8962_s23  ;;  %490 = sbr.rel (%p8965_p10) target bundleno = 160 (0xa0), region = 80 }
  0x1f   : > { %v11149_v0 = vmov -inf  }
  0x20   : > { %491 = vst [vmem:[#allocation2 + $0x2b0] sm:$0xff] %v11149_v0 }
  0x21   : > { %492 = vst [vmem:[#allocation2 + $0x3b0] sm:$0xff] %v11149_v0 }
  0x22   : > { %493 = vst [vmem:[#allocation2 + $0xd8] sm:$0xff] %v11149_v0 }
  0x23   : > { %494 = vst [vmem:[#allocation2 + $0x18] sm:$0xff] %v11149_v0 }
  0x24   : > { %495 = vst [vmem:[#allocation2 + $0x50] sm:$0xff] %v11149_v0 }
  0x25   : > { %496 = vst [vmem:[#allocation2 + $0x368] sm:$0xff] %v11149_v0 }
  0x26   : > { %497 = vst [vmem:[#allocation2 + $0x330] sm:$0xff] %v11149_v0 }
  0x27   : > { %498 = vst [vmem:[#allocation2 + $0x48] sm:$0xff] %v11149_v0 }
  0x28   : > { %499 = vst [vmem:[#allocation2 + $0x380] sm:$0xff] %v11149_v0 }
  0x29   : > { %500 = vst [vmem:[#allocation2 + $0x110] sm:$0xff] %v11149_v0 }
  0x2a   : > { %501 = vst [vmem:[#allocation2 + $0x118] sm:$0xff] %v11149_v0 }
  0x2b   : > { %502 = vst [vmem:[#allocation2 + $0x98] sm:$0xff] %v11149_v0 }
  0x2c   : > { %503 = vst [vmem:[#allocation2 + $0x320] sm:$0xff] %v11149_v0 }
  0x2d   : > { %504 = vst [vmem:[#allocation2 + $0x150] sm:$0xff] %v11149_v0 }
  0x2e   : > { %505 = vst [vmem:[#allocation2 + $0x108] sm:$0xff] %v11149_v0 }
  0x2f   : > { %506 = vst [vmem:[#allocation2 + $0x60] sm:$0xff] %v11149_v0 }
  0x30   : > { %507 = vst [vmem:[#allocation2 + $0x2e0] sm:$0xff] %v11149_v0 }
  0x31   : > { %508 = vst [vmem:[#allocation2 + $0x388] sm:$0xff] %v11149_v0 }
  0x32   : > { %509 = vst [vmem:[#allocation2 + $0x338] sm:$0xff] %v11149_v0 }
  0x33   : > { %510 = vst [vmem:[#allocation2 + $0x340] sm:$0xff] %v11149_v0 }
  0x34   : > { %511 = vst [vmem:[#allocation2 + $0x80] sm:$0xff] %v11149_v0 }
  0x35   : > { %512 = vst [vmem:[#allocation2 + $0x1a8] sm:$0xff] %v11149_v0 }
  0x36   : > { %513 = vst [vmem:[#allocation2 + $0x1b8] sm:$0xff] %v11149_v0 }
  0x37   : > { %514 = vst [vmem:[#allocation2 + $0x168] sm:$0xff] %v11149_v0 }
  0x38   : > { %515 = vst [vmem:[#allocation2 + $0x3e8] sm:$0xff] %v11149_v0 }
  0x39   : > { %516 = vst [vmem:[#allocation2 + $0x2f8] sm:$0xff] %v11149_v0 }
  0x3a   : > { %517 = vst [vmem:[#allocation2 + $0x290] sm:$0xff] %v11149_v0 }
  0x3b   : > { %518 = vst [vmem:[#allocation2 + $0x28] sm:$0xff] %v11149_v0 }
  0x3c   : > { %519 = vst [vmem:[#allocation2 + $0x138] sm:$0xff] %v11149_v0 }
  0x3d   : > { %520 = vst [vmem:[#allocation2 + $0xc0] sm:$0xff] %v11149_v0 }
  0x3e   : > { %521 = vst [vmem:[#allocation2 + $0x1c0] sm:$0xff] %v11149_v0 }
  0x3f   : > { %522 = vst [vmem:[#allocation2 + $0x280] sm:$0xff] %v11149_v0 }
  0x40   : > { %523 = vst [vmem:[#allocation2 + $0x100] sm:$0xff] %v11149_v0 }
  0x41   : > { %524 = vst [vmem:[#allocation2 + $0x3c0] sm:$0xff] %v11149_v0 }
  0x42   : > { %525 = vst [vmem:[#allocation2 + $0x158] sm:$0xff] %v11149_v0 }
  0x43   : > { %526 = vst [vmem:[#allocation2 + $0x3e0] sm:$0xff] %v11149_v0 }
  0x44   : > { %527 = vst [vmem:[#allocation2 + $0x218] sm:$0xff] %v11149_v0 }
  0x45   : > { %528 = vst [vmem:[#allocation2 + $0x3f8] sm:$0xff] %v11149_v0 }
  0x46   : > { %529 = vst [vmem:[#allocation2 + $0x8] sm:$0xff] %v11149_v0 }
  0x47   : > { %530 = vst [vmem:[#allocation2 + $0x128] sm:$0xff] %v11149_v0 }
  0x48   : > { %531 = vst [vmem:[#allocation2 + $0x2a0] sm:$0xff] %v11149_v0 }
  0x49   : > { %532 = vst [vmem:[#allocation2 + $0x3f0] sm:$0xff] %v11149_v0 }
  0x4a   : > { %533 = vst [vmem:[#allocation2 + $0xa0] sm:$0xff] %v11149_v0 }
  0x4b   : > { %534 = vst [vmem:[#allocation2 + $0x2c0] sm:$0xff] %v11149_v0 }
  0x4c   : > { %535 = vst [vmem:[#allocation2 + $0xb0] sm:$0xff] %v11149_v0 }
  0x4d   : > { %536 = vst [vmem:[#allocation2 + $0x1e0] sm:$0xff] %v11149_v0 }
  0x4e   : > { %537 = vst [vmem:[#allocation2 + $0x1f0] sm:$0xff] %v11149_v0 }
  0x4f   : > { %538 = vst [vmem:[#allocation2 + $0x10] sm:$0xff] %v11149_v0 }
  0x50   : > { %539 = vst [vmem:[#allocation2 + $0x230] sm:$0xff] %v11149_v0 }
  0x51   : > { %540 = vst [vmem:[#allocation2 + $0x240] sm:$0xff] %v11149_v0 }
  0x52   : > { %541 = vst [vmem:[#allocation2 + $0x90] sm:$0xff] %v11149_v0 }
  0x53   : > { %542 = vst [vmem:[#allocation2 + $0x3a0] sm:$0xff] %v11149_v0 }
  0x54   : > { %543 = vst [vmem:[#allocation2 + $0x208] sm:$0xff] %v11149_v0 }
  0x55   : > { %544 = vst [vmem:[#allocation2 + $0xd0] sm:$0xff] %v11149_v0 }
  0x56   : > { %545 = vst [vmem:[#allocation2 + $0x88] sm:$0xff] %v11149_v0 }
  0x57   : > { %546 = vst [vmem:[#allocation2 + $0x2f0] sm:$0xff] %v11149_v0 }
  0x58   : > { %547 = vst [vmem:[#allocation2 + $0x358] sm:$0xff] %v11149_v0 }
  0x59   : > { %548 = vst [vmem:[#allocation2 + $0x268] sm:$0xff] %v11149_v0 }
  0x5a   : > { %549 = vst [vmem:[#allocation2 + $0x350] sm:$0xff] %v11149_v0 }
  0x5b   : > { %550 = vst [vmem:[#allocation2 + $0x188] sm:$0xff] %v11149_v0 }
  0x5c   : > { %551 = vst [vmem:[#allocation2 + $0x1d8] sm:$0xff] %v11149_v0 }
  0x5d   : > { %552 = vst [vmem:[#allocation2 + $0x30] sm:$0xff] %v11149_v0 }
  0x5e   : > { %553 = vst [vmem:[#allocation2 + $0x140] sm:$0xff] %v11149_v0 }
  0x5f   : > { %554 = vst [vmem:[#allocation2 + $0x2a8] sm:$0xff] %v11149_v0 }
  0x60   : > { %555 = vst [vmem:[#allocation2 + $0x130] sm:$0xff] %v11149_v0 }
  0x61   : > { %556 = vst [vmem:[#allocation2 + $0x200] sm:$0xff] %v11149_v0 }
  0x62   : > { %557 = vst [vmem:[#allocation2 + $0x318] sm:$0xff] %v11149_v0 }
  0x63   : > { %558 = vst [vmem:[#allocation2 + $0x220] sm:$0xff] %v11149_v0 }
  0x64   : > { %559 = vst [vmem:[#allocation2 + $0x70] sm:$0xff] %v11149_v0 }
  0x65   : > { %560 = vst [vmem:[#allocation2 + $0x300] sm:$0xff] %v11149_v0 }
  0x66   : > { %561 = vst [vmem:[#allocation2 + $0xe0] sm:$0xff] %v11149_v0 }
  0x67   : > { %562 = vst [vmem:[#allocation2 + $0x178] sm:$0xff] %v11149_v0 }
  0x68   : > { %563 = vst [vmem:[#allocation2 + $0x328] sm:$0xff] %v11149_v0 }
  0x69   : > { %564 = vst [vmem:[#allocation2 + $0x260] sm:$0xff] %v11149_v0 }
  0x6a   : > { %565 = vst [vmem:[#allocation2 + $0x3b8] sm:$0xff] %v11149_v0 }
  0x6b   : > { %566 = vst [vmem:[#allocation2 + $0x2b8] sm:$0xff] %v11149_v0 }
  0x6c   : > { %567 = vst [vmem:[#allocation2 + $0x248] sm:$0xff] %v11149_v0 }
  0x6d   : > { %568 = vst [vmem:[#allocation2 + $0x40] sm:$0xff] %v11149_v0 }
  0x6e   : > { %569 = vst [vmem:[#allocation2 + $0x20] sm:$0xff] %v11149_v0 }
  0x6f   : > { %570 = vst [vmem:[#allocation2 + $0xe8] sm:$0xff] %v11149_v0 }
  0x70   : > { %571 = vst [vmem:[#allocation2 + $0x288] sm:$0xff] %v11149_v0 }
  0x71   : > { %572 = vst [vmem:[#allocation2 + $0x3a8] sm:$0xff] %v11149_v0 }
  0x72   : > { %573 = vst [vmem:[#allocation2 + $0x3c8] sm:$0xff] %v11149_v0 }
  0x73   : > { %574 = vst [vmem:[#allocation2 + $0x160] sm:$0xff] %v11149_v0 }
  0x74   : > { %575 = vst [vmem:[#allocation2 + $0x2c8] sm:$0xff] %v11149_v0 }
  0x75   : > { %576 = vst [vmem:[#allocation2 + $0x210] sm:$0xff] %v11149_v0 }
  0x76   : > { %577 = vst [vmem:[#allocation2 + $0x3d8] sm:$0xff] %v11149_v0 }
  0x77   : > { %578 = vst [vmem:[#allocation2 + $0x1e8] sm:$0xff] %v11149_v0 }
  0x78   : > { %579 = vst [vmem:[#allocation2 + $0x1b0] sm:$0xff] %v11149_v0 }
  0x79   : > { %580 = vst [vmem:[#allocation2 + $0x1c8] sm:$0xff] %v11149_v0 }
  0x7a   : > { %581 = vst [vmem:[#allocation2 + $0x2d0] sm:$0xff] %v11149_v0 }
  0x7b   : > { %582 = vst [vmem:[#allocation2 + $0x1d0] sm:$0xff] %v11149_v0 }
  0x7c   : > { %583 = vst [vmem:[#allocation2 + $0x58] sm:$0xff] %v11149_v0 }
  0x7d   : > { %584 = vst [vmem:[#allocation2 + $0x120] sm:$0xff] %v11149_v0 }
  0x7e   : > { %585 = vst [vmem:[#allocation2 + $0x198] sm:$0xff] %v11149_v0 }
  0x7f   : > { %586 = vst [vmem:[#allocation2 + $0x2e8] sm:$0xff] %v11149_v0 }
  0x80   : > { %587 = vst [vmem:[#allocation2 + $0x1f8] sm:$0xff] %v11149_v0 }
  0x81   : > { %588 = vst [vmem:[#allocation2 + $0x238] sm:$0xff] %v11149_v0 }
  0x82   : > { %589 = vst [vmem:[#allocation2 + $0x398] sm:$0xff] %v11149_v0 }
  0x83   : > { %590 = vst [vmem:[#allocation2 + $0x390] sm:$0xff] %v11149_v0 }
  0x84   : > { %591 = vst [vmem:[#allocation2 + $0x1a0] sm:$0xff] %v11149_v0 }
  0x85   : > { %592 = vst [vmem:[#allocation2 + $0xa8] sm:$0xff] %v11149_v0 }
  0x86   : > { %593 = vst [vmem:[#allocation2 + $0x258] sm:$0xff] %v11149_v0 }
  0x87   : > { %594 = vst [vmem:[#allocation2 + $0x2d8] sm:$0xff] %v11149_v0 }
  0x88   : > { %595 = vst [vmem:[#allocation2 + $0xf0] sm:$0xff] %v11149_v0 }
  0x89   : > { %596 = vst [vmem:[#allocation2 + $0x180] sm:$0xff] %v11149_v0 }
  0x8a   : > { %597 = vst [vmem:[#allocation2 + $0x170] sm:$0xff] %v11149_v0 }
  0x8b   : > { %598 = vst [vmem:[#allocation2 + $0x3d0] sm:$0xff] %v11149_v0 }
  0x8c   : > { %599 = vst [vmem:[#allocation2 + $0x250] sm:$0xff] %v11149_v0 }
  0x8d   : > { %600 = vst [vmem:[#allocation2 + $0x378] sm:$0xff] %v11149_v0 }
  0x8e   : > { %601 = vst [vmem:[#allocation2 + $0xb8] sm:$0xff] %v11149_v0 }
  0x8f   : > { %602 = vst [vmem:[#allocation2 + $0x38] sm:$0xff] %v11149_v0 }
  0x90   : > { %603 = vst [vmem:[#allocation2 + $0x78] sm:$0xff] %v11149_v0 }
  0x91   : > { %604 = vst [vmem:[#allocation2 + $0x308] sm:$0xff] %v11149_v0 }
  0x92   : > { %605 = vst [vmem:[#allocation2 + $0x370] sm:$0xff] %v11149_v0 }
  0x93   : > { %606 = vst [vmem:[#allocation2 + $0xc8] sm:$0xff] %v11149_v0 }
  0x94   : > { %607 = vst [vmem:[#allocation2 + $0x278] sm:$0xff] %v11149_v0 }
  0x95   : > { %608 = vst [vmem:[#allocation2 + $0x360] sm:$0xff] %v11149_v0 }
  0x96   : > { %609 = vst [vmem:[#allocation2 + $0x228] sm:$0xff] %v11149_v0 }
  0x97   : > { %610 = vst [vmem:[#allocation2 + $0x348] sm:$0xff] %v11149_v0 }
  0x98   : > { %611 = vst [vmem:[#allocation2 + $0x148] sm:$0xff] %v11149_v0 }
  0x99   : > { %612 = vst [vmem:[#allocation2 + $0xf8] sm:$0xff] %v11149_v0 }
  0x9a   : > { %613 = vst [vmem:[#allocation2 + $0x68] sm:$0xff] %v11149_v0 }
  0x9b   : > { %614 = vst [vmem:[#allocation2] sm:$0xff] %v11149_v0 }
  0x9c   : > { %615 = vst [vmem:[#allocation2 + $0x298] sm:$0xff] %v11149_v0 }
  0x9d   : > { %616 = vst [vmem:[#allocation2 + $0x270] sm:$0xff] %v11149_v0 }
  0x9e   : > { %617 = vst [vmem:[#allocation2 + $0x310] sm:$0xff] %v11149_v0 }
  0x9f   : > { %618 = vst [vmem:[#allocation2 + $0x190] sm:$0xff] %v11149_v0 }
  0xa0 PF: > { %v627_v1 = vld [vmem:[%s13914_s1 + $0x30] sm:$0xff]  ;;  %v624_v2 = vld [vmem:[%s13914_s1 + $0x18] sm:$0xff]  ;;  %v11150_v3 = vmov 2   ;;  %v11151_v4 = vmov 1   ;;  %v626_v6 = vld [vmem:[%s13914_s1 + $0x28] sm:$0xff]  ;;  %v11152_v9 = vmov 0  }
  0xa1   : > { %11062 = vset.pattern.permute.xlu0 %v11150_v3  ;;  %11052 = vset.pattern.permute.xlu2 %v11150_v3  ;;  %v628_v5 = vld [vmem:[%s13914_s1 + $0x38] sm:$0xff]  ;;  %v625_v7 = vld [vmem:[%s13914_s1 + $0x20] sm:$0xff]  ;;  %v937_v10 = vld [vmem:[%s13915_s2 + $0x30] sm:$0xff]  ;;  %vm1211_vm0 = vcmask 523264   ;;  %p9286_p11 = scmp.ne.s32.totalorder %s11128_s25, 1 }
  0xa2   : > { %11051 = vset.pattern.permute.xlu1 %v11151_v4  ;;  %848 = vperm.xlu2 %11052, %v627_v1   ;;  %v621_v8 = vld [vmem:[%s13914_s1] sm:$0xff]  ;;  %v938_v11 = vld [vmem:[%s13915_s2 + $0x38] sm:$0xff]  ;;  %v623_v12 = vld [vmem:[%s13914_s1 + $0x10] sm:$0xff] }
  0xa3   : > { %740 = vperm.xlu1 %11051, %v627_v1   ;;  %836 = vperm.xlu0 %11062, %v624_v2   ;;  %v934_v13 = vld [vmem:[%s13915_s2 + $0x18] sm:$0xff]  ;;  %v935_v14 = vld [vmem:[%s13915_s2 + $0x20] sm:$0xff]  ;;  %v936_v15 = vld [vmem:[%s13915_s2 + $0x28] sm:$0xff] }
  0xa4   : > { %v1087_v16 = vld [vmem:[%s13917_s4 + $0x60] sm:$0xff]  ;;  %v622_v17 = vld [vmem:[%s13914_s1 + $0x8] sm:$0xff]  ;;  %v1086_v18 = vld [vmem:[%s13917_s4 + $0x58] sm:$0xff] }
  0xa5   : > { %v1081_v19 = vld [vmem:[%s13917_s4 + $0x30] sm:$0xff]  ;;  %v1080_v21 = vld [vmem:[%s13917_s4 + $0x28] sm:$0xff]  ;;  %v931_v23 = vld [vmem:[%s13915_s2] sm:$0xff] }
  0xa6   : > { %v933_v20 = vld [vmem:[%s13915_s2 + $0x10] sm:$0xff]  ;;  %v932_v24 = vld [vmem:[%s13915_s2 + $0x8] sm:$0xff]  ;;  %v1075_v25 = vld [vmem:[%s13917_s4] sm:$0xff] }
  0xa7   : > { %v1089_v27 = vld [vmem:[%s13917_s4 + $0x70] sm:$0xff]  ;;  %v1090_v28 = vld [vmem:[%s13917_s4 + $0x78] sm:$0xff]  ;;  %v1088_v30 = vld [vmem:[%s13917_s4 + $0x68] sm:$0xff] }
  0xa8   : > { %v1085_v31 = vld [vmem:[%s13917_s4 + $0x50] sm:$0xff]  ;;  %v1083_v35 = vld [vmem:[%s13917_s4 + $0x40] sm:$0xff]  ;;  %v1084_v36 = vld [vmem:[%s13917_s4 + $0x48] sm:$0xff] }
  0xa9   : > { %v1082_v39 = vld [vmem:[%s13917_s4 + $0x38] sm:$0xff]  ;;  %v1079_v41 = vld [vmem:[%s13917_s4 + $0x20] sm:$0xff]  ;;  %v620_v43 = vld [vmem:[%s11290_s7 + $0x8] sm:$0x77] }
  0xaa   : > { %852 = vperm.xlu2 %11052, %v628_v5   ;;  %v619_v42 = vld [vmem:[%s11290_s7] sm:$0x77]  ;;  %v857_v46 = vperm.slane %v620_v43, 2  ;;  %v858_v47 = vperm.slane %v620_v43, 6  ;;  %v1077_v52 = vld [vmem:[%s13917_s4 + $0x10] sm:$0xff]  ;;  %v749_v55 = vperm.slane %v620_v43, 1 }
  0xab   : > { %744 = vperm.xlu1 %11051, %v628_v5   ;;  %11063 = vset.pattern.permute.xlu0 %v11151_v4  ;;  %v855_v44 = vperm.slane %v619_v42, 2  ;;  %v856_v45 = vperm.slane %v619_v42, 6  ;;  %v747_v50 = vperm.slane %v619_v42, 1  ;;  %v748_v51 = vperm.slane %v619_v42, 5  ;;  %v1078_v57 = vld [vmem:[%s13917_s4 + $0x18] sm:$0xff] }
  0xac   : > { %736 = vperm.xlu0 %11063, %v626_v6   ;;  %v750_v56 = vperm.slane %v620_v43, 5  ;;  %v11547_v58 = vperm.slane %v857_v46, 2  ;;  %v11549_v59 = vperm.slane %v858_v47, 2  ;;  %v671_v61 = vperm.slane %v619_v42, 0 }
  0xad   : > { %v11540_v53 = vperm.slane %v855_v44, 2  ;;  %v11542_v54 = vperm.slane %v856_v45, 2  ;;  %v672_v62 = vperm.slane %v619_v42, 4  ;;  %v11553_v63 = vperm.slane %v747_v50, 1 }
  0xae   : > { %v11555_v0 = vperm.slane %v748_v51, 1 }
  0xb2   : > { %11054 = vset.pattern.permute.xlu2 %v11151_v4 }
  0xb3   : > { %11053 = vset.pattern.permute.xlu1 %v11152_v9  ;;  %732 = vperm.xlu2 %11054, %v625_v7  }
  0xb4   : > { %656 = vperm.xlu1 %11053, %v626_v6   ;;  %716 = vperm.xlu0 %11063, %v621_v8  }
  0xbb   : > { %11056 = vset.pattern.permute.xlu2 %v11150_v3 }
  0xbc   : > { %11055 = vset.pattern.permute.xlu1 %v11150_v3  ;;  %11066 = vset.pattern.permute.xlu0 %v11152_v9 }
  0xbd   : > { %840 = vperm.xlu1 %11055, %v625_v7   ;;  %844 = vperm.xlu2 %11056, %v626_v6   ;;  %v11567_v6 = vperm.slane %v750_v56, 1 }
  0xbe   : > { %661 = vperm.xlu0 %11066, %v627_v1   ;;  %v673_v1 = vperm.slane %v620_v43, 0 }
  0xc5   : > { %11057 = vset.pattern.permute.xlu1 %v11152_v9  ;;  %11058 = vset.pattern.permute.xlu2 %v11152_v9 }
  0xc6   : > { %666 = vperm.xlu0 %11066, %v628_v5   ;;  %971 = vperm.xlu1 %11057, %v937_v10   ;;  %v11565_v5 = vperm.slane %v749_v55, 1 }
  0xc7   : > { %976 = vperm.xlu2 %11058, %v938_v11  }
  0xce   : > { %651 = vperm.xlu0 %11066, %v625_v7   ;;  %646 = vperm.xlu1 %11057, %v624_v2  }
  0xcf   : > { %11059 = vset.pattern.permute.xlu2 %v11151_v4 }
  0xd0   : > { %724 = vperm.xlu2 %11059, %v623_v12  }
  0xd6   : > { %641 = vperm.xlu0 %11066, %v623_v12   ;;  %11060 = vset.pattern.permute.xlu1 %v11151_v4 }
  0xd7   : > { %728 = vperm.xlu1 %11060, %v624_v2   ;;  %v674_v2 = vperm.slane %v620_v43, 4 }
  0xd8   : > { %11061 = vset.pattern.permute.xlu2 %v11150_v3 }
  0xd9   : > { %832 = vperm.xlu2 %11061, %v623_v12  }
  0xde   : > { %956 = vperm.xlu0 %11066, %v934_v13   ;;  %v11589_v13 = vperm.slane %v671_v61, 0 }
  0xdf   : > { %11064 = vset.pattern.permute.xlu1 %v11152_v9 }
  0xe0   : > { %961 = vperm.xlu1 %11064, %v935_v14   ;;  %v11591_v14 = vperm.slane %v672_v62, 0 }
  0xe1   : > { %11065 = vset.pattern.permute.xlu2 %v11152_v9 }
  0xe2   : > { %966 = vperm.xlu2 %11065, %v936_v15  }
  0xe6   : > { %1153 = vperm.xlu0 %11066, %v1087_v16  }
  0xe8   : > { %631 = vperm.xlu1 %11064, %v621_v8  }
  0xea   : > { %636 = vperm.xlu2 %11065, %v622_v17  }
  0xee   : > { %1148 = vperm.xlu0 %11066, %v1086_v18   ;;  %v11603_v18 = vperm.slane %v673_v1, 0 }
  0xf0   : > { %11067 = vset.pattern.permute.xlu1 %v11151_v4 }
  0xf1   : > { %720 = vperm.xlu1 %11067, %v622_v17  }
  0xf2   : > { %11068 = vset.pattern.permute.xlu2 %v11150_v3 }
  0xf3   : > { %824 = vperm.xlu2 %11068, %v621_v8  }
  0xf6   : > { %1123 = vperm.xlu0 %11066, %v1081_v19   ;;  %v11605_v19 = vperm.slane %v674_v2, 0 }
  0xf9   : > { %11069 = vset.pattern.permute.xlu1 %v11150_v3 }
  0xfa   : > { %828 = vperm.xlu1 %11069, %v622_v17  }
  0xfb   : > { %11070 = vset.pattern.permute.xlu2 %v11152_v9 }
  0xfc   : > { %951 = vperm.xlu2 %11070, %v933_v20   ;;  %v11482_v22 = vpop.permute.xlu2 %848 }
  0xfd   : > { %v11559_v3 = vmul.f32 %v11540_v53, %v11482_v22  ;;  %v11563_v4 = vmul.f32 %v11542_v54, %v11482_v22  ;;  %v11571_v7 = vmul.f32 %v11547_v58, %v11482_v22  ;;  %v11575_v8 = vmul.f32 %v11549_v59, %v11482_v22 }
  0xfe   : > { %1118 = vperm.xlu0 %11066, %v1080_v21   ;;  %v1076_v21 = vld [vmem:[%s13917_s4 + $0x8] sm:$0xff] }
 0x102   : > { %11071 = vset.pattern.permute.xlu1 %v11152_v9 }
 0x103   : > { %941 = vperm.xlu1 %11071, %v931_v23  }
 0x104   : > { %946 = vperm.xlu2 %11070, %v932_v24   ;;  %v853_v26 = vpop.permute.xlu2 %852 }
 0x105   : > { %v11578_v9 = vmul.f32 %v11540_v53, %v853_v26  ;;  %v11581_v10 = vmul.f32 %v11542_v54, %v853_v26  ;;  %v11584_v11 = vmul.f32 %v11547_v58, %v853_v26  ;;  %v11587_v12 = vmul.f32 %v11549_v59, %v853_v26 }
 0x106   : > { %1093 = vperm.xlu0 %11066, %v1075_v25  }
 0x10b   : > { %1163 = vperm.xlu1 %11071, %v1089_v27  }
 0x10c   : > { %1168 = vperm.xlu2 %11070, %v1090_v28  }
 0x10d   : > { %v11499_v29 = vpop.permute.xlu2 %732 }
 0x10e   : > { %v11597_v16 = vmul.f32 %v11553_v63, %v11499_v29  ;;  %v11601_v17 = vmul.f32 %v11555_v0, %v11499_v29  ;;  %v11612_v22 = vmul.f32 %v11565_v5, %v11499_v29  ;;  %v11616_v23 = vmul.f32 %v11567_v6, %v11499_v29 }
 0x110   : > { %13943 = vst [vmem:[#allocation7_spill] sm:$0xff] %v11612_v22 }
 0x111   : > { %13944 = vst [vmem:[#allocation8_spill] sm:$0xff] %v11616_v23 }
 0x113   : > { %1158 = vperm.xlu1 %11071, %v1088_v30  }
 0x114   : > { %1143 = vperm.xlu2 %11070, %v1085_v31  }
 0x115   : > { %v11507_v32 = vpop.permute.xlu1 %740  ;;  %v11509_v33 = vpop.permute.xlu0 %836 }
 0x116   : > { %v783_v24 = vmul.f32 %v11553_v63, %v11507_v32  ;;  %v784_v25 = vmul.f32 %v11555_v0, %v11507_v32  ;;  %v785_v26 = vmul.f32 %v11565_v5, %v11507_v32  ;;  %v786_v27 = vmul.f32 %v11567_v6, %v11507_v32 }
 0x117   : > { %v11511_v34 = vpop.permute.xlu2 %844  ;;  %v11628_v28 = vmul.f32 %v11540_v53, %v11509_v33  ;;  %v11632_v29 = vmul.f32 %v11542_v54, %v11509_v33  ;;  %v11636_v30 = vmul.f32 %v11547_v58, %v11509_v33  ;;  %v11640_v31 = vmul.f32 %v11549_v59, %v11509_v33 }
 0x118   : > { %v11648_v32 = vmul.f32 %v11542_v54, %v11511_v34  ;;  %v889_v43 = vmul.f32 %v11547_v58, %v11511_v34  ;;  %v890_v44 = vmul.f32 %v11549_v59, %v11511_v34 }
 0x119   : > { %13945 = vst [vmem:[#allocation9_spill] sm:$0xff] %v11628_v28 }
 0x11a   : > { %13946 = vst [vmem:[#allocation10_spill] sm:$0xff] %v11632_v29 }
 0x11b   : > { %1133 = vperm.xlu1 %11071, %v1083_v35   ;;  %13947 = vst [vmem:[#allocation11_spill] sm:$0xff] %v11636_v30  ;;  %v11644_v35 = vmul.f32 %v11540_v53, %v11511_v34 }
 0x11c   : > { %1138 = vperm.xlu2 %11070, %v1084_v36   ;;  %13948 = vst [vmem:[#allocation12_spill] sm:$0xff] %v11640_v31 }
 0x11d   : > { %v11519_v37 = vpop.permute.xlu1 %744 }
 0x11e   : > { %v11521_v38 = vpop.permute.xlu0 %736  ;;  %v787_v45 = vmul.f32 %v11553_v63, %v11519_v37  ;;  %v788_v46 = vmul.f32 %v11555_v0, %v11519_v37  ;;  %v789_v34 = vmul.f32 %v11565_v5, %v11519_v37  ;;  %v790_v55 = vmul.f32 %v11567_v6, %v11519_v37 }
 0x11f   : > { %v779_v47 = vmul.f32 %v11553_v63, %v11521_v38  ;;  %v780_v50 = vmul.f32 %v11555_v0, %v11521_v38  ;;  %v781_v56 = vmul.f32 %v11565_v5, %v11521_v38 }
 0x121   : > { %v11526_v40 = vpop.permute.xlu2 %976 }
 0x123   : > { %1128 = vperm.xlu1 %11071, %v1082_v39  }
 0x124   : > { %1113 = vperm.xlu2 %11070, %v1079_v41  }
 0x126   : > { %v11533_v48 = vpop.permute.xlu1 %656  ;;  %v11535_v49 = vpop.permute.xlu0 %716 }
 0x127   : > { %13942 = vst [vmem:[#allocation6_spill] sm:$0xff] %v11535_v49  ;;  %v703_v51 = vmul.f32 %v11589_v13, %v11533_v48  ;;  %v705_v29 = vmul.f32 %v11603_v18, %v11533_v48 }
 0x129   : > { %v811_v28 = vadd.f32 %v779_v47, %v703_v51 }
 0x12a   : > { %v11551_v60 = vpop.permute.xlu2 %724 }
 0x12b   : > { %1103 = vperm.xlu1 %11071, %v1077_v52   ;;  %v704_v52 = vmul.f32 %v11591_v14, %v11533_v48  ;;  %v11712_v51 = vmul.f32 %v11565_v5, %v11551_v60 }
 0x12c   : > { %1108 = vperm.xlu2 %11070, %v1078_v57   ;;  %v782_v57 = vmul.f32 %v11567_v6, %v11521_v38  ;;  %v706_v38 = vmul.f32 %v11605_v19, %v11533_v48 }
 0x12d   : > { %v812_v23 = vadd.f32 %v780_v50, %v704_v52  ;;  %v11716_v52 = vmul.f32 %v11567_v6, %v11551_v60 }
 0x12f   : > { %v11593_v15 = vpop.permute.xlu1 %840 }
 0x130   : > { %v662_v20 = vpop.permute.xlu0 %661 }
 0x131   : > { %v707_v39 = vmul.f32 %v11589_v13, %v662_v20  ;;  %v708_v41 = vmul.f32 %v11591_v14, %v662_v20  ;;  %v709_v42 = vmul.f32 %v11603_v18, %v662_v20  ;;  %v710_v33 = vmul.f32 %v11605_v19, %v662_v20 }
 0x133   : > { %v11650_v36 = vpop.permute.xlu2 %832  ;;  %1098 = vperm.xlu1 %11071, %v1076_v21   ;;  %v815_v1 = vadd.f32 %v783_v24, %v707_v39  ;;  %v816_v2 = vadd.f32 %v784_v25, %v708_v41  ;;  %v817_v20 = vadd.f32 %v785_v26, %v709_v42  ;;  %v818_v21 = vadd.f32 %v786_v27, %v710_v33 }
 0x135   : > { %v923_v41 = vadd.f32 %v11559_v3, %v815_v1  ;;  %v924_v42 = vadd.f32 %v11563_v4, %v816_v2  ;;  %v925_v33 = vadd.f32 %v11571_v7, %v817_v20  ;;  %v11704_v3 = vmul.f32 %v11555_v0, %v11551_v60 }
 0x138   : > { %v667_v61 = vpop.permute.xlu0 %666  ;;  %v972_v62 = vpop.permute.xlu1 %971 }
 0x139   : > { %v711_v49 = vmul.f32 %v11589_v13, %v667_v61  ;;  %v712_v31 = vmul.f32 %v11591_v14, %v667_v61  ;;  %v713_v30 = vmul.f32 %v11603_v18, %v667_v61  ;;  %v714_v37 = vmul.f32 %v11605_v19, %v667_v61 }
 0x13a   : > { %v926_v61 = vadd.f32 %v11575_v8, %v818_v21  ;;  %v1003_v4 = vadd.f32 %v972_v62, %v923_v41  ;;  %v1004_v7 = vadd.f32 %v972_v62, %v924_v42  ;;  %v1005_v8 = vadd.f32 %v972_v62, %v925_v33 }
 0x13b   : > { %v819_v24 = vadd.f32 %v787_v45, %v711_v49  ;;  %v820_v25 = vadd.f32 %v788_v46, %v712_v31  ;;  %v821_v26 = vadd.f32 %v789_v34, %v713_v30  ;;  %v822_v27 = vadd.f32 %v790_v55, %v714_v37 }
 0x13c   : > { %v11688_v39 = vpop.permute.xlu2 %966  ;;  %v813_v30 = vadd.f32 %v781_v56, %v705_v29  ;;  %v814_v31 = vadd.f32 %v782_v57, %v706_v38  ;;  %v11700_v45 = vmul.f32 %v11553_v63, %v11551_v60  ;;  %v919_v34 = vadd.f32 %v11644_v35, %v811_v28 }
 0x13d   : > { %v927_v22 = vadd.f32 %v11578_v9, %v819_v24  ;;  %v928_v48 = vadd.f32 %v11581_v10, %v820_v25  ;;  %v929_v47 = vadd.f32 %v11584_v11, %v821_v26  ;;  %v930_v49 = vadd.f32 %v11587_v12, %v822_v27 }
 0x13e   : > { %v1006_v9 = vadd.f32 %v972_v62, %v926_v61  ;;  %v920_v55 = vadd.f32 %v11648_v32, %v812_v23  ;;  %v11726_v56 = vmul.f32 %v11542_v54, %v11593_v15  ;;  %v922_v57 = vadd.f32 %v890_v44, %v814_v31 }
 0x13f   : > { %v1007_v11 = vadd.f32 %v11526_v40, %v927_v22  ;;  %v1008_v12 = vadd.f32 %v11526_v40, %v928_v48  ;;  %v1009_v29 = vadd.f32 %v11526_v40, %v929_v47  ;;  %v1010_v50 = vadd.f32 %v11526_v40, %v930_v49 }
 0x140   : > { %v652_v46 = vpop.permute.xlu0 %651  ;;  %v647_v10 = vpop.permute.xlu1 %646  ;;  %v11722_v22 = vmul.f32 %v11540_v53, %v11593_v15  ;;  %v921_v40 = vadd.f32 %v889_v43, %v813_v30  ;;  %v1035_v62 = vmax.f32 %v1003_v4, 0.0  ;;  %v1036_v1 = vmax.f32 %v1004_v7, 0.0 }
 0x141   : > { %v1037_v2 = vmax.f32 %v1005_v8, 0.0  ;;  %v1038_v20 = vmax.f32 %v1006_v9, 0.0  ;;  %v1039_v60 = vmax.f32 %v1007_v11, 0.0  ;;  %v1040_v21 = vmax.f32 %v1008_v12, 0.0 }
 0x142   : > { %v1041_v37 = vmax.f32 %v1009_v29, 0.0  ;;  %v1042_v28 = vmax.f32 %v1010_v50, 0.0  ;;  %v885_v23 = vmul.f32 %v11547_v58, %v11593_v15  ;;  %v886_v32 = vmul.f32 %v11549_v59, %v11593_v15 }
 0x143   : > { %v11736_v43 = vmul.f32 %v11540_v53, %v11650_v36  ;;  %v11740_v44 = vmul.f32 %v11542_v54, %v11650_v36  ;;  %v1071_v38 = vpack.c.bf16 %v1039_v60, %v1035_v62  ;;  %v1072_v24 = vpack.c.bf16 %v1040_v21, %v1036_v1  ;;  %v13950_v60 = vld [vmem:[#allocation8_spill] sm:$0xff] }
 0x144   : > { %v11728_v35 = vpop.permute.xlu2 %636  ;;  %v1073_v25 = vpack.c.bf16 %v1041_v37, %v1037_v2  ;;  %v1074_v26 = vpack.c.bf16 %v1042_v28, %v1038_v20  ;;  %v11744_v27 = vmul.f32 %v11547_v58, %v11650_v36  ;;  %v11748_v41 = vmul.f32 %v11549_v59, %v11650_v36  ;;  %v13949_v2 = vld [vmem:[#allocation7_spill] sm:$0xff] }
 0x145   : > { %v11751_v15 = vadd.f32 %v11688_v39, %v919_v34  ;;  %v11754_v42 = vadd.f32 %v11688_v39, %v920_v55  ;;  %v699_v33 = vmul.f32 %v11589_v13, %v652_v46  ;;  %v700_v61 = vmul.f32 %v11591_v14, %v652_v46  ;;  %1240 = vmatpush.bf16.msra.mxu0 %v1071_v38 }
 0x146   : > { %v701_v48 = vmul.f32 %v11603_v18, %v652_v46  ;;  %1289 = vmatpush.bf16.msra.mxu1 %v1072_v24  ;;  %v702_v49 = vmul.f32 %v11605_v19, %v652_v46  ;;  %v695_v36 = vmul.f32 %v11589_v13, %v647_v10  ;;  %v696_v30 = vmul.f32 %v11591_v14, %v647_v10 }
 0x147   : > { %1338 = vmatpush.bf16.msra.mxu2 %v1073_v25  ;;  %1387 = vmatpush.bf16.msra.mxu3 %v1074_v26  ;;  %v697_v4 = vmul.f32 %v11603_v18, %v647_v10  ;;  %v698_v11 = vmul.f32 %v11605_v19, %v647_v10  ;;  %v1001_v46 = vadd.f32 %v11688_v39, %v921_v40  ;;  %v1032_v38 = vmax.f32 %v11754_v42, 0.0  ;;  %v13951_v25 = vld [vmem:[#allocation9_spill] sm:$0xff] }
 0x148   : > { %v642_v47 = vpop.permute.xlu0 %641  ;;  %v1002_v29 = vadd.f32 %v11688_v39, %v922_v57  ;;  %v807_v50 = vadd.f32 %v11597_v16, %v699_v33  ;;  %v808_v1 = vadd.f32 %v11601_v17, %v700_v61  ;;  %v809_v20 = vadd.f32 %v13949_v2, %v701_v48  ;;  %v13952_v33 = vld [vmem:[#allocation10_spill] sm:$0xff]  ;;  %v13953_v48 = vld [vmem:[#allocation11_spill] sm:$0xff] }
 0x149   : > { %v729_v31 = vpop.permute.xlu1 %728  ;;  %v810_v21 = vadd.f32 %v13950_v60, %v702_v49  ;;  %v691_v10 = vmul.f32 %v11589_v13, %v642_v47  ;;  %v692_v40 = vmul.f32 %v11591_v14, %v642_v47  ;;  %v693_v39 = vmul.f32 %v11603_v18, %v642_v47 }
 0x14a   : > { %v771_v7 = vmul.f32 %v11553_v63, %v729_v31  ;;  %v772_v8 = vmul.f32 %v11555_v0, %v729_v31  ;;  %v773_v9 = vmul.f32 %v11565_v5, %v729_v31  ;;  %v774_v12 = vmul.f32 %v11567_v6, %v729_v31 }
 0x14b   : > { %v694_v16 = vmul.f32 %v11605_v19, %v642_v47  ;;  %v1031_v57 = vmax.f32 %v11751_v15, 0.0  ;;  %v1033_v17 = vmax.f32 %v1001_v46, 0.0  ;;  %v1034_v24 = vmax.f32 %v1002_v29, 0.0 }
 0x14c   : > { %v803_v34 = vadd.f32 %v771_v7, %v695_v36  ;;  %v804_v55 = vadd.f32 %v772_v8, %v696_v30  ;;  %v805_v62 = vadd.f32 %v773_v9, %v697_v4  ;;  %v806_v37 = vadd.f32 %v774_v12, %v698_v11  ;;  %v13954_v36 = vld [vmem:[#allocation12_spill] sm:$0xff] }
 0x14d   : > { %v11774_v28 = vpop.permute.xlu2 %824  ;;  %v915_v4 = vadd.f32 %v11722_v22, %v807_v50  ;;  %v916_v7 = vadd.f32 %v11726_v56, %v808_v1  ;;  %v917_v47 = vadd.f32 %v885_v23, %v809_v20  ;;  %v918_v8 = vadd.f32 %v886_v32, %v810_v21 }
 0x14e   : > { %v911_v26 = vadd.f32 %v13951_v25, %v803_v34  ;;  %v912_v61 = vadd.f32 %v13952_v33, %v804_v55  ;;  %v913_v49 = vadd.f32 %v13953_v48, %v805_v62  ;;  %v914_v30 = vadd.f32 %v13954_v36, %v806_v37 }
 0x14f   : > { %v799_v15 = vadd.f32 %v11700_v45, %v691_v10  ;;  %v800_v42 = vadd.f32 %v11704_v3, %v692_v40  ;;  %v801_v9 = vadd.f32 %v11712_v51, %v693_v39  ;;  %v802_v11 = vadd.f32 %v11716_v52, %v694_v16 }
 0x150   : > { %v957_v31 = vpop.permute.xlu0 %956 }
 0x151   : > { %v991_v62 = vadd.f32 %v957_v31, %v911_v26  ;;  %v992_v2 = vadd.f32 %v957_v31, %v912_v61  ;;  %v993_v22 = vadd.f32 %v957_v31, %v913_v49  ;;  %v994_v50 = vadd.f32 %v957_v31, %v914_v30 }
 0x152   : > { %v962_v12 = vpop.permute.xlu1 %961  ;;  %v907_v3 = vadd.f32 %v11736_v43, %v799_v15  ;;  %v908_v51 = vadd.f32 %v11740_v44, %v800_v42  ;;  %v909_v52 = vadd.f32 %v11744_v27, %v801_v9  ;;  %v910_v20 = vadd.f32 %v11748_v41, %v802_v11 }
 0x153   : > { %v995_v46 = vadd.f32 %v962_v12, %v915_v4  ;;  %v996_v29 = vadd.f32 %v962_v12, %v916_v7  ;;  %v997_v34 = vadd.f32 %v962_v12, %v917_v47  ;;  %v998_v55 = vadd.f32 %v962_v12, %v918_v8  ;;  %v13955_v47 = vld [vmem:[#allocation6_spill] sm:$0xff] }
 0x154   : > { %v1023_v26 = vmax.f32 %v991_v62, 0.0  ;;  %v1024_v33 = vmax.f32 %v992_v2, 0.0  ;;  %v1025_v61 = vmax.f32 %v993_v22, 0.0  ;;  %v1026_v43 = vmax.f32 %v994_v50, 0.0 }
 0x155   : > { %v1027_v56 = vmax.f32 %v995_v46, 0.0  ;;  %v1028_v23 = vmax.f32 %v996_v29, 0.0  ;;  %v1029_v32 = vmax.f32 %v997_v34, 0.0  ;;  %v1030_v1 = vmax.f32 %v998_v55, 0.0 }
 0x156   : > { %v952_v45 = vpop.permute.xlu2 %951  ;;  %v759_v8 = vmul.f32 %v11553_v63, %v13955_v47  ;;  %v760_v15 = vmul.f32 %v11555_v0, %v13955_v47  ;;  %v761_v42 = vmul.f32 %v11565_v5, %v13955_v47  ;;  %v762_v9 = vmul.f32 %v11567_v6, %v13955_v47  ;;  %v10574_v47 = vld [vmem:[%s13916_s3 + $0x20] sm:$0xff] }
 0x157   : > { %v1067_v60 = vpack.c.bf16 %v1031_v57, %v1027_v56  ;;  %v1068_v21 = vpack.c.bf16 %v1032_v38, %v1028_v23  ;;  %v1069_v37 = vpack.c.bf16 %v1033_v17, %v1029_v32  ;;  %v1070_v10 = vpack.c.bf16 %v1034_v24, %v1030_v1 }
 0x158   : > { %v987_v40 = vadd.f32 %v952_v45, %v907_v3  ;;  %v988_v39 = vadd.f32 %v952_v45, %v908_v51  ;;  %v989_v16 = vadd.f32 %v952_v45, %v909_v52  ;;  %v990_v25 = vadd.f32 %v952_v45, %v910_v20 }
 0x159   : > { %1241 = vmatpush.bf16.msra.mxu0 %v1067_v60  ;;  %1290 = vmatpush.bf16.msra.mxu1 %v1068_v21  ;;  %v687_v11 = vmul.f32 %v11589_v13, %v11728_v35  ;;  %v688_v12 = vmul.f32 %v11591_v14, %v11728_v35  ;;  %v689_v46 = vmul.f32 %v11603_v18, %v11728_v35 }
 0x15a   : > { %1339 = vmatpush.bf16.msra.mxu2 %v1069_v37  ;;  %1388 = vmatpush.bf16.msra.mxu3 %v1070_v10  ;;  %v632_v44 = vpop.permute.xlu1 %631  ;;  %v1019_v27 = vmax.f32 %v987_v40, 0.0  ;;  %v1020_v48 = vmax.f32 %v988_v39, 0.0  ;;  %v1021_v41 = vmax.f32 %v989_v16, 0.0  ;;  %v1022_v57 = vmax.f32 %v990_v25, 0.0 }
 0x15b   : > { %v684_v29 = vmul.f32 %v11591_v14, %v632_v44  ;;  %v868_v14 = vmul.f32 %v11542_v54, %v11774_v28 }
 0x15c   : > { %v1063_v38 = vpack.c.bf16 %v1023_v26, %v1019_v27  ;;  %v1064_v17 = vpack.c.bf16 %v1024_v33, %v1020_v48  ;;  %v1065_v24 = vpack.c.bf16 %v1025_v61, %v1021_v41  ;;  %v1066_v49 = vpack.c.bf16 %v1026_v43, %v1022_v57 }
 0x15d   : > { %v792_v52 = vadd.f32 %v760_v15, %v684_v29  ;;  %v10576_v15 = vld [vmem:[%s13916_s3 + $0x30] sm:$0xff] }
 0x15e   : > { %1242 = vmatpush.bf16.msra.mxu0 %v1063_v38  ;;  %1291 = vmatpush.bf16.msra.mxu1 %v1064_v17  ;;  %v947_v21 = vpop.permute.xlu2 %946 }
 0x15f   : > { %1340 = vmatpush.bf16.msra.mxu2 %v1065_v24  ;;  %1389 = vmatpush.bf16.msra.mxu3 %v1066_v49  ;;  %v900_v39 = vadd.f32 %v868_v14, %v792_v52 }
 0x163   : > { %v721_v36 = vpop.permute.xlu1 %720 }
 0x164   : > { %v763_v30 = vmul.f32 %v11553_v63, %v721_v36  ;;  %v764_v31 = vmul.f32 %v11555_v0, %v721_v36  ;;  %v765_v4 = vmul.f32 %v11565_v5, %v721_v36  ;;  %v766_v7 = vmul.f32 %v11567_v6, %v721_v36 }
 0x165   : > { %v690_v63 = vmul.f32 %v11605_v19, %v11728_v35  ;;  %v683_v0 = vmul.f32 %v11589_v13, %v632_v44  ;;  %v685_v5 = vmul.f32 %v11603_v18, %v632_v44  ;;  %v686_v6 = vmul.f32 %v11605_v19, %v632_v44 }
 0x166   : > { %v795_v34 = vadd.f32 %v763_v30, %v687_v11  ;;  %v796_v55 = vadd.f32 %v764_v31, %v688_v12  ;;  %v797_v62 = vadd.f32 %v765_v4, %v689_v46  ;;  %v867_v13 = vmul.f32 %v11540_v53, %v11774_v28  ;;  %v10570_v30 = vld [vmem:[%s13916_s3] sm:$0xff]  ;;  %v10571_v31 = vld [vmem:[%s13916_s3 + $0x8] sm:$0xff]  ;;  %v10572_v4 = vld [vmem:[%s13916_s3 + $0x10] sm:$0xff] }
 0x167   : > { %v798_v2 = vadd.f32 %v766_v7, %v690_v63  ;;  %v869_v18 = vmul.f32 %v11547_v58, %v11774_v28  ;;  %v870_v19 = vmul.f32 %v11549_v59, %v11774_v28  ;;  %v791_v51 = vadd.f32 %v759_v8, %v683_v0  ;;  %v10573_v7 = vld [vmem:[%s13916_s3 + $0x18] sm:$0xff]  ;;  %v10575_v8 = vld [vmem:[%s13916_s3 + $0x28] sm:$0xff] }
 0x168   : > { %v793_v20 = vadd.f32 %v761_v42, %v685_v5  ;;  %v794_v60 = vadd.f32 %v762_v9, %v686_v6  ;;  %v10577_v42 = vld [vmem:[%s13916_s3 + $0x38] sm:$0xff] }
 0x16a   : > { %v901_v16 = vadd.f32 %v869_v18, %v793_v20 }
 0x16c   : > { %v829_v22 = vpop.permute.xlu1 %828 }
 0x16d   : > { %v871_v50 = vmul.f32 %v11540_v53, %v829_v22  ;;  %v872_v56 = vmul.f32 %v11542_v54, %v829_v22  ;;  %v873_v23 = vmul.f32 %v11547_v58, %v829_v22  ;;  %v874_v35 = vmul.f32 %v11549_v59, %v829_v22 }
 0x16e   : > { %v899_v54 = vadd.f32 %v867_v13, %v791_v51  ;;  %v902_v58 = vadd.f32 %v870_v19, %v794_v60 }
 0x16f   : > { %v903_v32 = vadd.f32 %v871_v50, %v795_v34  ;;  %v904_v1 = vadd.f32 %v872_v56, %v796_v55  ;;  %v905_v45 = vadd.f32 %v873_v23, %v797_v62  ;;  %v906_v3 = vadd.f32 %v874_v35, %v798_v2 }
 0x171   : > { %v983_v37 = vadd.f32 %v947_v21, %v903_v32  ;;  %v984_v53 = vadd.f32 %v947_v21, %v904_v1  ;;  %v985_v10 = vadd.f32 %v947_v21, %v905_v45  ;;  %v986_v40 = vadd.f32 %v947_v21, %v906_v3 }
 0x173   : > { %v1015_v61 = vmax.f32 %v983_v37, 0.0  ;;  %v1016_v43 = vmax.f32 %v984_v53, 0.0  ;;  %v1017_v44 = vmax.f32 %v985_v10, 0.0  ;;  %v1018_v27 = vmax.f32 %v986_v40, 0.0 }
 0x175   : > { %v942_v25 = vpop.permute.xlu1 %941 }
 0x176   : > { %v979_v26 = vadd.f32 %v942_v25, %v899_v54  ;;  %v980_v59 = vadd.f32 %v942_v25, %v900_v39  ;;  %v981_v28 = vadd.f32 %v942_v25, %v901_v16  ;;  %v982_v33 = vadd.f32 %v942_v25, %v902_v58  ;;  %v11966_v25 = vpop.permute.xlu0 %1153 }
 0x178   : > { %v1011_v48 = vmax.f32 %v979_v26, 0.0  ;;  %v1012_v41 = vmax.f32 %v980_v59, 0.0  ;;  %v1013_v57 = vmax.f32 %v981_v28, 0.0  ;;  %v1014_v38 = vmax.f32 %v982_v33, 0.0  ;;  %v11970_v59 = vpop.permute.xlu2 %1168 }
 0x17a   : > { %v1059_v17 = vpack.c.bf16 %v1015_v61, %v1011_v48  ;;  %v1060_v24 = vpack.c.bf16 %v1016_v43, %v1012_v41  ;;  %v1061_v49 = vpack.c.bf16 %v1017_v44, %v1013_v57  ;;  %v1062_v36 = vpack.c.bf16 %v1018_v27, %v1014_v38 }
 0x17c   : > { %1243 = vmatpush.bf16.msra.mxu0 %v1059_v17  ;;  %1292 = vmatpush.bf16.msra.mxu1 %v1060_v24 }
 0x17d   : > { %1341 = vmatpush.bf16.msra.mxu2 %v1061_v49  ;;  %1390 = vmatpush.bf16.msra.mxu3 %v1062_v36  ;;  %v11948_v21 = vpop.permute.xlu1 %1163 }
 0x17e   : > { %v11980_v44 = vpop.permute.xlu0 %1148 }
 0x17f   : > { %8998 = vmatmul.msk.bf16.vlgmr.msra.gmra.mxu0 %vm1211_vm0, %v10570_v30  ;;  %9006 = vmatmul.msk.bf16.vlgmr.msra.gmra.mxu1 %vm1211_vm0, %v10570_v30 }
 0x180   : > { %9014 = vmatmul.msk.bf16.vlgmr.msra.gmra.mxu2 %vm1211_vm0, %v10570_v30  ;;  %9022 = vmatmul.msk.bf16.vlgmr.msra.gmra.mxu3 %vm1211_vm0, %v10570_v30  ;;  %v11984_v48 = vpop.permute.xlu2 %1143 }
 0x185   : > { %v11968_v26 = vpop.permute.xlu1 %1158 }
 0x186   : > { %v11990_v24 = vpop.permute.xlu0 %1123 }
 0x18d   : > { %v11982_v27 = vpop.permute.xlu1 %1133 }
 0x18f   : > { %8999 = vmatmul.msk.bf16.gmra.mxu0 %vm1211_vm0, %v10571_v31  ;;  %9007 = vmatmul.msk.bf16.gmra.mxu1 %vm1211_vm0, %v10571_v31 }
 0x190   : > { %9015 = vmatmul.msk.bf16.gmra.mxu2 %vm1211_vm0, %v10571_v31  ;;  %9023 = vmatmul.msk.bf16.gmra.mxu3 %vm1211_vm0, %v10571_v31 }
 0x195   : > { %v11992_v49 = vpop.permute.xlu1 %1128 }
 0x19f   : > { %9000 = vmatmul.msk.bf16.gmra.mxu0 %vm1211_vm0, %v10572_v4  ;;  %9008 = vmatmul.msk.bf16.gmra.mxu1 %vm1211_vm0, %v10572_v4 }
 0x1a0   : > { %9016 = vmatmul.msk.bf16.gmra.mxu2 %vm1211_vm0, %v10572_v4  ;;  %9024 = vmatmul.msk.bf16.gmra.mxu3 %vm1211_vm0, %v10572_v4 }
 0x1af   : > { %9001 = vmatmul.msk.bf16.gmra.mxu0 %vm1211_vm0, %v10573_v7  ;;  %9009 = vmatmul.msk.bf16.gmra.mxu1 %vm1211_vm0, %v10573_v7 }
 0x1b0   : > { %9017 = vmatmul.msk.bf16.gmra.mxu2 %vm1211_vm0, %v10573_v7  ;;  %9025 = vmatmul.msk.bf16.gmra.mxu3 %vm1211_vm0, %v10573_v7  ;;  %v11998_v7 = vpop.permute.xlu2 %1138 }
 0x1bf   : > { %9002 = vmatmul.msk.bf16.gmra.mxu0 %vm1211_vm0, %v10574_v47  ;;  %9010 = vmatmul.msk.bf16.gmra.mxu1 %vm1211_vm0, %v10574_v47 }
 0x1c0   : > { %9018 = vmatmul.msk.bf16.gmra.mxu2 %vm1211_vm0, %v10574_v47  ;;  %9026 = vmatmul.msk.bf16.gmra.mxu3 %vm1211_vm0, %v10574_v47 }
 0x1cf   : > { %9003 = vmatmul.msk.bf16.gmra.mxu0 %vm1211_vm0, %v10575_v8  ;;  %9011 = vmatmul.msk.bf16.gmra.mxu1 %vm1211_vm0, %v10575_v8 }
 0x1d0   : > { %9019 = vmatmul.msk.bf16.gmra.mxu2 %vm1211_vm0, %v10575_v8  ;;  %9027 = vmatmul.msk.bf16.gmra.mxu3 %vm1211_vm0, %v10575_v8 }
 0x1df   : > { %9004 = vmatmul.msk.bf16.gmra.mxu0 %vm1211_vm0, %v10576_v15  ;;  %9012 = vmatmul.msk.bf16.gmra.mxu1 %vm1211_vm0, %v10576_v15 }
 0x1e0   : > { %9020 = vmatmul.msk.bf16.gmra.mxu2 %vm1211_vm0, %v10576_v15  ;;  %9028 = vmatmul.msk.bf16.gmra.mxu3 %vm1211_vm0, %v10576_v15 }
 0x1ef   : > { %9005 = vmatmul.msk.bf16.gmra.mxu0 %vm1211_vm0, %v10577_v42  ;;  %9013 = vmatmul.msk.bf16.gmra.mxu1 %vm1211_vm0, %v10577_v42 }
 0x1f0   : > { %9021 = vmatmul.msk.bf16.gmra.mxu2 %vm1211_vm0, %v10577_v42  ;;  %9029 = vmatmul.msk.bf16.gmra.mxu3 %vm1211_vm0, %v10577_v42 }
 0x1fc   : > { %v11888_v9 = vpop.f32.mrf.mxu0  ;;  %v11890_v11 = vpop.f32.mrf.mxu1 }
 0x203   : > { %v11892_v12 = vpop.f32.mrf.mxu2  ;;  %v11894_v46 = vpop.f32.mrf.mxu3 }
 0x204   : > { %13956 = vst [vmem:[#allocation7_spill] sm:$0xff] %v11892_v12  ;;  %v11896_v63 = vpop.f32.mrf.mxu0  ;;  %v11898_v0 = vpop.f32.mrf.mxu1 }
 0x205   : > { %13957 = vst [vmem:[#allocation8_spill] sm:$0xff] %v11894_v46  ;;  %v12004_v46 = vpop.permute.xlu0 %1118  ;;  %v12006_v12 = vpop.permute.xlu1 %1103 }
 0x206   : > { %13971 = vst [vmem:[#allocation21_spill] sm:$0xff] %v12006_v12 }
 0x20b   : > { %v11900_v29 = vpop.f32.mrf.mxu2  ;;  %v11902_v5 = vpop.f32.mrf.mxu3 }
 0x20c   : > { %13958 = vst [vmem:[#allocation9_spill] sm:$0xff] %v11900_v29  ;;  %v11904_v6 = vpop.f32.mrf.mxu0  ;;  %v11906_v34 = vpop.f32.mrf.mxu1 }
 0x20d   : > { %13959 = vst [vmem:[#allocation10_spill] sm:$0xff] %v11902_v5  ;;  %v12008_v5 = vpop.permute.xlu2 %1113 }
 0x20e   : > { %13972 = vst [vmem:[#allocation22_spill] sm:$0xff] %v12008_v5 }
 0x213   : > { %v11908_v55 = vpop.f32.mrf.mxu2  ;;  %v11910_v62 = vpop.f32.mrf.mxu3 }
 0x214   : > { %13960 = vst [vmem:[#allocation11_spill] sm:$0xff] %v11908_v55  ;;  %v11912_v2 = vpop.f32.mrf.mxu0  ;;  %v11914_v22 = vpop.f32.mrf.mxu1 }
 0x215   : > { %13961 = vst [vmem:[#allocation12_spill] sm:$0xff] %v11910_v62 }
 0x21b   : > { %v11916_v50 = vpop.f32.mrf.mxu2  ;;  %v11918_v56 = vpop.f32.mrf.mxu3 }
 0x21c   : > { %13962 = vst [vmem:[#allocation6_spill] sm:$0xff] %v11916_v50  ;;  %v11920_v23 = vpop.f32.mrf.mxu0  ;;  %v11922_v35 = vpop.f32.mrf.mxu1 }
 0x21d   : > { %13963 = vst [vmem:[#allocation13_spill] sm:$0xff] %v11918_v56  ;;  %v12010_v50 = vpop.permute.xlu0 %1093 }
 0x21e   : > { %13973 = vst [vmem:[#allocation23_spill] sm:$0xff] %v12010_v50 }
 0x223   : > { %v11924_v13 = vpop.f32.mrf.mxu2  ;;  %v11926_v14 = vpop.f32.mrf.mxu3 }
 0x224   : > { %13964 = vst [vmem:[#allocation14_spill] sm:$0xff] %v11924_v13  ;;  %v11928_v18 = vpop.f32.mrf.mxu0  ;;  %v11930_v19 = vpop.f32.mrf.mxu1  ;;  %v12016_v13 = vadd.f32 %v11888_v9, %v12010_v50  ;;  %v12038_v9 = vadd.f32 %v11906_v34, %v12006_v12 }
 0x225   : > { %13965 = vst [vmem:[#allocation15_spill] sm:$0xff] %v11926_v14  ;;  %v12012_v14 = vpop.permute.xlu1 %1098  ;;  %v12058_v34 = vadd.f32 %v11928_v18, %v12004_v46 }
 0x226   : > { %13974 = vst [vmem:[#allocation24_spill] sm:$0xff] %v12012_v14 }
 0x227   : > { %13975 = vst [vmem:[#allocation25_spill] sm:$0xff] %v12016_v13 }
 0x228   : > { %13981 = vst [vmem:[#allocation31_spill] sm:$0xff] %v12038_v9 }
 0x22b   : > { %v11932_v32 = vpop.f32.mrf.mxu2  ;;  %v11934_v1 = vpop.f32.mrf.mxu3 }
 0x22c   : > { %13966 = vst [vmem:[#allocation16_spill] sm:$0xff] %v11932_v32  ;;  %v11936_v45 = vpop.f32.mrf.mxu0  ;;  %v11938_v3 = vpop.f32.mrf.mxu1 }
 0x22d   : > { %13967 = vst [vmem:[#allocation17_spill] sm:$0xff] %v11934_v1  ;;  %v12020_v1 = vadd.f32 %v11890_v11, %v12010_v50  ;;  %v12022_v32 = vpop.permute.xlu2 %1108 }
 0x22e   : > { %13977 = vst [vmem:[#allocation27_spill] sm:$0xff] %v12022_v32  ;;  %v12042_v11 = vadd.f32 %v11912_v2, %v12022_v32  ;;  %v12062_v2 = vadd.f32 %v11930_v19, %v12004_v46 }
 0x22f   : > { %13976 = vst [vmem:[#allocation26_spill] sm:$0xff] %v12020_v1 }
 0x230   : > { %13982 = vst [vmem:[#allocation32_spill] sm:$0xff] %v12042_v11 }
 0x233   : > { %v11940_v51 = vpop.f32.mrf.mxu2  ;;  %v11942_v52 = vpop.f32.mrf.mxu3 }
 0x234   : > { %13968 = vst [vmem:[#allocation18_spill] sm:$0xff] %v11940_v51  ;;  %v11944_v20 = vpop.f32.mrf.mxu0  ;;  %v11946_v60 = vpop.f32.mrf.mxu1  ;;  %v12030_v51 = vadd.f32 %v11898_v0, %v12012_v14  ;;  %v12050_v0 = vadd.f32 %v11920_v23, %v12008_v5  ;;  %v12068_v23 = vadd.f32 %v11936_v45, %v11990_v24 }
 0x235   : > { %13969 = vst [vmem:[#allocation19_spill] sm:$0xff] %v11942_v52  ;;  %v12026_v52 = vadd.f32 %v11896_v63, %v12012_v14  ;;  %v12046_v63 = vadd.f32 %v11914_v22, %v12022_v32  ;;  %v12076_v18 = vadd.f32 %v11944_v20, %v11992_v49  ;;  %v12080_v19 = vadd.f32 %v11946_v60, %v11992_v49 }
 0x236   : > { %13979 = vst [vmem:[#allocation29_spill] sm:$0xff] %v12030_v51 }
 0x237   : > { %13978 = vst [vmem:[#allocation28_spill] sm:$0xff] %v12026_v52 }
 0x238   : > { %13983 = vst [vmem:[#allocation33_spill] sm:$0xff] %v12046_v63 }
 0x23b   : > { %v11950_v37 = vpop.f32.mrf.mxu2  ;;  %v11952_v53 = vpop.f32.mrf.mxu3 }
 0x23c   : > { %13970 = vst [vmem:[#allocation20_spill] sm:$0xff] %v11952_v53  ;;  %v11954_v10 = vpop.f32.mrf.mxu0  ;;  %v11956_v40 = vpop.f32.mrf.mxu1  ;;  %v12034_v53 = vadd.f32 %v11904_v6, %v12006_v12  ;;  %v12054_v6 = vadd.f32 %v11922_v35, %v12008_v5  ;;  %v12072_v35 = vadd.f32 %v11938_v3, %v11990_v24 }
 0x23e   : > { %13980 = vst [vmem:[#allocation30_spill] sm:$0xff] %v12034_v53 }
 0x243   : > { %v11958_v54 = vpop.f32.mrf.mxu2  ;;  %v11960_v39 = vpop.f32.mrf.mxu3 }
 0x244   : > { %v11962_v16 = vpop.f32.mrf.mxu0  ;;  %v11964_v58 = vpop.f32.mrf.mxu1 }
 0x24b   : > { %v11972_v28 = vpop.f32.mrf.mxu2  ;;  %v11974_v33 = vpop.f32.mrf.mxu3 }
 0x24c   : > { %v11976_v61 = vpop.f32.mrf.mxu0  ;;  %v11978_v43 = vpop.f32.mrf.mxu1 }
 0x253   : > { %v11986_v41 = vpop.f32.mrf.mxu2  ;;  %v11988_v57 = vpop.f32.mrf.mxu3 }
 0x254   : > { %v1272_v38 = vpop.f32.mrf.mxu0  ;;  %v1321_v17 = vpop.f32.mrf.mxu1 }
 0x255   : > { %v1273_v3 = vadd.f32 %v1272_v38, %v11980_v44  ;;  %v1322_v52 = vadd.f32 %v1321_v17, %v11980_v44  ;;  %v12100_v38 = vadd.f32 %v11962_v16, %v11998_v7  ;;  %v12104_v17 = vadd.f32 %v11964_v58, %v11998_v7 }
 0x257   : > { %v1476_v16 = vmax.f32 %v1273_v3, 0.0 }
 0x25b   : > { %v11994_v36 = vpop.f32.mrf.mxu2  ;;  %v11996_v30 = vpop.f32.mrf.mxu3 }
 0x25c   : > { %v1275_v31 = vpop.f32.mrf.mxu0  ;;  %v1324_v4 = vpop.f32.mrf.mxu1 }
 0x25d   : > { %v1276_v20 = vadd.f32 %v1275_v31, %v11966_v25  ;;  %v1325_v32 = vadd.f32 %v1324_v4, %v11966_v25 }
 0x25f   : > { %v1481_v63 = vmax.f32 %v1325_v32, 0.0 }
 0x263   : > { %v12000_v47 = vpop.f32.mrf.mxu2  ;;  %v12002_v8 = vpop.f32.mrf.mxu3 }
 0x264   : > { %v1277_v15 = vpop.f32.mrf.mxu0  ;;  %v1326_v42 = vpop.f32.mrf.mxu1 }
 0x265   : > { %v1278_v13 = vadd.f32 %v1277_v15, %v11968_v26  ;;  %v1327_v12 = vadd.f32 %v1326_v42, %v11968_v26  ;;  %v12092_v15 = vadd.f32 %v11954_v10, %v11982_v27  ;;  %v12096_v42 = vadd.f32 %v11956_v40, %v11982_v27 }
 0x266   : > { %v1271_v10 = vadd.f32 %v11976_v61, %v11984_v48 }
 0x267   : > { %v1485_v31 = vmax.f32 %v1327_v12, 0.0 }
 0x268   : > { %v1472_v3 = vmax.f32 %v1271_v10, 0.0 }
 0x269   : > { %v1649_v32 = vpack.c.bf16 %v1485_v31, %v1481_v63  ;;  %v1469_v63 = vmax.f32 %v12104_v17, 0.0  ;;  %v1415_v17 = vadd.f32 %v11974_v33, %v11998_v7 }
 0x26b   : > { %v1375_v29 = vpop.f32.mrf.mxu2  ;;  %v1424_v62 = vpop.f32.mrf.mxu3 }
 0x26c   : > { %v1280_v55 = vpop.f32.mrf.mxu0  ;;  %v1329_v56 = vpop.f32.mrf.mxu1  ;;  %v1376_v12 = vadd.f32 %v1375_v29, %v11968_v26 }
 0x26d   : > { %v1281_v50 = vadd.f32 %v1280_v55, %v11948_v21  ;;  %v1330_v22 = vadd.f32 %v1329_v56, %v11948_v21 }
 0x26f   : > { %v1488_v60 = vmax.f32 %v1281_v50, 0.0  ;;  %v1489_v9 = vmax.f32 %v1330_v22, 0.0  ;;  %v1484_v50 = vmax.f32 %v1278_v13, 0.0  ;;  %v1320_v22 = vadd.f32 %v11978_v43, %v11984_v48 }
 0x271   : > { %v1473_v29 = vmax.f32 %v1320_v22, 0.0  ;;  %v1461_v22 = vmax.f32 %v12080_v19, 0.0  ;;  %v13984_v19 = vld [vmem:[#allocation20_spill] sm:$0xff] }
 0x273   : > { %v1378_v14 = vpop.f32.mrf.mxu2  ;;  %v1427_v1 = vpop.f32.mrf.mxu3 }
 0x274   : > { %v1282_v55 = vpop.f32.mrf.mxu0  ;;  %v1331_v56 = vpop.f32.mrf.mxu1  ;;  %v1379_v40 = vadd.f32 %v1378_v14, %v11948_v21  ;;  %v1374_v14 = vadd.f32 %v12000_v47, %v11966_v25 }
 0x275   : > { %v1283_v45 = vadd.f32 %v1282_v55, %v11970_v59  ;;  %v1332_v51 = vadd.f32 %v1331_v56, %v11970_v59  ;;  %v1428_v55 = vadd.f32 %v1427_v1, %v11948_v21  ;;  %v1477_v56 = vmax.f32 %v1322_v52, 0.0 }
 0x276   : > { %v1423_v1 = vadd.f32 %v12002_v8, %v11966_v25  ;;  %v1490_v21 = vmax.f32 %v1379_v40, 0.0  ;;  %v1468_v8 = vmax.f32 %v12100_v38, 0.0  ;;  %v1482_v31 = vmax.f32 %v1374_v14, 0.0 }
 0x277   : > { %v1492_v53 = vmax.f32 %v1283_v45, 0.0  ;;  %v1493_v5 = vmax.f32 %v1332_v51, 0.0  ;;  %v1480_v45 = vmax.f32 %v1276_v20, 0.0  ;;  %v1491_v61 = vmax.f32 %v1428_v55, 0.0 }
 0x278   : > { %v1644_v20 = vpack.c.bf16 %v1476_v16, %v1472_v3  ;;  %v1366_v38 = vadd.f32 %v11972_v28, %v11998_v7  ;;  %v1413_v28 = vadd.f32 %v11960_v39, %v11982_v27  ;;  %v1456_v7 = vmax.f32 %v12068_v23, 0.0  ;;  %v13989_v3 = vld [vmem:[#allocation32_spill] sm:$0xff] }
 0x279   : > { %v1652_v4 = vpack.c.bf16 %v1492_v53, %v1488_v60  ;;  %v1653_v51 = vpack.c.bf16 %v1493_v5, %v1489_v9  ;;  %v1425_v5 = vadd.f32 %v1424_v62, %v11968_v26  ;;  %v1648_v52 = vpack.c.bf16 %v1484_v50, %v1480_v45 }
 0x27a   : > { %v1371_v62 = vadd.f32 %v11994_v36, %v11980_v44  ;;  %v1420_v26 = vadd.f32 %v11996_v30, %v11980_v44  ;;  %v1645_v60 = vpack.c.bf16 %v1477_v56, %v1473_v29  ;;  %v1369_v50 = vadd.f32 %v11986_v41, %v11984_v48 }
 0x27b   : > { %v1380_v58 = vpop.f32.mrf.mxu2  ;;  %v1429_v11 = vpop.f32.mrf.mxu3  ;;  %2040 = vmatpush.bf16.msrb.mxu0 %v1652_v4  ;;  %2369 = vmatpush.bf16.msrb.mxu1 %v1653_v51  ;;  %v1487_v47 = vmax.f32 %v1425_v5, 0.0  ;;  %v1418_v36 = vadd.f32 %v11988_v57, %v11984_v48  ;;  %v1483_v44 = vmax.f32 %v1423_v1, 0.0  ;;  %v1464_v30 = vmax.f32 %v12092_v15, 0.0 }
 0x27c   : > { %v1381_v13 = vadd.f32 %v1380_v58, %v11970_v59  ;;  %v1430_v53 = vadd.f32 %v1429_v11, %v11970_v59  ;;  %v1486_v59 = vmax.f32 %v1376_v12, 0.0  ;;  %v1465_v4 = vmax.f32 %v12096_v42, 0.0 }
 0x27d   : > { %v1478_v41 = vmax.f32 %v1371_v62, 0.0  ;;  %v1479_v51 = vmax.f32 %v1420_v26, 0.0  ;;  %v1651_v48 = vpack.c.bf16 %v1487_v47, %v1483_v44  ;;  %v1460_v57 = vmax.f32 %v12076_v18, 0.0  ;;  %v13990_v62 = vld [vmem:[#allocation33_spill] sm:$0xff]  ;;  %v13991_v47 = vld [vmem:[#allocation22_spill] sm:$0xff] }
 0x27e   : > { %v1494_v43 = vmax.f32 %v1381_v13, 0.0  ;;  %v1495_v9 = vmax.f32 %v1430_v53, 0.0  ;;  %v1650_v10 = vpack.c.bf16 %v1486_v59, %v1482_v31  ;;  %v1640_v40 = vpack.c.bf16 %v1468_v8, %v1464_v30  ;;  %v13996_v31 = vld [vmem:[#allocation27_spill] sm:$0xff]  ;;  %v13997_v44 = vld [vmem:[#allocation6_spill] sm:$0xff] }
 0x27f   : > { %2041 = vmatpush.bf16.msrb.mxu0 %v1648_v52  ;;  %2370 = vmatpush.bf16.msrb.mxu1 %v1649_v32  ;;  %v1641_v15 = vpack.c.bf16 %v1469_v63, %v1465_v4  ;;  %v1364_v42 = vadd.f32 %v11958_v54, %v11982_v27  ;;  %v1474_v55 = vmax.f32 %v1369_v50, 0.0  ;;  %v1475_v33 = vmax.f32 %v1418_v36, 0.0  ;;  %v13995_v50 = vld [vmem:[#allocation31_spill] sm:$0xff]  ;;  %v13998_v4 = vld [vmem:[#allocation13_spill] sm:$0xff] }
 0x280   : > { %v1654_v11 = vpack.c.bf16 %v1494_v43, %v1490_v21  ;;  %v1655_v25 = vpack.c.bf16 %v1495_v9, %v1491_v61  ;;  %v1457_v16 = vmax.f32 %v12072_v35, 0.0  ;;  %v1361_v18 = vadd.f32 %v11950_v37, %v11992_v49  ;;  %v13985_v35 = vld [vmem:[#allocation18_spill] sm:$0xff]  ;;  %v13986_v37 = vld [vmem:[#allocation19_spill] sm:$0xff] }
 0x281   : > { %v1410_v56 = vadd.f32 %v13984_v19, %v11992_v49  ;;  %v1470_v54 = vmax.f32 %v1366_v38, 0.0  ;;  %v1471_v45 = vmax.f32 %v1415_v17, 0.0  ;;  %v1646_v58 = vpack.c.bf16 %v1478_v41, %v1474_v55  ;;  %v14002_v55 = vld [vmem:[#allocation11_spill] sm:$0xff] }
 0x282   : > { %2698 = vmatpush.bf16.msrb.mxu2 %v1654_v11  ;;  %3027 = vmatpush.bf16.msrb.mxu3 %v1655_v25  ;;  %v1647_v39 = vpack.c.bf16 %v1479_v51, %v1475_v33  ;;  %v1452_v27 = vmax.f32 %v12058_v34, 0.0  ;;  %v1453_v12 = vmax.f32 %v12062_v2, 0.0  ;;  %v1636_v5 = vpack.c.bf16 %v1460_v57, %v1456_v7  ;;  %v13987_v34 = vld [vmem:[#allocation16_spill] sm:$0xff]  ;;  %v13988_v2 = vld [vmem:[#allocation17_spill] sm:$0xff]  ;;  %v13993_v25 = vld [vmem:[#allocation15_spill] sm:$0xff] }
 0x283   : > { %2042 = vmatpush.bf16.msrb.mxu0 %v1644_v20  ;;  %2371 = vmatpush.bf16.msrb.mxu1 %v1645_v60  ;;  %v1637_v23 = vpack.c.bf16 %v1461_v22, %v1457_v16  ;;  %v1359_v13 = vadd.f32 %v13985_v35, %v11990_v24  ;;  %v1408_v53 = vadd.f32 %v13986_v37, %v11990_v24  ;;  %v1466_v14 = vmax.f32 %v1364_v42, 0.0  ;;  %v13994_v20 = vld [vmem:[#allocation30_spill] sm:$0xff]  ;;  %v14000_v22 = vld [vmem:[#allocation29_spill] sm:$0xff]  ;;  %v14003_v7 = vld [vmem:[#allocation12_spill] sm:$0xff] }
 0x284   : > { %v1467_v49 = vmax.f32 %v1413_v28, 0.0  ;;  %v1448_v1 = vmax.f32 %v12050_v0, 0.0  ;;  %v1449_v52 = vmax.f32 %v12054_v6, 0.0  ;;  %v1356_v32 = vadd.f32 %v13987_v34, %v12004_v46  ;;  %v13992_v6 = vld [vmem:[#allocation14_spill] sm:$0xff]  ;;  %v14001_v28 = vld [vmem:[#allocation21_spill] sm:$0xff] }
 0x285   : > { %v1405_v21 = vadd.f32 %v13988_v2, %v12004_v46  ;;  %v1462_v61 = vmax.f32 %v1361_v18, 0.0  ;;  %v1463_v43 = vmax.f32 %v1410_v56, 0.0  ;;  %v1642_v9 = vpack.c.bf16 %v1470_v54, %v1466_v14  ;;  %v14004_v56 = vld [vmem:[#allocation25_spill] sm:$0xff] }
 0x286   : > { %2699 = vmatpush.bf16.msrb.mxu2 %v1650_v10  ;;  %3028 = vmatpush.bf16.msrb.mxu3 %v1651_v48  ;;  %v1643_v24 = vpack.c.bf16 %v1471_v45, %v1467_v49  ;;  %v1444_v29 = vmax.f32 %v13989_v3, 0.0  ;;  %v1445_v26 = vmax.f32 %v13990_v62, 0.0  ;;  %v1632_v59 = vpack.c.bf16 %v1452_v27, %v1448_v1  ;;  %v13999_v48 = vld [vmem:[#allocation28_spill] sm:$0xff]  ;;  %v14005_v45 = vld [vmem:[#allocation26_spill] sm:$0xff]  ;;  %v14007_v27 = vld [vmem:[#allocation9_spill] sm:$0xff] }
 0x287   : > { %2043 = vmatpush.bf16.msrb.mxu0 %v1640_v40  ;;  %2372 = vmatpush.bf16.msrb.mxu1 %v1641_v15  ;;  %v1633_v0 = vpack.c.bf16 %v1453_v12, %v1449_v52  ;;  %v1354_v11 = vadd.f32 %v13992_v6, %v13991_v47  ;;  %v1403_v8 = vadd.f32 %v13993_v25, %v13991_v47  ;;  %v1458_v63 = vmax.f32 %v1359_v13, 0.0  ;;  %v14009_v1 = vld [vmem:[#allocation23_spill] sm:$0xff]  ;;  %v10580_v6 = vld [vmem:[%s13918_s5 + $0x10] sm:$0xff]  ;;  %v10582_v25 = vld [vmem:[%s13918_s5 + $0x20] sm:$0xff] }
 0x288   : > { %v1459_v46 = vmax.f32 %v1408_v53, 0.0  ;;  %v1440_v60 = vmax.f32 %v13994_v20, 0.0  ;;  %v1441_v36 = vmax.f32 %v13995_v50, 0.0  ;;  %v1351_v30 = vadd.f32 %v13997_v44, %v13996_v31  ;;  %v14010_v52 = vld [vmem:[#allocation7_spill] sm:$0xff]  ;;  %v10586_v20 = vld [vmem:[%s13918_s5 + $0x40] sm:$0xff] }
 0x289   : > { %v1400_v38 = vadd.f32 %v13998_v4, %v13996_v31  ;;  %v1454_v17 = vmax.f32 %v1356_v32, 0.0  ;;  %v1455_v41 = vmax.f32 %v1405_v21, 0.0  ;;  %v1638_v51 = vpack.c.bf16 %v1462_v61, %v1458_v63  ;;  %v14011_v32 = vld [vmem:[#allocation8_spill] sm:$0xff]  ;;  %v10579_v47 = vld [vmem:[%s13918_s5 + $0x8] sm:$0xff] }
 0x28a   : > { %2700 = vmatpush.bf16.msrb.mxu2 %v1646_v58  ;;  %3029 = vmatpush.bf16.msrb.mxu3 %v1647_v39  ;;  %v1639_v10 = vpack.c.bf16 %v1463_v43, %v1459_v46  ;;  %v1436_v57 = vmax.f32 %v13999_v48, 0.0  ;;  %v1437_v40 = vmax.f32 %v14000_v22, 0.0  ;;  %v1628_v15 = vpack.c.bf16 %v1444_v29, %v1440_v60  ;;  %v14006_v39 = vld [vmem:[#allocation24_spill] sm:$0xff]  ;;  %v10578_v43 = vld [vmem:[%s13918_s5] sm:$0xff]  ;;  %v10585_v46 = vld [vmem:[%s13918_s5 + $0x38] sm:$0xff] }
 0x28b   : > { %2044 = vmatpush.bf16.msrb.mxu0 %v1636_v5  ;;  %2373 = vmatpush.bf16.msrb.mxu1 %v1637_v23  ;;  %v1629_v42 = vpack.c.bf16 %v1445_v26, %v1441_v36  ;;  %v1349_v33 = vadd.f32 %v14002_v55, %v14001_v28  ;;  %v1398_v16 = vadd.f32 %v14003_v7, %v14001_v28  ;;  %v1450_v18 = vmax.f32 %v1354_v11, 0.0  ;;  %v14008_v5 = vld [vmem:[#allocation10_spill] sm:$0xff]  ;;  %v10581_v11 = vld [vmem:[%s13918_s5 + $0x18] sm:$0xff]  ;;  %v10584_v63 = vld [vmem:[%s13918_s5 + $0x30] sm:$0xff] }
 0x28c   : > { %v1451_v19 = vmax.f32 %v1403_v8, 0.0  ;;  %v1432_v54 = vmax.f32 %v14004_v56, 0.0  ;;  %v1433_v58 = vmax.f32 %v14005_v45, 0.0  ;;  %v1346_v12 = vadd.f32 %v14007_v27, %v14006_v39  ;;  %v10583_v8 = vld [vmem:[%s13918_s5 + $0x28] sm:$0xff]  ;;  %v3741_v28 = vld [vmem:[#allocation2 + $0x3b0] sm:$0xff]  ;;  %v3742_v45 = vld [vmem:[#allocation2 + $0xd8] sm:$0xff] }
 0x28d   : > { %v1395_v23 = vadd.f32 %v14008_v5, %v14006_v39  ;;  %v1446_v35 = vmax.f32 %v1351_v30, 0.0  ;;  %v1447_v13 = vmax.f32 %v1400_v38, 0.0  ;;  %v1634_v37 = vpack.c.bf16 %v1454_v17, %v1450_v18  ;;  %v3740_v17 = vld [vmem:[#allocation2 + $0x2b0] sm:$0xff] }
 0x28e   : > { %2701 = vmatpush.bf16.msrb.mxu2 %v1642_v9  ;;  %3030 = vmatpush.bf16.msrb.mxu3 %v1643_v24  ;;  %v1635_v53 = vpack.c.bf16 %v1455_v41, %v1451_v19  ;;  %v1624_v14 = vpack.c.bf16 %v1436_v57, %v1432_v54  ;;  %v1625_v49 = vpack.c.bf16 %v1437_v40, %v1433_v58  ;;  %v1442_v21 = vmax.f32 %v1349_v33, 0.0  ;;  %v10588_v39 = vld [vmem:[%s13918_s5 + $0x50] sm:$0xff] }
 0x28f   : > { %2045 = vmatpush.bf16.msrb.mxu0 %v1632_v59  ;;  %2374 = vmatpush.bf16.msrb.mxu1 %v1633_v0  ;;  %v1344_v34 = vadd.f32 %v14010_v52, %v14009_v1  ;;  %v1393_v2 = vadd.f32 %v14011_v32, %v14009_v1  ;;  %v1443_v61 = vmax.f32 %v1398_v16, 0.0  ;;  %v1438_v9 = vmax.f32 %v1346_v12, 0.0 }
 0x290   : > { %v1439_v24 = vmax.f32 %v1395_v23, 0.0  ;;  %v1630_v3 = vpack.c.bf16 %v1446_v35, %v1442_v21 }
 0x291   : > { %v1631_v29 = vpack.c.bf16 %v1447_v13, %v1443_v61  ;;  %v1434_v62 = vmax.f32 %v1344_v34, 0.0  ;;  %v1435_v26 = vmax.f32 %v1393_v2, 0.0  ;;  %v3744_v61 = vld [vmem:[#allocation2 + $0x50] sm:$0xff] }
 0x292   : > { %2702 = vmatpush.bf16.msrb.mxu2 %v1638_v51  ;;  %3031 = vmatpush.bf16.msrb.mxu3 %v1639_v10  ;;  %v10587_v51 = vld [vmem:[%s13918_s5 + $0x48] sm:$0xff] }
 0x293   : > { %2046 = vmatpush.bf16.msrb.mxu0 %v1628_v15  ;;  %2375 = vmatpush.bf16.msrb.mxu1 %v1629_v42  ;;  %v1626_v59 = vpack.c.bf16 %v1438_v9, %v1434_v62  ;;  %v1627_v0 = vpack.c.bf16 %v1439_v24, %v1435_v26  ;;  %v10589_v9 = vld [vmem:[%s13918_s5 + $0x58] sm:$0xff] }
 0x296   : > { %2703 = vmatpush.bf16.msrb.mxu2 %v1634_v37  ;;  %3032 = vmatpush.bf16.msrb.mxu3 %v1635_v53  ;;  %v3743_v53 = vld [vmem:[#allocation2 + $0x18] sm:$0xff] }
 0x297   : > { %2047 = vmatpush.bf16.msrb.mxu0 %v1624_v14  ;;  %2376 = vmatpush.bf16.msrb.mxu1 %v1625_v49 }
 0x29a   : > { %2704 = vmatpush.bf16.msrb.mxu2 %v1630_v3  ;;  %3033 = vmatpush.bf16.msrb.mxu3 %v1631_v29 }
 0x29b   : > { %2048 = vmatmul.bf16.vlgmr.msrb.gmra.mxu0 %v10578_v43  ;;  %2377 = vmatmul.bf16.vlgmr.msrb.gmra.mxu1 %v10578_v43 }
 0x29e   : > { %2705 = vmatpush.bf16.msrb.mxu2 %v1626_v59  ;;  %3034 = vmatpush.bf16.msrb.mxu3 %v1627_v0 }
 0x2a1   : > { %2706 = vmatmul.bf16.vlgmr.msrb.gmra.mxu2 %v10578_v43  ;;  %3035 = vmatmul.bf16.vlgmr.msrb.gmra.mxu3 %v10578_v43 }
 0x2ab   : > { %2053 = vmatmul.bf16.gmra.mxu0 %v10579_v47  ;;  %2382 = vmatmul.bf16.gmra.mxu1 %v10579_v47 }
 0x2b1   : > { %2711 = vmatmul.bf16.gmra.mxu2 %v10579_v47  ;;  %3040 = vmatmul.bf16.gmra.mxu3 %v10579_v47  ;;  %v3745_v47 = vld [vmem:[#allocation2 + $0x368] sm:$0xff] }
 0x2bb   : > { %2058 = vmatmul.bf16.gmra.mxu0 %v10580_v6  ;;  %2387 = vmatmul.bf16.gmra.mxu1 %v10580_v6 }
 0x2c1   : > { %2716 = vmatmul.bf16.gmra.mxu2 %v10580_v6  ;;  %3045 = vmatmul.bf16.gmra.mxu3 %v10580_v6 }
 0x2cb   : > { %2063 = vmatmul.bf16.gmra.mxu0 %v10581_v11  ;;  %2392 = vmatmul.bf16.gmra.mxu1 %v10581_v11 }
 0x2d1   : > { %2721 = vmatmul.bf16.gmra.mxu2 %v10581_v11  ;;  %3050 = vmatmul.bf16.gmra.mxu3 %v10581_v11 }
 0x2db   : > { %2068 = vmatmul.bf16.gmra.mxu0 %v10582_v25  ;;  %2397 = vmatmul.bf16.gmra.mxu1 %v10582_v25 }
 0x2e1   : > { %2726 = vmatmul.bf16.gmra.mxu2 %v10582_v25  ;;  %3055 = vmatmul.bf16.gmra.mxu3 %v10582_v25 }
 0x2eb   : > { %2073 = vmatmul.bf16.gmra.mxu0 %v10583_v8  ;;  %2402 = vmatmul.bf16.gmra.mxu1 %v10583_v8 }
 0x2f1   : > { %2731 = vmatmul.bf16.gmra.mxu2 %v10583_v8  ;;  %3060 = vmatmul.bf16.gmra.mxu3 %v10583_v8 }
 0x2fb   : > { %2078 = vmatmul.bf16.gmra.mxu0 %v10584_v63  ;;  %2407 = vmatmul.bf16.gmra.mxu1 %v10584_v63 }
 0x301   : > { %2736 = vmatmul.bf16.gmra.mxu2 %v10584_v63  ;;  %3065 = vmatmul.bf16.gmra.mxu3 %v10584_v63 }
 0x30b   : > { %2083 = vmatmul.bf16.gmra.mxu0 %v10585_v46  ;;  %2412 = vmatmul.bf16.gmra.mxu1 %v10585_v46 }
 0x311   : > { %2741 = vmatmul.bf16.gmra.mxu2 %v10585_v46  ;;  %3070 = vmatmul.bf16.gmra.mxu3 %v10585_v46 }
 0x318   : > { %v2049_v60 = vpop.f32.mrf.mxu0  ;;  %v2378_v50 = vpop.f32.mrf.mxu1 }
 0x319   : > { %v3356_v44 = vmax.f32 %v2049_v60, %v2378_v50  ;;  %v3746_v50 = vld [vmem:[#allocation2 + $0x330] sm:$0xff] }
 0x31b   : > { %2088 = vmatmul.bf16.gmra.mxu0 %v10586_v20  ;;  %2417 = vmatmul.bf16.gmra.mxu1 %v10586_v20 }
 0x320   : > { %v2051_v36 = vpop.f32.mrf.mxu0  ;;  %v2380_v31 = vpop.f32.mrf.mxu1 }
 0x321   : > { %2746 = vmatmul.bf16.gmra.mxu2 %v10586_v20  ;;  %3075 = vmatmul.bf16.gmra.mxu3 %v10586_v20  ;;  %v3357_v22 = vmax.f32 %v2051_v36, %v2380_v31  ;;  %v10590_v31 = vld [vmem:[%s13918_s5 + $0x60] sm:$0xff] }
 0x324   : > { %v2707_v30 = vpop.f32.mrf.mxu2  ;;  %v3036_v4 = vpop.f32.mrf.mxu3 }
 0x325   : > { %v3484_v38 = vmax.f32 %v3356_v44, %v2707_v30 }
 0x327   : > { %v3612_v41 = vmax.f32 %v3484_v38, %v3036_v4 }
 0x328   : > { %v2054_v10 = vpop.f32.mrf.mxu0  ;;  %v2383_v48 = vpop.f32.mrf.mxu1 }
 0x329   : > { %v3868_v57 = vmax.f32 %v3740_v17, %v3612_v41  ;;  %v3358_v18 = vmax.f32 %v2054_v10, %v2383_v48  ;;  %v3747_v10 = vld [vmem:[#allocation2 + $0x48] sm:$0xff] }
 0x32b   : > { %3996 = vst [vmem:[#allocation2 + $0x2b0] sm:$0xff] %v3868_v57  ;;  %2093 = vmatmul.bf16.gmra.mxu0 %v10587_v51  ;;  %2422 = vmatmul.bf16.gmra.mxu1 %v10587_v51 }
 0x32c   : > { %v2709_v40 = vpop.f32.mrf.mxu2  ;;  %v3038_v15 = vpop.f32.mrf.mxu3 }
 0x32d   : > { %v3485_v42 = vmax.f32 %v3357_v22, %v2709_v40 }
 0x32f   : > { %v3613_v55 = vmax.f32 %v3485_v42, %v3038_v15 }
 0x330   : > { %v2056_v33 = vpop.f32.mrf.mxu0  ;;  %v2385_v7 = vpop.f32.mrf.mxu1 }
 0x331   : > { %v3869_v16 = vmax.f32 %v3741_v28, %v3613_v55  ;;  %2751 = vmatmul.bf16.gmra.mxu2 %v10587_v51  ;;  %3080 = vmatmul.bf16.gmra.mxu3 %v10587_v51  ;;  %v3359_v23 = vmax.f32 %v2056_v33, %v2385_v7  ;;  %v3748_v33 = vld [vmem:[#allocation2 + $0x380] sm:$0xff] }
 0x333   : > { %3997 = vst [vmem:[#allocation2 + $0x3b0] sm:$0xff] %v3869_v16  ;;  %v10591_v16 = vld [vmem:[%s13918_s5 + $0x68] sm:$0xff] }
 0x334   : > { %v2712_v19 = vpop.f32.mrf.mxu2  ;;  %v3041_v56 = vpop.f32.mrf.mxu3 }
 0x335   : > { %v3486_v54 = vmax.f32 %v3358_v18, %v2712_v19 }
 0x337   : > { %v3614_v58 = vmax.f32 %v3486_v54, %v3041_v56 }
 0x338   : > { %v2059_v27 = vpop.f32.mrf.mxu0  ;;  %v2388_v12 = vpop.f32.mrf.mxu1 }
 0x339   : > { %v3870_v5 = vmax.f32 %v3742_v45, %v3614_v58  ;;  %v3360_v34 = vmax.f32 %v2059_v27, %v2388_v12  ;;  %v3749_v27 = vld [vmem:[#allocation2 + $0x110] sm:$0xff] }
 0x33b   : > { %3998 = vst [vmem:[#allocation2 + $0xd8] sm:$0xff] %v3870_v5  ;;  %2098 = vmatmul.bf16.gmra.mxu0 %v10588_v39  ;;  %2427 = vmatmul.bf16.gmra.mxu1 %v10588_v39 }
 0x33c   : > { %v2714_v35 = vpop.f32.mrf.mxu2  ;;  %v3043_v13 = vpop.f32.mrf.mxu3 }
 0x33d   : > { %v3487_v37 = vmax.f32 %v3359_v23, %v2714_v35 }
 0x33f   : > { %v3615_v14 = vmax.f32 %v3487_v37, %v3043_v13 }
 0x340   : > { %v2061_v49 = vpop.f32.mrf.mxu0  ;;  %v2390_v1 = vpop.f32.mrf.mxu1 }
 0x341   : > { %v3871_v52 = vmax.f32 %v3743_v53, %v3615_v14  ;;  %2756 = vmatmul.bf16.gmra.mxu2 %v10588_v39  ;;  %3085 = vmatmul.bf16.gmra.mxu3 %v10588_v39  ;;  %v3361_v62 = vmax.f32 %v2061_v49, %v2390_v1  ;;  %v3750_v49 = vld [vmem:[#allocation2 + $0x118] sm:$0xff] }
 0x343   : > { %3999 = vst [vmem:[#allocation2 + $0x18] sm:$0xff] %v3871_v52  ;;  %v10592_v52 = vld [vmem:[%s13918_s5 + $0x70] sm:$0xff] }
 0x344   : > { %v2717_v32 = vpop.f32.mrf.mxu2  ;;  %v3046_v2 = vpop.f32.mrf.mxu3 }
 0x345   : > { %v3488_v21 = vmax.f32 %v3360_v34, %v2717_v32 }
 0x347   : > { %v3616_v43 = vmax.f32 %v3488_v21, %v3046_v2 }
 0x348   : > { %v2064_v24 = vpop.f32.mrf.mxu0  ;;  %v2393_v3 = vpop.f32.mrf.mxu1 }
 0x349   : > { %v3872_v29 = vmax.f32 %v3744_v61, %v3616_v43  ;;  %v3362_v63 = vmax.f32 %v2064_v24, %v2393_v3  ;;  %v3751_v24 = vld [vmem:[#allocation2 + $0x98] sm:$0xff] }
 0x34b   : > { %4000 = vst [vmem:[#allocation2 + $0x50] sm:$0xff] %v3872_v29  ;;  %2103 = vmatmul.bf16.gmra.mxu0 %v10589_v9  ;;  %2432 = vmatmul.bf16.gmra.mxu1 %v10589_v9 }
 0x34c   : > { %v2719_v26 = vpop.f32.mrf.mxu2  ;;  %v3048_v59 = vpop.f32.mrf.mxu3 }
 0x34d   : > { %v3489_v0 = vmax.f32 %v3361_v62, %v2719_v26 }
 0x34f   : > { %v3617_v6 = vmax.f32 %v3489_v0, %v3048_v59 }
 0x350   : > { %v2066_v11 = vpop.f32.mrf.mxu0  ;;  %v2395_v25 = vpop.f32.mrf.mxu1 }
 0x351   : > { %v3873_v8 = vmax.f32 %v3745_v47, %v3617_v6  ;;  %2761 = vmatmul.bf16.gmra.mxu2 %v10589_v9  ;;  %3090 = vmatmul.bf16.gmra.mxu3 %v10589_v9  ;;  %v3363_v38 = vmax.f32 %v2066_v11, %v2395_v25  ;;  %v3752_v11 = vld [vmem:[#allocation2 + $0x320] sm:$0xff] }
 0x353   : > { %4001 = vst [vmem:[#allocation2 + $0x368] sm:$0xff] %v3873_v8  ;;  %v10593_v8 = vld [vmem:[%s13918_s5 + $0x78] sm:$0xff] }
 0x354   : > { %v2722_v46 = vpop.f32.mrf.mxu2  ;;  %v3051_v20 = vpop.f32.mrf.mxu3 }
 0x355   : > { %v3490_v60 = vmax.f32 %v3362_v63, %v2722_v46 }
 0x357   : > { %v3618_v36 = vmax.f32 %v3490_v60, %v3051_v20 }
 0x358   : > { %v2069_v44 = vpop.f32.mrf.mxu0  ;;  %v2398_v30 = vpop.f32.mrf.mxu1 }
 0x359   : > { %v3874_v4 = vmax.f32 %v3746_v50, %v3618_v36  ;;  %v3364_v15 = vmax.f32 %v2069_v44, %v2398_v30  ;;  %v3753_v44 = vld [vmem:[#allocation2 + $0x150] sm:$0xff] }
 0x35b   : > { %4002 = vst [vmem:[#allocation2 + $0x330] sm:$0xff] %v3874_v4  ;;  %2108 = vmatmul.bf16.gmra.mxu0 %v10590_v31  ;;  %2437 = vmatmul.bf16.gmra.mxu1 %v10590_v31 }
 0x35c   : > { %v2724_v17 = vpop.f32.mrf.mxu2  ;;  %v3053_v41 = vpop.f32.mrf.mxu3 }
 0x35d   : > { %v3491_v51 = vmax.f32 %v3363_v38, %v2724_v17 }
 0x35f   : > { %v3619_v48 = vmax.f32 %v3491_v51, %v3053_v41 }
 0x360   : > { %v2071_v57 = vpop.f32.mrf.mxu0  ;;  %v2400_v22 = vpop.f32.mrf.mxu1 }
 0x361   : > { %v3875_v40 = vmax.f32 %v3747_v10, %v3619_v48  ;;  %2766 = vmatmul.bf16.gmra.mxu2 %v10590_v31  ;;  %3095 = vmatmul.bf16.gmra.mxu3 %v10590_v31  ;;  %v3365_v54 = vmax.f32 %v2071_v57, %v2400_v22  ;;  %v3754_v57 = vld [vmem:[#allocation2 + $0x108] sm:$0xff] }
 0x363   : > { %4003 = vst [vmem:[#allocation2 + $0x48] sm:$0xff] %v3875_v40  ;;  %v10594_v40 = vld [vmem:[%s13918_s5 + $0x80] sm:$0xff] }
 0x364   : > { %v2727_v42 = vpop.f32.mrf.mxu2  ;;  %v3056_v28 = vpop.f32.mrf.mxu3 }
 0x365   : > { %v3492_v55 = vmax.f32 %v3364_v15, %v2727_v42 }
 0x367   : > { %v3620_v7 = vmax.f32 %v3492_v55, %v3056_v28 }
 0x368   : > { %v2074_v18 = vpop.f32.mrf.mxu0  ;;  %v2403_v19 = vpop.f32.mrf.mxu1 }
 0x369   : > { %v3876_v56 = vmax.f32 %v3748_v33, %v3620_v7  ;;  %v3366_v13 = vmax.f32 %v2074_v18, %v2403_v19  ;;  %v3755_v18 = vld [vmem:[#allocation2 + $0x60] sm:$0xff] }
 0x36b   : > { %4004 = vst [vmem:[#allocation2 + $0x380] sm:$0xff] %v3876_v56  ;;  %2113 = vmatmul.bf16.gmra.mxu0 %v10591_v16  ;;  %2442 = vmatmul.bf16.gmra.mxu1 %v10591_v16 }
 0x36c   : > { %v2729_v45 = vpop.f32.mrf.mxu2  ;;  %v3058_v58 = vpop.f32.mrf.mxu3 }
 0x36d   : > { %v3493_v39 = vmax.f32 %v3365_v54, %v2729_v45 }
 0x36f   : > { %v3621_v12 = vmax.f32 %v3493_v39, %v3058_v58 }
 0x370   : > { %v2076_v5 = vpop.f32.mrf.mxu0  ;;  %v2405_v23 = vpop.f32.mrf.mxu1 }
 0x371   : > { %v3877_v35 = vmax.f32 %v3749_v27, %v3621_v12  ;;  %2771 = vmatmul.bf16.gmra.mxu2 %v10591_v16  ;;  %3100 = vmatmul.bf16.gmra.mxu3 %v10591_v16  ;;  %v3367_v21 = vmax.f32 %v2076_v5, %v2405_v23  ;;  %v3756_v5 = vld [vmem:[#allocation2 + $0x2e0] sm:$0xff] }
 0x373   : > { %4005 = vst [vmem:[#allocation2 + $0x110] sm:$0xff] %v3877_v35  ;;  %v10595_v35 = vld [vmem:[%s13918_s5 + $0x88] sm:$0xff] }
 0x374   : > { %v2732_v37 = vpop.f32.mrf.mxu2  ;;  %v3061_v53 = vpop.f32.mrf.mxu3 }
 0x375   : > { %v3494_v14 = vmax.f32 %v3366_v13, %v2732_v37 }
 0x377   : > { %v3622_v1 = vmax.f32 %v3494_v14, %v3061_v53 }
 0x378   : > { %v2079_v34 = vpop.f32.mrf.mxu0  ;;  %v2408_v32 = vpop.f32.mrf.mxu1 }
 0x379   : > { %v3878_v2 = vmax.f32 %v3750_v49, %v3622_v1  ;;  %v3368_v59 = vmax.f32 %v2079_v34, %v2408_v32  ;;  %v3757_v34 = vld [vmem:[#allocation2 + $0x388] sm:$0xff] }
 0x37b   : > { %4006 = vst [vmem:[#allocation2 + $0x118] sm:$0xff] %v3878_v2  ;;  %2118 = vmatmul.bf16.gmra.mxu0 %v10592_v52  ;;  %2447 = vmatmul.bf16.gmra.mxu1 %v10592_v52 }
 0x37c   : > { %v2734_v61 = vpop.f32.mrf.mxu2  ;;  %v3063_v43 = vpop.f32.mrf.mxu3 }
 0x37d   : > { %v3495_v9 = vmax.f32 %v3367_v21, %v2734_v61 }
 0x37f   : > { %v3623_v3 = vmax.f32 %v3495_v9, %v3063_v43 }
 0x380   : > { %v2081_v29 = vpop.f32.mrf.mxu0  ;;  %v2410_v62 = vpop.f32.mrf.mxu1 }
 0x381   : > { %v3879_v26 = vmax.f32 %v3751_v24, %v3623_v3  ;;  %2776 = vmatmul.bf16.gmra.mxu2 %v10592_v52  ;;  %3105 = vmatmul.bf16.gmra.mxu3 %v10592_v52  ;;  %v3369_v60 = vmax.f32 %v2081_v29, %v2410_v62  ;;  %v3758_v29 = vld [vmem:[#allocation2 + $0x338] sm:$0xff] }
 0x383   : > { %4007 = vst [vmem:[#allocation2 + $0x98] sm:$0xff] %v3879_v26  ;;  %v10596_v26 = vld [vmem:[%s13918_s5 + $0x90] sm:$0xff] }
 0x384   : > { %v2737_v0 = vpop.f32.mrf.mxu2  ;;  %v3066_v47 = vpop.f32.mrf.mxu3 }
 0x385   : > { %v3496_v6 = vmax.f32 %v3368_v59, %v2737_v0 }
 0x387   : > { %v3624_v25 = vmax.f32 %v3496_v6, %v3066_v47 }
 0x388   : > { %v2084_v63 = vpop.f32.mrf.mxu0  ;;  %v2413_v46 = vpop.f32.mrf.mxu1 }
 0x389   : > { %v3880_v20 = vmax.f32 %v3752_v11, %v3624_v25  ;;  %v3370_v41 = vmax.f32 %v2084_v63, %v2413_v46  ;;  %v3759_v63 = vld [vmem:[#allocation2 + $0x340] sm:$0xff] }
 0x38b   : > { %4008 = vst [vmem:[#allocation2 + $0x320] sm:$0xff] %v3880_v20  ;;  %2123 = vmatmul.bf16.gmra.mxu0 %v10593_v8  ;;  %2452 = vmatmul.bf16.gmra.mxu1 %v10593_v8 }
 0x38c   : > { %v2739_v50 = vpop.f32.mrf.mxu2  ;;  %v3068_v36 = vpop.f32.mrf.mxu3 }
 0x38d   : > { %v3497_v31 = vmax.f32 %v3369_v60, %v2739_v50 }
 0x38f   : > { %v3625_v30 = vmax.f32 %v3497_v31, %v3068_v36 }
 0x390   : > { %v2086_v4 = vpop.f32.mrf.mxu0  ;;  %v2415_v38 = vpop.f32.mrf.mxu1 }
 0x391   : > { %v3881_v17 = vmax.f32 %v3753_v44, %v3625_v30  ;;  %2781 = vmatmul.bf16.gmra.mxu2 %v10593_v8  ;;  %3110 = vmatmul.bf16.gmra.mxu3 %v10593_v8  ;;  %v3371_v55 = vmax.f32 %v2086_v4, %v2415_v38  ;;  %v3760_v4 = vld [vmem:[#allocation2 + $0x80] sm:$0xff] }
 0x393   : > { %4009 = vst [vmem:[#allocation2 + $0x150] sm:$0xff] %v3881_v17  ;;  %v10597_v17 = vld [vmem:[%s13918_s5 + $0x98] sm:$0xff] }
 0x394   : > { %v2742_v51 = vpop.f32.mrf.mxu2  ;;  %v3071_v10 = vpop.f32.mrf.mxu3 }
 0x395   : > { %v3498_v48 = vmax.f32 %v3370_v41, %v2742_v51 }
 0x397   : > { %v3626_v22 = vmax.f32 %v3498_v48, %v3071_v10 }
 0x398   : > { %v2089_v15 = vpop.f32.mrf.mxu0  ;;  %v2418_v42 = vpop.f32.mrf.mxu1 }
 0x399   : > { %v3882_v28 = vmax.f32 %v3754_v57, %v3626_v22  ;;  %v3372_v58 = vmax.f32 %v2089_v15, %v2418_v42  ;;  %v3761_v15 = vld [vmem:[#allocation2 + $0x1a8] sm:$0xff] }
 0x39b   : > { %4010 = vst [vmem:[#allocation2 + $0x108] sm:$0xff] %v3882_v28  ;;  %2128 = vmatmul.bf16.gmra.mxu0 %v10594_v40  ;;  %2457 = vmatmul.bf16.gmra.mxu1 %v10594_v40 }
 0x39c   : > { %v2744_v33 = vpop.f32.mrf.mxu2  ;;  %v3073_v7 = vpop.f32.mrf.mxu3 }
 0x39d   : > { %v3499_v16 = vmax.f32 %v3371_v55, %v2744_v33 }
 0x39f   : > { %v3627_v19 = vmax.f32 %v3499_v16, %v3073_v7 }
 0x3a0   : > { %v2091_v56 = vpop.f32.mrf.mxu0  ;;  %v2420_v54 = vpop.f32.mrf.mxu1 }
 0x3a1   : > { %v3883_v45 = vmax.f32 %v3755_v18, %v3627_v19  ;;  %2786 = vmatmul.bf16.gmra.mxu2 %v10594_v40  ;;  %3115 = vmatmul.bf16.gmra.mxu3 %v10594_v40  ;;  %v3373_v14 = vmax.f32 %v2091_v56, %v2420_v54  ;;  %v3762_v56 = vld [vmem:[#allocation2 + $0x1b8] sm:$0xff] }
 0x3a3   : > { %4011 = vst [vmem:[#allocation2 + $0x60] sm:$0xff] %v3883_v45  ;;  %v10598_v45 = vld [vmem:[%s13918_s5 + $0xa0] sm:$0xff] }
 0x3a4   : > { %v2747_v39 = vpop.f32.mrf.mxu2  ;;  %v3076_v27 = vpop.f32.mrf.mxu3 }
 0x3a5   : > { %v3500_v12 = vmax.f32 %v3372_v58, %v2747_v39 }
 0x3a7   : > { %v3628_v23 = vmax.f32 %v3500_v12, %v3076_v27 }
 0x3a8   : > { %v2094_v13 = vpop.f32.mrf.mxu0  ;;  %v2423_v37 = vpop.f32.mrf.mxu1 }
 0x3a9   : > { %v3884_v53 = vmax.f32 %v3756_v5, %v3628_v23  ;;  %v3374_v43 = vmax.f32 %v2094_v13, %v2423_v37  ;;  %v3763_v13 = vld [vmem:[#allocation2 + $0x168] sm:$0xff] }
 0x3ab   : > { %4012 = vst [vmem:[#allocation2 + $0x2e0] sm:$0xff] %v3884_v53  ;;  %2133 = vmatmul.bf16.gmra.mxu0 %v10595_v35  ;;  %2462 = vmatmul.bf16.gmra.mxu1 %v10595_v35 }
 0x3ac   : > { %v2749_v49 = vpop.f32.mrf.mxu2  ;;  %v3078_v1 = vpop.f32.mrf.mxu3 }
 0x3ad   : > { %v3501_v52 = vmax.f32 %v3373_v14, %v2749_v49 }
 0x3af   : > { %v3629_v32 = vmax.f32 %v3501_v52, %v3078_v1 }
 0x3b0   : > { %v2096_v2 = vpop.f32.mrf.mxu0  ;;  %v2425_v21 = vpop.f32.mrf.mxu1 }
 0x3b1   : > { %v3885_v61 = vmax.f32 %v3757_v34, %v3629_v32  ;;  %2791 = vmatmul.bf16.gmra.mxu2 %v10595_v35  ;;  %3120 = vmatmul.bf16.gmra.mxu3 %v10595_v35  ;;  %v3375_v6 = vmax.f32 %v2096_v2, %v2425_v21  ;;  %v3764_v2 = vld [vmem:[#allocation2 + $0x3e8] sm:$0xff] }
 0x3b3   : > { %4013 = vst [vmem:[#allocation2 + $0x388] sm:$0xff] %v3885_v61  ;;  %v10599_v61 = vld [vmem:[%s13918_s5 + $0xa8] sm:$0xff] }
 0x3b4   : > { %v2752_v9 = vpop.f32.mrf.mxu2  ;;  %v3081_v24 = vpop.f32.mrf.mxu3 }
 0x3b5   : > { %v3502_v3 = vmax.f32 %v3374_v43, %v2752_v9 }
 0x3b7   : > { %v3630_v62 = vmax.f32 %v3502_v3, %v3081_v24 }
 0x3b8   : > { %v2099_v59 = vpop.f32.mrf.mxu0  ;;  %v2428_v0 = vpop.f32.mrf.mxu1 }
 0x3b9   : > { %v3886_v47 = vmax.f32 %v3758_v29, %v3630_v62  ;;  %v3376_v36 = vmax.f32 %v2099_v59, %v2428_v0  ;;  %v3765_v59 = vld [vmem:[#allocation2 + $0x2f8] sm:$0xff] }
 0x3bb   : > { %4014 = vst [vmem:[#allocation2 + $0x338] sm:$0xff] %v3886_v47  ;;  %2138 = vmatmul.bf16.gmra.mxu0 %v10596_v26  ;;  %2467 = vmatmul.bf16.gmra.mxu1 %v10596_v26 }
 0x3bc   : > { %v2754_v11 = vpop.f32.mrf.mxu2  ;;  %v3083_v25 = vpop.f32.mrf.mxu3 }
 0x3bd   : > { %v3503_v8 = vmax.f32 %v3375_v6, %v2754_v11 }
 0x3bf   : > { %v3631_v46 = vmax.f32 %v3503_v8, %v3083_v25 }
 0x3c0   : > { %v2101_v20 = vpop.f32.mrf.mxu0  ;;  %v2430_v60 = vpop.f32.mrf.mxu1 }
 0x3c1   : > { %v3887_v50 = vmax.f32 %v3759_v63, %v3631_v46  ;;  %2796 = vmatmul.bf16.gmra.mxu2 %v10596_v26  ;;  %3125 = vmatmul.bf16.gmra.mxu3 %v10596_v26  ;;  %v3377_v48 = vmax.f32 %v2101_v20, %v2430_v60  ;;  %v3766_v20 = vld [vmem:[#allocation2 + $0x290] sm:$0xff] }
 0x3c3   : > { %4015 = vst [vmem:[#allocation2 + $0x340] sm:$0xff] %v3887_v50  ;;  %v10600_v50 = vld [vmem:[%s13918_s5 + $0xb0] sm:$0xff] }
 0x3c4   : > { %v2757_v31 = vpop.f32.mrf.mxu2  ;;  %v3086_v44 = vpop.f32.mrf.mxu3 }
 0x3c5   : > { %v3504_v30 = vmax.f32 %v3376_v36, %v2757_v31 }
 0x3c7   : > { %v3632_v38 = vmax.f32 %v3504_v30, %v3086_v44 }
 0x3c8   : > { %v2104_v41 = vpop.f32.mrf.mxu0  ;;  %v2433_v51 = vpop.f32.mrf.mxu1 }
 0x3c9   : > { %v3888_v10 = vmax.f32 %v3760_v4, %v3632_v38  ;;  %v3378_v7 = vmax.f32 %v2104_v41, %v2433_v51  ;;  %v3767_v41 = vld [vmem:[#allocation2 + $0x28] sm:$0xff] }
 0x3cb   : > { %4016 = vst [vmem:[#allocation2 + $0x80] sm:$0xff] %v3888_v10  ;;  %2143 = vmatmul.bf16.gmra.mxu0 %v10597_v17  ;;  %2472 = vmatmul.bf16.gmra.mxu1 %v10597_v17 }
 0x3cc   : > { %v2759_v57 = vpop.f32.mrf.mxu2  ;;  %v3088_v22 = vpop.f32.mrf.mxu3 }
 0x3cd   : > { %v3505_v40 = vmax.f32 %v3377_v48, %v2759_v57 }
 0x3cf   : > { %v3633_v42 = vmax.f32 %v3505_v40, %v3088_v22 }
 0x3d0   : > { %v2106_v28 = vpop.f32.mrf.mxu0  ;;  %v2435_v55 = vpop.f32.mrf.mxu1 }
 0x3d1   : > { %v3889_v33 = vmax.f32 %v3761_v15, %v3633_v42  ;;  %2801 = vmatmul.bf16.gmra.mxu2 %v10597_v17  ;;  %3130 = vmatmul.bf16.gmra.mxu3 %v10597_v17  ;;  %v3379_v12 = vmax.f32 %v2106_v28, %v2435_v55  ;;  %v3768_v28 = vld [vmem:[#allocation2 + $0x138] sm:$0xff] }
 0x3d3   : > { %4017 = vst [vmem:[#allocation2 + $0x1a8] sm:$0xff] %v3889_v33  ;;  %v10601_v33 = vld [vmem:[%s13918_s5 + $0xb8] sm:$0xff] }
 0x3d4   : > { %v2762_v16 = vpop.f32.mrf.mxu2  ;;  %v3091_v18 = vpop.f32.mrf.mxu3 }
 0x3d5   : > { %v3506_v19 = vmax.f32 %v3378_v7, %v2762_v16 }
 0x3d7   : > { %v3634_v54 = vmax.f32 %v3506_v19, %v3091_v18 }
 0x3d8   : > { %v2109_v58 = vpop.f32.mrf.mxu0  ;;  %v2438_v39 = vpop.f32.mrf.mxu1 }
 0x3d9   : > { %v3890_v27 = vmax.f32 %v3762_v56, %v3634_v54  ;;  %v3380_v1 = vmax.f32 %v2109_v58, %v2438_v39  ;;  %v3769_v58 = vld [vmem:[#allocation2 + $0xc0] sm:$0xff] }
 0x3db   : > { %4018 = vst [vmem:[#allocation2 + $0x1b8] sm:$0xff] %v3890_v27  ;;  %2148 = vmatmul.bf16.gmra.mxu0 %v10598_v45  ;;  %2477 = vmatmul.bf16.gmra.mxu1 %v10598_v45 }
 0x3dc   : > { %v2764_v5 = vpop.f32.mrf.mxu2  ;;  %v3093_v23 = vpop.f32.mrf.mxu3 }
 0x3dd   : > { %v3507_v35 = vmax.f32 %v3379_v12, %v2764_v5 }
 0x3df   : > { %v3635_v37 = vmax.f32 %v3507_v35, %v3093_v23 }
 0x3e0   : > { %v2111_v53 = vpop.f32.mrf.mxu0  ;;  %v2440_v14 = vpop.f32.mrf.mxu1 }
 0x3e1   : > { %v3891_v49 = vmax.f32 %v3763_v13, %v3635_v37  ;;  %2806 = vmatmul.bf16.gmra.mxu2 %v10598_v45  ;;  %3135 = vmatmul.bf16.gmra.mxu3 %v10598_v45  ;;  %v3381_v3 = vmax.f32 %v2111_v53, %v2440_v14  ;;  %v3770_v53 = vld [vmem:[#allocation2 + $0x1c0] sm:$0xff] }
 0x3e3   : > { %4019 = vst [vmem:[#allocation2 + $0x168] sm:$0xff] %v3891_v49  ;;  %v10602_v49 = vld [vmem:[%s13918_s5 + $0xc0] sm:$0xff] }
 0x3e4   : > { %v2767_v52 = vpop.f32.mrf.mxu2  ;;  %v3096_v34 = vpop.f32.mrf.mxu3 }
 0x3e5   : > { %v3508_v32 = vmax.f32 %v3380_v1, %v2767_v52 }
 0x3e7   : > { %v3636_v21 = vmax.f32 %v3508_v32, %v3096_v34 }
 0x3e8   : > { %v2114_v43 = vpop.f32.mrf.mxu0  ;;  %v2443_v9 = vpop.f32.mrf.mxu1 }
 0x3e9   : > { %v3892_v24 = vmax.f32 %v3764_v2, %v3636_v21  ;;  %v3382_v25 = vmax.f32 %v2114_v43, %v2443_v9  ;;  %v3771_v43 = vld [vmem:[#allocation2 + $0x280] sm:$0xff] }
 0x3eb   : > { %4020 = vst [vmem:[#allocation2 + $0x3e8] sm:$0xff] %v3892_v24  ;;  %2153 = vmatmul.bf16.gmra.mxu0 %v10599_v61  ;;  %2482 = vmatmul.bf16.gmra.mxu1 %v10599_v61 }
 0x3ec   : > { %v2769_v29 = vpop.f32.mrf.mxu2  ;;  %v3098_v62 = vpop.f32.mrf.mxu3 }
 0x3ed   : > { %v3509_v26 = vmax.f32 %v3381_v3, %v2769_v29 }
 0x3ef   : > { %v3637_v0 = vmax.f32 %v3509_v26, %v3098_v62 }
 0x3f0   : > { %v2116_v47 = vpop.f32.mrf.mxu0  ;;  %v2445_v6 = vpop.f32.mrf.mxu1 }
 0x3f1   : > { %v3893_v11 = vmax.f32 %v3765_v59, %v3637_v0  ;;  %2811 = vmatmul.bf16.gmra.mxu2 %v10599_v61  ;;  %3140 = vmatmul.bf16.gmra.mxu3 %v10599_v61  ;;  %v3383_v30 = vmax.f32 %v2116_v47, %v2445_v6  ;;  %v3772_v47 = vld [vmem:[#allocation2 + $0x100] sm:$0xff] }
 0x3f3   : > { %4021 = vst [vmem:[#allocation2 + $0x2f8] sm:$0xff] %v3893_v11  ;;  %v10603_v11 = vld [vmem:[%s13918_s5 + $0xc8] sm:$0xff] }
 0x3f4   : > { %v2772_v8 = vpop.f32.mrf.mxu2  ;;  %v3101_v63 = vpop.f32.mrf.mxu3 }
 0x3f5   : > { %v3510_v46 = vmax.f32 %v3382_v25, %v2772_v8 }
 0x3f7   : > { %v3638_v60 = vmax.f32 %v3510_v46, %v3101_v63 }
 0x3f8   : > { %v2119_v36 = vpop.f32.mrf.mxu0  ;;  %v2448_v31 = vpop.f32.mrf.mxu1 }
 0x3f9   : > { %v3894_v44 = vmax.f32 %v3766_v20, %v3638_v60  ;;  %v3384_v22 = vmax.f32 %v2119_v36, %v2448_v31  ;;  %v3773_v36 = vld [vmem:[#allocation2 + $0x3c0] sm:$0xff] }
 0x3fb   : > { %4022 = vst [vmem:[#allocation2 + $0x290] sm:$0xff] %v3894_v44  ;;  %2158 = vmatmul.bf16.gmra.mxu0 %v10600_v50  ;;  %2487 = vmatmul.bf16.gmra.mxu1 %v10600_v50 }
 0x3fc   : > { %v2774_v4 = vpop.f32.mrf.mxu2  ;;  %v3103_v38 = vpop.f32.mrf.mxu3 }
 0x3fd   : > { %v3511_v17 = vmax.f32 %v3383_v30, %v2774_v4 }
 0x3ff   : > { %v3639_v51 = vmax.f32 %v3511_v17, %v3103_v38 }
 0x400   : > { %v2121_v10 = vpop.f32.mrf.mxu0  ;;  %v2450_v48 = vpop.f32.mrf.mxu1 }
 0x401   : > { %v3895_v57 = vmax.f32 %v3767_v41, %v3639_v51  ;;  %2816 = vmatmul.bf16.gmra.mxu2 %v10600_v50  ;;  %3145 = vmatmul.bf16.gmra.mxu3 %v10600_v50  ;;  %v3385_v19 = vmax.f32 %v2121_v10, %v2450_v48  ;;  %v3774_v10 = vld [vmem:[#allocation2 + $0x158] sm:$0xff] }
 0x403   : > { %4023 = vst [vmem:[#allocation2 + $0x28] sm:$0xff] %v3895_v57  ;;  %v10604_v57 = vld [vmem:[%s13918_s5 + $0xd0] sm:$0xff] }
 0x404   : > { %v2777_v40 = vpop.f32.mrf.mxu2  ;;  %v3106_v15 = vpop.f32.mrf.mxu3 }
 0x405   : > { %v3512_v42 = vmax.f32 %v3384_v22, %v2777_v40 }
 0x407   : > { %v3640_v55 = vmax.f32 %v3512_v42, %v3106_v15 }
 0x408   : > { %v2124_v7 = vpop.f32.mrf.mxu0  ;;  %v2453_v16 = vpop.f32.mrf.mxu1 }
 0x409   : > { %v3896_v18 = vmax.f32 %v3768_v28, %v3640_v55  ;;  %v3386_v23 = vmax.f32 %v2124_v7, %v2453_v16  ;;  %v3775_v7 = vld [vmem:[#allocation2 + $0x3e0] sm:$0xff] }
 0x40b   : > { %4024 = vst [vmem:[#allocation2 + $0x138] sm:$0xff] %v3896_v18  ;;  %2163 = vmatmul.bf16.gmra.mxu0 %v10601_v33  ;;  %2492 = vmatmul.bf16.gmra.mxu1 %v10601_v33 }
 0x40c   : > { %v2779_v56 = vpop.f32.mrf.mxu2  ;;  %v3108_v54 = vpop.f32.mrf.mxu3 }
 0x40d   : > { %v3513_v45 = vmax.f32 %v3385_v19, %v2779_v56 }
 0x40f   : > { %v3641_v39 = vmax.f32 %v3513_v45, %v3108_v54 }
 0x410   : > { %v2126_v27 = vpop.f32.mrf.mxu0  ;;  %v2455_v12 = vpop.f32.mrf.mxu1 }
 0x411   : > { %v3897_v5 = vmax.f32 %v3769_v58, %v3641_v39  ;;  %2821 = vmatmul.bf16.gmra.mxu2 %v10601_v33  ;;  %3150 = vmatmul.bf16.gmra.mxu3 %v10601_v33  ;;  %v3387_v32 = vmax.f32 %v2126_v27, %v2455_v12  ;;  %v3776_v27 = vld [vmem:[#allocation2 + $0x218] sm:$0xff] }
 0x413   : > { %4025 = vst [vmem:[#allocation2 + $0xc0] sm:$0xff] %v3897_v5  ;;  %v10605_v5 = vld [vmem:[%s13918_s5 + $0xd8] sm:$0xff] }
 0x414   : > { %v2782_v35 = vpop.f32.mrf.mxu2  ;;  %v3111_v13 = vpop.f32.mrf.mxu3 }
 0x415   : > { %v3514_v37 = vmax.f32 %v3386_v23, %v2782_v35 }
 0x417   : > { %v3642_v14 = vmax.f32 %v3514_v37, %v3111_v13 }
 0x418   : > { %v2129_v1 = vpop.f32.mrf.mxu0  ;;  %v2458_v52 = vpop.f32.mrf.mxu1 }
 0x419   : > { %v3898_v34 = vmax.f32 %v3770_v53, %v3642_v14  ;;  %v3388_v62 = vmax.f32 %v2129_v1, %v2458_v52  ;;  %v3777_v1 = vld [vmem:[#allocation2 + $0x3f8] sm:$0xff] }
 0x41b   : > { %4026 = vst [vmem:[#allocation2 + $0x1c0] sm:$0xff] %v3898_v34  ;;  %2168 = vmatmul.bf16.gmra.mxu0 %v10602_v49  ;;  %2497 = vmatmul.bf16.gmra.mxu1 %v10602_v49 }
 0x41c   : > { %v2784_v2 = vpop.f32.mrf.mxu2  ;;  %v3113_v21 = vpop.f32.mrf.mxu3 }
 0x41d   : > { %v3515_v61 = vmax.f32 %v3387_v32, %v2784_v2 }
 0x41f   : > { %v3643_v9 = vmax.f32 %v3515_v61, %v3113_v21 }
 0x420   : > { %v2131_v24 = vpop.f32.mrf.mxu0  ;;  %v2460_v3 = vpop.f32.mrf.mxu1 }
 0x421   : > { %v3899_v29 = vmax.f32 %v3771_v43, %v3643_v9  ;;  %2826 = vmatmul.bf16.gmra.mxu2 %v10602_v49  ;;  %3155 = vmatmul.bf16.gmra.mxu3 %v10602_v49  ;;  %v3389_v46 = vmax.f32 %v2131_v24, %v2460_v3  ;;  %v3778_v24 = vld [vmem:[#allocation2 + $0x8] sm:$0xff] }
 0x423   : > { %4027 = vst [vmem:[#allocation2 + $0x280] sm:$0xff] %v3899_v29  ;;  %v10606_v29 = vld [vmem:[%s13918_s5 + $0xe0] sm:$0xff] }
 0x424   : > { %v2787_v26 = vpop.f32.mrf.mxu2  ;;  %v3116_v59 = vpop.f32.mrf.mxu3 }
 0x425   : > { %v3516_v0 = vmax.f32 %v3388_v62, %v2787_v26 }
 0x427   : > { %v3644_v6 = vmax.f32 %v3516_v0, %v3116_v59 }
 0x428   : > { %v2134_v25 = vpop.f32.mrf.mxu0  ;;  %v2463_v8 = vpop.f32.mrf.mxu1 }
 0x429   : > { %v3900_v63 = vmax.f32 %v3772_v47, %v3644_v6  ;;  %v3390_v38 = vmax.f32 %v2134_v25, %v2463_v8  ;;  %v3779_v25 = vld [vmem:[#allocation2 + $0x128] sm:$0xff] }
 0x42b   : > { %4028 = vst [vmem:[#allocation2 + $0x100] sm:$0xff] %v3900_v63  ;;  %2173 = vmatmul.bf16.gmra.mxu0 %v10603_v11  ;;  %2502 = vmatmul.bf16.gmra.mxu1 %v10603_v11 }
 0x42c   : > { %v2789_v20 = vpop.f32.mrf.mxu2  ;;  %v3118_v60 = vpop.f32.mrf.mxu3 }
 0x42d   : > { %v3517_v50 = vmax.f32 %v3389_v46, %v2789_v20 }
 0x42f   : > { %v3645_v31 = vmax.f32 %v3517_v50, %v3118_v60 }
 0x430   : > { %v2136_v44 = vpop.f32.mrf.mxu0  ;;  %v2465_v30 = vpop.f32.mrf.mxu1 }
 0x431   : > { %v3901_v4 = vmax.f32 %v3773_v36, %v3645_v31  ;;  %2831 = vmatmul.bf16.gmra.mxu2 %v10603_v11  ;;  %3160 = vmatmul.bf16.gmra.mxu3 %v10603_v11  ;;  %v3391_v42 = vmax.f32 %v2136_v44, %v2465_v30  ;;  %v3780_v44 = vld [vmem:[#allocation2 + $0x2a0] sm:$0xff] }
 0x433   : > { %4029 = vst [vmem:[#allocation2 + $0x3c0] sm:$0xff] %v3901_v4  ;;  %v10607_v4 = vld [vmem:[%s13918_s5 + $0xe8] sm:$0xff] }
 0x434   : > { %v2792_v17 = vpop.f32.mrf.mxu2  ;;  %v3121_v41 = vpop.f32.mrf.mxu3 }
 0x435   : > { %v3518_v51 = vmax.f32 %v3390_v38, %v2792_v17 }
 0x437   : > { %v3646_v48 = vmax.f32 %v3518_v51, %v3121_v41 }
 0x438   : > { %v2139_v22 = vpop.f32.mrf.mxu0  ;;  %v2468_v40 = vpop.f32.mrf.mxu1 }
 0x439   : > { %v3902_v15 = vmax.f32 %v3774_v10, %v3646_v48  ;;  %v3392_v54 = vmax.f32 %v2139_v22, %v2468_v40  ;;  %v3781_v22 = vld [vmem:[#allocation2 + $0x3f0] sm:$0xff] }
 0x43b   : > { %4030 = vst [vmem:[#allocation2 + $0x158] sm:$0xff] %v3902_v15  ;;  %2178 = vmatmul.bf16.gmra.mxu0 %v10604_v57  ;;  %2507 = vmatmul.bf16.gmra.mxu1 %v10604_v57 }
 0x43c   : > { %v2794_v28 = vpop.f32.mrf.mxu2  ;;  %v3123_v55 = vpop.f32.mrf.mxu3 }
 0x43d   : > { %v3519_v33 = vmax.f32 %v3391_v42, %v2794_v28 }
 0x43f   : > { %v3647_v16 = vmax.f32 %v3519_v33, %v3123_v55 }
 0x440   : > { %v2141_v18 = vpop.f32.mrf.mxu0  ;;  %v2470_v19 = vpop.f32.mrf.mxu1 }
 0x441   : > { %v3903_v56 = vmax.f32 %v3775_v7, %v3647_v16  ;;  %2836 = vmatmul.bf16.gmra.mxu2 %v10604_v57  ;;  %3165 = vmatmul.bf16.gmra.mxu3 %v10604_v57  ;;  %v3393_v37 = vmax.f32 %v2141_v18, %v2470_v19  ;;  %v3782_v18 = vld [vmem:[#allocation2 + $0xa0] sm:$0xff] }
 0x443   : > { %4031 = vst [vmem:[#allocation2 + $0x3e0] sm:$0xff] %v3903_v56  ;;  %v10608_v56 = vld [vmem:[%s13918_s5 + $0xf0] sm:$0xff] }
 0x444   : > { %v2797_v45 = vpop.f32.mrf.mxu2  ;;  %v3126_v58 = vpop.f32.mrf.mxu3 }
 0x445   : > { %v3520_v39 = vmax.f32 %v3392_v54, %v2797_v45 }
 0x447   : > { %v3648_v12 = vmax.f32 %v3520_v39, %v3126_v58 }
 0x448   : > { %v2144_v23 = vpop.f32.mrf.mxu0  ;;  %v2473_v35 = vpop.f32.mrf.mxu1 }
 0x449   : > { %v3904_v13 = vmax.f32 %v3776_v27, %v3648_v12  ;;  %v3394_v21 = vmax.f32 %v2144_v23, %v2473_v35  ;;  %v3783_v23 = vld [vmem:[#allocation2 + $0x2c0] sm:$0xff] }
 0x44b   : > { %4032 = vst [vmem:[#allocation2 + $0x218] sm:$0xff] %v3904_v13  ;;  %2183 = vmatmul.bf16.gmra.mxu0 %v10605_v5  ;;  %2512 = vmatmul.bf16.gmra.mxu1 %v10605_v5 }
 0x44c   : > { %v2799_v53 = vpop.f32.mrf.mxu2  ;;  %v3128_v14 = vpop.f32.mrf.mxu3 }
 0x44d   : > { %v3521_v49 = vmax.f32 %v3393_v37, %v2799_v53 }
 0x44f   : > { %v3649_v52 = vmax.f32 %v3521_v49, %v3128_v14 }
 0x450   : > { %v2146_v34 = vpop.f32.mrf.mxu0  ;;  %v2475_v32 = vpop.f32.mrf.mxu1 }
 0x451   : > { %v3905_v2 = vmax.f32 %v3777_v1, %v3649_v52  ;;  %2841 = vmatmul.bf16.gmra.mxu2 %v10605_v5  ;;  %3170 = vmatmul.bf16.gmra.mxu3 %v10605_v5  ;;  %v3395_v0 = vmax.f32 %v2146_v34, %v2475_v32  ;;  %v3784_v34 = vld [vmem:[#allocation2 + $0xb0] sm:$0xff] }
 0x453   : > { %4033 = vst [vmem:[#allocation2 + $0x3f8] sm:$0xff] %v3905_v2  ;;  %v10609_v2 = vld [vmem:[%s13918_s5 + $0xf8] sm:$0xff] }
 0x454   : > { %v2802_v61 = vpop.f32.mrf.mxu2  ;;  %v3131_v43 = vpop.f32.mrf.mxu3 }
 0x455   : > { %v3522_v9 = vmax.f32 %v3394_v21, %v2802_v61 }
 0x457   : > { %v3650_v3 = vmax.f32 %v3522_v9, %v3131_v43 }
 0x458   : > { %v2149_v62 = vpop.f32.mrf.mxu0  ;;  %v2478_v26 = vpop.f32.mrf.mxu1 }
 0x459   : > { %v3906_v59 = vmax.f32 %v3778_v24, %v3650_v3  ;;  %v3396_v60 = vmax.f32 %v2149_v62, %v2478_v26  ;;  %v3785_v62 = vld [vmem:[#allocation2 + $0x1e0] sm:$0xff] }
 0x45b   : > { %4034 = vst [vmem:[#allocation2 + $0x8] sm:$0xff] %v3906_v59  ;;  %2188 = vmatmul.bf16.gmra.mxu0 %v10606_v29  ;;  %2517 = vmatmul.bf16.gmra.mxu1 %v10606_v29 }
 0x45c   : > { %v2804_v47 = vpop.f32.mrf.mxu2  ;;  %v3133_v6 = vpop.f32.mrf.mxu3 }
 0x45d   : > { %v3523_v11 = vmax.f32 %v3395_v0, %v2804_v47 }
 0x45f   : > { %v3651_v8 = vmax.f32 %v3523_v11, %v3133_v6 }
 0x460   : > { %v2151_v63 = vpop.f32.mrf.mxu0  ;;  %v2480_v46 = vpop.f32.mrf.mxu1 }
 0x461   : > { %v3907_v20 = vmax.f32 %v3779_v25, %v3651_v8  ;;  %2846 = vmatmul.bf16.gmra.mxu2 %v10606_v29  ;;  %3175 = vmatmul.bf16.gmra.mxu3 %v10606_v29  ;;  %v3397_v51 = vmax.f32 %v2151_v63, %v2480_v46  ;;  %v3786_v63 = vld [vmem:[#allocation2 + $0x1f0] sm:$0xff] }
 0x463   : > { %4035 = vst [vmem:[#allocation2 + $0x128] sm:$0xff] %v3907_v20  ;;  %v10610_v20 = vld [vmem:[%s13918_s5 + $0x100] sm:$0xff] }
 0x464   : > { %v2807_v50 = vpop.f32.mrf.mxu2  ;;  %v3136_v36 = vpop.f32.mrf.mxu3 }
 0x465   : > { %v3524_v31 = vmax.f32 %v3396_v60, %v2807_v50 }
 0x467   : > { %v3652_v30 = vmax.f32 %v3524_v31, %v3136_v36 }
 0x468   : > { %v2154_v38 = vpop.f32.mrf.mxu0  ;;  %v2483_v17 = vpop.f32.mrf.mxu1 }
 0x469   : > { %v3908_v41 = vmax.f32 %v3780_v44, %v3652_v30  ;;  %v3398_v55 = vmax.f32 %v2154_v38, %v2483_v17  ;;  %v3787_v38 = vld [vmem:[#allocation2 + $0x10] sm:$0xff] }
 0x46b   : > { %4036 = vst [vmem:[#allocation2 + $0x2a0] sm:$0xff] %v3908_v41  ;;  %2193 = vmatmul.bf16.gmra.mxu0 %v10607_v4  ;;  %2522 = vmatmul.bf16.gmra.mxu1 %v10607_v4 }
 0x46c   : > { %v2809_v10 = vpop.f32.mrf.mxu2  ;;  %v3138_v48 = vpop.f32.mrf.mxu3 }
 0x46d   : > { %v3525_v57 = vmax.f32 %v3397_v51, %v2809_v10 }
 0x46f   : > { %v3653_v40 = vmax.f32 %v3525_v57, %v3138_v48 }
 0x470   : > { %v2156_v15 = vpop.f32.mrf.mxu0  ;;  %v2485_v42 = vpop.f32.mrf.mxu1 }
 0x471   : > { %v3909_v28 = vmax.f32 %v3781_v22, %v3653_v40  ;;  %2851 = vmatmul.bf16.gmra.mxu2 %v10607_v4  ;;  %3180 = vmatmul.bf16.gmra.mxu3 %v10607_v4  ;;  %v3399_v39 = vmax.f32 %v2156_v15, %v2485_v42  ;;  %v3788_v15 = vld [vmem:[#allocation2 + $0x230] sm:$0xff] }
 0x473   : > { %4037 = vst [vmem:[#allocation2 + $0x3f0] sm:$0xff] %v3909_v28  ;;  %v10611_v28 = vld [vmem:[%s13918_s5 + $0x108] sm:$0xff] }
 0x474   : > { %v2812_v33 = vpop.f32.mrf.mxu2  ;;  %v3141_v7 = vpop.f32.mrf.mxu3 }
 0x475   : > { %v3526_v16 = vmax.f32 %v3398_v55, %v2812_v33 }
 0x477   : > { %v3654_v19 = vmax.f32 %v3526_v16, %v3141_v7 }
 0x478   : > { %v2159_v54 = vpop.f32.mrf.mxu0  ;;  %v2488_v45 = vpop.f32.mrf.mxu1 }
 0x479   : > { %v3910_v58 = vmax.f32 %v3782_v18, %v3654_v19  ;;  %v3400_v14 = vmax.f32 %v2159_v54, %v2488_v45  ;;  %v3789_v54 = vld [vmem:[#allocation2 + $0x240] sm:$0xff] }
 0x47b   : > { %4038 = vst [vmem:[#allocation2 + $0xa0] sm:$0xff] %v3910_v58  ;;  %2198 = vmatmul.bf16.gmra.mxu0 %v10608_v56  ;;  %2527 = vmatmul.bf16.gmra.mxu1 %v10608_v56 }
 0x47c   : > { %v2814_v27 = vpop.f32.mrf.mxu2  ;;  %v3143_v12 = vpop.f32.mrf.mxu3 }
 0x47d   : > { %v3527_v5 = vmax.f32 %v3399_v39, %v2814_v27 }
 0x47f   : > { %v3655_v35 = vmax.f32 %v3527_v5, %v3143_v12 }
 0x480   : > { %v2161_v13 = vpop.f32.mrf.mxu0  ;;  %v2490_v37 = vpop.f32.mrf.mxu1 }
 0x481   : > { %v3911_v53 = vmax.f32 %v3783_v23, %v3655_v35  ;;  %2856 = vmatmul.bf16.gmra.mxu2 %v10608_v56  ;;  %3185 = vmatmul.bf16.gmra.mxu3 %v10608_v56  ;;  %v3401_v9 = vmax.f32 %v2161_v13, %v2490_v37  ;;  %v3790_v13 = vld [vmem:[#allocation2 + $0x90] sm:$0xff] }
 0x483   : > { %4039 = vst [vmem:[#allocation2 + $0x2c0] sm:$0xff] %v3911_v53  ;;  %v10612_v53 = vld [vmem:[%s13918_s5 + $0x110] sm:$0xff] }
 0x484   : > { %v2817_v49 = vpop.f32.mrf.mxu2  ;;  %v3146_v1 = vpop.f32.mrf.mxu3 }
 0x485   : > { %v3528_v52 = vmax.f32 %v3400_v14, %v2817_v49 }
 0x487   : > { %v3656_v32 = vmax.f32 %v3528_v52, %v3146_v1 }
 0x488   : > { %v2164_v21 = vpop.f32.mrf.mxu0  ;;  %v2493_v61 = vpop.f32.mrf.mxu1 }
 0x489   : > { %v3912_v43 = vmax.f32 %v3784_v34, %v3656_v32  ;;  %v3402_v6 = vmax.f32 %v2164_v21, %v2493_v61  ;;  %v3791_v21 = vld [vmem:[#allocation2 + $0x3a0] sm:$0xff] }
 0x48b   : > { %4040 = vst [vmem:[#allocation2 + $0xb0] sm:$0xff] %v3912_v43  ;;  %2203 = vmatmul.bf16.gmra.mxu0 %v10609_v2  ;;  %2532 = vmatmul.bf16.gmra.mxu1 %v10609_v2 }
 0x48c   : > { %v2819_v24 = vpop.f32.mrf.mxu2  ;;  %v3148_v3 = vpop.f32.mrf.mxu3 }
 0x48d   : > { %v3529_v29 = vmax.f32 %v3401_v9, %v2819_v24 }
 0x48f   : > { %v3657_v26 = vmax.f32 %v3529_v29, %v3148_v3 }
 0x490   : > { %v2166_v59 = vpop.f32.mrf.mxu0  ;;  %v2495_v0 = vpop.f32.mrf.mxu1 }
 0x491   : > { %v3913_v47 = vmax.f32 %v3785_v62, %v3657_v26  ;;  %2861 = vmatmul.bf16.gmra.mxu2 %v10609_v2  ;;  %3190 = vmatmul.bf16.gmra.mxu3 %v10609_v2  ;;  %v3403_v31 = vmax.f32 %v2166_v59, %v2495_v0  ;;  %v3792_v59 = vld [vmem:[#allocation2 + $0x208] sm:$0xff] }
 0x493   : > { %4041 = vst [vmem:[#allocation2 + $0x1e0] sm:$0xff] %v3913_v47  ;;  %v10613_v47 = vld [vmem:[%s13918_s5 + $0x118] sm:$0xff] }
 0x494   : > { %v2822_v11 = vpop.f32.mrf.mxu2  ;;  %v3151_v25 = vpop.f32.mrf.mxu3 }
 0x495   : > { %v3530_v8 = vmax.f32 %v3402_v6, %v2822_v11 }
 0x497   : > { %v3658_v46 = vmax.f32 %v3530_v8, %v3151_v25 }
 0x498   : > { %v2169_v60 = vpop.f32.mrf.mxu0  ;;  %v2498_v50 = vpop.f32.mrf.mxu1 }
 0x499   : > { %v3914_v36 = vmax.f32 %v3786_v63, %v3658_v46  ;;  %v3404_v48 = vmax.f32 %v2169_v60, %v2498_v50  ;;  %v3793_v60 = vld [vmem:[#allocation2 + $0xd0] sm:$0xff] }
 0x49b   : > { %4042 = vst [vmem:[#allocation2 + $0x1f0] sm:$0xff] %v3914_v36  ;;  %2208 = vmatmul.bf16.gmra.mxu0 %v10610_v20  ;;  %2537 = vmatmul.bf16.gmra.mxu1 %v10610_v20 }
 0x49c   : > { %v2824_v44 = vpop.f32.mrf.mxu2  ;;  %v3153_v30 = vpop.f32.mrf.mxu3 }
 0x49d   : > { %v3531_v4 = vmax.f32 %v3403_v31, %v2824_v44 }
 0x49f   : > { %v3659_v17 = vmax.f32 %v3531_v4, %v3153_v30 }
 0x4a0   : > { %v2171_v41 = vpop.f32.mrf.mxu0  ;;  %v2500_v51 = vpop.f32.mrf.mxu1 }
 0x4a1   : > { %v3915_v10 = vmax.f32 %v3787_v38, %v3659_v17  ;;  %2866 = vmatmul.bf16.gmra.mxu2 %v10610_v20  ;;  %3195 = vmatmul.bf16.gmra.mxu3 %v10610_v20  ;;  %v3405_v16 = vmax.f32 %v2171_v41, %v2500_v51  ;;  %v3794_v41 = vld [vmem:[#allocation2 + $0x88] sm:$0xff] }
 0x4a3   : > { %4043 = vst [vmem:[#allocation2 + $0x10] sm:$0xff] %v3915_v10  ;;  %v10614_v10 = vld [vmem:[%s13918_s5 + $0x120] sm:$0xff] }
 0x4a4   : > { %v2827_v57 = vpop.f32.mrf.mxu2  ;;  %v3156_v22 = vpop.f32.mrf.mxu3 }
 0x4a5   : > { %v3532_v40 = vmax.f32 %v3404_v48, %v2827_v57 }
 0x4a7   : > { %v3660_v42 = vmax.f32 %v3532_v40, %v3156_v22 }
 0x4a8   : > { %v2174_v55 = vpop.f32.mrf.mxu0  ;;  %v2503_v33 = vpop.f32.mrf.mxu1 }
 0x4a9   : > { %v3916_v7 = vmax.f32 %v3788_v15, %v3660_v42  ;;  %v3406_v12 = vmax.f32 %v2174_v55, %v2503_v33  ;;  %v3795_v55 = vld [vmem:[#allocation2 + $0x2f0] sm:$0xff] }
 0x4ab   : > { %4044 = vst [vmem:[#allocation2 + $0x230] sm:$0xff] %v3916_v7  ;;  %2213 = vmatmul.bf16.gmra.mxu0 %v10611_v28  ;;  %2542 = vmatmul.bf16.gmra.mxu1 %v10611_v28 }
 0x4ac   : > { %v2829_v18 = vpop.f32.mrf.mxu2  ;;  %v3158_v19 = vpop.f32.mrf.mxu3 }
 0x4ad   : > { %v3533_v56 = vmax.f32 %v3405_v16, %v2829_v18 }
 0x4af   : > { %v3661_v45 = vmax.f32 %v3533_v56, %v3158_v19 }
 0x4b0   : > { %v2176_v58 = vpop.f32.mrf.mxu0  ;;  %v2505_v39 = vpop.f32.mrf.mxu1 }
 0x4b1   : > { %v3917_v27 = vmax.f32 %v3789_v54, %v3661_v45  ;;  %2871 = vmatmul.bf16.gmra.mxu2 %v10611_v28  ;;  %3200 = vmatmul.bf16.gmra.mxu3 %v10611_v28  ;;  %v3407_v52 = vmax.f32 %v2176_v58, %v2505_v39  ;;  %v3796_v58 = vld [vmem:[#allocation2 + $0x358] sm:$0xff] }
 0x4b3   : > { %4045 = vst [vmem:[#allocation2 + $0x240] sm:$0xff] %v3917_v27  ;;  %v10615_v27 = vld [vmem:[%s13918_s5 + $0x128] sm:$0xff] }
 0x4b4   : > { %v2832_v5 = vpop.f32.mrf.mxu2  ;;  %v3161_v23 = vpop.f32.mrf.mxu3 }
 0x4b5   : > { %v3534_v35 = vmax.f32 %v3406_v12, %v2832_v5 }
 0x4b7   : > { %v3662_v37 = vmax.f32 %v3534_v35, %v3161_v23 }
 0x4b8   : > { %v2179_v14 = vpop.f32.mrf.mxu0  ;;  %v2508_v49 = vpop.f32.mrf.mxu1 }
 0x4b9   : > { %v3918_v1 = vmax.f32 %v3790_v13, %v3662_v37  ;;  %v3408_v3 = vmax.f32 %v2179_v14, %v2508_v49  ;;  %v3797_v14 = vld [vmem:[#allocation2 + $0x268] sm:$0xff] }
 0x4bb   : > { %4046 = vst [vmem:[#allocation2 + $0x90] sm:$0xff] %v3918_v1  ;;  %2218 = vmatmul.bf16.gmra.mxu0 %v10612_v53  ;;  %2547 = vmatmul.bf16.gmra.mxu1 %v10612_v53 }
 0x4bc   : > { %v2834_v34 = vpop.f32.mrf.mxu2  ;;  %v3163_v32 = vpop.f32.mrf.mxu3 }
 0x4bd   : > { %v3535_v2 = vmax.f32 %v3407_v52, %v2834_v34 }
 0x4bf   : > { %v3663_v61 = vmax.f32 %v3535_v2, %v3163_v32 }
 0x4c0   : > { %v2181_v43 = vpop.f32.mrf.mxu0  ;;  %v2510_v9 = vpop.f32.mrf.mxu1 }
 0x4c1   : > { %v3919_v24 = vmax.f32 %v3791_v21, %v3663_v61  ;;  %2876 = vmatmul.bf16.gmra.mxu2 %v10612_v53  ;;  %3205 = vmatmul.bf16.gmra.mxu3 %v10612_v53  ;;  %v3409_v8 = vmax.f32 %v2181_v43, %v2510_v9  ;;  %v3798_v43 = vld [vmem:[#allocation2 + $0x350] sm:$0xff] }
 0x4c3   : > { %4047 = vst [vmem:[#allocation2 + $0x3a0] sm:$0xff] %v3919_v24  ;;  %v10616_v24 = vld [vmem:[%s13918_s5 + $0x130] sm:$0xff] }
 0x4c4   : > { %v2837_v29 = vpop.f32.mrf.mxu2  ;;  %v3166_v62 = vpop.f32.mrf.mxu3 }
 0x4c5   : > { %v3536_v26 = vmax.f32 %v3408_v3, %v2837_v29 }
 0x4c7   : > { %v3664_v0 = vmax.f32 %v3536_v26, %v3166_v62 }
 0x4c8   : > { %v2184_v6 = vpop.f32.mrf.mxu0  ;;  %v2513_v11 = vpop.f32.mrf.mxu1 }
 0x4c9   : > { %v3920_v25 = vmax.f32 %v3792_v59, %v3664_v0  ;;  %v3410_v30 = vmax.f32 %v2184_v6, %v2513_v11  ;;  %v3799_v6 = vld [vmem:[#allocation2 + $0x188] sm:$0xff] }
 0x4cb   : > { %4048 = vst [vmem:[#allocation2 + $0x208] sm:$0xff] %v3920_v25  ;;  %2223 = vmatmul.bf16.gmra.mxu0 %v10613_v47  ;;  %2552 = vmatmul.bf16.gmra.mxu1 %v10613_v47 }
 0x4cc   : > { %v2839_v63 = vpop.f32.mrf.mxu2  ;;  %v3168_v46 = vpop.f32.mrf.mxu3 }
 0x4cd   : > { %v3537_v20 = vmax.f32 %v3409_v8, %v2839_v63 }
 0x4cf   : > { %v3665_v50 = vmax.f32 %v3537_v20, %v3168_v46 }
 0x4d0   : > { %v2186_v36 = vpop.f32.mrf.mxu0  ;;  %v2515_v31 = vpop.f32.mrf.mxu1 }
 0x4d1   : > { %v3921_v44 = vmax.f32 %v3793_v60, %v3665_v50  ;;  %2881 = vmatmul.bf16.gmra.mxu2 %v10613_v47  ;;  %3210 = vmatmul.bf16.gmra.mxu3 %v10613_v47  ;;  %v3411_v40 = vmax.f32 %v2186_v36, %v2515_v31  ;;  %v3800_v36 = vld [vmem:[#allocation2 + $0x1d8] sm:$0xff] }
 0x4d3   : > { %4049 = vst [vmem:[#allocation2 + $0xd0] sm:$0xff] %v3921_v44  ;;  %v10617_v44 = vld [vmem:[%s13918_s5 + $0x138] sm:$0xff] }
 0x4d4   : > { %v2842_v4 = vpop.f32.mrf.mxu2  ;;  %v3171_v38 = vpop.f32.mrf.mxu3 }
 0x4d5   : > { %v3538_v17 = vmax.f32 %v3410_v30, %v2842_v4 }
 0x4d7   : > { %v3666_v51 = vmax.f32 %v3538_v17, %v3171_v38 }
 0x4d8   : > { %v2189_v48 = vpop.f32.mrf.mxu0  ;;  %v2518_v57 = vpop.f32.mrf.mxu1 }
 0x4d9   : > { %v3922_v22 = vmax.f32 %v3794_v41, %v3666_v51  ;;  %v3412_v19 = vmax.f32 %v2189_v48, %v2518_v57  ;;  %v3801_v48 = vld [vmem:[#allocation2 + $0x30] sm:$0xff] }
 0x4db   : > { %4050 = vst [vmem:[#allocation2 + $0x88] sm:$0xff] %v3922_v22  ;;  %2228 = vmatmul.bf16.gmra.mxu0 %v10614_v10  ;;  %2557 = vmatmul.bf16.gmra.mxu1 %v10614_v10 }
 0x4dc   : > { %v2844_v15 = vpop.f32.mrf.mxu2  ;;  %v3173_v42 = vpop.f32.mrf.mxu3 }
 0x4dd   : > { %v3539_v28 = vmax.f32 %v3411_v40, %v2844_v15 }
 0x4df   : > { %v3667_v33 = vmax.f32 %v3539_v28, %v3173_v42 }
 0x4e0   : > { %v2191_v7 = vpop.f32.mrf.mxu0  ;;  %v2520_v16 = vpop.f32.mrf.mxu1 }
 0x4e1   : > { %v3923_v18 = vmax.f32 %v3795_v55, %v3667_v33  ;;  %2886 = vmatmul.bf16.gmra.mxu2 %v10614_v10  ;;  %3215 = vmatmul.bf16.gmra.mxu3 %v10614_v10  ;;  %v3413_v35 = vmax.f32 %v2191_v7, %v2520_v16  ;;  %v3802_v7 = vld [vmem:[#allocation2 + $0x140] sm:$0xff] }
 0x4e3   : > { %4051 = vst [vmem:[#allocation2 + $0x2f0] sm:$0xff] %v3923_v18  ;;  %v10618_v18 = vld [vmem:[%s13918_s5 + $0x140] sm:$0xff] }
 0x4e4   : > { %v2847_v56 = vpop.f32.mrf.mxu2  ;;  %v3176_v54 = vpop.f32.mrf.mxu3 }
 0x4e5   : > { %v3540_v45 = vmax.f32 %v3412_v19, %v2847_v56 }
 0x4e7   : > { %v3668_v39 = vmax.f32 %v3540_v45, %v3176_v54 }
 0x4e8   : > { %v2194_v12 = vpop.f32.mrf.mxu0  ;;  %v2523_v5 = vpop.f32.mrf.mxu1 }
 0x4e9   : > { %v3924_v23 = vmax.f32 %v3796_v58, %v3668_v39  ;;  %v3414_v32 = vmax.f32 %v2194_v12, %v2523_v5  ;;  %v3803_v12 = vld [vmem:[#allocation2 + $0x2a8] sm:$0xff] }
 0x4eb   : > { %4052 = vst [vmem:[#allocation2 + $0x358] sm:$0xff] %v3924_v23  ;;  %2233 = vmatmul.bf16.gmra.mxu0 %v10615_v27  ;;  %2562 = vmatmul.bf16.gmra.mxu1 %v10615_v27 }
 0x4ec   : > { %v2849_v13 = vpop.f32.mrf.mxu2  ;;  %v3178_v37 = vpop.f32.mrf.mxu3 }
 0x4ed   : > { %v3541_v53 = vmax.f32 %v3413_v35, %v2849_v13 }
 0x4ef   : > { %v3669_v49 = vmax.f32 %v3541_v53, %v3178_v37 }
 0x4f0   : > { %v2196_v1 = vpop.f32.mrf.mxu0  ;;  %v2525_v52 = vpop.f32.mrf.mxu1 }
 0x4f1   : > { %v3925_v34 = vmax.f32 %v3797_v14, %v3669_v49  ;;  %2891 = vmatmul.bf16.gmra.mxu2 %v10615_v27  ;;  %3220 = vmatmul.bf16.gmra.mxu3 %v10615_v27  ;;  %v3415_v26 = vmax.f32 %v2196_v1, %v2525_v52  ;;  %v3804_v1 = vld [vmem:[#allocation2 + $0x130] sm:$0xff] }
 0x4f3   : > { %4053 = vst [vmem:[#allocation2 + $0x268] sm:$0xff] %v3925_v34  ;;  %v10619_v34 = vld [vmem:[%s13918_s5 + $0x148] sm:$0xff] }
 0x4f4   : > { %v2852_v2 = vpop.f32.mrf.mxu2  ;;  %v3181_v21 = vpop.f32.mrf.mxu3 }
 0x4f5   : > { %v3542_v61 = vmax.f32 %v3414_v32, %v2852_v2 }
 0x4f7   : > { %v3670_v9 = vmax.f32 %v3542_v61, %v3181_v21 }
 0x4f8   : > { %v2199_v3 = vpop.f32.mrf.mxu0  ;;  %v2528_v29 = vpop.f32.mrf.mxu1 }
 0x4f9   : > { %v3926_v62 = vmax.f32 %v3798_v43, %v3670_v9  ;;  %v3416_v46 = vmax.f32 %v2199_v3, %v2528_v29  ;;  %v3805_v3 = vld [vmem:[#allocation2 + $0x200] sm:$0xff] }
 0x4fb   : > { %4054 = vst [vmem:[#allocation2 + $0x350] sm:$0xff] %v3926_v62  ;;  %2238 = vmatmul.bf16.gmra.mxu0 %v10616_v24  ;;  %2567 = vmatmul.bf16.gmra.mxu1 %v10616_v24 }
 0x4fc   : > { %v2854_v59 = vpop.f32.mrf.mxu2  ;;  %v3183_v0 = vpop.f32.mrf.mxu3 }
 0x4fd   : > { %v3543_v47 = vmax.f32 %v3415_v26, %v2854_v59 }
 0x4ff   : > { %v3671_v11 = vmax.f32 %v3543_v47, %v3183_v0 }
 0x500   : > { %v2201_v25 = vpop.f32.mrf.mxu0  ;;  %v2530_v8 = vpop.f32.mrf.mxu1 }
 0x501   : > { %v3927_v63 = vmax.f32 %v3799_v6, %v3671_v11  ;;  %2896 = vmatmul.bf16.gmra.mxu2 %v10616_v24  ;;  %3225 = vmatmul.bf16.gmra.mxu3 %v10616_v24  ;;  %v3417_v17 = vmax.f32 %v2201_v25, %v2530_v8  ;;  %v3806_v25 = vld [vmem:[#allocation2 + $0x318] sm:$0xff] }
 0x503   : > { %4055 = vst [vmem:[#allocation2 + $0x188] sm:$0xff] %v3927_v63  ;;  %v10620_v63 = vld [vmem:[%s13918_s5 + $0x150] sm:$0xff] }
 0x504   : > { %v2857_v20 = vpop.f32.mrf.mxu2  ;;  %v3186_v60 = vpop.f32.mrf.mxu3 }
 0x505   : > { %v3544_v50 = vmax.f32 %v3416_v46, %v2857_v20 }
 0x507   : > { %v3672_v31 = vmax.f32 %v3544_v50, %v3186_v60 }
 0x508   : > { %v2204_v30 = vpop.f32.mrf.mxu0  ;;  %v2533_v4 = vpop.f32.mrf.mxu1 }
 0x509   : > { %v3928_v38 = vmax.f32 %v3800_v36, %v3672_v31  ;;  %v3418_v42 = vmax.f32 %v2204_v30, %v2533_v4  ;;  %v3807_v30 = vld [vmem:[#allocation2 + $0x220] sm:$0xff] }
 0x50b   : > { %4056 = vst [vmem:[#allocation2 + $0x1d8] sm:$0xff] %v3928_v38  ;;  %2243 = vmatmul.bf16.gmra.mxu0 %v10617_v44  ;;  %2572 = vmatmul.bf16.gmra.mxu1 %v10617_v44 }
 0x50c   : > { %v2859_v41 = vpop.f32.mrf.mxu2  ;;  %v3188_v51 = vpop.f32.mrf.mxu3 }
 0x50d   : > { %v3545_v10 = vmax.f32 %v3417_v17, %v2859_v41 }
 0x50f   : > { %v3673_v57 = vmax.f32 %v3545_v10, %v3188_v51 }
 0x510   : > { %v2206_v22 = vpop.f32.mrf.mxu0  ;;  %v2535_v40 = vpop.f32.mrf.mxu1 }
 0x511   : > { %v3929_v15 = vmax.f32 %v3801_v48, %v3673_v57  ;;  %2901 = vmatmul.bf16.gmra.mxu2 %v10617_v44  ;;  %3230 = vmatmul.bf16.gmra.mxu3 %v10617_v44  ;;  %v3419_v45 = vmax.f32 %v2206_v22, %v2535_v40  ;;  %v3808_v22 = vld [vmem:[#allocation2 + $0x70] sm:$0xff] }
 0x513   : > { %4057 = vst [vmem:[#allocation2 + $0x30] sm:$0xff] %v3929_v15  ;;  %v10621_v15 = vld [vmem:[%s13918_s5 + $0x158] sm:$0xff] }
 0x514   : > { %v2862_v28 = vpop.f32.mrf.mxu2  ;;  %v3191_v55 = vpop.f32.mrf.mxu3 }
 0x515   : > { %v3546_v33 = vmax.f32 %v3418_v42, %v2862_v28 }
 0x517   : > { %v3674_v16 = vmax.f32 %v3546_v33, %v3191_v55 }
 0x518   : > { %v2209_v19 = vpop.f32.mrf.mxu0  ;;  %v2538_v56 = vpop.f32.mrf.mxu1 }
 0x519   : > { %v3930_v54 = vmax.f32 %v3802_v7, %v3674_v16  ;;  %v3420_v37 = vmax.f32 %v2209_v19, %v2538_v56  ;;  %v3809_v19 = vld [vmem:[#allocation2 + $0x300] sm:$0xff] }
 0x51b   : > { %4058 = vst [vmem:[#allocation2 + $0x140] sm:$0xff] %v3930_v54  ;;  %2248 = vmatmul.bf16.gmra.mxu0 %v10618_v18  ;;  %2577 = vmatmul.bf16.gmra.mxu1 %v10618_v18 }
 0x51c   : > { %v2864_v58 = vpop.f32.mrf.mxu2  ;;  %v3193_v39 = vpop.f32.mrf.mxu3 }
 0x51d   : > { %v3547_v27 = vmax.f32 %v3419_v45, %v2864_v58 }
 0x51f   : > { %v3675_v5 = vmax.f32 %v3547_v27, %v3193_v39 }
 0x520   : > { %v2211_v23 = vpop.f32.mrf.mxu0  ;;  %v2540_v35 = vpop.f32.mrf.mxu1 }
 0x521   : > { %v3931_v13 = vmax.f32 %v3803_v12, %v3675_v5  ;;  %2906 = vmatmul.bf16.gmra.mxu2 %v10618_v18  ;;  %3235 = vmatmul.bf16.gmra.mxu3 %v10618_v18  ;;  %v3421_v61 = vmax.f32 %v2211_v23, %v2540_v35  ;;  %v3810_v23 = vld [vmem:[#allocation2 + $0xe0] sm:$0xff] }
 0x523   : > { %4059 = vst [vmem:[#allocation2 + $0x2a8] sm:$0xff] %v3931_v13  ;;  %v10622_v13 = vld [vmem:[%s13918_s5 + $0x160] sm:$0xff] }
 0x524   : > { %v2867_v53 = vpop.f32.mrf.mxu2  ;;  %v3196_v14 = vpop.f32.mrf.mxu3 }
 0x525   : > { %v3548_v49 = vmax.f32 %v3420_v37, %v2867_v53 }
 0x527   : > { %v3676_v52 = vmax.f32 %v3548_v49, %v3196_v14 }
 0x528   : > { %v2214_v32 = vpop.f32.mrf.mxu0  ;;  %v2543_v2 = vpop.f32.mrf.mxu1 }
 0x529   : > { %v3932_v21 = vmax.f32 %v3804_v1, %v3676_v52  ;;  %v3422_v0 = vmax.f32 %v2214_v32, %v2543_v2  ;;  %v3811_v32 = vld [vmem:[#allocation2 + $0x178] sm:$0xff] }
 0x52b   : > { %4060 = vst [vmem:[#allocation2 + $0x130] sm:$0xff] %v3932_v21  ;;  %2253 = vmatmul.bf16.gmra.mxu0 %v10619_v34  ;;  %2582 = vmatmul.bf16.gmra.mxu1 %v10619_v34 }
 0x52c   : > { %v2869_v43 = vpop.f32.mrf.mxu2  ;;  %v3198_v9 = vpop.f32.mrf.mxu3 }
 0x52d   : > { %v3549_v24 = vmax.f32 %v3421_v61, %v2869_v43 }
 0x52f   : > { %v3677_v29 = vmax.f32 %v3549_v24, %v3198_v9 }
 0x530   : > { %v2216_v62 = vpop.f32.mrf.mxu0  ;;  %v2545_v26 = vpop.f32.mrf.mxu1 }
 0x531   : > { %v3933_v59 = vmax.f32 %v3805_v3, %v3677_v29  ;;  %2911 = vmatmul.bf16.gmra.mxu2 %v10619_v34  ;;  %3240 = vmatmul.bf16.gmra.mxu3 %v10619_v34  ;;  %v3423_v50 = vmax.f32 %v2216_v62, %v2545_v26  ;;  %v3812_v62 = vld [vmem:[#allocation2 + $0x328] sm:$0xff] }
 0x533   : > { %4061 = vst [vmem:[#allocation2 + $0x200] sm:$0xff] %v3933_v59  ;;  %v10623_v59 = vld [vmem:[%s13918_s5 + $0x168] sm:$0xff] }
 0x534   : > { %v2872_v47 = vpop.f32.mrf.mxu2  ;;  %v3201_v6 = vpop.f32.mrf.mxu3 }
 0x535   : > { %v3550_v11 = vmax.f32 %v3422_v0, %v2872_v47 }
 0x537   : > { %v3678_v8 = vmax.f32 %v3550_v11, %v3201_v6 }
 0x538   : > { %v2219_v46 = vpop.f32.mrf.mxu0  ;;  %v2548_v20 = vpop.f32.mrf.mxu1 }
 0x539   : > { %v3934_v60 = vmax.f32 %v3806_v25, %v3678_v8  ;;  %v3424_v51 = vmax.f32 %v2219_v46, %v2548_v20  ;;  %v3813_v46 = vld [vmem:[#allocation2 + $0x260] sm:$0xff] }
 0x53b   : > { %4062 = vst [vmem:[#allocation2 + $0x318] sm:$0xff] %v3934_v60  ;;  %2258 = vmatmul.bf16.gmra.mxu0 %v10620_v63  ;;  %2587 = vmatmul.bf16.gmra.mxu1 %v10620_v63 }
 0x53c   : > { %v2874_v36 = vpop.f32.mrf.mxu2  ;;  %v3203_v31 = vpop.f32.mrf.mxu3 }
 0x53d   : > { %v3551_v44 = vmax.f32 %v3423_v50, %v2874_v36 }
 0x53f   : > { %v3679_v4 = vmax.f32 %v3551_v44, %v3203_v31 }
 0x540   : > { %v2221_v38 = vpop.f32.mrf.mxu0  ;;  %v2550_v17 = vpop.f32.mrf.mxu1 }
 0x541   : > { %v3935_v41 = vmax.f32 %v3807_v30, %v3679_v4  ;;  %2916 = vmatmul.bf16.gmra.mxu2 %v10620_v63  ;;  %3245 = vmatmul.bf16.gmra.mxu3 %v10620_v63  ;;  %v3425_v33 = vmax.f32 %v2221_v38, %v2550_v17  ;;  %v3814_v38 = vld [vmem:[#allocation2 + $0x3b8] sm:$0xff] }
 0x543   : > { %4063 = vst [vmem:[#allocation2 + $0x220] sm:$0xff] %v3935_v41  ;;  %v10624_v41 = vld [vmem:[%s13918_s5 + $0x170] sm:$0xff] }
 0x544   : > { %v2877_v10 = vpop.f32.mrf.mxu2  ;;  %v3206_v48 = vpop.f32.mrf.mxu3 }
 0x545   : > { %v3552_v57 = vmax.f32 %v3424_v51, %v2877_v10 }
 0x547   : > { %v3680_v40 = vmax.f32 %v3552_v57, %v3206_v48 }
 0x548   : > { %v2224_v42 = vpop.f32.mrf.mxu0  ;;  %v2553_v28 = vpop.f32.mrf.mxu1 }
 0x549   : > { %v3936_v55 = vmax.f32 %v3808_v22, %v3680_v40  ;;  %v3426_v39 = vmax.f32 %v2224_v42, %v2553_v28  ;;  %v3815_v42 = vld [vmem:[#allocation2 + $0x2b8] sm:$0xff] }
 0x54b   : > { %4064 = vst [vmem:[#allocation2 + $0x70] sm:$0xff] %v3936_v55  ;;  %2263 = vmatmul.bf16.gmra.mxu0 %v10621_v15  ;;  %2592 = vmatmul.bf16.gmra.mxu1 %v10621_v15 }
 0x54c   : > { %v2879_v7 = vpop.f32.mrf.mxu2  ;;  %v3208_v16 = vpop.f32.mrf.mxu3 }
 0x54d   : > { %v3553_v18 = vmax.f32 %v3425_v33, %v2879_v7 }
 0x54f   : > { %v3681_v56 = vmax.f32 %v3553_v18, %v3208_v16 }
 0x550   : > { %v2226_v54 = vpop.f32.mrf.mxu0  ;;  %v2555_v45 = vpop.f32.mrf.mxu1 }
 0x551   : > { %v3937_v58 = vmax.f32 %v3809_v19, %v3681_v56  ;;  %2921 = vmatmul.bf16.gmra.mxu2 %v10621_v15  ;;  %3250 = vmatmul.bf16.gmra.mxu3 %v10621_v15  ;;  %v3427_v49 = vmax.f32 %v2226_v54, %v2555_v45  ;;  %v3816_v54 = vld [vmem:[#allocation2 + $0x248] sm:$0xff] }
 0x553   : > { %4065 = vst [vmem:[#allocation2 + $0x300] sm:$0xff] %v3937_v58  ;;  %v10625_v58 = vld [vmem:[%s13918_s5 + $0x178] sm:$0xff] }
 0x554   : > { %v2882_v27 = vpop.f32.mrf.mxu2  ;;  %v3211_v12 = vpop.f32.mrf.mxu3 }
 0x555   : > { %v3554_v5 = vmax.f32 %v3426_v39, %v2882_v27 }
 0x557   : > { %v3682_v35 = vmax.f32 %v3554_v5, %v3211_v12 }
 0x558   : > { %v2229_v37 = vpop.f32.mrf.mxu0  ;;  %v2558_v53 = vpop.f32.mrf.mxu1 }
 0x559   : > { %v3938_v14 = vmax.f32 %v3810_v23, %v3682_v35  ;;  %v3428_v9 = vmax.f32 %v2229_v37, %v2558_v53  ;;  %v3817_v37 = vld [vmem:[#allocation2 + $0x40] sm:$0xff] }
 0x55b   : > { %4066 = vst [vmem:[#allocation2 + $0xe0] sm:$0xff] %v3938_v14  ;;  %2268 = vmatmul.bf16.gmra.mxu0 %v10622_v13  ;;  %2597 = vmatmul.bf16.gmra.mxu1 %v10622_v13 }
 0x55c   : > { %v2884_v1 = vpop.f32.mrf.mxu2  ;;  %v3213_v52 = vpop.f32.mrf.mxu3 }
 0x55d   : > { %v3555_v34 = vmax.f32 %v3427_v49, %v2884_v1 }
 0x55f   : > { %v3683_v2 = vmax.f32 %v3555_v34, %v3213_v52 }
 0x560   : > { %v2231_v21 = vpop.f32.mrf.mxu0  ;;  %v2560_v61 = vpop.f32.mrf.mxu1 }
 0x561   : > { %v3939_v43 = vmax.f32 %v3811_v32, %v3683_v2  ;;  %2926 = vmatmul.bf16.gmra.mxu2 %v10622_v13  ;;  %3255 = vmatmul.bf16.gmra.mxu3 %v10622_v13  ;;  %v3429_v11 = vmax.f32 %v2231_v21, %v2560_v61  ;;  %v3818_v21 = vld [vmem:[#allocation2 + $0x20] sm:$0xff] }
 0x563   : > { %4067 = vst [vmem:[#allocation2 + $0x178] sm:$0xff] %v3939_v43  ;;  %v10626_v43 = vld [vmem:[%s13918_s5 + $0x180] sm:$0xff] }
 0x564   : > { %v2887_v24 = vpop.f32.mrf.mxu2  ;;  %v3216_v3 = vpop.f32.mrf.mxu3 }
 0x565   : > { %v3556_v29 = vmax.f32 %v3428_v9, %v2887_v24 }
 0x567   : > { %v3684_v26 = vmax.f32 %v3556_v29, %v3216_v3 }
 0x568   : > { %v2234_v0 = vpop.f32.mrf.mxu0  ;;  %v2563_v47 = vpop.f32.mrf.mxu1 }
 0x569   : > { %v3940_v6 = vmax.f32 %v3812_v62, %v3684_v26  ;;  %v3430_v31 = vmax.f32 %v2234_v0, %v2563_v47  ;;  %v3819_v0 = vld [vmem:[#allocation2 + $0xe8] sm:$0xff] }
 0x56b   : > { %4068 = vst [vmem:[#allocation2 + $0x328] sm:$0xff] %v3940_v6  ;;  %2273 = vmatmul.bf16.gmra.mxu0 %v10623_v59  ;;  %2602 = vmatmul.bf16.gmra.mxu1 %v10623_v59 }
 0x56c   : > { %v2889_v25 = vpop.f32.mrf.mxu2  ;;  %v3218_v8 = vpop.f32.mrf.mxu3 }
 0x56d   : > { %v3557_v63 = vmax.f32 %v3429_v11, %v2889_v25 }
 0x56f   : > { %v3685_v20 = vmax.f32 %v3557_v63, %v3218_v8 }
 0x570   : > { %v2236_v60 = vpop.f32.mrf.mxu0  ;;  %v2565_v50 = vpop.f32.mrf.mxu1 }
 0x571   : > { %v3941_v36 = vmax.f32 %v3813_v46, %v3685_v20  ;;  %2931 = vmatmul.bf16.gmra.mxu2 %v10623_v59  ;;  %3260 = vmatmul.bf16.gmra.mxu3 %v10623_v59  ;;  %v3431_v57 = vmax.f32 %v2236_v60, %v2565_v50  ;;  %v3820_v60 = vld [vmem:[#allocation2 + $0x288] sm:$0xff] }
 0x573   : > { %4069 = vst [vmem:[#allocation2 + $0x260] sm:$0xff] %v3941_v36  ;;  %v10627_v36 = vld [vmem:[%s13918_s5 + $0x188] sm:$0xff] }
 0x574   : > { %v2892_v44 = vpop.f32.mrf.mxu2  ;;  %v3221_v30 = vpop.f32.mrf.mxu3 }
 0x575   : > { %v3558_v4 = vmax.f32 %v3430_v31, %v2892_v44 }
 0x577   : > { %v3686_v17 = vmax.f32 %v3558_v4, %v3221_v30 }
 0x578   : > { %v2239_v51 = vpop.f32.mrf.mxu0  ;;  %v2568_v10 = vpop.f32.mrf.mxu1 }
 0x579   : > { %v3942_v48 = vmax.f32 %v3814_v38, %v3686_v17  ;;  %v3432_v16 = vmax.f32 %v2239_v51, %v2568_v10  ;;  %v3821_v51 = vld [vmem:[#allocation2 + $0x3a8] sm:$0xff] }
 0x57b   : > { %4070 = vst [vmem:[#allocation2 + $0x3b8] sm:$0xff] %v3942_v48  ;;  %2278 = vmatmul.bf16.gmra.mxu0 %v10624_v41  ;;  %2607 = vmatmul.bf16.gmra.mxu1 %v10624_v41 }
 0x57c   : > { %v2894_v22 = vpop.f32.mrf.mxu2  ;;  %v3223_v40 = vpop.f32.mrf.mxu3 }
 0x57d   : > { %v3559_v15 = vmax.f32 %v3431_v57, %v2894_v22 }
 0x57f   : > { %v3687_v28 = vmax.f32 %v3559_v15, %v3223_v40 }
 0x580   : > { %v2241_v55 = vpop.f32.mrf.mxu0  ;;  %v2570_v33 = vpop.f32.mrf.mxu1 }
 0x581   : > { %v3943_v7 = vmax.f32 %v3815_v42, %v3687_v28  ;;  %2936 = vmatmul.bf16.gmra.mxu2 %v10624_v41  ;;  %3265 = vmatmul.bf16.gmra.mxu3 %v10624_v41  ;;  %v3433_v5 = vmax.f32 %v2241_v55, %v2570_v33  ;;  %v3822_v55 = vld [vmem:[#allocation2 + $0x3c8] sm:$0xff] }
 0x583   : > { %4071 = vst [vmem:[#allocation2 + $0x2b8] sm:$0xff] %v3943_v7  ;;  %v10628_v7 = vld [vmem:[%s13918_s5 + $0x190] sm:$0xff] }
 0x584   : > { %v2897_v18 = vpop.f32.mrf.mxu2  ;;  %v3226_v19 = vpop.f32.mrf.mxu3 }
 0x585   : > { %v3560_v56 = vmax.f32 %v3432_v16, %v2897_v18 }
 0x587   : > { %v3688_v45 = vmax.f32 %v3560_v56, %v3226_v19 }
 0x588   : > { %v2244_v39 = vpop.f32.mrf.mxu0  ;;  %v2573_v27 = vpop.f32.mrf.mxu1 }
 0x589   : > { %v3944_v12 = vmax.f32 %v3816_v54, %v3688_v45  ;;  %v3434_v52 = vmax.f32 %v2244_v39, %v2573_v27  ;;  %v3823_v39 = vld [vmem:[#allocation2 + $0x160] sm:$0xff] }
 0x58b   : > { %4072 = vst [vmem:[#allocation2 + $0x248] sm:$0xff] %v3944_v12  ;;  %2283 = vmatmul.bf16.gmra.mxu0 %v10625_v58  ;;  %2612 = vmatmul.bf16.gmra.mxu1 %v10625_v58 }
 0x58c   : > { %v2899_v23 = vpop.f32.mrf.mxu2  ;;  %v3228_v35 = vpop.f32.mrf.mxu3 }
 0x58d   : > { %v3561_v13 = vmax.f32 %v3433_v5, %v2899_v23 }
 0x58f   : > { %v3689_v53 = vmax.f32 %v3561_v13, %v3228_v35 }
 0x590   : > { %v2246_v14 = vpop.f32.mrf.mxu0  ;;  %v2575_v49 = vpop.f32.mrf.mxu1 }
 0x591   : > { %v3945_v1 = vmax.f32 %v3817_v37, %v3689_v53  ;;  %2941 = vmatmul.bf16.gmra.mxu2 %v10625_v58  ;;  %3270 = vmatmul.bf16.gmra.mxu3 %v10625_v58  ;;  %v3435_v29 = vmax.f32 %v2246_v14, %v2575_v49  ;;  %v3824_v14 = vld [vmem:[#allocation2 + $0x2c8] sm:$0xff] }
 0x593   : > { %4073 = vst [vmem:[#allocation2 + $0x40] sm:$0xff] %v3945_v1  ;;  %v10629_v1 = vld [vmem:[%s13918_s5 + $0x198] sm:$0xff] }
 0x594   : > { %v2902_v34 = vpop.f32.mrf.mxu2  ;;  %v3231_v32 = vpop.f32.mrf.mxu3 }
 0x595   : > { %v3562_v2 = vmax.f32 %v3434_v52, %v2902_v34 }
 0x597   : > { %v3690_v61 = vmax.f32 %v3562_v2, %v3231_v32 }
 0x598   : > { %v2249_v9 = vpop.f32.mrf.mxu0  ;;  %v2578_v24 = vpop.f32.mrf.mxu1 }
 0x599   : > { %v3946_v3 = vmax.f32 %v3818_v21, %v3690_v61  ;;  %v3436_v8 = vmax.f32 %v2249_v9, %v2578_v24  ;;  %v3825_v9 = vld [vmem:[#allocation2 + $0x210] sm:$0xff] }
 0x59b   : > { %4074 = vst [vmem:[#allocation2 + $0x20] sm:$0xff] %v3946_v3  ;;  %2288 = vmatmul.bf16.gmra.mxu0 %v10626_v43  ;;  %2617 = vmatmul.bf16.gmra.mxu1 %v10626_v43 }
 0x59c   : > { %v2904_v62 = vpop.f32.mrf.mxu2  ;;  %v3233_v26 = vpop.f32.mrf.mxu3 }
 0x59d   : > { %v3563_v59 = vmax.f32 %v3435_v29, %v2904_v62 }
 0x59f   : > { %v3691_v47 = vmax.f32 %v3563_v59, %v3233_v26 }
 0x5a0   : > { %v2251_v6 = vpop.f32.mrf.mxu0  ;;  %v2580_v11 = vpop.f32.mrf.mxu1 }
 0x5a1   : > { %v3947_v25 = vmax.f32 %v3819_v0, %v3691_v47  ;;  %2946 = vmatmul.bf16.gmra.mxu2 %v10626_v43  ;;  %3275 = vmatmul.bf16.gmra.mxu3 %v10626_v43  ;;  %v3437_v4 = vmax.f32 %v2251_v6, %v2580_v11  ;;  %v3826_v6 = vld [vmem:[#allocation2 + $0x3d8] sm:$0xff] }
 0x5a3   : > { %4075 = vst [vmem:[#allocation2 + $0xe8] sm:$0xff] %v3947_v25  ;;  %v10630_v25 = vld [vmem:[%s13918_s5 + $0x1a0] sm:$0xff] }
 0x5a4   : > { %v2907_v63 = vpop.f32.mrf.mxu2  ;;  %v3236_v46 = vpop.f32.mrf.mxu3 }
 0x5a5   : > { %v3564_v20 = vmax.f32 %v3436_v8, %v2907_v63 }
 0x5a7   : > { %v3692_v50 = vmax.f32 %v3564_v20, %v3236_v46 }
 0x5a8   : > { %v2254_v31 = vpop.f32.mrf.mxu0  ;;  %v2583_v44 = vpop.f32.mrf.mxu1 }
 0x5a9   : > { %v3948_v30 = vmax.f32 %v3820_v60, %v3692_v50  ;;  %v3438_v40 = vmax.f32 %v2254_v31, %v2583_v44  ;;  %v3827_v31 = vld [vmem:[#allocation2 + $0x1e8] sm:$0xff] }
 0x5ab   : > { %4076 = vst [vmem:[#allocation2 + $0x288] sm:$0xff] %v3948_v30  ;;  %2293 = vmatmul.bf16.gmra.mxu0 %v10627_v36  ;;  %2622 = vmatmul.bf16.gmra.mxu1 %v10627_v36 }
 0x5ac   : > { %v2909_v38 = vpop.f32.mrf.mxu2  ;;  %v3238_v17 = vpop.f32.mrf.mxu3 }
 0x5ad   : > { %v3565_v41 = vmax.f32 %v3437_v4, %v2909_v38 }
 0x5af   : > { %v3693_v10 = vmax.f32 %v3565_v41, %v3238_v17 }
 0x5b0   : > { %v2256_v48 = vpop.f32.mrf.mxu0  ;;  %v2585_v57 = vpop.f32.mrf.mxu1 }
 0x5b1   : > { %v3949_v22 = vmax.f32 %v3821_v51, %v3693_v10  ;;  %2951 = vmatmul.bf16.gmra.mxu2 %v10627_v36  ;;  %3280 = vmatmul.bf16.gmra.mxu3 %v10627_v36  ;;  %v3439_v56 = vmax.f32 %v2256_v48, %v2585_v57  ;;  %v3828_v48 = vld [vmem:[#allocation2 + $0x1b0] sm:$0xff] }
 0x5b3   : > { %4077 = vst [vmem:[#allocation2 + $0x3a8] sm:$0xff] %v3949_v22  ;;  %v10631_v22 = vld [vmem:[%s13918_s5 + $0x1a8] sm:$0xff] }
 0x5b4   : > { %v2912_v15 = vpop.f32.mrf.mxu2  ;;  %v3241_v42 = vpop.f32.mrf.mxu3 }
 0x5b5   : > { %v3566_v28 = vmax.f32 %v3438_v40, %v2912_v15 }
 0x5b7   : > { %v3694_v33 = vmax.f32 %v3566_v28, %v3241_v42 }
 0x5b8   : > { %v2259_v16 = vpop.f32.mrf.mxu0  ;;  %v2588_v18 = vpop.f32.mrf.mxu1 }
 0x5b9   : > { %v3950_v19 = vmax.f32 %v3822_v55, %v3694_v33  ;;  %v3440_v35 = vmax.f32 %v2259_v16, %v2588_v18  ;;  %v3829_v16 = vld [vmem:[#allocation2 + $0x1c8] sm:$0xff] }
 0x5bb   : > { %4078 = vst [vmem:[#allocation2 + $0x3c8] sm:$0xff] %v3950_v19  ;;  %2298 = vmatmul.bf16.gmra.mxu0 %v10628_v7  ;;  %2627 = vmatmul.bf16.gmra.mxu1 %v10628_v7 }
 0x5bc   : > { %v2914_v54 = vpop.f32.mrf.mxu2  ;;  %v3243_v45 = vpop.f32.mrf.mxu3 }
 0x5bd   : > { %v3567_v58 = vmax.f32 %v3439_v56, %v2914_v54 }
 0x5bf   : > { %v3695_v27 = vmax.f32 %v3567_v58, %v3243_v45 }
 0x5c0   : > { %v2261_v12 = vpop.f32.mrf.mxu0  ;;  %v2590_v5 = vpop.f32.mrf.mxu1 }
 0x5c1   : > { %v3951_v23 = vmax.f32 %v3823_v39, %v3695_v27  ;;  %2956 = vmatmul.bf16.gmra.mxu2 %v10628_v7  ;;  %3285 = vmatmul.bf16.gmra.mxu3 %v10628_v7  ;;  %v3441_v2 = vmax.f32 %v2261_v12, %v2590_v5  ;;  %v3830_v12 = vld [vmem:[#allocation2 + $0x2d0] sm:$0xff] }
 0x5c3   : > { %4079 = vst [vmem:[#allocation2 + $0x160] sm:$0xff] %v3951_v23  ;;  %v10632_v23 = vld [vmem:[%s13918_s5 + $0x1b0] sm:$0xff] }
 0x5c4   : > { %v2917_v13 = vpop.f32.mrf.mxu2  ;;  %v3246_v37 = vpop.f32.mrf.mxu3 }
 0x5c5   : > { %v3568_v53 = vmax.f32 %v3440_v35, %v2917_v13 }
 0x5c7   : > { %v3696_v49 = vmax.f32 %v3568_v53, %v3246_v37 }
 0x5c8   : > { %v2264_v52 = vpop.f32.mrf.mxu0  ;;  %v2593_v34 = vpop.f32.mrf.mxu1 }
 0x5c9   : > { %v3952_v32 = vmax.f32 %v3824_v14, %v3696_v49  ;;  %v3442_v26 = vmax.f32 %v2264_v52, %v2593_v34  ;;  %v3831_v52 = vld [vmem:[#allocation2 + $0x1d0] sm:$0xff] }
 0x5cb   : > { %4080 = vst [vmem:[#allocation2 + $0x2c8] sm:$0xff] %v3952_v32  ;;  %2303 = vmatmul.bf16.gmra.mxu0 %v10629_v1  ;;  %2632 = vmatmul.bf16.gmra.mxu1 %v10629_v1 }
 0x5cc   : > { %v2919_v21 = vpop.f32.mrf.mxu2  ;;  %v3248_v61 = vpop.f32.mrf.mxu3 }
 0x5cd   : > { %v3569_v43 = vmax.f32 %v3441_v2, %v2919_v21 }
 0x5cf   : > { %v3697_v24 = vmax.f32 %v3569_v43, %v3248_v61 }
 0x5d0   : > { %v2266_v3 = vpop.f32.mrf.mxu0  ;;  %v2595_v29 = vpop.f32.mrf.mxu1 }
 0x5d1   : > { %v3953_v62 = vmax.f32 %v3825_v9, %v3697_v24  ;;  %2961 = vmatmul.bf16.gmra.mxu2 %v10629_v1  ;;  %3290 = vmatmul.bf16.gmra.mxu3 %v10629_v1  ;;  %v3443_v20 = vmax.f32 %v2266_v3, %v2595_v29  ;;  %v3832_v3 = vld [vmem:[#allocation2 + $0x58] sm:$0xff] }
 0x5d3   : > { %4081 = vst [vmem:[#allocation2 + $0x210] sm:$0xff] %v3953_v62  ;;  %v10633_v62 = vld [vmem:[%s13918_s5 + $0x1b8] sm:$0xff] }
 0x5d4   : > { %v2922_v59 = vpop.f32.mrf.mxu2  ;;  %v3251_v0 = vpop.f32.mrf.mxu3 }
 0x5d5   : > { %v3570_v47 = vmax.f32 %v3442_v26, %v2922_v59 }
 0x5d7   : > { %v3698_v11 = vmax.f32 %v3570_v47, %v3251_v0 }
 0x5d8   : > { %v2269_v8 = vpop.f32.mrf.mxu0  ;;  %v2598_v63 = vpop.f32.mrf.mxu1 }
 0x5d9   : > { %v3954_v46 = vmax.f32 %v3826_v6, %v3698_v11  ;;  %v3444_v17 = vmax.f32 %v2269_v8, %v2598_v63  ;;  %v3833_v8 = vld [vmem:[#allocation2 + $0x120] sm:$0xff] }
 0x5db   : > { %4082 = vst [vmem:[#allocation2 + $0x3d8] sm:$0xff] %v3954_v46  ;;  %2308 = vmatmul.bf16.gmra.mxu0 %v10630_v25  ;;  %2637 = vmatmul.bf16.gmra.mxu1 %v10630_v25 }
 0x5dc   : > { %v2924_v60 = vpop.f32.mrf.mxu2  ;;  %v3253_v50 = vpop.f32.mrf.mxu3 }
 0x5dd   : > { %v3571_v36 = vmax.f32 %v3443_v20, %v2924_v60 }
 0x5df   : > { %v3699_v44 = vmax.f32 %v3571_v36, %v3253_v50 }
 0x5e0   : > { %v2271_v30 = vpop.f32.mrf.mxu0  ;;  %v2600_v4 = vpop.f32.mrf.mxu1 }
 0x5e1   : > { %v3955_v38 = vmax.f32 %v3827_v31, %v3699_v44  ;;  %2966 = vmatmul.bf16.gmra.mxu2 %v10630_v25  ;;  %3295 = vmatmul.bf16.gmra.mxu3 %v10630_v25  ;;  %v3445_v28 = vmax.f32 %v2271_v30, %v2600_v4  ;;  %v3834_v30 = vld [vmem:[#allocation2 + $0x198] sm:$0xff] }
 0x5e3   : > { %4083 = vst [vmem:[#allocation2 + $0x1e8] sm:$0xff] %v3955_v38  ;;  %v10634_v38 = vld [vmem:[%s13918_s5 + $0x1c0] sm:$0xff] }
 0x5e4   : > { %v2927_v41 = vpop.f32.mrf.mxu2  ;;  %v3256_v51 = vpop.f32.mrf.mxu3 }
 0x5e5   : > { %v3572_v10 = vmax.f32 %v3444_v17, %v2927_v41 }
 0x5e7   : > { %v3700_v57 = vmax.f32 %v3572_v10, %v3256_v51 }
 0x5e8   : > { %v2274_v40 = vpop.f32.mrf.mxu0  ;;  %v2603_v15 = vpop.f32.mrf.mxu1 }
 0x5e9   : > { %v3956_v42 = vmax.f32 %v3828_v48, %v3700_v57  ;;  %v3446_v45 = vmax.f32 %v2274_v40, %v2603_v15  ;;  %v3835_v40 = vld [vmem:[#allocation2 + $0x2e8] sm:$0xff] }
 0x5eb   : > { %4084 = vst [vmem:[#allocation2 + $0x1b0] sm:$0xff] %v3956_v42  ;;  %2313 = vmatmul.bf16.gmra.mxu0 %v10631_v22  ;;  %2642 = vmatmul.bf16.gmra.mxu1 %v10631_v22 }
 0x5ec   : > { %v2929_v55 = vpop.f32.mrf.mxu2  ;;  %v3258_v33 = vpop.f32.mrf.mxu3 }
 0x5ed   : > { %v3573_v7 = vmax.f32 %v3445_v28, %v2929_v55 }
 0x5ef   : > { %v3701_v18 = vmax.f32 %v3573_v7, %v3258_v33 }
 0x5f0   : > { %v2276_v19 = vpop.f32.mrf.mxu0  ;;  %v2605_v56 = vpop.f32.mrf.mxu1 }
 0x5f1   : > { %v3957_v54 = vmax.f32 %v3829_v16, %v3701_v18  ;;  %2971 = vmatmul.bf16.gmra.mxu2 %v10631_v22  ;;  %3300 = vmatmul.bf16.gmra.mxu3 %v10631_v22  ;;  %v3447_v53 = vmax.f32 %v2276_v19, %v2605_v56  ;;  %v3836_v19 = vld [vmem:[#allocation2 + $0x1f8] sm:$0xff] }
 0x5f3   : > { %4085 = vst [vmem:[#allocation2 + $0x1c8] sm:$0xff] %v3957_v54  ;;  %v10635_v54 = vld [vmem:[%s13918_s5 + $0x1c8] sm:$0xff] }
 0x5f4   : > { %v2932_v58 = vpop.f32.mrf.mxu2  ;;  %v3261_v39 = vpop.f32.mrf.mxu3 }
 0x5f5   : > { %v3574_v27 = vmax.f32 %v3446_v45, %v2932_v58 }
 0x5f7   : > { %v3702_v5 = vmax.f32 %v3574_v27, %v3261_v39 }
 0x5f8   : > { %v2279_v35 = vpop.f32.mrf.mxu0  ;;  %v2608_v13 = vpop.f32.mrf.mxu1 }
 0x5f9   : > { %v3958_v37 = vmax.f32 %v3830_v12, %v3702_v5  ;;  %v3448_v61 = vmax.f32 %v2279_v35, %v2608_v13  ;;  %v3837_v35 = vld [vmem:[#allocation2 + $0x238] sm:$0xff] }
 0x5fb   : > { %4086 = vst [vmem:[#allocation2 + $0x2d0] sm:$0xff] %v3958_v37  ;;  %2318 = vmatmul.bf16.gmra.mxu0 %v10632_v23  ;;  %2647 = vmatmul.bf16.gmra.mxu1 %v10632_v23 }
 0x5fc   : > { %v2934_v14 = vpop.f32.mrf.mxu2  ;;  %v3263_v49 = vpop.f32.mrf.mxu3 }
 0x5fd   : > { %v3575_v1 = vmax.f32 %v3447_v53, %v2934_v14 }
 0x5ff   : > { %v3703_v34 = vmax.f32 %v3575_v1, %v3263_v49 }
 0x600   : > { %v2281_v32 = vpop.f32.mrf.mxu0  ;;  %v2610_v2 = vpop.f32.mrf.mxu1 }
 0x601   : > { %v3959_v21 = vmax.f32 %v3831_v52, %v3703_v34  ;;  %2976 = vmatmul.bf16.gmra.mxu2 %v10632_v23  ;;  %3305 = vmatmul.bf16.gmra.mxu3 %v10632_v23  ;;  %v3449_v47 = vmax.f32 %v2281_v32, %v2610_v2  ;;  %v3838_v32 = vld [vmem:[#allocation2 + $0x398] sm:$0xff] }
 0x603   : > { %4087 = vst [vmem:[#allocation2 + $0x1d0] sm:$0xff] %v3959_v21  ;;  %v10636_v21 = vld [vmem:[%s13918_s5 + $0x1d0] sm:$0xff] }
 0x604   : > { %v2937_v43 = vpop.f32.mrf.mxu2  ;;  %v3266_v9 = vpop.f32.mrf.mxu3 }
 0x605   : > { %v3576_v24 = vmax.f32 %v3448_v61, %v2937_v43 }
 0x607   : > { %v3704_v29 = vmax.f32 %v3576_v24, %v3266_v9 }
 0x608   : > { %v2284_v26 = vpop.f32.mrf.mxu0  ;;  %v2613_v59 = vpop.f32.mrf.mxu1 }
 0x609   : > { %v3960_v0 = vmax.f32 %v3832_v3, %v3704_v29  ;;  %v3450_v50 = vmax.f32 %v2284_v26, %v2613_v59  ;;  %v3839_v26 = vld [vmem:[#allocation2 + $0x390] sm:$0xff] }
 0x60b   : > { %4088 = vst [vmem:[#allocation2 + $0x58] sm:$0xff] %v3960_v0  ;;  %2323 = vmatmul.bf16.gmra.mxu0 %v10633_v62  ;;  %2652 = vmatmul.bf16.gmra.mxu1 %v10633_v62 }
 0x60c   : > { %v2939_v6 = vpop.f32.mrf.mxu2  ;;  %v3268_v11 = vpop.f32.mrf.mxu3 }
 0x60d   : > { %v3577_v25 = vmax.f32 %v3449_v47, %v2939_v6 }
 0x60f   : > { %v3705_v63 = vmax.f32 %v3577_v25, %v3268_v11 }
 0x610   : > { %v2286_v46 = vpop.f32.mrf.mxu0  ;;  %v2615_v20 = vpop.f32.mrf.mxu1 }
 0x611   : > { %v3961_v60 = vmax.f32 %v3833_v8, %v3705_v63  ;;  %2981 = vmatmul.bf16.gmra.mxu2 %v10633_v62  ;;  %3310 = vmatmul.bf16.gmra.mxu3 %v10633_v62  ;;  %v3451_v10 = vmax.f32 %v2286_v46, %v2615_v20  ;;  %v3840_v46 = vld [vmem:[#allocation2 + $0x1a0] sm:$0xff] }
 0x613   : > { %4089 = vst [vmem:[#allocation2 + $0x120] sm:$0xff] %v3961_v60  ;;  %v10637_v60 = vld [vmem:[%s13918_s5 + $0x1d8] sm:$0xff] }
 0x614   : > { %v2942_v36 = vpop.f32.mrf.mxu2  ;;  %v3271_v31 = vpop.f32.mrf.mxu3 }
 0x615   : > { %v3578_v44 = vmax.f32 %v3450_v50, %v2942_v36 }
 0x617   : > { %v3706_v4 = vmax.f32 %v3578_v44, %v3271_v31 }
 0x618   : > { %v2289_v17 = vpop.f32.mrf.mxu0  ;;  %v2618_v41 = vpop.f32.mrf.mxu1 }
 0x619   : > { %v3962_v51 = vmax.f32 %v3834_v30, %v3706_v4  ;;  %v3452_v33 = vmax.f32 %v2289_v17, %v2618_v41  ;;  %v3841_v17 = vld [vmem:[#allocation2 + $0xa8] sm:$0xff] }
 0x61b   : > { %4090 = vst [vmem:[#allocation2 + $0x198] sm:$0xff] %v3962_v51  ;;  %2328 = vmatmul.bf16.gmra.mxu0 %v10634_v38  ;;  %2657 = vmatmul.bf16.gmra.mxu1 %v10634_v38 }
 0x61c   : > { %v2944_v48 = vpop.f32.mrf.mxu2  ;;  %v3273_v57 = vpop.f32.mrf.mxu3 }
 0x61d   : > { %v3579_v22 = vmax.f32 %v3451_v10, %v2944_v48 }
 0x61f   : > { %v3707_v15 = vmax.f32 %v3579_v22, %v3273_v57 }
 0x620   : > { %v2291_v42 = vpop.f32.mrf.mxu0  ;;  %v2620_v28 = vpop.f32.mrf.mxu1 }
 0x621   : > { %v3963_v55 = vmax.f32 %v3835_v40, %v3707_v15  ;;  %2986 = vmatmul.bf16.gmra.mxu2 %v10634_v38  ;;  %3315 = vmatmul.bf16.gmra.mxu3 %v10634_v38  ;;  %v3453_v27 = vmax.f32 %v2291_v42, %v2620_v28  ;;  %v3842_v42 = vld [vmem:[#allocation2 + $0x258] sm:$0xff] }
 0x623   : > { %4091 = vst [vmem:[#allocation2 + $0x2e8] sm:$0xff] %v3963_v55  ;;  %v10638_v55 = vld [vmem:[%s13918_s5 + $0x1e0] sm:$0xff] }
 0x624   : > { %v2947_v7 = vpop.f32.mrf.mxu2  ;;  %v3276_v16 = vpop.f32.mrf.mxu3 }
 0x625   : > { %v3580_v18 = vmax.f32 %v3452_v33, %v2947_v7 }
 0x627   : > { %v3708_v56 = vmax.f32 %v3580_v18, %v3276_v16 }
 0x628   : > { %v2294_v45 = vpop.f32.mrf.mxu0  ;;  %v2623_v58 = vpop.f32.mrf.mxu1 }
 0x629   : > { %v3964_v39 = vmax.f32 %v3836_v19, %v3708_v56  ;;  %v3454_v49 = vmax.f32 %v2294_v45, %v2623_v58  ;;  %v3843_v45 = vld [vmem:[#allocation2 + $0x2d8] sm:$0xff] }
 0x62b   : > { %4092 = vst [vmem:[#allocation2 + $0x1f8] sm:$0xff] %v3964_v39  ;;  %2333 = vmatmul.bf16.gmra.mxu0 %v10635_v54  ;;  %2662 = vmatmul.bf16.gmra.mxu1 %v10635_v54 }
 0x62c   : > { %v2949_v12 = vpop.f32.mrf.mxu2  ;;  %v3278_v5 = vpop.f32.mrf.mxu3 }
 0x62d   : > { %v3581_v23 = vmax.f32 %v3453_v27, %v2949_v12 }
 0x62f   : > { %v3709_v13 = vmax.f32 %v3581_v23, %v3278_v5 }
 0x630   : > { %v2296_v37 = vpop.f32.mrf.mxu0  ;;  %v2625_v53 = vpop.f32.mrf.mxu1 }
 0x631   : > { %v3965_v14 = vmax.f32 %v3837_v35, %v3709_v13  ;;  %2991 = vmatmul.bf16.gmra.mxu2 %v10635_v54  ;;  %3320 = vmatmul.bf16.gmra.mxu3 %v10635_v54  ;;  %v3455_v24 = vmax.f32 %v2296_v37, %v2625_v53  ;;  %v3844_v37 = vld [vmem:[#allocation2 + $0xf0] sm:$0xff] }
 0x633   : > { %4093 = vst [vmem:[#allocation2 + $0x238] sm:$0xff] %v3965_v14  ;;  %v10639_v14 = vld [vmem:[%s13918_s5 + $0x1e8] sm:$0xff] }
 0x634   : > { %v2952_v1 = vpop.f32.mrf.mxu2  ;;  %v3281_v52 = vpop.f32.mrf.mxu3 }
 0x635   : > { %v3582_v34 = vmax.f32 %v3454_v49, %v2952_v1 }
 0x637   : > { %v3710_v2 = vmax.f32 %v3582_v34, %v3281_v52 }
 0x638   : > { %v2299_v61 = vpop.f32.mrf.mxu0  ;;  %v2628_v43 = vpop.f32.mrf.mxu1 }
 0x639   : > { %v3966_v9 = vmax.f32 %v3838_v32, %v3710_v2  ;;  %v3456_v11 = vmax.f32 %v2299_v61, %v2628_v43  ;;  %v3845_v61 = vld [vmem:[#allocation2 + $0x180] sm:$0xff] }
 0x63b   : > { %4094 = vst [vmem:[#allocation2 + $0x398] sm:$0xff] %v3966_v9  ;;  %2338 = vmatmul.bf16.gmra.mxu0 %v10636_v21  ;;  %2667 = vmatmul.bf16.gmra.mxu1 %v10636_v21 }
 0x63c   : > { %v2954_v3 = vpop.f32.mrf.mxu2  ;;  %v3283_v29 = vpop.f32.mrf.mxu3 }
 0x63d   : > { %v3583_v62 = vmax.f32 %v3455_v24, %v2954_v3 }
 0x63f   : > { %v3711_v59 = vmax.f32 %v3583_v62, %v3283_v29 }
 0x640   : > { %v2301_v0 = vpop.f32.mrf.mxu0  ;;  %v2630_v47 = vpop.f32.mrf.mxu1 }
 0x641   : > { %v3967_v6 = vmax.f32 %v3839_v26, %v3711_v59  ;;  %2996 = vmatmul.bf16.gmra.mxu2 %v10636_v21  ;;  %3325 = vmatmul.bf16.gmra.mxu3 %v10636_v21  ;;  %v3457_v44 = vmax.f32 %v2301_v0, %v2630_v47  ;;  %v3846_v0 = vld [vmem:[#allocation2 + $0x170] sm:$0xff] }
 0x643   : > { %4095 = vst [vmem:[#allocation2 + $0x390] sm:$0xff] %v3967_v6  ;;  %v10640_v6 = vld [vmem:[%s13918_s5 + $0x1f0] sm:$0xff] }
 0x644   : > { %v2957_v25 = vpop.f32.mrf.mxu2  ;;  %v3286_v8 = vpop.f32.mrf.mxu3 }
 0x645   : > { %v3584_v63 = vmax.f32 %v3456_v11, %v2957_v25 }
 0x647   : > { %v3712_v20 = vmax.f32 %v3584_v63, %v3286_v8 }
 0x648   : > { %v2304_v50 = vpop.f32.mrf.mxu0  ;;  %v2633_v36 = vpop.f32.mrf.mxu1 }
 0x649   : > { %v3968_v31 = vmax.f32 %v3840_v46, %v3712_v20  ;;  %v3458_v57 = vmax.f32 %v2304_v50, %v2633_v36  ;;  %v3847_v50 = vld [vmem:[#allocation2 + $0x3d0] sm:$0xff] }
 0x64b   : > { %4096 = vst [vmem:[#allocation2 + $0x1a0] sm:$0xff] %v3968_v31  ;;  %2343 = vmatmul.bf16.gmra.mxu0 %v10637_v60  ;;  %2672 = vmatmul.bf16.gmra.mxu1 %v10637_v60 }
 0x64c   : > { %v2959_v30 = vpop.f32.mrf.mxu2  ;;  %v3288_v4 = vpop.f32.mrf.mxu3 }
 0x64d   : > { %v3585_v38 = vmax.f32 %v3457_v44, %v2959_v30 }
 0x64f   : > { %v3713_v41 = vmax.f32 %v3585_v38, %v3288_v4 }
 0x650   : > { %v2306_v51 = vpop.f32.mrf.mxu0  ;;  %v2635_v10 = vpop.f32.mrf.mxu1 }
 0x651   : > { %v3969_v48 = vmax.f32 %v3841_v17, %v3713_v41  ;;  %3001 = vmatmul.bf16.gmra.mxu2 %v10637_v60  ;;  %3330 = vmatmul.bf16.gmra.mxu3 %v10637_v60  ;;  %v3459_v18 = vmax.f32 %v2306_v51, %v2635_v10  ;;  %v3848_v51 = vld [vmem:[#allocation2 + $0x250] sm:$0xff] }
 0x653   : > { %4097 = vst [vmem:[#allocation2 + $0xa8] sm:$0xff] %v3969_v48  ;;  %v10641_v48 = vld [vmem:[%s13918_s5 + $0x1f8] sm:$0xff] }
 0x654   : > { %v2962_v22 = vpop.f32.mrf.mxu2  ;;  %v3291_v40 = vpop.f32.mrf.mxu3 }
 0x655   : > { %v3586_v15 = vmax.f32 %v3458_v57, %v2962_v22 }
 0x657   : > { %v3714_v28 = vmax.f32 %v3586_v15, %v3291_v40 }
 0x658   : > { %v2309_v33 = vpop.f32.mrf.mxu0  ;;  %v2638_v7 = vpop.f32.mrf.mxu1 }
 0x659   : > { %v3970_v16 = vmax.f32 %v3842_v42, %v3714_v28  ;;  %v3460_v5 = vmax.f32 %v2309_v33, %v2638_v7  ;;  %v3849_v33 = vld [vmem:[#allocation2 + $0x378] sm:$0xff] }
 0x65b   : > { %4098 = vst [vmem:[#allocation2 + $0x258] sm:$0xff] %v3970_v16  ;;  %2348 = vmatmul.bf16.gmra.mxu0 %v10638_v55  ;;  %2677 = vmatmul.bf16.gmra.mxu1 %v10638_v55 }
 0x65c   : > { %v2964_v19 = vpop.f32.mrf.mxu2  ;;  %v3293_v56 = vpop.f32.mrf.mxu3 }
 0x65d   : > { %v3587_v54 = vmax.f32 %v3459_v18, %v2964_v19 }
 0x65f   : > { %v3715_v58 = vmax.f32 %v3587_v54, %v3293_v56 }
 0x660   : > { %v2311_v39 = vpop.f32.mrf.mxu0  ;;  %v2640_v27 = vpop.f32.mrf.mxu1 }
 0x661   : > { %v3971_v12 = vmax.f32 %v3843_v45, %v3715_v58  ;;  %3006 = vmatmul.bf16.gmra.mxu2 %v10638_v55  ;;  %3335 = vmatmul.bf16.gmra.mxu3 %v10638_v55  ;;  %v3461_v34 = vmax.f32 %v2311_v39, %v2640_v27  ;;  %v3850_v39 = vld [vmem:[#allocation2 + $0xb8] sm:$0xff] }
 0x663   : > { %4099 = vst [vmem:[#allocation2 + $0x2d8] sm:$0xff] %v3971_v12 }
 0x664   : > { %v2967_v23 = vpop.f32.mrf.mxu2  ;;  %v3296_v35 = vpop.f32.mrf.mxu3 }
 0x665   : > { %v3588_v13 = vmax.f32 %v3460_v5, %v2967_v23 }
 0x667   : > { %v3716_v53 = vmax.f32 %v3588_v13, %v3296_v35 }
 0x668   : > { %v2314_v49 = vpop.f32.mrf.mxu0  ;;  %v2643_v1 = vpop.f32.mrf.mxu1 }
 0x669   : > { %v3972_v52 = vmax.f32 %v3844_v37, %v3716_v53  ;;  %v3462_v29 = vmax.f32 %v2314_v49, %v2643_v1 }
 0x66b   : > { %4100 = vst [vmem:[#allocation2 + $0xf0] sm:$0xff] %v3972_v52  ;;  %2353 = vmatmul.bf16.gmra.mxu0 %v10639_v14  ;;  %2682 = vmatmul.bf16.gmra.mxu1 %v10639_v14 }
 0x66c   : > { %v2969_v32 = vpop.f32.mrf.mxu2  ;;  %v3298_v2 = vpop.f32.mrf.mxu3 }
 0x66d   : > { %v3589_v21 = vmax.f32 %v3461_v34, %v2969_v32 }
 0x66f   : > { %v3717_v43 = vmax.f32 %v3589_v21, %v3298_v2 }
 0x670   : > { %v2316_v9 = vpop.f32.mrf.mxu0  ;;  %v2645_v24 = vpop.f32.mrf.mxu1 }
 0x671   : > { %v3973_v3 = vmax.f32 %v3845_v61, %v3717_v43  ;;  %3011 = vmatmul.bf16.gmra.mxu2 %v10639_v14  ;;  %3340 = vmatmul.bf16.gmra.mxu3 %v10639_v14  ;;  %v3463_v63 = vmax.f32 %v2316_v9, %v2645_v24  ;;  %v3851_v14 = vld [vmem:[#allocation2 + $0x38] sm:$0xff] }
 0x672   : > { %v3852_v43 = vld [vmem:[#allocation2 + $0x78] sm:$0xff] }
 0x673   : > { %4101 = vst [vmem:[#allocation2 + $0x180] sm:$0xff] %v3973_v3 }
 0x674   : > { %v2972_v62 = vpop.f32.mrf.mxu2  ;;  %v3301_v26 = vpop.f32.mrf.mxu3 }
 0x675   : > { %v3590_v59 = vmax.f32 %v3462_v29, %v2972_v62 }
 0x677   : > { %v3718_v47 = vmax.f32 %v3590_v59, %v3301_v26 }
 0x678   : > { %v2319_v11 = vpop.f32.mrf.mxu0  ;;  %v2648_v25 = vpop.f32.mrf.mxu1 }
 0x679   : > { %v3974_v8 = vmax.f32 %v3846_v0, %v3718_v47  ;;  %v3464_v4 = vmax.f32 %v2319_v11, %v2648_v25  ;;  %v3853_v47 = vld [vmem:[#allocation2 + $0x308] sm:$0xff] }
 0x67b   : > { %4102 = vst [vmem:[#allocation2 + $0x170] sm:$0xff] %v3974_v8  ;;  %2358 = vmatmul.bf16.gmra.mxu0 %v10640_v6  ;;  %2687 = vmatmul.bf16.gmra.mxu1 %v10640_v6 }
 0x67c   : > { %v2974_v46 = vpop.f32.mrf.mxu2  ;;  %v3303_v20 = vpop.f32.mrf.mxu3 }
 0x67d   : > { %v3591_v60 = vmax.f32 %v3463_v63, %v2974_v46 }
 0x67f   : > { %v3719_v36 = vmax.f32 %v3591_v60, %v3303_v20 }
 0x680   : > { %v2321_v31 = vpop.f32.mrf.mxu0  ;;  %v2650_v44 = vpop.f32.mrf.mxu1 }
 0x681   : > { %v3975_v30 = vmax.f32 %v3847_v50, %v3719_v36  ;;  %3016 = vmatmul.bf16.gmra.mxu2 %v10640_v6  ;;  %3345 = vmatmul.bf16.gmra.mxu3 %v10640_v6  ;;  %v3465_v15 = vmax.f32 %v2321_v31, %v2650_v44  ;;  %v3854_v50 = vld [vmem:[#allocation2 + $0x370] sm:$0xff] }
 0x683   : > { %4103 = vst [vmem:[#allocation2 + $0x3d0] sm:$0xff] %v3975_v30 }
 0x684   : > { %v2977_v38 = vpop.f32.mrf.mxu2  ;;  %v3306_v17 = vpop.f32.mrf.mxu3 }
 0x685   : > { %v3592_v41 = vmax.f32 %v3464_v4, %v2977_v38 }
 0x687   : > { %v3720_v10 = vmax.f32 %v3592_v41, %v3306_v17 }
 0x688   : > { %v2324_v57 = vpop.f32.mrf.mxu0  ;;  %v2653_v22 = vpop.f32.mrf.mxu1 }
 0x689   : > { %v3976_v40 = vmax.f32 %v3848_v51, %v3720_v10  ;;  %v3466_v56 = vmax.f32 %v2324_v57, %v2653_v22  ;;  %v3855_v51 = vld [vmem:[#allocation2 + $0xc8] sm:$0xff] }
 0x68b   : > { %4104 = vst [vmem:[#allocation2 + $0x250] sm:$0xff] %v3976_v40  ;;  %2363 = vmatmul.bf16.gmra.mxu0 %v10641_v48  ;;  %2692 = vmatmul.bf16.gmra.mxu1 %v10641_v48 }
 0x68c   : > { %v2979_v42 = vpop.f32.mrf.mxu2  ;;  %v3308_v28 = vpop.f32.mrf.mxu3 }
 0x68d   : > { %v3593_v55 = vmax.f32 %v3465_v15, %v2979_v42 }
 0x68f   : > { %v3721_v7 = vmax.f32 %v3593_v55, %v3308_v28  ;;  %v3856_v55 = vld [vmem:[#allocation2 + $0x278] sm:$0xff] }
 0x690   : > { %v2326_v16 = vpop.f32.mrf.mxu0  ;;  %v2655_v18 = vpop.f32.mrf.mxu1 }
 0x691   : > { %v3977_v19 = vmax.f32 %v3849_v33, %v3721_v7  ;;  %3021 = vmatmul.bf16.gmra.mxu2 %v10641_v48  ;;  %3350 = vmatmul.bf16.gmra.mxu3 %v10641_v48  ;;  %v3467_v35 = vmax.f32 %v2326_v16, %v2655_v18 }
 0x693   : > { %4105 = vst [vmem:[#allocation2 + $0x378] sm:$0xff] %v3977_v19 }
 0x694   : > { %v2982_v54 = vpop.f32.mrf.mxu2  ;;  %v3311_v45 = vpop.f32.mrf.mxu3 }
 0x695   : > { %v3594_v58 = vmax.f32 %v3466_v56, %v2982_v54 }
 0x697   : > { %v3722_v27 = vmax.f32 %v3594_v58, %v3311_v45  ;;  %v3857_v58 = vld [vmem:[#allocation2 + $0x360] sm:$0xff] }
 0x698   : > { %v2329_v12 = vpop.f32.mrf.mxu0  ;;  %v2658_v5 = vpop.f32.mrf.mxu1 }
 0x699   : > { %v3978_v23 = vmax.f32 %v3850_v39, %v3722_v27  ;;  %v3468_v32 = vmax.f32 %v2329_v12, %v2658_v5 }
 0x69b   : > { %4106 = vst [vmem:[#allocation2 + $0xb8] sm:$0xff] %v3978_v23 }
 0x69c   : > { %v2984_v13 = vpop.f32.mrf.mxu2  ;;  %v3313_v37 = vpop.f32.mrf.mxu3 }
 0x69d   : > { %v3595_v53 = vmax.f32 %v3467_v35, %v2984_v13 }
 0x69f   : > { %v3723_v49 = vmax.f32 %v3595_v53, %v3313_v37  ;;  %v3858_v53 = vld [vmem:[#allocation2 + $0x228] sm:$0xff] }
 0x6a0   : > { %v2331_v1 = vpop.f32.mrf.mxu0  ;;  %v2660_v52 = vpop.f32.mrf.mxu1 }
 0x6a1   : > { %v3979_v34 = vmax.f32 %v3851_v14, %v3723_v49  ;;  %v3469_v62 = vmax.f32 %v2331_v1, %v2660_v52 }
 0x6a3   : > { %4107 = vst [vmem:[#allocation2 + $0x38] sm:$0xff] %v3979_v34 }
 0x6a4   : > { %v2987_v2 = vpop.f32.mrf.mxu2  ;;  %v3316_v21 = vpop.f32.mrf.mxu3 }
 0x6a5   : > { %v3596_v61 = vmax.f32 %v3468_v32, %v2987_v2 }
 0x6a7   : > { %v3724_v9 = vmax.f32 %v3596_v61, %v3316_v21  ;;  %v3859_v61 = vld [vmem:[#allocation2 + $0x348] sm:$0xff] }
 0x6a8   : > { %v2334_v24 = vpop.f32.mrf.mxu0  ;;  %v2663_v3 = vpop.f32.mrf.mxu1 }
 0x6a9   : > { %v3980_v29 = vmax.f32 %v3852_v43, %v3724_v9  ;;  %v3470_v63 = vmax.f32 %v2334_v24, %v2663_v3 }
 0x6ab   : > { %4108 = vst [vmem:[#allocation2 + $0x78] sm:$0xff] %v3980_v29 }
 0x6ac   : > { %v2989_v26 = vpop.f32.mrf.mxu2  ;;  %v3318_v59 = vpop.f32.mrf.mxu3 }
 0x6ad   : > { %v3597_v0 = vmax.f32 %v3469_v62, %v2989_v26 }
 0x6af   : > { %v3725_v6 = vmax.f32 %v3597_v0, %v3318_v59  ;;  %v3860_v0 = vld [vmem:[#allocation2 + $0x148] sm:$0xff] }
 0x6b0   : > { %v2336_v11 = vpop.f32.mrf.mxu0  ;;  %v2665_v25 = vpop.f32.mrf.mxu1 }
 0x6b1   : > { %v3981_v8 = vmax.f32 %v3853_v47, %v3725_v6  ;;  %v3471_v4 = vmax.f32 %v2336_v11, %v2665_v25 }
 0x6b3   : > { %4109 = vst [vmem:[#allocation2 + $0x308] sm:$0xff] %v3981_v8 }
 0x6b4   : > { %v2992_v46 = vpop.f32.mrf.mxu2  ;;  %v3321_v20 = vpop.f32.mrf.mxu3 }
 0x6b5   : > { %v3598_v60 = vmax.f32 %v3470_v63, %v2992_v46 }
 0x6b7   : > { %v3726_v36 = vmax.f32 %v3598_v60, %v3321_v20  ;;  %v3861_v60 = vld [vmem:[#allocation2 + $0xf8] sm:$0xff] }
 0x6b8   : > { %v2339_v31 = vpop.f32.mrf.mxu0  ;;  %v2668_v44 = vpop.f32.mrf.mxu1 }
 0x6b9   : > { %v3982_v30 = vmax.f32 %v3854_v50, %v3726_v36  ;;  %v3472_v40 = vmax.f32 %v2339_v31, %v2668_v44 }
 0x6bb   : > { %4110 = vst [vmem:[#allocation2 + $0x370] sm:$0xff] %v3982_v30 }
 0x6bc   : > { %v2994_v38 = vpop.f32.mrf.mxu2  ;;  %v3323_v17 = vpop.f32.mrf.mxu3 }
 0x6bd   : > { %v3599_v41 = vmax.f32 %v3471_v4, %v2994_v38 }
 0x6bf   : > { %v3727_v10 = vmax.f32 %v3599_v41, %v3323_v17  ;;  %v3862_v41 = vld [vmem:[#allocation2 + $0x68] sm:$0xff] }
 0x6c0   : > { %v2341_v48 = vpop.f32.mrf.mxu0  ;;  %v2670_v57 = vpop.f32.mrf.mxu1 }
 0x6c1   : > { %v3983_v22 = vmax.f32 %v3855_v51, %v3727_v10  ;;  %v3473_v19 = vmax.f32 %v2341_v48, %v2670_v57 }
 0x6c3   : > { %4111 = vst [vmem:[#allocation2 + $0xc8] sm:$0xff] %v3983_v22 }
 0x6c4   : > { %v2997_v15 = vpop.f32.mrf.mxu2  ;;  %v3326_v42 = vpop.f32.mrf.mxu3 }
 0x6c5   : > { %v3600_v28 = vmax.f32 %v3472_v40, %v2997_v15 }
 0x6c7   : > { %v3728_v33 = vmax.f32 %v3600_v28, %v3326_v42  ;;  %v3863_v28 = vld [vmem:[#allocation2] sm:$0xff] }
 0x6c8   : > { %v2344_v7 = vpop.f32.mrf.mxu0  ;;  %v2673_v16 = vpop.f32.mrf.mxu1 }
 0x6c9   : > { %v3984_v18 = vmax.f32 %v3856_v55, %v3728_v33  ;;  %v3474_v23 = vmax.f32 %v2344_v7, %v2673_v16 }
 0x6cb   : > { %4112 = vst [vmem:[#allocation2 + $0x278] sm:$0xff] %v3984_v18 }
 0x6cc   : > { %v2999_v56 = vpop.f32.mrf.mxu2  ;;  %v3328_v54 = vpop.f32.mrf.mxu3 }
 0x6cd   : > { %v3601_v45 = vmax.f32 %v3473_v19, %v2999_v56 }
 0x6cf   : > { %v3729_v39 = vmax.f32 %v3601_v45, %v3328_v54  ;;  %v3864_v45 = vld [vmem:[#allocation2 + $0x298] sm:$0xff] }
 0x6d0   : > { %v2346_v27 = vpop.f32.mrf.mxu0  ;;  %v2675_v12 = vpop.f32.mrf.mxu1 }
 0x6d1   : > { %v3985_v5 = vmax.f32 %v3857_v58, %v3729_v39  ;;  %v3475_v34 = vmax.f32 %v2346_v27, %v2675_v12 }
 0x6d3   : > { %4113 = vst [vmem:[#allocation2 + $0x360] sm:$0xff] %v3985_v5 }
 0x6d4   : > { %v3002_v35 = vpop.f32.mrf.mxu2  ;;  %v3331_v13 = vpop.f32.mrf.mxu3 }
 0x6d5   : > { %v3602_v37 = vmax.f32 %v3474_v23, %v3002_v35  ;;  %v3865_v35 = vld [vmem:[#allocation2 + $0x270] sm:$0xff] }
 0x6d7   : > { %v3730_v14 = vmax.f32 %v3602_v37, %v3331_v13 }
 0x6d8   : > { %v2349_v49 = vpop.f32.mrf.mxu0  ;;  %v2678_v1 = vpop.f32.mrf.mxu1 }
 0x6d9   : > { %v3986_v52 = vmax.f32 %v3858_v53, %v3730_v14  ;;  %v3476_v29 = vmax.f32 %v2349_v49, %v2678_v1 }
 0x6db   : > { %4114 = vst [vmem:[#allocation2 + $0x228] sm:$0xff] %v3986_v52 }
 0x6dc   : > { %v3004_v32 = vpop.f32.mrf.mxu2  ;;  %v3333_v2 = vpop.f32.mrf.mxu3 }
 0x6dd   : > { %v3603_v21 = vmax.f32 %v3475_v34, %v3004_v32  ;;  %v3866_v32 = vld [vmem:[#allocation2 + $0x310] sm:$0xff] }
 0x6df   : > { %v3731_v43 = vmax.f32 %v3603_v21, %v3333_v2 }
 0x6e0   : > { %v2351_v9 = vpop.f32.mrf.mxu0  ;;  %v2680_v24 = vpop.f32.mrf.mxu1 }
 0x6e1   : > { %v3987_v3 = vmax.f32 %v3859_v61, %v3731_v43  ;;  %v3477_v8 = vmax.f32 %v2351_v9, %v2680_v24 }
 0x6e3   : > { %4115 = vst [vmem:[#allocation2 + $0x348] sm:$0xff] %v3987_v3 }
 0x6e4   : > { %v3007_v62 = vpop.f32.mrf.mxu2  ;;  %v3336_v26 = vpop.f32.mrf.mxu3 }
 0x6e5   : > { %v3604_v59 = vmax.f32 %v3476_v29, %v3007_v62  ;;  %v3867_v62 = vld [vmem:[#allocation2 + $0x190] sm:$0xff] }
 0x6e7   : > { %v3732_v47 = vmax.f32 %v3604_v59, %v3336_v26 }
 0x6e8   : > { %v2354_v6 = vpop.f32.mrf.mxu0  ;;  %v2683_v11 = vpop.f32.mrf.mxu1 }
 0x6e9   : > { %v3988_v25 = vmax.f32 %v3860_v0, %v3732_v47  ;;  %v3478_v30 = vmax.f32 %v2354_v6, %v2683_v11 }
 0x6eb   : > { %4116 = vst [vmem:[#allocation2 + $0x148] sm:$0xff] %v3988_v25 }
 0x6ec   : > { %v3009_v63 = vpop.f32.mrf.mxu2  ;;  %v3338_v46 = vpop.f32.mrf.mxu3 }
 0x6ed   : > { %v3605_v20 = vmax.f32 %v3477_v8, %v3009_v63 }
 0x6ef   : > { %v3733_v50 = vmax.f32 %v3605_v20, %v3338_v46 }
 0x6f0   : > { %v2356_v36 = vpop.f32.mrf.mxu0  ;;  %v2685_v31 = vpop.f32.mrf.mxu1 }
 0x6f1   : > { %v3989_v44 = vmax.f32 %v3861_v60, %v3733_v50  ;;  %v3479_v22 = vmax.f32 %v2356_v36, %v2685_v31 }
 0x6f3   : > { %4117 = vst [vmem:[#allocation2 + $0xf8] sm:$0xff] %v3989_v44 }
 0x6f4   : > { %v3012_v4 = vpop.f32.mrf.mxu2  ;;  %v3341_v38 = vpop.f32.mrf.mxu3 }
 0x6f5   : > { %v3606_v17 = vmax.f32 %v3478_v30, %v3012_v4 }
 0x6f7   : > { %v3734_v51 = vmax.f32 %v3606_v17, %v3341_v38 }
 0x6f8   : > { %v2359_v48 = vpop.f32.mrf.mxu0  ;;  %v2688_v57 = vpop.f32.mrf.mxu1 }
 0x6f9   : > { %v3990_v10 = vmax.f32 %v3862_v41, %v3734_v51  ;;  %v3480_v7 = vmax.f32 %v2359_v48, %v2688_v57 }
 0x6fb   : > { %4118 = vst [vmem:[#allocation2 + $0x68] sm:$0xff] %v3990_v10 }
 0x6fc   : > { %v3014_v40 = vpop.f32.mrf.mxu2  ;;  %v3343_v15 = vpop.f32.mrf.mxu3 }
 0x6fd   : > { %v3607_v42 = vmax.f32 %v3479_v22, %v3014_v40 }
 0x6ff   : > { %v3735_v55 = vmax.f32 %v3607_v42, %v3343_v15 }
 0x700   : > { %v2361_v16 = vpop.f32.mrf.mxu0  ;;  %v2690_v18 = vpop.f32.mrf.mxu1 }
 0x701   : > { %v3991_v33 = vmax.f32 %v3863_v28, %v3735_v55  ;;  %v3481_v27 = vmax.f32 %v2361_v16, %v2690_v18 }
 0x703   : > { %4119 = vst [vmem:[#allocation2] sm:$0xff] %v3991_v33 }
 0x704   : > { %v3017_v19 = vpop.f32.mrf.mxu2  ;;  %v3346_v56 = vpop.f32.mrf.mxu3 }
 0x705   : > { %v3608_v54 = vmax.f32 %v3480_v7, %v3017_v19 }
 0x707   : > { %v3736_v58 = vmax.f32 %v3608_v54, %v3346_v56 }
 0x708   : > { %v2364_v13 = vpop.f32.mrf.mxu0  ;;  %v2693_v37 = vpop.f32.mrf.mxu1 }
 0x709   : > { %v3992_v39 = vmax.f32 %v3864_v45, %v3736_v58  ;;  %v3482_v49 = vmax.f32 %v2364_v13, %v2693_v37 }
 0x70b   : > { %4120 = vst [vmem:[#allocation2 + $0x298] sm:$0xff] %v3992_v39 }
 0x70c   : > { %v3019_v12 = vpop.f32.mrf.mxu2  ;;  %v3348_v5 = vpop.f32.mrf.mxu3 }
 0x70d   : > { %v3609_v23 = vmax.f32 %v3481_v27, %v3019_v12 }
 0x70f   : > { %v3737_v53 = vmax.f32 %v3609_v23, %v3348_v5 }
 0x710   : > { %v2366_v21 = vpop.f32.mrf.mxu0  ;;  %v2695_v61 = vpop.f32.mrf.mxu1 }
 0x711   : > { %v3993_v14 = vmax.f32 %v3865_v35, %v3737_v53  ;;  %v3483_v9 = vmax.f32 %v2366_v21, %v2695_v61 }
 0x713   : > { %4121 = vst [vmem:[#allocation2 + $0x270] sm:$0xff] %v3993_v14 }
 0x714   : > { %v3022_v1 = vpop.f32.mrf.mxu2  ;;  %v3351_v52 = vpop.f32.mrf.mxu3 }
 0x715   : > { %v3610_v34 = vmax.f32 %v3482_v49, %v3022_v1 }
 0x717   : > { %v3738_v2 = vmax.f32 %v3610_v34, %v3351_v52 }
 0x719   : > { %v3994_v43 = vmax.f32 %v3866_v32, %v3738_v2 }
 0x71b   : > { %4122 = vst [vmem:[#allocation2 + $0x310] sm:$0xff] %v3994_v43 }
 0x71c   : > { %v3024_v24 = vpop.f32.mrf.mxu2  ;;  %v3353_v29 = vpop.f32.mrf.mxu3 }
 0x71d   : > { %v3611_v3 = vmax.f32 %v3483_v9, %v3024_v24 }
 0x71f   : > { %v3739_v26 = vmax.f32 %v3611_v3, %v3353_v29  ;;  %4127 = sbr.rel (%p9286_p11) target bundleno = 3855 (0xf0f), region = 84 }
 0x721   : > { %v3995_v59 = vmax.f32 %v3867_v62, %v3739_v26 }
 0x723   : > { %4123 = vst [vmem:[#allocation2 + $0x190] sm:$0xff] %v3995_v59 }
 0x724   : > { %v4190_v0 = vld [vmem:[#allocation2 + $0x140] sm:$0xff]  ;;  %v4174_v47 = vld [vmem:[#allocation2 + $0x1f0] sm:$0xff]  ;;  %v4142_v6 = vld [vmem:[#allocation2 + $0x108] sm:$0xff]  ;;  %vm8864_vm1 = vcmask 7168   ;;  %vm8866_vm2 = vcmask 0  }
 0x725   : > { %4380 = vmax.xlane.f32.xlu2 %v4190_v0  ;;  %4348 = vmax.xlane.f32.xlu0 %v4174_v47  ;;  %v4191_v11 = vld [vmem:[#allocation2 + $0x2a8] sm:$0xff]  ;;  %v4175_v25 = vld [vmem:[#allocation2 + $0x10] sm:$0xff]  ;;  %v4143_v8 = vld [vmem:[#allocation2 + $0x60] sm:$0xff] }
 0x726   : > { %4284 = vmax.xlane.f32.xlu1 %v4142_v6  ;;  %v4172_v63 = vld [vmem:[#allocation2 + $0xb0] sm:$0xff]  ;;  %v4158_v46 = vld [vmem:[#allocation2 + $0x1c0] sm:$0xff]  ;;  %v4188_v31 = vld [vmem:[#allocation2 + $0x1d8] sm:$0xff] }
 0x727   : > { %v4159_v20 = vld [vmem:[#allocation2 + $0x280] sm:$0xff]  ;;  %v4141_v50 = vld [vmem:[#allocation2 + $0x150] sm:$0xff]  ;;  %v4156_v44 = vld [vmem:[#allocation2 + $0x138] sm:$0xff] }
 0x728   : > { %v4173_v60 = vld [vmem:[#allocation2 + $0x1e0] sm:$0xff]  ;;  %v4189_v30 = vld [vmem:[#allocation2 + $0x30] sm:$0xff]  ;;  %v4138_v51 = vld [vmem:[#allocation2 + $0x118] sm:$0xff] }
 0x729   : > { %v4140_v36 = vld [vmem:[#allocation2 + $0x320] sm:$0xff]  ;;  %v4186_v41 = vld [vmem:[#allocation2 + $0x350] sm:$0xff]  ;;  %v4139_v10 = vld [vmem:[#allocation2 + $0x98] sm:$0xff] }
 0x72a   : > { %v4157_v4 = vld [vmem:[#allocation2 + $0xc0] sm:$0xff]  ;;  %v4155_v48 = vld [vmem:[#allocation2 + $0x28] sm:$0xff]  ;;  %v4154_v22 = vld [vmem:[#allocation2 + $0x290] sm:$0xff] }
 0x72b   : > { %v4171_v38 = vld [vmem:[#allocation2 + $0x2c0] sm:$0xff]  ;;  %v4187_v57 = vld [vmem:[#allocation2 + $0x188] sm:$0xff]  ;;  %v4169_v42 = vld [vmem:[#allocation2 + $0x3f0] sm:$0xff] }
 0x72c   : > { %v4170_v17 = vld [vmem:[#allocation2 + $0xa0] sm:$0xff]  ;;  %v4137_v28 = vld [vmem:[#allocation2 + $0x110] sm:$0xff]  ;;  %v4185_v55 = vld [vmem:[#allocation2 + $0x268] sm:$0xff] }
 0x72d   : > { %4382 = vmax.xlane.f32.xlu2 %v4191_v11  ;;  %4350 = vmax.xlane.f32.xlu0 %v4175_v25  ;;  %v4168_v40 = vld [vmem:[#allocation2 + $0x2a0] sm:$0xff]  ;;  %v4184_v33 = vld [vmem:[#allocation2 + $0x358] sm:$0xff]  ;;  %v4152_v7 = vld [vmem:[#allocation2 + $0x3e8] sm:$0xff] }
 0x72e   : > { %4286 = vmax.xlane.f32.xlu1 %v4143_v8  ;;  %v4136_v15 = vld [vmem:[#allocation2 + $0x380] sm:$0xff]  ;;  %v4166_v16 = vld [vmem:[#allocation2 + $0x8] sm:$0xff]  ;;  %v4153_v18 = vld [vmem:[#allocation2 + $0x2f8] sm:$0xff] }
 0x72f   : > { %v4167_v19 = vld [vmem:[#allocation2 + $0x128] sm:$0xff]  ;;  %v4134_v54 = vld [vmem:[#allocation2 + $0x330] sm:$0xff]  ;;  %v4150_v58 = vld [vmem:[#allocation2 + $0x1b8] sm:$0xff] }
 0x730   : > { %v4135_v56 = vld [vmem:[#allocation2 + $0x48] sm:$0xff]  ;;  %v4183_v39 = vld [vmem:[#allocation2 + $0x2f0] sm:$0xff]  ;;  %v4165_v12 = vld [vmem:[#allocation2 + $0x3f8] sm:$0xff] }
 0x731   : > { %v4182_v45 = vld [vmem:[#allocation2 + $0x88] sm:$0xff]  ;;  %v4164_v5 = vld [vmem:[#allocation2 + $0x218] sm:$0xff]  ;;  %v4132_v35 = vld [vmem:[#allocation2 + $0x50] sm:$0xff] }
 0x732   : > { %v4151_v27 = vld [vmem:[#allocation2 + $0x168] sm:$0xff]  ;;  %v4574_v49 = vld [vmem:[%s13919_s6 + $0x1f0] sm:$0xff]  ;;  %v4148_v34 = vld [vmem:[#allocation2 + $0x80] sm:$0xff] }
 0x733   : > { %v4180_v23 = vld [vmem:[#allocation2 + $0x208] sm:$0xff]  ;;  %v4181_v52 = vld [vmem:[#allocation2 + $0xd0] sm:$0xff]  ;;  %v4575_v61 = vld [vmem:[%s13919_s6 + $0x1f8] sm:$0xff] }
 0x734   : > { %v4133_v13 = vld [vmem:[#allocation2 + $0x368] sm:$0xff]  ;;  %v4558_v32 = vld [vmem:[%s13919_s6 + $0x170] sm:$0xff]  ;;  %v4559_v43 = vld [vmem:[%s13919_s6 + $0x178] sm:$0xff] }
 0x735   : > { %4344 = vmax.xlane.f32.xlu2 %v4172_v63  ;;  %4316 = vmax.xlane.f32.xlu0 %v4158_v46  ;;  %v4149_v1 = vld [vmem:[#allocation2 + $0x1a8] sm:$0xff]  ;;  %v4526_v21 = vld [vmem:[%s13919_s6 + $0x70] sm:$0xff]  ;;  %v4527_v24 = vld [vmem:[%s13919_s6 + $0x78] sm:$0xff] }
 0x736   : > { %4318 = vmax.xlane.f32.xlu1 %v4159_v20  ;;  %v4162_v11 = vld [vmem:[#allocation2 + $0x158] sm:$0xff]  ;;  %v4163_v20 = vld [vmem:[#allocation2 + $0x3e0] sm:$0xff] }
 0x737   : > { %v4130_v25 = vld [vmem:[#allocation2 + $0xd8] sm:$0xff] }
 0x73d   : > { %4346 = vmax.xlane.f32.xlu0 %v4173_v60  ;;  %4282 = vmax.xlane.f32.xlu2 %v4141_v50 }
 0x73e   : > { %4280 = vmax.xlane.f32.xlu1 %v4140_v36 }
 0x745   : > { %4376 = vmax.xlane.f32.xlu0 %v4188_v31  ;;  %4312 = vmax.xlane.f32.xlu2 %v4156_v44 }
 0x746   : > { %4378 = vmax.xlane.f32.xlu1 %v4189_v30  ;;  %v4542_v30 = vld [vmem:[%s13919_s6 + $0xf0] sm:$0xff] }
 0x74d   : > { %4314 = vmax.xlane.f32.xlu0 %v4157_v4  ;;  %4342 = vmax.xlane.f32.xlu2 %v4171_v38  ;;  %v4543_v4 = vld [vmem:[%s13919_s6 + $0xf8] sm:$0xff] }
 0x74e   : > { %4340 = vmax.xlane.f32.xlu1 %v4170_v17 }
 0x755   : > { %4372 = vmax.xlane.f32.xlu2 %v4186_v41  ;;  %4276 = vmax.xlane.f32.xlu0 %v4138_v51 }
 0x756   : > { %4278 = vmax.xlane.f32.xlu1 %v4139_v10  ;;  %v4556_v10 = vld [vmem:[%s13919_s6 + $0x160] sm:$0xff] }
 0x75d   : > { %4310 = vmax.xlane.f32.xlu2 %v4155_v48  ;;  %4374 = vmax.xlane.f32.xlu0 %v4187_v57  ;;  %v4131_v57 = vld [vmem:[#allocation2 + $0x18] sm:$0xff] }
 0x75e   : > { %4308 = vmax.xlane.f32.xlu1 %v4154_v22  ;;  %v4179_v22 = vld [vmem:[#allocation2 + $0x3a0] sm:$0xff] }
 0x765   : > { %4336 = vmax.xlane.f32.xlu0 %v4168_v40  ;;  %4272 = vmax.xlane.f32.xlu2 %v4136_v15  ;;  %v4178_v15 = vld [vmem:[#allocation2 + $0x90] sm:$0xff] }
 0x766   : > { %4338 = vmax.xlane.f32.xlu1 %v4169_v42 }
 0x76d   : > { %4274 = vmax.xlane.f32.xlu0 %v4137_v28  ;;  %4370 = vmax.xlane.f32.xlu2 %v4185_v55 }
 0x76e   : > { %4368 = vmax.xlane.f32.xlu1 %v4184_v33  ;;  %v4557_v33 = vld [vmem:[%s13919_s6 + $0x168] sm:$0xff] }
 0x775   : > { %4304 = vmax.xlane.f32.xlu0 %v4152_v7  ;;  %4332 = vmax.xlane.f32.xlu2 %v4166_v16  ;;  %v4525_v7 = vld [vmem:[%s13919_s6 + $0x68] sm:$0xff]  ;;  %v4524_v16 = vld [vmem:[%s13919_s6 + $0x60] sm:$0xff] }
 0x776   : > { %4306 = vmax.xlane.f32.xlu1 %v4153_v18 }
 0x77d   : > { %4334 = vmax.xlane.f32.xlu0 %v4167_v19  ;;  %4270 = vmax.xlane.f32.xlu2 %v4135_v56 }
 0x77e   : > { %4268 = vmax.xlane.f32.xlu1 %v4134_v54 }
 0x785   : > { %4364 = vmax.xlane.f32.xlu0 %v4182_v45  ;;  %4300 = vmax.xlane.f32.xlu2 %v4150_v58 }
 0x786   : > { %4366 = vmax.xlane.f32.xlu1 %v4183_v39 }
 0x78d   : > { %4302 = vmax.xlane.f32.xlu0 %v4151_v27  ;;  %4330 = vmax.xlane.f32.xlu2 %v4165_v12  ;;  %v4146_v27 = vld [vmem:[#allocation2 + $0x338] sm:$0xff]  ;;  %v4160_v12 = vld [vmem:[#allocation2 + $0x100] sm:$0xff] }
 0x78e   : > { %4328 = vmax.xlane.f32.xlu1 %v4164_v5 }
 0x795   : > { %4360 = vmax.xlane.f32.xlu2 %v4180_v23  ;;  %4264 = vmax.xlane.f32.xlu0 %v4132_v35  ;;  %v4147_v35 = vld [vmem:[#allocation2 + $0x340] sm:$0xff] }
 0x796   : > { %4266 = vmax.xlane.f32.xlu1 %v4133_v13 }
 0x798   : > { %v4381_v37 = vpop.xlane.xlu2 %4380  ;;  %v4349_v53 = vpop.xlane.xlu0 %4348 }
 0x799   : > { %v4285_v14 = vpop.xlane.xlu1 %4284  ;;  %v4702_v2 = vadd.f32 %v4574_v49, %v4381_v37  ;;  %v4686_v9 = vadd.f32 %v4558_v32, %v4349_v53  ;;  %v4572_v53 = vld [vmem:[%s13919_s6 + $0x1e0] sm:$0xff]  ;;  %v4573_v49 = vld [vmem:[%s13919_s6 + $0x1e8] sm:$0xff] }
 0x79a   : > { %v4654_v3 = vadd.f32 %v4526_v21, %v4285_v14 }
 0x79b   : > { %v4830_v26 = vmax.f32 %v4702_v2, 0.0  ;;  %v4814_v8 = vmax.f32 %v4686_v9, 0.0  ;;  %v4540_v2 = vld [vmem:[%s13919_s6 + $0xe0] sm:$0xff] }
 0x79c   : > { %v4782_v60 = vmax.f32 %v4654_v3, 0.0 }
 0x79d   : > { %4298 = vmax.xlane.f32.xlu2 %v4149_v1  ;;  %4362 = vmax.xlane.f32.xlu0 %v4181_v52 }
 0x79e   : > { %4296 = vmax.xlane.f32.xlu1 %v4148_v34 }
 0x7a0   : > { %v4383_v29 = vpop.xlane.xlu2 %4382  ;;  %v4351_v62 = vpop.xlane.xlu0 %4350 }
 0x7a1   : > { %v4703_v59 = vadd.f32 %v4575_v61, %v4383_v29  ;;  %v4687_v0 = vadd.f32 %v4559_v43, %v4351_v62  ;;  %v4287_v47 = vpop.xlane.xlu1 %4286  ;;  %v4161_v61 = vld [vmem:[#allocation2 + $0x3c0] sm:$0xff]  ;;  %v4129_v43 = vld [vmem:[#allocation2 + $0x3b0] sm:$0xff] }
 0x7a2   : > { %v4655_v6 = vadd.f32 %v4527_v24, %v4287_v47  ;;  %v4128_v24 = vld [vmem:[#allocation2 + $0x2b0] sm:$0xff] }
 0x7a3   : > { %v4831_v63 = vmax.f32 %v4703_v59, 0.0  ;;  %v4815_v46 = vmax.f32 %v4687_v0, 0.0  ;;  %v4555_v59 = vld [vmem:[%s13919_s6 + $0x158] sm:$0xff]  ;;  %v4554_v0 = vld [vmem:[%s13919_s6 + $0x150] sm:$0xff] }
 0x7a4   : > { %v4783_v50 = vmax.f32 %v4655_v6, 0.0 }
 0x7a5   : > { %4324 = vmax.xlane.f32.xlu0 %v4162_v11  ;;  %4260 = vmax.xlane.f32.xlu2 %v4130_v25  ;;  %v5175_v36 = vpack.c.bf16 %v4815_v46, %v4814_v8  ;;  %v5183_v31 = vpack.c.bf16 %v4831_v63, %v4830_v26  ;;  %v4541_v26 = vld [vmem:[%s13919_s6 + $0xe8] sm:$0xff] }
 0x7a6   : > { %4326 = vmax.xlane.f32.xlu1 %v4163_v20  ;;  %v5159_v44 = vpack.c.bf16 %v4783_v50, %v4782_v60  ;;  %v4176_v20 = vld [vmem:[#allocation2 + $0x230] sm:$0xff]  ;;  %v4144_v60 = vld [vmem:[#allocation2 + $0x2e0] sm:$0xff] }
 0x7a7   : > { %6898 = vmatpush.bf16.msra.mxu2 %v5175_v36  ;;  %7067 = vmatpush.bf16.msra.mxu3 %v5183_v31  ;;  %v4177_v31 = vld [vmem:[#allocation2 + $0x240] sm:$0xff] }
 0x7a8   : > { %6560 = vmatpush.bf16.msra.mxu0 %v5159_v44  ;;  %v4345_v38 = vpop.xlane.xlu2 %4344  ;;  %v4317_v17 = vpop.xlane.xlu0 %4316 }
 0x7a9   : > { %v4670_v41 = vadd.f32 %v4542_v30, %v4317_v17  ;;  %v4319_v51 = vpop.xlane.xlu1 %4318  ;;  %v4684_v28 = vadd.f32 %v4556_v10, %v4345_v38  ;;  %v4523_v17 = vld [vmem:[%s13919_s6 + $0x58] sm:$0xff] }
 0x7aa   : > { %v4671_v48 = vadd.f32 %v4543_v4, %v4319_v51  ;;  %v4522_v4 = vld [vmem:[%s13919_s6 + $0x50] sm:$0xff] }
 0x7ab   : > { %v4798_v40 = vmax.f32 %v4670_v41, 0.0  ;;  %v4812_v56 = vmax.f32 %v4684_v28, 0.0 }
 0x7ac   : > { %v4799_v42 = vmax.f32 %v4671_v48, 0.0 }
 0x7ad   : > { %4262 = vmax.xlane.f32.xlu0 %v4131_v57  ;;  %4358 = vmax.xlane.f32.xlu2 %v4179_v22  ;;  %v4570_v57 = vld [vmem:[%s13919_s6 + $0x1d0] sm:$0xff] }
 0x7ae   : > { %4356 = vmax.xlane.f32.xlu1 %v4178_v15  ;;  %v5167_v55 = vpack.c.bf16 %v4799_v42, %v4798_v40  ;;  %v4145_v40 = vld [vmem:[#allocation2 + $0x388] sm:$0xff] }
 0x7b0   : > { %6729 = vmatpush.bf16.msra.mxu1 %v5167_v55  ;;  %v4347_v18 = vpop.xlane.xlu0 %4346  ;;  %v4283_v19 = vpop.xlane.xlu2 %4282 }
 0x7b1   : > { %v4685_v54 = vadd.f32 %v4557_v33, %v4347_v18  ;;  %v4653_v45 = vadd.f32 %v4525_v7, %v4283_v19  ;;  %v4281_v58 = vpop.xlane.xlu1 %4280  ;;  %v4539_v33 = vld [vmem:[%s13919_s6 + $0xd8] sm:$0xff] }
 0x7b2   : > { %v4652_v39 = vadd.f32 %v4524_v16, %v4281_v58  ;;  %v4571_v7 = vld [vmem:[%s13919_s6 + $0x1d8] sm:$0xff]  ;;  %v4538_v16 = vld [vmem:[%s13919_s6 + $0xd0] sm:$0xff] }
 0x7b3   : > { %v4813_v5 = vmax.f32 %v4685_v54, 0.0  ;;  %v4781_v23 = vmax.f32 %v4653_v45, 0.0 }
 0x7b4   : > { %v4780_v13 = vmax.f32 %v4652_v39, 0.0 }
 0x7b5   : > { %4292 = vmax.xlane.f32.xlu0 %v4146_v27  ;;  %4320 = vmax.xlane.f32.xlu2 %v4160_v12  ;;  %v5174_v37 = vpack.c.bf16 %v4813_v5, %v4812_v56 }
 0x7b6   : > { %4294 = vmax.xlane.f32.xlu1 %v4147_v35  ;;  %v5158_v14 = vpack.c.bf16 %v4781_v23, %v4780_v13  ;;  %v4552_v35 = vld [vmem:[%s13919_s6 + $0x140] sm:$0xff] }
 0x7b7   : > { %6899 = vmatpush.bf16.msra.mxu2 %v5174_v37  ;;  %v4553_v37 = vld [vmem:[%s13919_s6 + $0x148] sm:$0xff] }
 0x7b8   : > { %v4377_v1 = vpop.xlane.xlu0 %4376  ;;  %v4313_v52 = vpop.xlane.xlu2 %4312  ;;  %6561 = vmatpush.bf16.msra.mxu0 %v5158_v14 }
 0x7b9   : > { %v4700_v34 = vadd.f32 %v4572_v53, %v4377_v1  ;;  %v4379_v32 = vpop.xlane.xlu1 %4378  ;;  %v4668_v29 = vadd.f32 %v4540_v2, %v4313_v52 }
 0x7ba   : > { %v4701_v21 = vadd.f32 %v4573_v49, %v4379_v32 }
 0x7bb   : > { %v4828_v9 = vmax.f32 %v4700_v34, 0.0  ;;  %v4796_v11 = vmax.f32 %v4668_v29, 0.0  ;;  %v4520_v34 = vld [vmem:[%s13919_s6 + $0x40] sm:$0xff] }
 0x7bc   : > { %v4829_v3 = vmax.f32 %v4701_v21, 0.0 }
 0x7bd   : > { %4322 = vmax.xlane.f32.xlu0 %v4161_v61  ;;  %4258 = vmax.xlane.f32.xlu2 %v4129_v43  ;;  %v4521_v43 = vld [vmem:[%s13919_s6 + $0x48] sm:$0xff] }
 0x7be   : > { %4256 = vmax.xlane.f32.xlu1 %v4128_v24  ;;  %v5182_v62 = vpack.c.bf16 %v4829_v3, %v4828_v9  ;;  %v4569_v9 = vld [vmem:[%s13919_s6 + $0x1c8] sm:$0xff]  ;;  %v4568_v24 = vld [vmem:[%s13919_s6 + $0x1c0] sm:$0xff] }
 0x7c0   : > { %7068 = vmatpush.bf16.msra.mxu3 %v5182_v62  ;;  %v4315_v47 = vpop.xlane.xlu0 %4314  ;;  %v4343_v6 = vpop.xlane.xlu2 %4342 }
 0x7c1   : > { %v4669_v25 = vadd.f32 %v4541_v26, %v4315_v47  ;;  %v4683_v8 = vadd.f32 %v4555_v59, %v4343_v6  ;;  %v4341_v63 = vpop.xlane.xlu1 %4340 }
 0x7c2   : > { %v4682_v46 = vadd.f32 %v4554_v0, %v4341_v63  ;;  %v4536_v63 = vld [vmem:[%s13919_s6 + $0xc0] sm:$0xff] }
 0x7c3   : > { %v4797_v50 = vmax.f32 %v4669_v25, 0.0  ;;  %v4811_v36 = vmax.f32 %v4683_v8, 0.0 }
 0x7c4   : > { %v4810_v44 = vmax.f32 %v4682_v46, 0.0 }
 0x7c5   : > { %4352 = vmax.xlane.f32.xlu0 %v4176_v20  ;;  %v5166_v30 = vpack.c.bf16 %v4797_v50, %v4796_v11  ;;  %4288 = vmax.xlane.f32.xlu2 %v4144_v60  ;;  %v4537_v20 = vld [vmem:[%s13919_s6 + $0xc8] sm:$0xff] }
 0x7c6   : > { %4354 = vmax.xlane.f32.xlu1 %v4177_v31  ;;  %v5173_v38 = vpack.c.bf16 %v4811_v36, %v4810_v44 }
 0x7c7   : > { %6730 = vmatpush.bf16.msra.mxu1 %v5166_v30  ;;  %v4550_v30 = vld [vmem:[%s13919_s6 + $0x130] sm:$0xff] }
 0x7c8   : > { %v4373_v41 = vpop.xlane.xlu2 %4372  ;;  %v4277_v51 = vpop.xlane.xlu0 %4276  ;;  %6900 = vmatpush.bf16.msra.mxu2 %v5173_v38 }
 0x7c9   : > { %v4279_v10 = vpop.xlane.xlu1 %4278  ;;  %v4650_v48 = vadd.f32 %v4522_v4, %v4277_v51  ;;  %v4698_v28 = vadd.f32 %v4570_v57, %v4373_v41  ;;  %v4551_v51 = vld [vmem:[%s13919_s6 + $0x138] sm:$0xff] }
 0x7ca   : > { %v4651_v22 = vadd.f32 %v4523_v17, %v4279_v10  ;;  %v4519_v10 = vld [vmem:[%s13919_s6 + $0x38] sm:$0xff] }
 0x7cb   : > { %v4778_v15 = vmax.f32 %v4650_v48, 0.0  ;;  %v4826_v56 = vmax.f32 %v4698_v28, 0.0  ;;  %v4518_v48 = vld [vmem:[%s13919_s6 + $0x30] sm:$0xff] }
 0x7cc   : > { %v4779_v42 = vmax.f32 %v4651_v22, 0.0 }
 0x7cd   : > { %4290 = vmax.xlane.f32.xlu0 %v4145_v40 }
 0x7ce   : > { %v5157_v55 = vpack.c.bf16 %v4779_v42, %v4778_v15 }
 0x7d0   : > { %6562 = vmatpush.bf16.msra.mxu0 %v5157_v55  ;;  %v4311_v18 = vpop.xlane.xlu2 %4310  ;;  %v4375_v19 = vpop.xlane.xlu0 %4374 }
 0x7d1   : > { %v4667_v54 = vadd.f32 %v4539_v33, %v4311_v18  ;;  %v4309_v45 = vpop.xlane.xlu1 %4308  ;;  %v4699_v58 = vadd.f32 %v4571_v7, %v4375_v19  ;;  %v4566_v19 = vld [vmem:[%s13919_s6 + $0x1b0] sm:$0xff] }
 0x7d2   : > { %v4666_v39 = vadd.f32 %v4538_v16, %v4309_v45 }
 0x7d3   : > { %v4795_v27 = vmax.f32 %v4667_v54, 0.0  ;;  %v4827_v12 = vmax.f32 %v4699_v58, 0.0  ;;  %v4567_v54 = vld [vmem:[%s13919_s6 + $0x1b8] sm:$0xff] }
 0x7d4   : > { %v4794_v5 = vmax.f32 %v4666_v39, 0.0 }
 0x7d5   : > { %v5181_v23 = vpack.c.bf16 %v4827_v12, %v4826_v56  ;;  %v4534_v12 = vld [vmem:[%s13919_s6 + $0xb0] sm:$0xff] }
 0x7d6   : > { %v5165_v13 = vpack.c.bf16 %v4795_v27, %v4794_v5 }
 0x7d7   : > { %7069 = vmatpush.bf16.msra.mxu3 %v5181_v23 }
 0x7d8   : > { %v4337_v53 = vpop.xlane.xlu0 %4336  ;;  %v4273_v14 = vpop.xlane.xlu2 %4272  ;;  %6731 = vmatpush.bf16.msra.mxu1 %v5165_v13 }
 0x7d9   : > { %v4339_v49 = vpop.xlane.xlu1 %4338  ;;  %v4680_v1 = vadd.f32 %v4552_v35, %v4337_v53  ;;  %v4648_v21 = vadd.f32 %v4520_v34, %v4273_v14  ;;  %v4535_v53 = vld [vmem:[%s13919_s6 + $0xb8] sm:$0xff]  ;;  %v4549_v14 = vld [vmem:[%s13919_s6 + $0x128] sm:$0xff] }
 0x7da   : > { %v4681_v52 = vadd.f32 %v4553_v37, %v4339_v49  ;;  %v4548_v49 = vld [vmem:[%s13919_s6 + $0x120] sm:$0xff] }
 0x7db   : > { %v4808_v32 = vmax.f32 %v4680_v1, 0.0  ;;  %v4776_v62 = vmax.f32 %v4648_v21, 0.0 }
 0x7dc   : > { %v4809_v2 = vmax.f32 %v4681_v52, 0.0 }
 0x7de   : > { %v5172_v61 = vpack.c.bf16 %v4809_v2, %v4808_v32 }
 0x7e0   : > { %6901 = vmatpush.bf16.msra.mxu2 %v5172_v61  ;;  %v4275_v3 = vpop.xlane.xlu0 %4274  ;;  %v4371_v29 = vpop.xlane.xlu2 %4370 }
 0x7e1   : > { %v4369_v26 = vpop.xlane.xlu1 %4368  ;;  %v4649_v59 = vadd.f32 %v4521_v43, %v4275_v3  ;;  %v4697_v0 = vadd.f32 %v4569_v9, %v4371_v29  ;;  %v4516_v29 = vld [vmem:[%s13919_s6 + $0x20] sm:$0xff] }
 0x7e2   : > { %v4696_v47 = vadd.f32 %v4568_v24, %v4369_v26  ;;  %v4517_v26 = vld [vmem:[%s13919_s6 + $0x28] sm:$0xff] }
 0x7e3   : > { %v4777_v6 = vmax.f32 %v4649_v59, 0.0  ;;  %v4825_v11 = vmax.f32 %v4697_v0, 0.0 }
 0x7e4   : > { %v4824_v25 = vmax.f32 %v4696_v47, 0.0 }
 0x7e5   : > { %v5156_v8 = vpack.c.bf16 %v4777_v6, %v4776_v62 }
 0x7e6   : > { %v5180_v46 = vpack.c.bf16 %v4825_v11, %v4824_v25  ;;  %v4564_v11 = vld [vmem:[%s13919_s6 + $0x1a0] sm:$0xff] }
 0x7e7   : > { %6563 = vmatpush.bf16.msra.mxu0 %v5156_v8 }
 0x7e8   : > { %v4305_v60 = vpop.xlane.xlu0 %4304  ;;  %v4333_v50 = vpop.xlane.xlu2 %4332  ;;  %7070 = vmatpush.bf16.msra.mxu3 %v5180_v46 }
 0x7e9   : > { %v4307_v36 = vpop.xlane.xlu1 %4306  ;;  %v4664_v31 = vadd.f32 %v4536_v63, %v4305_v60  ;;  %v4678_v17 = vadd.f32 %v4550_v30, %v4333_v50  ;;  %v4533_v60 = vld [vmem:[%s13919_s6 + $0xa8] sm:$0xff] }
 0x7ea   : > { %v4665_v44 = vadd.f32 %v4537_v20, %v4307_v36  ;;  %v4565_v50 = vld [vmem:[%s13919_s6 + $0x1a8] sm:$0xff]  ;;  %v4532_v36 = vld [vmem:[%s13919_s6 + $0xa0] sm:$0xff] }
 0x7eb   : > { %v4792_v4 = vmax.f32 %v4664_v31, 0.0  ;;  %v4806_v40 = vmax.f32 %v4678_v17, 0.0 }
 0x7ec   : > { %v4793_v38 = vmax.f32 %v4665_v44, 0.0 }
 0x7ee   : > { %v5164_v41 = vpack.c.bf16 %v4793_v38, %v4792_v4 }
 0x7f0   : > { %6732 = vmatpush.bf16.msra.mxu1 %v5164_v41  ;;  %v4335_v57 = vpop.xlane.xlu0 %4334  ;;  %v4271_v22 = vpop.xlane.xlu2 %4270 }
 0x7f1   : > { %v4679_v15 = vadd.f32 %v4551_v51, %v4335_v57  ;;  %v4647_v42 = vadd.f32 %v4519_v10, %v4271_v22  ;;  %v4269_v28 = vpop.xlane.xlu1 %4268  ;;  %v4546_v22 = vld [vmem:[%s13919_s6 + $0x110] sm:$0xff] }
 0x7f2   : > { %v4646_v55 = vadd.f32 %v4518_v48, %v4269_v28 }
 0x7f3   : > { %v4807_v33 = vmax.f32 %v4679_v15, 0.0  ;;  %v4775_v7 = vmax.f32 %v4647_v42, 0.0  ;;  %v4547_v15 = vld [vmem:[%s13919_s6 + $0x118] sm:$0xff] }
 0x7f4   : > { %v4774_v16 = vmax.f32 %v4646_v55, 0.0 }
 0x7f5   : > { %v5171_v18 = vpack.c.bf16 %v4807_v33, %v4806_v40 }
 0x7f6   : > { %v5155_v56 = vpack.c.bf16 %v4775_v7, %v4774_v16  ;;  %v4514_v16 = vld [vmem:[%s13919_s6 + $0x10] sm:$0xff] }
 0x7f7   : > { %6902 = vmatpush.bf16.msra.mxu2 %v5171_v18 }
 0x7f8   : > { %v4365_v45 = vpop.xlane.xlu0 %4364  ;;  %v4301_v58 = vpop.xlane.xlu2 %4300  ;;  %6564 = vmatpush.bf16.msra.mxu0 %v5155_v56 }
 0x7f9   : > { %v4694_v39 = vadd.f32 %v4566_v19, %v4365_v45  ;;  %v4367_v27 = vpop.xlane.xlu1 %4366  ;;  %v4662_v13 = vadd.f32 %v4534_v12, %v4301_v58  ;;  %v4515_v45 = vld [vmem:[%s13919_s6 + $0x18] sm:$0xff] }
 0x7fa   : > { %v4695_v5 = vadd.f32 %v4567_v54, %v4367_v27  ;;  %v4563_v58 = vld [vmem:[%s13919_s6 + $0x198] sm:$0xff] }
 0x7fb   : > { %v4822_v23 = vmax.f32 %v4694_v39, 0.0  ;;  %v4790_v34 = vmax.f32 %v4662_v13, 0.0  ;;  %v4562_v39 = vld [vmem:[%s13919_s6 + $0x190] sm:$0xff] }
 0x7fc   : > { %v4823_v35 = vmax.f32 %v4695_v5, 0.0 }
 0x7fe   : > { %v5179_v37 = vpack.c.bf16 %v4823_v35, %v4822_v23 }
 0x800   : > { %7071 = vmatpush.bf16.msra.mxu3 %v5179_v37  ;;  %v4303_v1 = vpop.xlane.xlu0 %4302  ;;  %v4331_v52 = vpop.xlane.xlu2 %4330 }
 0x801   : > { %v4663_v32 = vadd.f32 %v4535_v53, %v4303_v1  ;;  %v4677_v2 = vadd.f32 %v4549_v14, %v4331_v52  ;;  %v4329_v21 = vpop.xlane.xlu1 %4328  ;;  %v4530_v52 = vld [vmem:[%s13919_s6 + $0x90] sm:$0xff] }
 0x802   : > { %v4676_v61 = vadd.f32 %v4548_v49, %v4329_v21 }
 0x803   : > { %v4791_v43 = vmax.f32 %v4663_v32, 0.0  ;;  %v4805_v9 = vmax.f32 %v4677_v2, 0.0  ;;  %v4531_v32 = vld [vmem:[%s13919_s6 + $0x98] sm:$0xff] }
 0x804   : > { %v4804_v24 = vmax.f32 %v4676_v61, 0.0 }
 0x805   : > { %v5163_v3 = vpack.c.bf16 %v4791_v43, %v4790_v34 }
 0x806   : > { %v5170_v62 = vpack.c.bf16 %v4805_v9, %v4804_v24  ;;  %v4544_v24 = vld [vmem:[%s13919_s6 + $0x100] sm:$0xff] }
 0x807   : > { %6733 = vmatpush.bf16.msra.mxu1 %v5163_v3 }
 0x808   : > { %v4361_v59 = vpop.xlane.xlu2 %4360  ;;  %v4265_v0 = vpop.xlane.xlu0 %4264  ;;  %6903 = vmatpush.bf16.msra.mxu2 %v5170_v62 }
 0x809   : > { %v4267_v47 = vpop.xlane.xlu1 %4266  ;;  %v4644_v6 = vadd.f32 %v4516_v29, %v4265_v0  ;;  %v4692_v46 = vadd.f32 %v4564_v11, %v4361_v59  ;;  %v4545_v59 = vld [vmem:[%s13919_s6 + $0x108] sm:$0xff] }
 0x80a   : > { %v4645_v25 = vadd.f32 %v4517_v26, %v4267_v47  ;;  %v4513_v0 = vld [vmem:[%s13919_s6 + $0x8] sm:$0xff]  ;;  %v4512_v47 = vld [vmem:[%s13919_s6] sm:$0xff] }
 0x80b   : > { %v4772_v8 = vmax.f32 %v4644_v6, 0.0  ;;  %v4820_v30 = vmax.f32 %v4692_v46, 0.0 }
 0x80c   : > { %v4773_v63 = vmax.f32 %v4645_v25, 0.0 }
 0x80e   : > { %v5154_v20 = vpack.c.bf16 %v4773_v63, %v4772_v8 }
 0x810   : > { %6565 = vmatpush.bf16.msra.mxu0 %v5154_v20  ;;  %v4299_v31 = vpop.xlane.xlu2 %4298  ;;  %v4363_v44 = vpop.xlane.xlu0 %4362 }
 0x811   : > { %v4661_v4 = vadd.f32 %v4533_v60, %v4299_v31  ;;  %v4297_v38 = vpop.xlane.xlu1 %4296  ;;  %v4693_v17 = vadd.f32 %v4565_v50, %v4363_v44  ;;  %v10647_v31 = vld [vmem:[#allocation3 + $0x24] sm:$0xf0] }
 0x812   : > { %v4660_v41 = vadd.f32 %v4532_v36, %v4297_v38  ;;  %v9297_v36 = vld [vmem:[#allocation3 + $0x8] sm:$0xf] }
 0x813   : > { %v4789_v51 = vmax.f32 %v4661_v4, 0.0  ;;  %v4821_v10 = vmax.f32 %v4693_v17, 0.0  ;;  %v10646_v4 = vld [vmem:[#allocation3 + $0x1c] sm:$0xf0] }
 0x814   : > { %v4788_v48 = vmax.f32 %v4660_v41, 0.0  ;;  %v4560_v41 = vld [vmem:[%s13919_s6 + $0x180] sm:$0xff] }
 0x815   : > { %v5178_v57 = vpack.c.bf16 %v4821_v10, %v4820_v30  ;;  %v9289_v30 = vld [vmem:[#allocation3] sm:$0xf]  ;;  %v4561_v10 = vld [vmem:[%s13919_s6 + $0x188] sm:$0xff] }
 0x816   : > { %v5162_v40 = vpack.c.bf16 %v4789_v51, %v4788_v48  ;;  %v9298_v51 = vor.u32 %v10647_v31, %v9297_v36  ;;  %v9290_v48 = vor.u32 %v10646_v4, %v9289_v30  ;;  %v9395_v36 = vld [vmem:[#allocation3 + $0xe8] sm:$0xf0]  ;;  %v9387_v30 = vld [vmem:[#allocation3 + $0xe0] sm:$0xf0]  ;;  %v9425_v4 = vld [vmem:[#allocation3 + $0x108] sm:$0xf] }
 0x817   : > { %7072 = vmatpush.bf16.msra.mxu3 %v5178_v57 }
 0x818   : > { %v4325_v42 = vpop.xlane.xlu0 %4324  ;;  %v4261_v28 = vpop.xlane.xlu2 %4260  ;;  %6734 = vmatpush.bf16.msra.mxu1 %v5162_v40 }
 0x819   : > { %v4327_v55 = vpop.xlane.xlu1 %4326  ;;  %v4674_v33 = vadd.f32 %v4546_v22, %v4325_v42  ;;  %v4642_v56 = vadd.f32 %v4514_v16, %v4261_v28  ;;  %v4528_v42 = vld [vmem:[%s13919_s6 + $0x80] sm:$0xff]  ;;  %v9299_v16 = vld [vmem:[#allocation3 + $0x28] sm:$0xf0] }
 0x81a   : > { %v4675_v7 = vadd.f32 %v4547_v15, %v4327_v55 }
 0x81b   : > { %v4802_v18 = vmax.f32 %v4674_v33, 0.0  ;;  %v4770_v5 = vmax.f32 %v4642_v56, 0.0  ;;  %v4529_v56 = vld [vmem:[%s13919_s6 + $0x88] sm:$0xff] }
 0x81c   : > { %v4803_v19 = vmax.f32 %v4675_v7, 0.0  ;;  %v10643_v7 = vld [vmem:[#allocation3 + $0xc] sm:$0xf] }
 0x81e   : > { %v5169_v54 = vpack.c.bf16 %v4803_v19, %v4802_v18 }
 0x820   : > { %6904 = vmatpush.bf16.msra.mxu2 %v5169_v54  ;;  %v4263_v27 = vpop.xlane.xlu0 %4262  ;;  %v4359_v12 = vpop.xlane.xlu2 %4358  ;;  %v9302_v54 = vor.u32 %v10643_v7, %v9299_v16  ;;  %v10686_v7 = vld [vmem:[#allocation3 + $0x15c] sm:$0xf0] }
 0x821   : > { %v4357_v23 = vpop.xlane.xlu1 %4356  ;;  %v4643_v35 = vadd.f32 %v4515_v45, %v4263_v27  ;;  %v4691_v13 = vadd.f32 %v4563_v58, %v4359_v12  ;;  %v10642_v27 = vld [vmem:[#allocation3 + $0x4] sm:$0xf] }
 0x822   : > { %v4690_v37 = vadd.f32 %v4562_v39, %v4357_v23  ;;  %v9291_v12 = vld [vmem:[#allocation3 + $0x20] sm:$0xf0]  ;;  %v9329_v23 = vld [vmem:[#allocation3 + $0x48] sm:$0xf] }
 0x823   : > { %v4771_v53 = vmax.f32 %v4643_v35, 0.0  ;;  %v4819_v14 = vmax.f32 %v4691_v13, 0.0  ;;  %v10655_v35 = vld [vmem:[#allocation3 + $0x64] sm:$0xf0]  ;;  %v9321_v13 = vld [vmem:[#allocation3 + $0x40] sm:$0xf] }
 0x824   : > { %v4818_v49 = vmax.f32 %v4690_v37, 0.0  ;;  %v10654_v37 = vld [vmem:[#allocation3 + $0x5c] sm:$0xf0] }
 0x825   : > { %v5153_v1 = vpack.c.bf16 %v4771_v53, %v4770_v5 }
 0x826   : > { %v5177_v34 = vpack.c.bf16 %v4819_v14, %v4818_v49  ;;  %v9294_v14 = vor.u32 %v10642_v27, %v9291_v12  ;;  %v9330_v49 = vor.u32 %v10655_v35, %v9329_v23  ;;  %v9489_v27 = vld [vmem:[#allocation3 + $0x188] sm:$0xf]  ;;  %v10694_v23 = vld [vmem:[#allocation3 + $0x19c] sm:$0xf0] }
 0x827   : > { %6566 = vmatpush.bf16.msra.mxu0 %v5153_v1  ;;  %v9322_v1 = vor.u32 %v10654_v37, %v9321_v13  ;;  %v10695_v12 = vld [vmem:[#allocation3 + $0x1a4] sm:$0xf0] }
 0x828   : > { %v4293_v2 = vpop.xlane.xlu0 %4292  ;;  %v4321_v21 = vpop.xlane.xlu2 %4320  ;;  %7073 = vmatpush.bf16.msra.mxu3 %v5177_v34  ;;  %v9331_v34 = vld [vmem:[#allocation3 + $0x68] sm:$0xf0]  ;;  %v9490_v13 = vor.u32 %v10695_v12, %v9489_v27  ;;  %v5218_v12 = vld [vmem:[%s13921_s8 + $0x10] sm:$0xff] }
 0x829   : > { %v4295_v61 = vpop.xlane.xlu1 %4294  ;;  %v4658_v43 = vadd.f32 %v4530_v52, %v4293_v2  ;;  %v4672_v62 = vadd.f32 %v4544_v24, %v4321_v21  ;;  %v10651_v52 = vld [vmem:[#allocation3 + $0x4c] sm:$0xf]  ;;  %v10650_v2 = vld [vmem:[#allocation3 + $0x44] sm:$0xf]  ;;  %v10662_v24 = vld [vmem:[#allocation3 + $0x9c] sm:$0xf0] }
 0x82a   : > { %v4659_v9 = vadd.f32 %v4531_v32, %v4295_v61  ;;  %v9334_v32 = vor.u32 %v10651_v52, %v9331_v34  ;;  %v9323_v21 = vld [vmem:[#allocation3 + $0x60] sm:$0xf0]  ;;  %v9361_v61 = vld [vmem:[#allocation3 + $0x88] sm:$0xf] }
 0x82b   : > { %v4786_v3 = vmax.f32 %v4658_v43, 0.0  ;;  %v4800_v25 = vmax.f32 %v4672_v62, 0.0  ;;  %v10663_v43 = vld [vmem:[#allocation3 + $0xa4] sm:$0xf0]  ;;  %v9483_v52 = vld [vmem:[#allocation3 + $0x1a0] sm:$0xf0] }
 0x82c   : > { %v4787_v29 = vmax.f32 %v4659_v9, 0.0  ;;  %v9353_v9 = vld [vmem:[#allocation3 + $0x80] sm:$0xf]  ;;  %v9521_v34 = vld [vmem:[#allocation3 + $0x1c8] sm:$0xf] }
 0x82d   : > { %v9354_v62 = vor.u32 %v10662_v24, %v9353_v9  ;;  %v10699_v24 = vld [vmem:[#allocation3 + $0x1cc] sm:$0xf] }
 0x82e   : > { %v5161_v26 = vpack.c.bf16 %v4787_v29, %v4786_v3  ;;  %v9326_v3 = vor.u32 %v10650_v2, %v9323_v21  ;;  %v9362_v29 = vor.u32 %v10663_v43, %v9361_v61  ;;  %v9513_v2 = vld [vmem:[#allocation3 + $0x1c0] sm:$0xf] }
 0x82f   : > { %v10702_v21 = vld [vmem:[#allocation3 + $0x1dc] sm:$0xf0] }
 0x830   : > { %6735 = vmatpush.bf16.msra.mxu1 %v5161_v26  ;;  %v4323_v6 = vpop.xlane.xlu0 %4322  ;;  %v4259_v11 = vpop.xlane.xlu2 %4258  ;;  %v10659_v26 = vld [vmem:[#allocation3 + $0x8c] sm:$0xf]  ;;  %v9514_v9 = vor.u32 %v10702_v21, %v9513_v2 }
 0x831   : > { %v4673_v8 = vadd.f32 %v4545_v59, %v4323_v6  ;;  %v4641_v63 = vadd.f32 %v4513_v0, %v4259_v11  ;;  %v4257_v46 = vpop.xlane.xlu1 %4256  ;;  %v9363_v59 = vld [vmem:[#allocation3 + $0xa8] sm:$0xf0]  ;;  %v9355_v6 = vld [vmem:[#allocation3 + $0xa0] sm:$0xf0]  ;;  %v9393_v11 = vld [vmem:[#allocation3 + $0xc8] sm:$0xf] }
 0x832   : > { %v4640_v20 = vadd.f32 %v4512_v47, %v4257_v46  ;;  %v9366_v0 = vor.u32 %v10659_v26, %v9363_v59  ;;  %v10658_v47 = vld [vmem:[#allocation3 + $0x84] sm:$0xf]  ;;  %v9553_v59 = vld [vmem:[#allocation3 + $0x208] sm:$0xf] }
 0x833   : > { %v4801_v60 = vmax.f32 %v4673_v8, 0.0  ;;  %v4769_v50 = vmax.f32 %v4641_v63, 0.0  ;;  %v9385_v8 = vld [vmem:[#allocation3 + $0xc0] sm:$0xf]  ;;  %v9358_v46 = vor.u32 %v10658_v47, %v9355_v6  ;;  %v9515_v26 = vld [vmem:[#allocation3 + $0x1e0] sm:$0xf0] }
 0x834   : > { %v4768_v44 = vmax.f32 %v4640_v20, 0.0  ;;  %v10670_v63 = vld [vmem:[#allocation3 + $0xdc] sm:$0xf0] }
 0x835   : > { %v5168_v38 = vpack.c.bf16 %v4801_v60, %v4800_v25  ;;  %v10671_v25 = vld [vmem:[#allocation3 + $0xe4] sm:$0xf0]  ;;  %v9386_v60 = vor.u32 %v10670_v63, %v9385_v8  ;;  %v9545_v47 = vld [vmem:[#allocation3 + $0x200] sm:$0xf] }
 0x836   : > { %v5152_v17 = vpack.c.bf16 %v4769_v50, %v4768_v44  ;;  %v9394_v20 = vor.u32 %v10671_v25, %v9393_v11  ;;  %v10667_v50 = vld [vmem:[#allocation3 + $0xcc] sm:$0xf]  ;;  %v10666_v44 = vld [vmem:[#allocation3 + $0xc4] sm:$0xf]  ;;  %v10710_v6 = vld [vmem:[#allocation3 + $0x21c] sm:$0xf0] }
 0x837   : > { %6905 = vmatpush.bf16.msra.mxu2 %v5168_v38  ;;  %v9398_v31 = vor.u32 %v10667_v50, %v9395_v36  ;;  %v10679_v38 = vld [vmem:[#allocation3 + $0x124] sm:$0xf0]  ;;  %v9546_v8 = vor.u32 %v10710_v6, %v9545_v47 }
 0x838   : > { %6567 = vmatpush.bf16.msra.mxu0 %v5152_v17  ;;  %v4353_v57 = vpop.xlane.xlu0 %4352  ;;  %v4289_v28 = vpop.xlane.xlu2 %4288  ;;  %v9417_v17 = vld [vmem:[#allocation3 + $0x100] sm:$0xf] }
 0x839   : > { %v4688_v22 = vadd.f32 %v4560_v41, %v4353_v57  ;;  %v4355_v40 = vpop.xlane.xlu1 %4354  ;;  %v4656_v18 = vadd.f32 %v4528_v42, %v4289_v28  ;;  %v10678_v41 = vld [vmem:[#allocation3 + $0x11c] sm:$0xf0]  ;;  %v10675_v57 = vld [vmem:[#allocation3 + $0x10c] sm:$0xf]  ;;  %v9419_v42 = vld [vmem:[#allocation3 + $0x120] sm:$0xf0] }
 0x83a   : > { %v4689_v15 = vadd.f32 %v4561_v10, %v4355_v40  ;;  %6906 = vmatmul.bf16.vlgmr.msra.gmra.mxu2 %v9298_v51  ;;  %v9390_v51 = vor.u32 %v10666_v44, %v9387_v30  ;;  %v9426_v10 = vor.u32 %v10679_v38, %v9425_v4  ;;  %v9457_v28 = vld [vmem:[#allocation3 + $0x148] sm:$0xf]  ;;  %v10706_v44 = vld [vmem:[#allocation3 + $0x204] sm:$0xf] }
 0x83b   : > { %v4816_v55 = vmax.f32 %v4688_v22, 0.0  ;;  %6568 = vmatmul.bf16.vlgmr.msra.gmra.mxu0 %v9290_v48  ;;  %v4784_v39 = vmax.f32 %v4656_v18, 0.0  ;;  %v9418_v48 = vor.u32 %v10678_v41, %v9417_v17  ;;  %v9427_v22 = vld [vmem:[#allocation3 + $0x128] sm:$0xf0]  ;;  %v9547_v30 = vld [vmem:[#allocation3 + $0x220] sm:$0xf0] }
 0x83c   : > { %v4817_v33 = vmax.f32 %v4689_v15, 0.0  ;;  %v9430_v40 = vor.u32 %v10675_v57, %v9427_v22  ;;  %v10674_v15 = vld [vmem:[#allocation3 + $0x104] sm:$0xf]  ;;  %v9585_v4 = vld [vmem:[#allocation3 + $0x248] sm:$0xf]  ;;  %v9550_v57 = vor.u32 %v10706_v44, %v9547_v30 }
 0x83d   : > { %v9422_v16 = vor.u32 %v10674_v15, %v9419_v42  ;;  %v10719_v38 = vld [vmem:[#allocation3 + $0x264] sm:$0xf0]  ;;  %v9577_v41 = vld [vmem:[#allocation3 + $0x240] sm:$0xf] }
 0x83e   : > { %v5176_v19 = vpack.c.bf16 %v4817_v33, %v4816_v55  ;;  %v10687_v55 = vld [vmem:[#allocation3 + $0x164] sm:$0xf0]  ;;  %v9449_v33 = vld [vmem:[#allocation3 + $0x140] sm:$0xf]  ;;  %v9586_v22 = vor.u32 %v10719_v38, %v9585_v4 }
 0x83f   : > { %v9458_v18 = vor.u32 %v10687_v55, %v9457_v28  ;;  %v9641_v44 = vld [vmem:[#allocation3 + $0x2c0] sm:$0xf] }
 0x840   : > { %7074 = vmatpush.bf16.msra.mxu3 %v5176_v19  ;;  %v4291_v45 = vpop.xlane.xlu0 %4290  ;;  %v9450_v19 = vor.u32 %v10686_v7, %v9449_v33  ;;  %v5217_v33 = vld [vmem:[%s13921_s8 + $0x8] sm:$0xff]  ;;  %v10734_v30 = vld [vmem:[#allocation3 + $0x2dc] sm:$0xf0] }
 0x841   : > { %v4657_v58 = vadd.f32 %v4529_v56, %v4291_v45  ;;  %v10683_v56 = vld [vmem:[#allocation3 + $0x14c] sm:$0xf] }
 0x842   : > { %v10715_v7 = vld [vmem:[#allocation3 + $0x24c] sm:$0xf] }
 0x843   : > { %v4785_v5 = vmax.f32 %v4657_v58, 0.0  ;;  %7075 = vmatmul.bf16.vlgmr.msra.gmra.mxu3 %v9302_v54  ;;  %v9459_v54 = vld [vmem:[#allocation3 + $0x168] sm:$0xf0]  ;;  %v10682_v58 = vld [vmem:[#allocation3 + $0x144] sm:$0xf] }
 0x844   : > { %v9462_v45 = vor.u32 %v10683_v56, %v9459_v54 }
 0x845   : > { %v5160_v53 = vpack.c.bf16 %v4785_v5, %v4784_v39  ;;  %v9451_v39 = vld [vmem:[#allocation3 + $0x160] sm:$0xf0]  ;;  %v9481_v5 = vld [vmem:[#allocation3 + $0x180] sm:$0xf] }
 0x846   : > { %v9454_v35 = vor.u32 %v10682_v58, %v9451_v39  ;;  %v9482_v37 = vor.u32 %v10694_v23, %v9481_v5  ;;  %v10714_v23 = vld [vmem:[#allocation3 + $0x244] sm:$0xf] }
 0x847   : > { %6736 = vmatpush.bf16.msra.mxu1 %v5160_v53  ;;  %v10691_v53 = vld [vmem:[#allocation3 + $0x18c] sm:$0xf] }
 0x84a   : > { %6737 = vmatmul.bf16.vlgmr.msra.gmra.mxu1 %v9294_v14  ;;  %6911 = vmatmul.bf16.gmra.mxu2 %v9330_v49  ;;  %v9491_v14 = vld [vmem:[#allocation3 + $0x1a8] sm:$0xf0] }
 0x84b   : > { %6573 = vmatmul.bf16.gmra.mxu0 %v9322_v1  ;;  %v9494_v49 = vor.u32 %v10691_v53, %v9491_v14  ;;  %v10690_v1 = vld [vmem:[#allocation3 + $0x184] sm:$0xf]  ;;  %v9609_v14 = vld [vmem:[#allocation3 + $0x280] sm:$0xf] }
 0x84c   : > { %v9486_v61 = vor.u32 %v10690_v1, %v9483_v52 }
 0x853   : > { %7080 = vmatmul.bf16.gmra.mxu3 %v9334_v32  ;;  %v10703_v32 = vld [vmem:[#allocation3 + $0x1e4] sm:$0xf0] }
 0x854   : > { %v9522_v43 = vor.u32 %v10703_v32, %v9521_v34 }
 0x85a   : > { %6742 = vmatmul.bf16.gmra.mxu1 %v9326_v3  ;;  %6916 = vmatmul.bf16.gmra.mxu2 %v9362_v29  ;;  %v9523_v3 = vld [vmem:[#allocation3 + $0x1e8] sm:$0xf0] }
 0x85b   : > { %6578 = vmatmul.bf16.gmra.mxu0 %v9354_v62  ;;  %v9526_v29 = vor.u32 %v10699_v24, %v9523_v3  ;;  %v10698_v62 = vld [vmem:[#allocation3 + $0x1c4] sm:$0xf]  ;;  %v5219_v3 = vld [vmem:[%s13921_s8 + $0x18] sm:$0xff] }
 0x85c   : > { %v9518_v11 = vor.u32 %v10698_v62, %v9515_v26  ;;  %v9619_v62 = vld [vmem:[#allocation3 + $0x2a8] sm:$0xf0] }
 0x863   : > { %7085 = vmatmul.bf16.gmra.mxu3 %v9366_v0  ;;  %v10711_v0 = vld [vmem:[#allocation3 + $0x224] sm:$0xf0] }
 0x864   : > { %v9554_v25 = vor.u32 %v10711_v0, %v9553_v59 }
 0x86a   : > { %6747 = vmatmul.bf16.gmra.mxu1 %v9358_v46  ;;  %6921 = vmatmul.bf16.gmra.mxu2 %v9394_v20  ;;  %v10707_v46 = vld [vmem:[#allocation3 + $0x20c] sm:$0xf] }
 0x86b   : > { %6583 = vmatmul.bf16.gmra.mxu0 %v9386_v60  ;;  %v9555_v20 = vld [vmem:[#allocation3 + $0x228] sm:$0xf0] }
 0x86c   : > { %v9558_v50 = vor.u32 %v10707_v46, %v9555_v20  ;;  %v10722_v20 = vld [vmem:[#allocation3 + $0x284] sm:$0xf] }
 0x873   : > { %7090 = vmatmul.bf16.gmra.mxu3 %v9398_v31  ;;  %v5216_v31 = vld [vmem:[%s13921_s8] sm:$0xff] }
 0x87a   : > { %6752 = vmatmul.bf16.gmra.mxu1 %v9390_v51  ;;  %6926 = vmatmul.bf16.gmra.mxu2 %v9426_v10  ;;  %v10718_v51 = vld [vmem:[#allocation3 + $0x25c] sm:$0xf0] }
 0x87b   : > { %6588 = vmatmul.bf16.gmra.mxu0 %v9418_v48  ;;  %v9578_v15 = vor.u32 %v10718_v51, %v9577_v41 }
 0x883   : > { %7095 = vmatmul.bf16.gmra.mxu3 %v9430_v40 }
 0x88a   : > { %6757 = vmatmul.bf16.gmra.mxu1 %v9422_v16  ;;  %6931 = vmatmul.bf16.gmra.mxu2 %v9458_v18  ;;  %v9587_v16 = vld [vmem:[#allocation3 + $0x268] sm:$0xf0] }
 0x88b   : > { %6593 = vmatmul.bf16.gmra.mxu0 %v9450_v19  ;;  %v9590_v58 = vor.u32 %v10715_v7, %v9587_v16 }
 0x893   : > { %7100 = vmatmul.bf16.gmra.mxu3 %v9462_v45 }
 0x89a   : > { %6762 = vmatmul.bf16.gmra.mxu1 %v9454_v35  ;;  %6936 = vmatmul.bf16.gmra.mxu2 %v9490_v13  ;;  %v9579_v35 = vld [vmem:[#allocation3 + $0x260] sm:$0xf0]  ;;  %v9617_v13 = vld [vmem:[#allocation3 + $0x288] sm:$0xf] }
 0x89b   : > { %6598 = vmatmul.bf16.gmra.mxu0 %v9482_v37  ;;  %v10727_v37 = vld [vmem:[#allocation3 + $0x2a4] sm:$0xf0]  ;;  %v9582_v32 = vor.u32 %v10714_v23, %v9579_v35 }
 0x89c   : > { %v9618_v2 = vor.u32 %v10727_v37, %v9617_v13  ;;  %v10743_v23 = vld [vmem:[#allocation3 + $0x324] sm:$0xf0]  ;;  %v9673_v13 = vld [vmem:[#allocation3 + $0x300] sm:$0xf] }
 0x89d   : > { %v10742_v37 = vld [vmem:[#allocation3 + $0x31c] sm:$0xf0] }
 0x8a3   : > { %7105 = vmatmul.bf16.gmra.mxu3 %v9494_v49  ;;  %v10726_v49 = vld [vmem:[#allocation3 + $0x29c] sm:$0xf0] }
 0x8aa   : > { %6767 = vmatmul.bf16.gmra.mxu1 %v9486_v61  ;;  %6941 = vmatmul.bf16.gmra.mxu2 %v9522_v43  ;;  %v9610_v61 = vor.u32 %v10726_v49, %v9609_v14 }
 0x8ab   : > { %6603 = vmatmul.bf16.gmra.mxu0 %v9514_v9 }
 0x8b3   : > { %7110 = vmatmul.bf16.gmra.mxu3 %v9526_v29  ;;  %v10723_v29 = vld [vmem:[#allocation3 + $0x28c] sm:$0xf] }
 0x8b8   : > { %v6569_v63 = vpop.f32.mrf.mxu0 }
 0x8b9   : > { %v6570_v17 = vadd.f32 %v6569_v63, %v5216_v31  ;;  %v5220_v63 = vld [vmem:[%s13921_s8 + $0x20] sm:$0xff] }
 0x8ba   : > { %6772 = vmatmul.bf16.gmra.mxu1 %v9518_v11  ;;  %6946 = vmatmul.bf16.gmra.mxu2 %v9554_v25  ;;  %v9622_v11 = vor.u32 %v10723_v29, %v9619_v62 }
 0x8bb   : > { %6608 = vmatmul.bf16.gmra.mxu0 %v9546_v8 }
 0x8bd   : > { %v6907_v60 = vpop.f32.mrf.mxu2 }
 0x8c0   : > { %v6571_v36 = vpop.f32.mrf.mxu0 }
 0x8c1   : > { %v6572_v56 = vadd.f32 %v6571_v36, %v5217_v33  ;;  %v10735_v36 = vld [vmem:[#allocation3 + $0x2e4] sm:$0xf0] }
 0x8c3   : > { %7115 = vmatmul.bf16.gmra.mxu3 %v9558_v50  ;;  %v9649_v50 = vld [vmem:[#allocation3 + $0x2c8] sm:$0xf] }
 0x8c4   : > { %v9650_v51 = vor.u32 %v10735_v36, %v9649_v50  ;;  %v10751_v50 = vld [vmem:[#allocation3 + $0x364] sm:$0xf0]  ;;  %v4206_v36 = vld [vmem:[#allocation2 + $0x20] sm:$0xff] }
 0x8c5   : > { %v6909_v10 = vpop.f32.mrf.mxu2  ;;  %4412 = vmax.xlane.f32.xlu0 %v4206_v36  ;;  %v9747_v36 = vld [vmem:[#allocation3 + $0x3a8] sm:$0xf0] }
 0x8c6   : > { %v7076_v48 = vpop.f32.mrf.mxu3 }
 0x8c7   : > { %v6738_v40 = vpop.f32.mrf.mxu1 }
 0x8c8   : > { %v6574_v42 = vpop.f32.mrf.mxu0  ;;  %v6739_v28 = vadd.f32 %v6738_v40, %v6570_v17 }
 0x8c9   : > { %v6575_v53 = vadd.f32 %v6574_v42, %v5218_v12  ;;  %v10731_v42 = vld [vmem:[#allocation3 + $0x2cc] sm:$0xf]  ;;  %v9643_v12 = vld [vmem:[#allocation3 + $0x2e0] sm:$0xf0] }
 0x8ca   : > { %v6908_v55 = vadd.f32 %v6907_v60, %v6739_v28  ;;  %6777 = vmatmul.bf16.gmra.mxu1 %v9550_v57  ;;  %6951 = vmatmul.bf16.gmra.mxu2 %v9586_v22  ;;  %v9611_v60 = vld [vmem:[#allocation3 + $0x2a0] sm:$0xf0]  ;;  %v9651_v28 = vld [vmem:[#allocation3 + $0x2e8] sm:$0xf0] }
 0x8cb   : > { %6613 = vmatmul.bf16.gmra.mxu0 %v9578_v15  ;;  %v9614_v41 = vor.u32 %v10722_v20, %v9611_v60  ;;  %v5221_v15 = vld [vmem:[%s13921_s8 + $0x28] sm:$0xff]  ;;  %v9675_v20 = vld [vmem:[#allocation3 + $0x320] sm:$0xf0] }
 0x8cc   : > { %v12579_v18 = vadd.f32 %v7076_v48, %v6908_v55  ;;  %v9642_v48 = vor.u32 %v10734_v30, %v9641_v44  ;;  %v9713_v60 = vld [vmem:[#allocation3 + $0x348] sm:$0xf]  ;;  %v4238_v44 = vld [vmem:[#allocation2 + $0xb8] sm:$0xff] }
 0x8cd   : > { %v6912_v19 = vpop.f32.mrf.mxu2  ;;  %4476 = vmax.xlane.f32.xlu1 %v4238_v44 }
 0x8ce   : > { %v7078_v54 = vpop.f32.mrf.mxu3 }
 0x8cf   : > { %v6740_v45 = vpop.f32.mrf.mxu1 }
 0x8d0   : > { %v6576_v39 = vpop.f32.mrf.mxu0  ;;  %v6741_v27 = vadd.f32 %v6740_v45, %v6572_v56  ;;  %v9654_v56 = vor.u32 %v10731_v42, %v9651_v28  ;;  %v5225_v28 = vld [vmem:[%s13921_s8 + $0x48] sm:$0xff] }
 0x8d1   : > { %v6577_v0 = vadd.f32 %v6576_v39, %v5219_v3  ;;  %v9683_v3 = vld [vmem:[#allocation3 + $0x328] sm:$0xf0] }
 0x8d2   : > { %v6910_v5 = vadd.f32 %v6909_v10, %v6741_v27  ;;  %v10730_v27 = vld [vmem:[#allocation3 + $0x2c4] sm:$0xf] }
 0x8d3   : > { %7120 = vmatmul.bf16.gmra.mxu3 %v9590_v58  ;;  %v5222_v58 = vld [vmem:[%s13921_s8 + $0x30] sm:$0xff] }
 0x8d4   : > { %v12584_v1 = vadd.f32 %v7078_v54, %v6910_v5  ;;  %v9681_v5 = vld [vmem:[#allocation3 + $0x308] sm:$0xf] }
 0x8d5   : > { %v6914_v52 = vpop.f32.mrf.mxu2 }
 0x8d6   : > { %v7081_v34 = vpop.f32.mrf.mxu3 }
 0x8d7   : > { %v6743_v21 = vpop.f32.mrf.mxu1 }
 0x8d8   : > { %v6579_v43 = vpop.f32.mrf.mxu0  ;;  %v6744_v9 = vadd.f32 %v6743_v21, %v6575_v53 }
 0x8d9   : > { %v6580_v31 = vadd.f32 %v6579_v43, %v5220_v63  ;;  %v10738_v63 = vld [vmem:[#allocation3 + $0x304] sm:$0xf] }
 0x8da   : > { %v6913_v24 = vadd.f32 %v6912_v19, %v6744_v9  ;;  %6782 = vmatmul.bf16.gmra.mxu1 %v9582_v32  ;;  %6956 = vmatmul.bf16.gmra.mxu2 %v9618_v2  ;;  %v9674_v2 = vor.u32 %v10742_v37, %v9673_v13  ;;  %v5223_v9 = vld [vmem:[%s13921_s8 + $0x38] sm:$0xff]  ;;  %v5226_v13 = vld [vmem:[%s13921_s8 + $0x50] sm:$0xff]  ;;  %v10746_v37 = vld [vmem:[#allocation3 + $0x344] sm:$0xf] }
 0x8db   : > { %6618 = vmatmul.bf16.gmra.mxu0 %v9610_v61 }
 0x8dc   : > { %v12589_v26 = vadd.f32 %v7081_v34, %v6913_v24  ;;  %v9682_v34 = vor.u32 %v10743_v23, %v9681_v5  ;;  %v10739_v24 = vld [vmem:[#allocation3 + $0x30c] sm:$0xf] }
 0x8dd   : > { %v6917_v59 = vpop.f32.mrf.mxu2 }
 0x8de   : > { %v7083_v47 = vpop.f32.mrf.mxu3 }
 0x8df   : > { %v6745_v6 = vpop.f32.mrf.mxu1 }
 0x8e0   : > { %v6581_v25 = vpop.f32.mrf.mxu0  ;;  %v6746_v8 = vadd.f32 %v6745_v6, %v6577_v0  ;;  %v9686_v6 = vor.u32 %v10739_v24, %v9683_v3 }
 0x8e1   : > { %v6582_v7 = vadd.f32 %v6581_v25, %v5221_v15 }
 0x8e2   : > { %v6915_v46 = vadd.f32 %v6914_v52, %v6746_v8  ;;  %v9646_v52 = vor.u32 %v10730_v27, %v9643_v12  ;;  %v5224_v8 = vld [vmem:[%s13921_s8 + $0x40] sm:$0xff] }
 0x8e3   : > { %7125 = vmatmul.bf16.gmra.mxu3 %v9622_v11 }
 0x8e4   : > { %v12594_v4 = vadd.f32 %v7083_v47, %v6915_v46 }
 0x8e5   : > { %v6919_v38 = vpop.f32.mrf.mxu2 }
 0x8e6   : > { %v7086_v17 = vpop.f32.mrf.mxu3 }
 0x8e7   : > { %v6748_v10 = vpop.f32.mrf.mxu1 }
 0x8e8   : > { %v6584_v57 = vpop.f32.mrf.mxu0  ;;  %v6749_v22 = vadd.f32 %v6748_v10, %v6580_v31  ;;  %v4239_v31 = vld [vmem:[#allocation2 + $0x38] sm:$0xff] }
 0x8e9   : > { %v6585_v35 = vadd.f32 %v6584_v57, %v5222_v58  ;;  %4478 = vmax.xlane.f32.xlu2 %v4239_v31  ;;  %v9714_v57 = vor.u32 %v10751_v50, %v9713_v60  ;;  %v4237_v60 = vld [vmem:[#allocation2 + $0x378] sm:$0xff]  ;;  %v10755_v50 = vld [vmem:[#allocation3 + $0x38c] sm:$0xf] }
 0x8ea   : > { %v6918_v40 = vadd.f32 %v6917_v59, %v6749_v22  ;;  %6787 = vmatmul.bf16.gmra.mxu1 %v9614_v41  ;;  %6961 = vmatmul.bf16.gmra.mxu2 %v9650_v51 }
 0x8eb   : > { %6623 = vmatmul.bf16.gmra.mxu0 %v9642_v48  ;;  %v9678_v48 = vor.u32 %v10738_v63, %v9675_v20  ;;  %v4204_v20 = vld [vmem:[#allocation2 + $0x248] sm:$0xff] }
 0x8ec   : > { %v12599_v55 = vadd.f32 %v7086_v17, %v6918_v40  ;;  %v10750_v17 = vld [vmem:[#allocation3 + $0x35c] sm:$0xf0] }
 0x8ed   : > { %v6922_v33 = vpop.f32.mrf.mxu2 }
 0x8ee   : > { %v7088_v16 = vpop.f32.mrf.mxu3 }
 0x8ef   : > { %v6750_v19 = vpop.f32.mrf.mxu1 }
 0x8f0   : > { %v6586_v54 = vpop.f32.mrf.mxu0  ;;  %v6751_v45 = vadd.f32 %v6750_v19, %v6582_v7  ;;  %v4255_v7 = vld [vmem:[#allocation2 + $0x190] sm:$0xff]  ;;  %v4207_v19 = vld [vmem:[#allocation2 + $0xe8] sm:$0xff] }
 0x8f1   : > { %v6587_v59 = vadd.f32 %v6586_v54, %v5223_v9  ;;  %v9715_v54 = vld [vmem:[#allocation3 + $0x368] sm:$0xf0]  ;;  %4510 = vmax.xlane.f32.xlu0 %v4255_v7  ;;  %4414 = vmax.xlane.f32.xlu1 %v4207_v19  ;;  %v10758_v9 = vld [vmem:[#allocation3 + $0x39c] sm:$0xf0]  ;;  %v4253_v7 = vld [vmem:[#allocation2 + $0x270] sm:$0xff] }
 0x8f2   : > { %v6920_v39 = vadd.f32 %v6919_v38, %v6751_v45  ;;  %v9705_v38 = vld [vmem:[#allocation3 + $0x340] sm:$0xf] }
 0x8f3   : > { %7130 = vmatmul.bf16.gmra.mxu3 %v9654_v56  ;;  %v9706_v40 = vor.u32 %v10750_v17, %v9705_v38  ;;  %v10747_v56 = vld [vmem:[#allocation3 + $0x34c] sm:$0xf] }
 0x8f4   : > { %v12604_v53 = vadd.f32 %v7088_v16, %v6920_v39  ;;  %v4254_v16 = vld [vmem:[#allocation2 + $0x310] sm:$0xff]  ;;  %v9718_v5 = vor.u32 %v10747_v56, %v9715_v54  ;;  %v9769_v56 = vld [vmem:[#allocation3 + $0x3c0] sm:$0xf] }
 0x8f5   : > { %v6924_v14 = vpop.f32.mrf.mxu2  ;;  %4508 = vmax.xlane.f32.xlu2 %v4254_v16  ;;  %v4252_v16 = vld [vmem:[#allocation2 + $0x298] sm:$0xff]  ;;  %v10766_v54 = vld [vmem:[#allocation3 + $0x3dc] sm:$0xf0] }
 0x8f6   : > { %v7091_v49 = vpop.f32.mrf.mxu3 }
 0x8f7   : > { %v6753_v32 = vpop.f32.mrf.mxu1 }
 0x8f8   : > { %v6589_v21 = vpop.f32.mrf.mxu0  ;;  %v6754_v61 = vadd.f32 %v6753_v32, %v6585_v35  ;;  %v4236_v32 = vld [vmem:[#allocation2 + $0x250] sm:$0xff] }
 0x8f9   : > { %v6590_v30 = vadd.f32 %v6589_v21, %v5224_v8  ;;  %v4222_v21 = vld [vmem:[#allocation2 + $0x198] sm:$0xff]  ;;  %4472 = vmax.xlane.f32.xlu0 %v4236_v32  ;;  %v4221_v32 = vld [vmem:[#allocation2 + $0x120] sm:$0xff] }
 0x8fa   : > { %v6923_v43 = vadd.f32 %v6922_v33, %v6754_v61  ;;  %6792 = vmatmul.bf16.gmra.mxu1 %v9646_v52  ;;  %6966 = vmatmul.bf16.gmra.mxu2 %v9682_v34  ;;  %v9745_v52 = vld [vmem:[#allocation3 + $0x388] sm:$0xf]  ;;  %v5227_v8 = vld [vmem:[%s13921_s8 + $0x58] sm:$0xff] }
 0x8fb   : > { %6628 = vmatmul.bf16.gmra.mxu0 %v9674_v2  ;;  %v10759_v34 = vld [vmem:[#allocation3 + $0x3a4] sm:$0xf0]  ;;  %4444 = vmax.xlane.f32.xlu1 %v4222_v21  ;;  %v9779_v21 = vld [vmem:[#allocation3 + $0x3e8] sm:$0xf0] }
 0x8fc   : > { %v12609_v29 = vadd.f32 %v7091_v49, %v6923_v43  ;;  %v9707_v49 = vld [vmem:[#allocation3 + $0x360] sm:$0xf0]  ;;  %v4223_v2 = vld [vmem:[#allocation2 + $0x2e8] sm:$0xff]  ;;  %v9737_v43 = vld [vmem:[#allocation3 + $0x380] sm:$0xf] }
 0x8fd   : > { %v6927_v62 = vpop.f32.mrf.mxu2  ;;  %4446 = vmax.xlane.f32.xlu2 %v4223_v2  ;;  %v10763_v2 = vld [vmem:[#allocation3 + $0x3cc] sm:$0xf] }
 0x8fe   : > { %v7093_v0 = vpop.f32.mrf.mxu3 }
 0x8ff   : > { %v6755_v47 = vpop.f32.mrf.mxu1 }
 0x900   : > { %v6591_v11 = vpop.f32.mrf.mxu0  ;;  %v6756_v25 = vadd.f32 %v6755_v47, %v6587_v59  ;;  %v9710_v59 = vor.u32 %v10746_v37, %v9707_v49 }
 0x901   : > { %v6592_v39 = vadd.f32 %v6591_v11, %v5225_v28  ;;  %v10767_v28 = vld [vmem:[#allocation3 + $0x3e4] sm:$0xf0] }
 0x902   : > { %v6925_v46 = vadd.f32 %v6924_v14, %v6756_v25 }
 0x903   : > { %7135 = vmatmul.bf16.gmra.mxu3 %v9686_v6  ;;  %v9738_v6 = vor.u32 %v10758_v9, %v9737_v43  ;;  %4474 = vmax.xlane.f32.xlu1 %v4237_v60  ;;  %v4203_v60 = vld [vmem:[#allocation2 + $0x2b8] sm:$0xff] }
 0x904   : > { %v12614_v41 = vadd.f32 %v7093_v0, %v6925_v46  ;;  %v9746_v0 = vor.u32 %v10759_v34, %v9745_v52  ;;  %v4205_v46 = vld [vmem:[#allocation2 + $0x40] sm:$0xff]  ;;  %v4235_v52 = vld [vmem:[#allocation2 + $0x3d0] sm:$0xff] }
 0x905   : > { %v6929_v51 = vpop.f32.mrf.mxu2  ;;  %4410 = vmax.xlane.f32.xlu0 %v4205_v46  ;;  %4408 = vmax.xlane.f32.xlu2 %v4204_v20  ;;  %v4234_v34 = vld [vmem:[#allocation2 + $0x170] sm:$0xff]  ;;  %v10775_v46 = vld [vmem:[#allocation3 + $0x424] sm:$0xf0] }
 0x906   : > { %v7096_v10 = vpop.f32.mrf.mxu3  ;;  %v4250_v20 = vld [vmem:[#allocation2 + $0x68] sm:$0xff] }
 0x907   : > { %v6758_v22 = vpop.f32.mrf.mxu1 }
 0x908   : > { %v6594_v15 = vpop.f32.mrf.mxu0  ;;  %v6759_v42 = vadd.f32 %v6758_v22, %v6590_v30  ;;  %v10754_v22 = vld [vmem:[#allocation3 + $0x384] sm:$0xf] }
 0x909   : > { %v6595_v61 = vadd.f32 %v6594_v15, %v5226_v13  ;;  %v9739_v15 = vld [vmem:[#allocation3 + $0x3a0] sm:$0xf0] }
 0x90a   : > { %v6928_v33 = vadd.f32 %v6927_v62, %v6759_v42  ;;  %6797 = vmatmul.bf16.gmra.mxu1 %v9678_v48  ;;  %6971 = vmatmul.bf16.gmra.mxu2 %v9714_v57  ;;  %v5228_v57 = vld [vmem:[%s13921_s8 + $0x60] sm:$0xff]  ;;  %v9777_v42 = vld [vmem:[#allocation3 + $0x3c8] sm:$0xf] }
 0x90b   : > { %6633 = vmatmul.bf16.gmra.mxu0 %v9706_v40  ;;  %4504 = vmax.xlane.f32.xlu1 %v4252_v16  ;;  %v4251_v16 = vld [vmem:[#allocation2] sm:$0xff] }
 0x90c   : > { %v12619_v45 = vadd.f32 %v7096_v10, %v6928_v33  ;;  %v4220_v33 = vld [vmem:[#allocation2 + $0x58] sm:$0xff] }
 0x90d   : > { %v6932_v58 = vpop.f32.mrf.mxu2  ;;  %4440 = vmax.xlane.f32.xlu0 %v4220_v33  ;;  %4506 = vmax.xlane.f32.xlu2 %v4253_v7  ;;  %v4219_v33 = vld [vmem:[#allocation2 + $0x1d0] sm:$0xff] }
 0x90e   : > { %v7098_v27 = vpop.f32.mrf.mxu3  ;;  %v4218_v7 = vld [vmem:[#allocation2 + $0x2d0] sm:$0xff] }
 0x90f   : > { %v6760_v12 = vpop.f32.mrf.mxu1 }
 0x910   : > { %v6596_v23 = vpop.f32.mrf.mxu0  ;;  %v6761_v35 = vadd.f32 %v6760_v12, %v6592_v39  ;;  %v9742_v12 = vor.u32 %v10754_v22, %v9739_v15 }
 0x911   : > { %v6597_v30 = vadd.f32 %v6596_v23, %v5227_v8  ;;  %v9771_v8 = vld [vmem:[#allocation3 + $0x3e0] sm:$0xf0] }
 0x912   : > { %v6930_v14 = vadd.f32 %v6929_v51, %v6761_v35  ;;  %v9750_v51 = vor.u32 %v10755_v50, %v9747_v36  ;;  %v9770_v35 = vor.u32 %v10766_v54, %v9769_v56  ;;  %v4202_v50 = vld [vmem:[#allocation2 + $0x3b8] sm:$0xff]  ;;  %v9811_v56 = vld [vmem:[#allocation3 + $0x428] sm:$0xf0] }
 0x913   : > { %7140 = vmatmul.bf16.gmra.mxu3 %v9718_v5  ;;  %v9778_v5 = vor.u32 %v10767_v28, %v9777_v42  ;;  %4442 = vmax.xlane.f32.xlu1 %v4221_v32  ;;  %v5231_v42 = vld [vmem:[%s13921_s8 + $0x78] sm:$0xff]  ;;  %v10783_v32 = vld [vmem:[#allocation3 + $0x464] sm:$0xf0] }
 0x914   : > { %v12624_v24 = vadd.f32 %v7098_v27, %v6930_v14  ;;  %v5229_v14 = vld [vmem:[%s13921_s8 + $0x68] sm:$0xff] }
 0x915   : > { %v6934_v3 = vpop.f32.mrf.mxu2  ;;  %4470 = vmax.xlane.f32.xlu0 %v4235_v52  ;;  %4468 = vmax.xlane.f32.xlu2 %v4234_v34  ;;  %v9803_v52 = vld [vmem:[#allocation3 + $0x420] sm:$0xf0]  ;;  %v9841_v34 = vld [vmem:[#allocation3 + $0x448] sm:$0xf] }
 0x916   : > { %v7101_v62 = vpop.f32.mrf.mxu3 }
 0x917   : > { %v6763_v47 = vpop.f32.mrf.mxu1 }
 0x918   : > { %v6599_v11 = vpop.f32.mrf.mxu0  ;;  %v6764_v25 = vadd.f32 %v6763_v47, %v6595_v61 }
 0x919   : > { %v6600_v19 = vadd.f32 %v6599_v11, %v5228_v57  ;;  %v10762_v11 = vld [vmem:[#allocation3 + $0x3c4] sm:$0xf] }
 0x91a   : > { %v6933_v63 = vadd.f32 %v6932_v58, %v6764_v25  ;;  %6802 = vmatmul.bf16.gmra.mxu1 %v9710_v59  ;;  %6976 = vmatmul.bf16.gmra.mxu2 %v9746_v0  ;;  %v9782_v59 = vor.u32 %v10763_v2, %v9779_v21  ;;  %v4200_v2 = vld [vmem:[#allocation2 + $0x328] sm:$0xff]  ;;  %v4233_v21 = vld [vmem:[#allocation2 + $0x180] sm:$0xff] }
 0x91b   : > { %6638 = vmatmul.bf16.gmra.mxu0 %v9738_v6  ;;  %v5230_v6 = vld [vmem:[%s13921_s8 + $0x70] sm:$0xff]  ;;  %4404 = vmax.xlane.f32.xlu1 %v4202_v50  ;;  %v4249_v50 = vld [vmem:[#allocation2 + $0xf8] sm:$0xff] }
 0x91c   : > { %v12629_v31 = vadd.f32 %v7101_v62, %v6933_v63  ;;  %v9809_v63 = vld [vmem:[#allocation3 + $0x408] sm:$0xf] }
 0x91d   : > { %v6937_v44 = vpop.f32.mrf.mxu2  ;;  %4500 = vmax.xlane.f32.xlu0 %v4250_v20  ;;  %4406 = vmax.xlane.f32.xlu2 %v4203_v60  ;;  %v5233_v20 = vld [vmem:[%s13921_s8 + $0x88] sm:$0xff] }
 0x91e   : > { %v7103_v38 = vpop.f32.mrf.mxu3 }
 0x91f   : > { %v6765_v17 = vpop.f32.mrf.mxu1 }
 0x920   : > { %v6601_v10 = vpop.f32.mrf.mxu0  ;;  %v6766_v48 = vadd.f32 %v6765_v17, %v6597_v30  ;;  %v10774_v30 = vld [vmem:[#allocation3 + $0x41c] sm:$0xf0] }
 0x921   : > { %v6602_v9 = vadd.f32 %v6601_v10, %v5229_v14  ;;  %v9774_v10 = vor.u32 %v10762_v11, %v9771_v8  ;;  %v10770_v14 = vld [vmem:[#allocation3 + $0x404] sm:$0xf]  ;;  %v9842_v11 = vor.u32 %v10783_v32, %v9841_v34 }
 0x922   : > { %v6935_v40 = vadd.f32 %v6934_v3, %v6766_v48  ;;  %v9810_v48 = vor.u32 %v10775_v46, %v9809_v63 }
 0x923   : > { %7145 = vmatmul.bf16.gmra.mxu3 %v9750_v51  ;;  %4502 = vmax.xlane.f32.xlu1 %v4251_v16  ;;  %v9835_v16 = vld [vmem:[#allocation3 + $0x460] sm:$0xf0] }
 0x924   : > { %v12634_v58 = vadd.f32 %v7103_v38, %v6935_v40 }
 0x925   : > { %v6939_v39 = vpop.f32.mrf.mxu2  ;;  %4438 = vmax.xlane.f32.xlu0 %v4219_v33  ;;  %4436 = vmax.xlane.f32.xlu2 %v4218_v7  ;;  %v10778_v33 = vld [vmem:[#allocation3 + $0x444] sm:$0xf] }
 0x926   : > { %v7106_v27 = vpop.f32.mrf.mxu3 }
 0x927   : > { %v6768_v23 = vpop.f32.mrf.mxu1 }
 0x928   : > { %v6604_v13 = vpop.f32.mrf.mxu0  ;;  %v6769_v37 = vadd.f32 %v6768_v23, %v6600_v19  ;;  %v10771_v19 = vld [vmem:[#allocation3 + $0x40c] sm:$0xf] }
 0x929   : > { %v6605_v36 = vadd.f32 %v6604_v13, %v5230_v6  ;;  %v9814_v23 = vor.u32 %v10771_v19, %v9811_v56  ;;  %v9806_v6 = vor.u32 %v10770_v14, %v9803_v52  ;;  %v9873_v19 = vld [vmem:[#allocation3 + $0x488] sm:$0xf] }
 0x92a   : > { %v6938_v49 = vadd.f32 %v6937_v44, %v6769_v37  ;;  %6807 = vmatmul.bf16.gmra.mxu1 %v9742_v12  ;;  %6981 = vmatmul.bf16.gmra.mxu2 %v9778_v5  ;;  %v9801_v44 = vld [vmem:[#allocation3 + $0x400] sm:$0xf]  ;;  %v10791_v56 = vld [vmem:[#allocation3 + $0x4a4] sm:$0xf0] }
 0x92b   : > { %6643 = vmatmul.bf16.gmra.mxu0 %v9770_v35  ;;  %v9802_v22 = vor.u32 %v10774_v30, %v9801_v44  ;;  %v5232_v37 = vld [vmem:[%s13921_s8 + $0x80] sm:$0xff]  ;;  %v10779_v30 = vld [vmem:[#allocation3 + $0x44c] sm:$0xf]  ;;  %v9874_v52 = vor.u32 %v10791_v56, %v9873_v19 }
 0x92c   : > { %v12639_v61 = vadd.f32 %v7106_v27, %v6938_v49  ;;  %v4201_v44 = vld [vmem:[#allocation2 + $0x260] sm:$0xff] }
 0x92d   : > { %v6942_v43 = vpop.f32.mrf.mxu2  ;;  %4400 = vmax.xlane.f32.xlu0 %v4200_v2  ;;  %4466 = vmax.xlane.f32.xlu2 %v4233_v21 }
 0x92e   : > { %v7108_v3 = vpop.f32.mrf.mxu3 }
 0x92f   : > { %v6770_v62 = vpop.f32.mrf.mxu1 }
 0x930   : > { %v6606_v0 = vpop.f32.mrf.mxu0  ;;  %v6771_v47 = vadd.f32 %v6770_v62, %v6602_v9  ;;  %v10782_v62 = vld [vmem:[#allocation3 + $0x45c] sm:$0xf0] }
 0x931   : > { %v6607_v27 = vadd.f32 %v6606_v0, %v5231_v42 }
 0x932   : > { %v6940_v25 = vadd.f32 %v6939_v39, %v6771_v47 }
 0x933   : > { %7150 = vmatmul.bf16.gmra.mxu3 %v9782_v59 }
 0x934   : > { %v12644_v38 = vadd.f32 %v7108_v3, %v6940_v25  ;;  %v9833_v3 = vld [vmem:[#allocation3 + $0x440] sm:$0xf] }
 0x935   : > { %v6944_v17 = vpop.f32.mrf.mxu2  ;;  %v9834_v8 = vor.u32 %v10782_v62, %v9833_v3  ;;  %4498 = vmax.xlane.f32.xlu0 %v4249_v50  ;;  %v4199_v3 = vld [vmem:[#allocation2 + $0x178] sm:$0xff]  ;;  %v4198_v62 = vld [vmem:[#allocation2 + $0xe0] sm:$0xff] }
 0x936   : > { %v7111_v51 = vpop.f32.mrf.mxu3 }
 0x937   : > { %v6773_v57 = vpop.f32.mrf.mxu1 }
 0x938   : > { %v6609_v40 = vpop.f32.mrf.mxu0  ;;  %v6774_v15 = vadd.f32 %v6773_v57, %v6605_v36  ;;  %v4248_v36 = vld [vmem:[#allocation2 + $0x148] sm:$0xff] }
 0x939   : > { %v6610_v9 = vadd.f32 %v6609_v40, %v5232_v37  ;;  %4496 = vmax.xlane.f32.xlu2 %v4248_v36  ;;  %v5236_v36 = vld [vmem:[%s13921_s8 + $0xa0] sm:$0xff] }
 0x93a   : > { %v6943_v28 = vadd.f32 %v6942_v43, %v6774_v15  ;;  %6812 = vmatmul.bf16.gmra.mxu1 %v9774_v10  ;;  %6986 = vmatmul.bf16.gmra.mxu2 %v9810_v48  ;;  %v4232_v43 = vld [vmem:[#allocation2 + $0xf0] sm:$0xff] }
 0x93b   : > { %6648 = vmatmul.bf16.gmra.mxu0 %v9802_v22  ;;  %4464 = vmax.xlane.f32.xlu1 %v4232_v43  ;;  %v5235_v43 = vld [vmem:[%s13921_s8 + $0x98] sm:$0xff] }
 0x93c   : > { %v12649_v54 = vadd.f32 %v7111_v51, %v6943_v28  ;;  %v5234_v28 = vld [vmem:[%s13921_s8 + $0x90] sm:$0xff] }
 0x93d   : > { %v6947_v39 = vpop.f32.mrf.mxu2 }
 0x93e   : > { %v7113_v12 = vpop.f32.mrf.mxu3 }
 0x93f   : > { %v6775_v5 = vpop.f32.mrf.mxu1 }
 0x940   : > { %v6611_v35 = vpop.f32.mrf.mxu0  ;;  %v6776_v13 = vadd.f32 %v6775_v5, %v6607_v27  ;;  %v4217_v27 = vld [vmem:[#allocation2 + $0x1c8] sm:$0xff] }
 0x941   : > { %v6612_v48 = vadd.f32 %v6611_v35, %v5233_v20  ;;  %v10790_v35 = vld [vmem:[#allocation3 + $0x49c] sm:$0xf0]  ;;  %4434 = vmax.xlane.f32.xlu2 %v4217_v27 }
 0x942   : > { %v6945_v49 = vadd.f32 %v6944_v17, %v6776_v13  ;;  %v9843_v17 = vld [vmem:[#allocation3 + $0x468] sm:$0xf0] }
 0x943   : > { %7155 = vmatmul.bf16.gmra.mxu3 %v9814_v23  ;;  %4402 = vmax.xlane.f32.xlu1 %v4201_v44  ;;  %v9846_v40 = vor.u32 %v10779_v30, %v9843_v17  ;;  %v9865_v23 = vld [vmem:[#allocation3 + $0x480] sm:$0xf]  ;;  %v10786_v44 = vld [vmem:[#allocation3 + $0x484] sm:$0xf] }
 0x944   : > { %v12654_v59 = vadd.f32 %v7113_v12, %v6945_v49  ;;  %v4216_v12 = vld [vmem:[#allocation2 + $0x1b0] sm:$0xff]  ;;  %v9838_v49 = vor.u32 %v10778_v33, %v9835_v16  ;;  %v9866_v32 = vor.u32 %v10790_v35, %v9865_v23  ;;  %v9867_v17 = vld [vmem:[#allocation3 + $0x4a0] sm:$0xf0]  ;;  %v5237_v23 = vld [vmem:[%s13921_s8 + $0xa8] sm:$0xff] }
 0x945   : > { %v6949_v0 = vpop.f32.mrf.mxu2  ;;  %v9870_v19 = vor.u32 %v10786_v44, %v9867_v17 }
 0x946   : > { %v7116_v47 = vpop.f32.mrf.mxu3 }
 0x947   : > { %v6778_v25 = vpop.f32.mrf.mxu1 }
 0x948   : > { %v6614_v63 = vpop.f32.mrf.mxu0  ;;  %v6779_v46 = vadd.f32 %v6778_v25, %v6610_v9 }
 0x949   : > { %v6615_v5 = vadd.f32 %v6614_v63, %v5234_v28  ;;  %4396 = vmax.xlane.f32.xlu2 %v4198_v62  ;;  %v10798_v28 = vld [vmem:[#allocation3 + $0x4dc] sm:$0xf0] }
 0x94a   : > { %v6948_v60 = vadd.f32 %v6947_v39, %v6779_v46  ;;  %6817 = vmatmul.bf16.gmra.mxu1 %v9806_v6  ;;  %6991 = vmatmul.bf16.gmra.mxu2 %v9842_v11  ;;  %v4230_v39 = vld [vmem:[#allocation2 + $0x258] sm:$0xff]  ;;  %v9875_v6 = vld [vmem:[#allocation3 + $0x4a8] sm:$0xf0] }
 0x94b   : > { %6653 = vmatmul.bf16.gmra.mxu0 %v9834_v8  ;;  %4460 = vmax.xlane.f32.xlu0 %v4230_v39 }
 0x94c   : > { %v12659_v51 = vadd.f32 %v7116_v47, %v6948_v60  ;;  %4432 = vmax.xlane.f32.xlu1 %v4216_v12  ;;  %v10787_v47 = vld [vmem:[#allocation3 + $0x48c] sm:$0xf] }
 0x94d   : > { %v6952_v10 = vpop.f32.mrf.mxu2  ;;  %v9878_v20 = vor.u32 %v10787_v47, %v9875_v6  ;;  %v5238_v47 = vld [vmem:[%s13921_s8 + $0xb0] sm:$0xff]  ;;  %v10794_v6 = vld [vmem:[#allocation3 + $0x4c4] sm:$0xf] }
 0x94e   : > { %v7118_v57 = vpop.f32.mrf.mxu3 }
 0x94f   : > { %v6780_v22 = vpop.f32.mrf.mxu1 }
 0x950   : > { %v6616_v15 = vpop.f32.mrf.mxu0  ;;  %v6781_v42 = vadd.f32 %v6780_v22, %v6612_v48  ;;  %v10799_v48 = vld [vmem:[#allocation3 + $0x4e4] sm:$0xf0] }
 0x951   : > { %v6617_v8 = vadd.f32 %v6616_v15, %v5235_v43  ;;  %v4247_v22 = vld [vmem:[#allocation2 + $0x348] sm:$0xff]  ;;  %v9897_v15 = vld [vmem:[#allocation3 + $0x4c0] sm:$0xf] }
 0x952   : > { %v6950_v7 = vadd.f32 %v6949_v0, %v6781_v42  ;;  %v4231_v0 = vld [vmem:[#allocation2 + $0x2d8] sm:$0xff]  ;;  %4494 = vmax.xlane.f32.xlu2 %v4247_v22  ;;  %v9898_v27 = vor.u32 %v10798_v28, %v9897_v15 }
 0x953   : > { %7160 = vmatmul.bf16.gmra.mxu3 %v9846_v40  ;;  %4398 = vmax.xlane.f32.xlu0 %v4199_v3  ;;  %v4246_v40 = vld [vmem:[#allocation2 + $0x228] sm:$0xff] }
 0x954   : > { %v12664_v13 = vadd.f32 %v7118_v57, %v6950_v7  ;;  %4462 = vmax.xlane.f32.xlu1 %v4231_v0  ;;  %v4214_v57 = vld [vmem:[#allocation2 + $0x3d8] sm:$0xff] }
 0x955   : > { %v6954_v37 = vpop.f32.mrf.mxu2 }
 0x956   : > { %v7121_v14 = vpop.f32.mrf.mxu3 }
 0x957   : > { %v6783_v34 = vpop.f32.mrf.mxu1 }
 0x958   : > { %v6619_v2 = vpop.f32.mrf.mxu0  ;;  %v6784_v21 = vadd.f32 %v6783_v34, %v6615_v5  ;;  %v9907_v34 = vld [vmem:[#allocation3 + $0x4e8] sm:$0xf0] }
 0x959   : > { %v6620_v42 = vadd.f32 %v6619_v2, %v5236_v36  ;;  %v4196_v36 = vld [vmem:[#allocation2 + $0x70] sm:$0xff] }
 0x95a   : > { %v6953_v9 = vadd.f32 %v6952_v10, %v6784_v21  ;;  %6822 = vmatmul.bf16.gmra.mxu1 %v9838_v49  ;;  %6996 = vmatmul.bf16.gmra.mxu2 %v9874_v52  ;;  %v9905_v10 = vld [vmem:[#allocation3 + $0x4c8] sm:$0xf]  ;;  %v10795_v52 = vld [vmem:[#allocation3 + $0x4cc] sm:$0xf] }
 0x95b   : > { %6658 = vmatmul.bf16.gmra.mxu0 %v9866_v32  ;;  %4428 = vmax.xlane.f32.xlu0 %v4214_v57  ;;  %v9906_v56 = vor.u32 %v10799_v48, %v9905_v10  ;;  %v4215_v49 = vld [vmem:[#allocation2 + $0x1e8] sm:$0xff]  ;;  %v9910_v3 = vor.u32 %v10795_v52, %v9907_v34  ;;  %v4590_v34 = vld [vmem:[%s13919_s6 + $0x270] sm:$0xff] }
 0x95c   : > { %v12669_v11 = vadd.f32 %v7121_v14, %v6953_v9  ;;  %4492 = vmax.xlane.f32.xlu1 %v4246_v40  ;;  %v4228_v14 = vld [vmem:[#allocation2 + $0x1a0] sm:$0xff]  ;;  %v9939_v52 = vld [vmem:[#allocation3 + $0x528] sm:$0xf0] }
 0x95d   : > { %v6957_v25 = vpop.f32.mrf.mxu2  ;;  %4456 = vmax.xlane.f32.xlu2 %v4228_v14  ;;  %v4245_v14 = vld [vmem:[#allocation2 + $0x360] sm:$0xff] }
 0x95e   : > { %v7123_v63 = vpop.f32.mrf.mxu3 }
 0x95f   : > { %v6785_v46 = vpop.f32.mrf.mxu1 }
 0x960   : > { %v6621_v60 = vpop.f32.mrf.mxu0  ;;  %v6786_v50 = vadd.f32 %v6785_v46, %v6617_v8  ;;  %v9899_v8 = vld [vmem:[#allocation3 + $0x4e0] sm:$0xf0]  ;;  %v10807_v46 = vld [vmem:[#allocation3 + $0x524] sm:$0xf0] }
 0x961   : > { %v6622_v21 = vadd.f32 %v6621_v60, %v5237_v23  ;;  %v9929_v60 = vld [vmem:[#allocation3 + $0x500] sm:$0xf]  ;;  %v9902_v57 = vor.u32 %v10794_v6, %v9899_v8 }
 0x962   : > { %v6955_v30 = vadd.f32 %v6954_v37, %v6786_v50  ;;  %v4229_v37 = vld [vmem:[#allocation2 + $0xa8] sm:$0xff]  ;;  %v4197_v50 = vld [vmem:[#allocation2 + $0x300] sm:$0xff] }
 0x963   : > { %7165 = vmatmul.bf16.gmra.mxu3 %v9878_v20  ;;  %4458 = vmax.xlane.f32.xlu0 %v4229_v37  ;;  %v4244_v20 = vld [vmem:[#allocation2 + $0x278] sm:$0xff]  ;;  %v4212_v37 = vld [vmem:[#allocation2 + $0x2c8] sm:$0xff] }
 0x964   : > { %v12674_v33 = vadd.f32 %v7123_v63, %v6955_v30  ;;  %4430 = vmax.xlane.f32.xlu1 %v4215_v49  ;;  %v9937_v63 = vld [vmem:[#allocation3 + $0x508] sm:$0xf]  ;;  %v10806_v30 = vld [vmem:[#allocation3 + $0x51c] sm:$0xf0]  ;;  %v10803_v49 = vld [vmem:[#allocation3 + $0x50c] sm:$0xf] }
 0x965   : > { %v6959_v7 = vpop.f32.mrf.mxu2  ;;  %4394 = vmax.xlane.f32.xlu2 %v4197_v50  ;;  %v9938_v22 = vor.u32 %v10807_v46, %v9937_v63  ;;  %v9942_v6 = vor.u32 %v10803_v49, %v9939_v52  ;;  %v5240_v63 = vld [vmem:[%s13921_s8 + $0xc0] sm:$0xff] }
 0x966   : > { %v7126_v16 = vpop.f32.mrf.mxu3  ;;  %v10802_v50 = vld [vmem:[#allocation3 + $0x504] sm:$0xf] }
 0x967   : > { %v6788_v39 = vpop.f32.mrf.mxu1 }
 0x968   : > { %v6624_v12 = vpop.f32.mrf.mxu0  ;;  %v6789_v5 = vadd.f32 %v6788_v39, %v6620_v42  ;;  %v9930_v42 = vor.u32 %v10806_v30, %v9929_v60  ;;  %v5239_v39 = vld [vmem:[%s13921_s8 + $0xb8] sm:$0xff] }
 0x969   : > { %v6625_v44 = vadd.f32 %v6624_v12, %v5238_v47 }
 0x96a   : > { %v6958_v35 = vadd.f32 %v6957_v25, %v6789_v5  ;;  %6827 = vmatmul.bf16.gmra.mxu1 %v9870_v19  ;;  %7001 = vmatmul.bf16.gmra.mxu2 %v9906_v56  ;;  %v4479_v19 = vpop.xlane.xlu2 %4478  ;;  %v4622_v56 = vld [vmem:[%s13919_s6 + $0x370] sm:$0xff]  ;;  %v4477_v5 = vpop.xlane.xlu1 %4476 }
 0x96b   : > { %6663 = vmatmul.bf16.gmra.mxu0 %v9898_v27  ;;  %4488 = vmax.xlane.f32.xlu0 %v4244_v20  ;;  %v4750_v23 = vadd.f32 %v4622_v56, %v4477_v5  ;;  %v4227_v56 = vld [vmem:[#allocation2 + $0x390] sm:$0xff] }
 0x96c   : > { %v12679_v32 = vadd.f32 %v7126_v16, %v6958_v35  ;;  %4392 = vmax.xlane.f32.xlu1 %v4196_v36  ;;  %v4623_v16 = vld [vmem:[%s13919_s6 + $0x378] sm:$0xff]  ;;  %v4213_v35 = vld [vmem:[#allocation2 + $0x210] sm:$0xff]  ;;  %v9931_v36 = vld [vmem:[#allocation3 + $0x520] sm:$0xf0] }
 0x96d   : > { %v6962_v2 = vpop.f32.mrf.mxu2  ;;  %v4751_v12 = vadd.f32 %v4623_v16, %v4479_v19  ;;  %4424 = vmax.xlane.f32.xlu2 %v4212_v37  ;;  %v4194_v19 = vld [vmem:[#allocation2 + $0x318] sm:$0xff]  ;;  %v9934_v49 = vor.u32 %v10802_v50, %v9931_v36 }
 0x96e   : > { %v7128_v43 = vpop.f32.mrf.mxu3 }
 0x96f   : > { %v6790_v9 = vpop.f32.mrf.mxu1 }
 0x970   : > { %v6626_v62 = vpop.f32.mrf.mxu0  ;;  %v6791_v0 = vadd.f32 %v6790_v9, %v6622_v21  ;;  %v4879_v21 = vmax.f32 %v4751_v12, 0.0  ;;  %v4878_v9 = vmax.f32 %v4750_v23, 0.0  ;;  %v10814_v12 = vld [vmem:[#allocation3 + $0x55c] sm:$0xf0] }
 0x972   : > { %v6960_v25 = vadd.f32 %v6959_v7, %v6791_v0  ;;  %v4413_v7 = vpop.xlane.xlu0 %4412  ;;  %v5207_v8 = vpack.c.bf16 %v4879_v21, %v4878_v9  ;;  %v4509_v30 = vpop.xlane.xlu2 %4508 }
 0x973   : > { %7170 = vmatmul.bf16.gmra.mxu3 %v9910_v3  ;;  %4426 = vmax.xlane.f32.xlu0 %v4213_v35  ;;  %v6627_v3 = vadd.f32 %v6626_v62, %v5239_v39  ;;  %v4591_v62 = vld [vmem:[%s13919_s6 + $0x278] sm:$0xff] }
 0x974   : > { %v12684_v17 = vadd.f32 %v7128_v43, %v6960_v25  ;;  %4490 = vmax.xlane.f32.xlu1 %v4245_v14  ;;  %v4718_v25 = vadd.f32 %v4590_v34, %v4413_v7  ;;  %7574 = vmatpush.bf16.msrb.mxu2 %v5207_v8  ;;  %v4226_v39 = vld [vmem:[#allocation2 + $0x398] sm:$0xff] }
 0x975   : > { %v6964_v10 = vpop.f32.mrf.mxu2  ;;  %4454 = vmax.xlane.f32.xlu2 %v4227_v56 }
 0x976   : > { %v7131_v48 = vpop.f32.mrf.mxu3  ;;  %v4846_v7 = vmax.f32 %v4718_v25, 0.0 }
 0x977   : > { %v6793_v40 = vpop.f32.mrf.mxu1 }
 0x978   : > { %v6629_v15 = vpop.f32.mrf.mxu0  ;;  %v6794_v28 = vadd.f32 %v6793_v40, %v6625_v44  ;;  %v9969_v44 = vld [vmem:[#allocation3 + $0x548] sm:$0xf]  ;;  %v4638_v40 = vld [vmem:[%s13919_s6 + $0x3f0] sm:$0xff] }
 0x979   : > { %v4766_v5 = vadd.f32 %v4638_v40, %v4509_v30  ;;  %v4243_v30 = vld [vmem:[#allocation2 + $0xc8] sm:$0xff]  ;;  %v4620_v40 = vld [vmem:[%s13919_s6 + $0x360] sm:$0xff] }
 0x97a   : > { %v6963_v27 = vadd.f32 %v6962_v2, %v6794_v28  ;;  %6832 = vmatmul.bf16.gmra.mxu1 %v9902_v57  ;;  %7006 = vmatmul.bf16.gmra.mxu2 %v9938_v22  ;;  %v4511_v60 = vpop.xlane.xlu0 %4510  ;;  %v10815_v57 = vld [vmem:[#allocation3 + $0x564] sm:$0xf0]  ;;  %v4639_v22 = vld [vmem:[%s13919_s6 + $0x3f8] sm:$0xff]  ;;  %v6630_v28 = vadd.f32 %v6629_v15, %v5240_v63  ;;  %v4447_v8 = vpop.xlane.xlu2 %4446  ;;  %v4606_v63 = vld [vmem:[%s13919_s6 + $0x2f0] sm:$0xff] }
 0x97b   : > { %6668 = vmatmul.bf16.gmra.mxu0 %v9930_v42  ;;  %v4415_v42 = vpop.xlane.xlu1 %4414  ;;  %4388 = vmax.xlane.f32.xlu0 %v4194_v19  ;;  %v9970_v15 = vor.u32 %v10815_v57, %v9969_v44  ;;  %v10811_v57 = vld [vmem:[#allocation3 + $0x54c] sm:$0xf] }
 0x97c   : > { %v12698_v43 = vadd.f32 %v7131_v48, %v6963_v27  ;;  %v4719_v16 = vadd.f32 %v4591_v62, %v4415_v42  ;;  %v9961_v27 = vld [vmem:[#allocation3 + $0x540] sm:$0xf]  ;;  %4452 = vmax.xlane.f32.xlu1 %v4226_v39  ;;  %v4242_v62 = vld [vmem:[#allocation2 + $0x370] sm:$0xff] }
 0x97d   : > { %v6967_v2 = vpop.f32.mrf.mxu2  ;;  %v9962_v34 = vor.u32 %v10814_v12, %v9961_v27  ;;  %4484 = vmax.xlane.f32.xlu2 %v4242_v62 }
 0x97e   : > { %v7133_v0 = vpop.f32.mrf.mxu3  ;;  %v4847_v37 = vmax.f32 %v4719_v16, 0.0 }
 0x97f   : > { %v6795_v47 = vpop.f32.mrf.mxu1 }
 0x980   : > { %v12703_v46 = vpop.f32.mrf.mxu0  ;;  %v6796_v20 = vadd.f32 %v6795_v47, %v6627_v3  ;;  %v5191_v21 = vpack.c.bf16 %v4847_v37, %v4846_v7 }
 0x982   : > { %v6965_v48 = vadd.f32 %v6964_v10, %v6796_v20  ;;  %v4767_v10 = vadd.f32 %v4639_v22, %v4511_v60  ;;  %7236 = vmatpush.bf16.msrb.mxu0 %v5191_v21  ;;  %v4473_v25 = vpop.xlane.xlu0 %4472  ;;  %v5241_v20 = vld [vmem:[%s13921_s8 + $0xc8] sm:$0xff]  ;;  %v4409_v21 = vpop.xlane.xlu2 %4408 }
 0x983   : > { %7175 = vmatmul.bf16.gmra.mxu3 %v9942_v6  ;;  %v4894_v6 = vmax.f32 %v4766_v5, 0.0  ;;  %v4445_v44 = vpop.xlane.xlu1 %4444  ;;  %v9971_v22 = vld [vmem:[#allocation3 + $0x568] sm:$0xf0]  ;;  %4486 = vmax.xlane.f32.xlu0 %v4243_v30  ;;  %v6632_v19 = vadd.f32 %v12703_v46, %v5241_v20  ;;  %v4748_v12 = vadd.f32 %v4620_v40, %v4473_v25  ;;  %v5242_v5 = vld [vmem:[%s13921_s8 + $0xd0] sm:$0xff]  ;;  %v4588_v25 = vld [vmem:[%s13919_s6 + $0x260] sm:$0xff] }
 0x984   : > { %v12714_v23 = vadd.f32 %v7133_v0, %v6965_v48  ;;  %v4895_v47 = vmax.f32 %v4767_v10, 0.0  ;;  %v4607_v0 = vld [vmem:[%s13919_s6 + $0x2f8] sm:$0xff]  ;;  %v4734_v60 = vadd.f32 %v4606_v63, %v4445_v44  ;;  %v4195_v48 = vld [vmem:[#allocation2 + $0x220] sm:$0xff]  ;;  %v9974_v27 = vor.u32 %v10811_v57, %v9971_v22  ;;  %v4621_v46 = vld [vmem:[%s13919_s6 + $0x368] sm:$0xff] }
 0x985   : > { %v6969_v35 = vpop.f32.mrf.mxu2  ;;  %v4735_v36 = vadd.f32 %v4607_v0, %v4447_v8  ;;  %4390 = vmax.xlane.f32.xlu1 %v4195_v48  ;;  %v4876_v63 = vmax.f32 %v4748_v12, 0.0  ;;  %v4210_v44 = vld [vmem:[#allocation2 + $0x3c8] sm:$0xff]  ;;  %v10822_v30 = vld [vmem:[#allocation3 + $0x59c] sm:$0xf0]  ;;  %v4716_v62 = vadd.f32 %v4588_v25, %v4409_v21 }
 0x986   : > { %v7136_v14 = vpop.f32.mrf.mxu3  ;;  %v4862_v16 = vmax.f32 %v4734_v60, 0.0  ;;  %v9993_v60 = vld [vmem:[#allocation3 + $0x580] sm:$0xf]  ;;  %v10819_v25 = vld [vmem:[#allocation3 + $0x58c] sm:$0xf] }
 0x987   : > { %v6798_v52 = vpop.f32.mrf.mxu1  ;;  %v4863_v42 = vmax.f32 %v4735_v36, 0.0  ;;  %v4211_v36 = vld [vmem:[#allocation2 + $0x160] sm:$0xff] }
 0x988   : > { %v6634_v9 = vpop.f32.mrf.mxu0  ;;  %v6799_v3 = vadd.f32 %v6798_v52, %v6630_v28  ;;  %v5215_v28 = vpack.c.bf16 %v4895_v47, %v4894_v6  ;;  %v10001_v52 = vld [vmem:[#allocation3 + $0x588] sm:$0xf]  ;;  %4422 = vmax.xlane.f32.xlu2 %v4211_v36 }
 0x989   : > { %v5199_v10 = vpack.c.bf16 %v4863_v42, %v4862_v16  ;;  %v10823_v47 = vld [vmem:[#allocation3 + $0x5a4] sm:$0xf0]  ;;  %v6635_v8 = vadd.f32 %v6634_v9, %v5242_v5  ;;  %v9994_v16 = vor.u32 %v10822_v30, %v9993_v60 }
 0x98a   : > { %v6968_v50 = vadd.f32 %v6967_v2, %v6799_v3  ;;  %6837 = vmatmul.bf16.gmra.mxu1 %v9934_v49  ;;  %7011 = vmatmul.bf16.gmra.mxu2 %v9970_v15  ;;  %v9963_v15 = vld [vmem:[#allocation3 + $0x560] sm:$0xf0]  ;;  %v4589_v6 = vld [vmem:[%s13919_s6 + $0x268] sm:$0xff]  ;;  %v10002_v9 = vor.u32 %v10823_v47, %v10001_v52  ;;  %v4192_v47 = vld [vmem:[#allocation2 + $0x130] sm:$0xff] }
 0x98b   : > { %6673 = vmatmul.bf16.gmra.mxu0 %v9962_v34  ;;  %7743 = vmatpush.bf16.msrb.mxu3 %v5215_v28  ;;  %v4411_v34 = vpop.xlane.xlu0 %4410  ;;  %v4475_v0 = vpop.xlane.xlu1 %4474 }
 0x98c   : > { %v12728_v2 = vadd.f32 %v7136_v14, %v6968_v50  ;;  %v10810_v14 = vld [vmem:[#allocation3 + $0x544] sm:$0xf]  ;;  %7405 = vmatpush.bf16.msrb.mxu1 %v5199_v10  ;;  %v4749_v20 = vadd.f32 %v4621_v46, %v4475_v0  ;;  %v4224_v50 = vld [vmem:[#allocation2 + $0x1f8] sm:$0xff]  ;;  %v4844_v10 = vmax.f32 %v4716_v62, 0.0  ;;  %v10003_v0 = vld [vmem:[#allocation3 + $0x5a8] sm:$0xf0] }
 0x98d   : > { %v6972_v7 = vpop.f32.mrf.mxu2  ;;  %4448 = vmax.xlane.f32.xlu0 %v4224_v50  ;;  %4420 = vmax.xlane.f32.xlu1 %v4210_v44  ;;  %v9966_v42 = vor.u32 %v10810_v14, %v9963_v15  ;;  %v5243_v14 = vld [vmem:[%s13921_s8 + $0xd8] sm:$0xff] }
 0x98e   : > { %v7138_v56 = vpop.f32.mrf.mxu3  ;;  %v4877_v22 = vmax.f32 %v4749_v20, 0.0 }
 0x98f   : > { %v6800_v39 = vpop.f32.mrf.mxu1 }
 0x990   : > { %v12734_v37 = vpop.f32.mrf.mxu0  ;;  %v6801_v49 = vadd.f32 %v6800_v39, %v6632_v19  ;;  %v5206_v19 = vpack.c.bf16 %v4877_v22, %v4876_v63  ;;  %4384 = vmax.xlane.f32.xlu2 %v4192_v47  ;;  %v10830_v47 = vld [vmem:[#allocation3 + $0x5dc] sm:$0xf0] }
 0x991   : > { %v6637_v44 = vadd.f32 %v12734_v37, %v5243_v14  ;;  %v4605_v37 = vld [vmem:[%s13919_s6 + $0x2e8] sm:$0xff] }
 0x992   : > { %v6970_v3 = vadd.f32 %v6969_v35, %v6801_v49  ;;  %v4717_v35 = vadd.f32 %v4589_v6, %v4411_v34  ;;  %7575 = vmatpush.bf16.msrb.mxu2 %v5206_v19  ;;  %v4507_v49 = vpop.xlane.xlu2 %4506  ;;  %v4636_v34 = vld [vmem:[%s13919_s6 + $0x3e0] sm:$0xff]  ;;  %v4225_v6 = vld [vmem:[#allocation2 + $0x238] sm:$0xff] }
 0x993   : > { %7180 = vmatmul.bf16.gmra.mxu3 %v9974_v27  ;;  %v4441_v5 = vpop.xlane.xlu0 %4440  ;;  %v4505_v21 = vpop.xlane.xlu1 %4504 }
 0x994   : > { %v12745_v48 = vadd.f32 %v7138_v56, %v6970_v3  ;;  %v4845_v12 = vmax.f32 %v4717_v35, 0.0  ;;  %v4637_v56 = vld [vmem:[%s13919_s6 + $0x3e8] sm:$0xff]  ;;  %v4764_v46 = vadd.f32 %v4636_v34, %v4505_v21  ;;  %v4193_v3 = vld [vmem:[#allocation2 + $0x200] sm:$0xff]  ;;  %v10006_v35 = vor.u32 %v10819_v25, %v10003_v0  ;;  %v4240_v21 = vld [vmem:[#allocation2 + $0x78] sm:$0xff] }
 0x995   : > { %v6974_v57 = vpop.f32.mrf.mxu2  ;;  %v4765_v52 = vadd.f32 %v4637_v56, %v4507_v49  ;;  %4386 = vmax.xlane.f32.xlu0 %v4193_v3  ;;  %4450 = vmax.xlane.f32.xlu1 %v4225_v6  ;;  %v4618_v56 = vld [vmem:[%s13919_s6 + $0x350] sm:$0xff]  ;;  %v10831_v34 = vld [vmem:[#allocation3 + $0x5e4] sm:$0xf0]  ;;  %v10025_v3 = vld [vmem:[#allocation3 + $0x5c0] sm:$0xf] }
 0x996   : > { %v7141_v40 = vpop.f32.mrf.mxu3  ;;  %v5190_v20 = vpack.c.bf16 %v4845_v12, %v4844_v10  ;;  %v4892_v36 = vmax.f32 %v4764_v46, 0.0  ;;  %v10033_v10 = vld [vmem:[#allocation3 + $0x5c8] sm:$0xf] }
 0x997   : > { %v6803_v28 = vpop.f32.mrf.mxu1  ;;  %v4893_v63 = vmax.f32 %v4765_v52, 0.0  ;;  %v4241_v52 = vld [vmem:[#allocation2 + $0x308] sm:$0xff] }
 0x998   : > { %v6639_v39 = vpop.f32.mrf.mxu0  ;;  %v6804_v27 = vadd.f32 %v6803_v28, %v6635_v8  ;;  %v4604_v8 = vld [vmem:[%s13919_s6 + $0x2e0] sm:$0xff]  ;;  %7237 = vmatpush.bf16.msrb.mxu0 %v5190_v20  ;;  %4482 = vmax.xlane.f32.xlu2 %v4241_v52 }
 0x999   : > { %v4732_v62 = vadd.f32 %v4604_v8, %v4441_v5  ;;  %v5214_v22 = vpack.c.bf16 %v4893_v63, %v4892_v36  ;;  %v4619_v5 = vld [vmem:[%s13919_s6 + $0x358] sm:$0xff]  ;;  %v10034_v36 = vor.u32 %v10831_v34, %v10033_v10  ;;  %v10035_v34 = vld [vmem:[#allocation3 + $0x5e8] sm:$0xf0] }
 0x99a   : > { %v6973_v15 = vadd.f32 %v6972_v7, %v6804_v27  ;;  %6842 = vmatmul.bf16.gmra.mxu1 %v9966_v42  ;;  %7016 = vmatmul.bf16.gmra.mxu2 %v10002_v9  ;;  %v5244_v42 = vld [vmem:[%s13921_s8 + $0xe0] sm:$0xff]  ;;  %v4469_v27 = vpop.xlane.xlu2 %4468 }
 0x99b   : > { %6678 = vmatmul.bf16.gmra.mxu0 %v9994_v16  ;;  %v9995_v16 = vld [vmem:[#allocation3 + $0x5a0] sm:$0xf0]  ;;  %7744 = vmatpush.bf16.msrb.mxu3 %v5214_v22  ;;  %v4471_v19 = vpop.xlane.xlu0 %4470  ;;  %v4443_v49 = vpop.xlane.xlu1 %4442  ;;  %v4860_v14 = vmax.f32 %v4732_v62, 0.0  ;;  %v6640_v46 = vadd.f32 %v6639_v39, %v5244_v42  ;;  %v4746_v6 = vadd.f32 %v4618_v56, %v4469_v27  ;;  %v4586_v27 = vld [vmem:[%s13919_s6 + $0x250] sm:$0xff]  ;;  %v4209_v56 = vld [vmem:[#allocation2 + $0x3a8] sm:$0xff] }
 0x99c   : > { %v12759_v7 = vadd.f32 %v7141_v40, %v6973_v15  ;;  %v10818_v40 = vld [vmem:[#allocation3 + $0x584] sm:$0xf]  ;;  %v4733_v15 = vadd.f32 %v4605_v37, %v4443_v49  ;;  %v10827_v49 = vld [vmem:[#allocation3 + $0x5cc] sm:$0xf] }
 0x99d   : > { %v6977_v50 = vpop.f32.mrf.mxu2  ;;  %4480 = vmax.xlane.f32.xlu1 %v4240_v21  ;;  %v9998_v20 = vor.u32 %v10818_v40, %v9995_v16  ;;  %v4874_v39 = vmax.f32 %v4746_v6, 0.0  ;;  %v10038_v6 = vor.u32 %v10827_v49, %v10035_v34 }
 0x99e   : > { %v7143_v60 = vpop.f32.mrf.mxu3  ;;  %v4861_v8 = vmax.f32 %v4733_v15, 0.0 }
 0x99f   : > { %v6805_v30 = vpop.f32.mrf.mxu1 }
 0x9a0   : > { %v12765_v9 = vpop.f32.mrf.mxu0  ;;  %v6806_v28 = vadd.f32 %v6805_v30, %v6637_v44  ;;  %v10026_v30 = vor.u32 %v10830_v47, %v10025_v3 }
 0x9a2   : > { %v6975_v12 = vadd.f32 %v6974_v57, %v6806_v28  ;;  %v4747_v57 = vadd.f32 %v4619_v5, %v4471_v19  ;;  %v4407_v19 = vpop.xlane.xlu2 %4406  ;;  %v4208_v5 = vld [vmem:[#allocation2 + $0x288] sm:$0xff] }
 0x9a3   : > { %7185 = vmatmul.bf16.gmra.mxu3 %v10006_v35  ;;  %v5198_v35 = vpack.c.bf16 %v4861_v8, %v4860_v14  ;;  %v4501_v42 = vpop.xlane.xlu0 %4500  ;;  %v4405_v37 = vpop.xlane.xlu1 %4404  ;;  %v4634_v14 = vld [vmem:[%s13919_s6 + $0x3d0] sm:$0xff]  ;;  %4416 = vmax.xlane.f32.xlu0 %v4208_v5  ;;  %v10838_v5 = vld [vmem:[#allocation3 + $0x61c] sm:$0xf0] }
 0x9a4   : > { %v12776_v25 = vadd.f32 %v7143_v60, %v6975_v12  ;;  %v4875_v28 = vmax.f32 %v4747_v57, 0.0  ;;  %v4587_v60 = vld [vmem:[%s13919_s6 + $0x258] sm:$0xff]  ;;  %v5245_v12 = vld [vmem:[%s13921_s8 + $0xe8] sm:$0xff]  ;;  %v4714_v10 = vadd.f32 %v4586_v27, %v4405_v37  ;;  %v4762_v8 = vadd.f32 %v4634_v14, %v4501_v42 }
 0x9a5   : > { %v6979_v0 = vpop.f32.mrf.mxu2  ;;  %7406 = vmatpush.bf16.msrb.mxu1 %v5198_v35  ;;  %v4715_v16 = vadd.f32 %v4587_v60, %v4407_v19  ;;  %4418 = vmax.xlane.f32.xlu1 %v4209_v56  ;;  %v6642_v3 = vadd.f32 %v12765_v9, %v5245_v12  ;;  %v10826_v35 = vld [vmem:[#allocation3 + $0x5c4] sm:$0xf]  ;;  %v4635_v9 = vld [vmem:[%s13919_s6 + $0x3d8] sm:$0xff]  ;;  %v4602_v60 = vld [vmem:[%s13919_s6 + $0x2d0] sm:$0xff] }
 0x9a6   : > { %v7146_v63 = vpop.f32.mrf.mxu3  ;;  %v4603_v42 = vld [vmem:[%s13919_s6 + $0x2d8] sm:$0xff]  ;;  %v10065_v27 = vld [vmem:[#allocation3 + $0x608] sm:$0xf] }
 0x9a7   : > { %v6808_v44 = vpop.f32.mrf.mxu1  ;;  %v4843_v15 = vmax.f32 %v4715_v16, 0.0  ;;  %v4890_v16 = vmax.f32 %v4762_v8, 0.0 }
 0x9a8   : > { %v6644_v62 = vpop.f32.mrf.mxu0  ;;  %v6809_v22 = vadd.f32 %v6808_v44, %v6640_v46  ;;  %v4842_v46 = vmax.f32 %v4714_v10, 0.0  ;;  %v10057_v10 = vld [vmem:[#allocation3 + $0x600] sm:$0xf] }
 0x9aa   : > { %v6978_v40 = vadd.f32 %v6977_v50, %v6809_v22  ;;  %6847 = vmatmul.bf16.gmra.mxu1 %v9998_v20  ;;  %7021 = vmatmul.bf16.gmra.mxu2 %v10034_v36  ;;  %v5205_v50 = vpack.c.bf16 %v4875_v28, %v4874_v39  ;;  %v5189_v20 = vpack.c.bf16 %v4843_v15, %v4842_v46  ;;  %v4437_v22 = vpop.xlane.xlu2 %4436  ;;  %v10027_v39 = vld [vmem:[#allocation3 + $0x5e0] sm:$0xf0] }
 0x9ab   : > { %6683 = vmatmul.bf16.gmra.mxu0 %v10026_v30  ;;  %v5246_v30 = vld [vmem:[%s13921_s8 + $0xf0] sm:$0xff]  ;;  %v4503_v19 = vpop.xlane.xlu1 %4502 }
 0x9ac   : > { %v12790_v52 = vadd.f32 %v7146_v63, %v6978_v40  ;;  %7576 = vmatpush.bf16.msrb.mxu2 %v5205_v50  ;;  %7238 = vmatpush.bf16.msrb.mxu0 %v5189_v20  ;;  %v4439_v63 = vpop.xlane.xlu0 %4438  ;;  %v10839_v40 = vld [vmem:[#allocation3 + $0x624] sm:$0xf0]  ;;  %v4763_v37 = vadd.f32 %v4635_v9, %v4503_v19  ;;  %v6645_v12 = vadd.f32 %v6644_v62, %v5246_v30  ;;  %v4584_v19 = vld [vmem:[%s13919_s6 + $0x240] sm:$0xff] }
 0x9ad   : > { %v6982_v21 = vpop.f32.mrf.mxu2  ;;  %v4731_v56 = vadd.f32 %v4603_v42, %v4439_v63  ;;  %v10030_v50 = vor.u32 %v10826_v35, %v10027_v39  ;;  %v10066_v46 = vor.u32 %v10839_v40, %v10065_v27  ;;  %v4617_v30 = vld [vmem:[%s13919_s6 + $0x348] sm:$0xff]  ;;  %v4616_v63 = vld [vmem:[%s13919_s6 + $0x340] sm:$0xff] }
 0x9ae   : > { %14012 = vst [vmem:[#allocation34_spill] sm:$0xff] %v12790_v52  ;;  %v7148_v47 = vpop.f32.mrf.mxu3  ;;  %v4891_v14 = vmax.f32 %v4763_v37, 0.0  ;;  %v10835_v42 = vld [vmem:[#allocation3 + $0x60c] sm:$0xf] }
 0x9af   : > { %v6810_v57 = vpop.f32.mrf.mxu1  ;;  %v4859_v52 = vmax.f32 %v4731_v56, 0.0 }
 0x9b0   : > { %v6646_v36 = vpop.f32.mrf.mxu0  ;;  %v6811_v44 = vadd.f32 %v6810_v57, %v6642_v3  ;;  %v10058_v57 = vor.u32 %v10838_v5, %v10057_v10  ;;  %v5213_v20 = vpack.c.bf16 %v4891_v14, %v4890_v16 }
 0x9b2   : > { %v6980_v28 = vadd.f32 %v6979_v0, %v6811_v44  ;;  %v4730_v0 = vadd.f32 %v4602_v60, %v4437_v22  ;;  %7745 = vmatpush.bf16.msrb.mxu3 %v5213_v20  ;;  %v10067_v60 = vld [vmem:[#allocation3 + $0x628] sm:$0xf0] }
 0x9b3   : > { %7190 = vmatmul.bf16.gmra.mxu3 %v10038_v6  ;;  %v4465_v9 = vpop.xlane.xlu1 %4464  ;;  %v10070_v56 = vor.u32 %v10835_v42, %v10067_v60 }
 0x9b4   : > { %v12805_v49 = vadd.f32 %v7148_v47, %v6980_v28  ;;  %v4858_v8 = vmax.f32 %v4730_v0, 0.0  ;;  %v4401_v62 = vpop.xlane.xlu0 %4400  ;;  %v4467_v47 = vpop.xlane.xlu2 %4466  ;;  %v5247_v28 = vld [vmem:[%s13921_s8 + $0xf8] sm:$0xff]  ;;  %v4744_v39 = vadd.f32 %v4616_v63, %v4465_v9  ;;  %v10847_v63 = vld [vmem:[#allocation3 + $0x664] sm:$0xf0] }
 0x9b5   : > { %v6984_v34 = vpop.f32.mrf.mxu2  ;;  %v4745_v22 = vadd.f32 %v4617_v30, %v4467_v47  ;;  %v4712_v0 = vadd.f32 %v4584_v19, %v4401_v62  ;;  %v4632_v62 = vld [vmem:[%s13919_s6 + $0x3c0] sm:$0xff]  ;;  %v10097_v47 = vld [vmem:[#allocation3 + $0x648] sm:$0xf] }
 0x9b6   : > { %14013 = vst [vmem:[#allocation35_spill] sm:$0xff] %v12805_v49  ;;  %v7151_v15 = vpop.f32.mrf.mxu3  ;;  %v5197_v40 = vpack.c.bf16 %v4859_v52, %v4858_v8  ;;  %v4872_v37 = vmax.f32 %v4744_v39, 0.0  ;;  %v4633_v8 = vld [vmem:[%s13919_s6 + $0x3c8] sm:$0xff]  ;;  %v10846_v39 = vld [vmem:[#allocation3 + $0x65c] sm:$0xf0] }
 0x9b7   : > { %v6813_v3 = vpop.f32.mrf.mxu1  ;;  %v4873_v27 = vmax.f32 %v4745_v22, 0.0 }
 0x9b8   : > { %v6649_v6 = vpop.f32.mrf.mxu0  ;;  %v6814_v44 = vadd.f32 %v6813_v3, %v6645_v12  ;;  %v6647_v12 = vadd.f32 %v6646_v36, %v5247_v28  ;;  %7407 = vmatpush.bf16.msrb.mxu1 %v5197_v40  ;;  %v5248_v3 = vld [vmem:[%s13921_s8 + $0x100] sm:$0xff]  ;;  %v4585_v36 = vld [vmem:[%s13919_s6 + $0x248] sm:$0xff] }
 0x9b9   : > { %v5204_v14 = vpack.c.bf16 %v4873_v27, %v4872_v37  ;;  %v6650_v9 = vadd.f32 %v6649_v6, %v5248_v3  ;;  %v10089_v28 = vld [vmem:[#allocation3 + $0x640] sm:$0xf]  ;;  %v4601_v3 = vld [vmem:[%s13919_s6 + $0x2c8] sm:$0xff] }
 0x9ba   : > { %v6983_v35 = vadd.f32 %v6982_v21, %v6814_v44  ;;  %6852 = vmatmul.bf16.gmra.mxu1 %v10030_v50  ;;  %7026 = vmatmul.bf16.gmra.mxu2 %v10066_v46  ;;  %v10059_v44 = vld [vmem:[#allocation3 + $0x620] sm:$0xf0] }
 0x9bb   : > { %6688 = vmatmul.bf16.gmra.mxu0 %v10058_v57  ;;  %v10834_v57 = vld [vmem:[#allocation3 + $0x604] sm:$0xf]  ;;  %7577 = vmatpush.bf16.msrb.mxu2 %v5204_v14  ;;  %v4403_v30 = vpop.xlane.xlu1 %4402  ;;  %v10090_v14 = vor.u32 %v10846_v39, %v10089_v28 }
 0x9bc   : > { %v12819_v16 = vadd.f32 %v7151_v15, %v6983_v35  ;;  %v4499_v52 = vpop.xlane.xlu0 %4498  ;;  %v4497_v15 = vpop.xlane.xlu2 %4496  ;;  %v4840_v35 = vmax.f32 %v4712_v0, 0.0  ;;  %v4713_v22 = vadd.f32 %v4585_v36, %v4403_v30  ;;  %v10062_v37 = vor.u32 %v10834_v57, %v10059_v44  ;;  %v4614_v30 = vld [vmem:[%s13919_s6 + $0x330] sm:$0xff] }
 0x9bd   : > { %v6987_v21 = vpop.f32.mrf.mxu2  ;;  %v4761_v42 = vadd.f32 %v4633_v8, %v4499_v52  ;;  %v4600_v52 = vld [vmem:[%s13919_s6 + $0x2c0] sm:$0xff]  ;;  %v10843_v8 = vld [vmem:[#allocation3 + $0x64c] sm:$0xf] }
 0x9be   : > { %14014 = vst [vmem:[#allocation36_spill] sm:$0xff] %v12819_v16  ;;  %v7153_v10 = vpop.f32.mrf.mxu3  ;;  %v4841_v27 = vmax.f32 %v4713_v22, 0.0 }
 0x9bf   : > { %v6815_v5 = vpop.f32.mrf.mxu1  ;;  %v4889_v49 = vmax.f32 %v4761_v42, 0.0 }
 0x9c0   : > { %v6651_v50 = vpop.f32.mrf.mxu0  ;;  %v6816_v46 = vadd.f32 %v6815_v5, %v6647_v12  ;;  %v10098_v12 = vor.u32 %v10847_v63, %v10097_v47 }
 0x9c2   : > { %v6985_v20 = vadd.f32 %v6984_v34, %v6816_v46  ;;  %v4760_v34 = vadd.f32 %v4632_v62, %v4497_v15  ;;  %v5188_v46 = vpack.c.bf16 %v4841_v27, %v4840_v35  ;;  %v10099_v62 = vld [vmem:[#allocation3 + $0x668] sm:$0xf0] }
 0x9c3   : > { %7195 = vmatmul.bf16.gmra.mxu3 %v10070_v56  ;;  %v4433_v36 = vpop.xlane.xlu1 %4432  ;;  %v10102_v39 = vor.u32 %v10843_v8, %v10099_v62 }
 0x9c4   : > { %v12833_v60 = vadd.f32 %v7153_v10, %v6985_v20  ;;  %v4888_v0 = vmax.f32 %v4760_v34, 0.0  ;;  %7239 = vmatpush.bf16.msrb.mxu0 %v5188_v46  ;;  %v4461_v6 = vpop.xlane.xlu0 %4460  ;;  %v4435_v10 = vpop.xlane.xlu2 %4434  ;;  %v5249_v20 = vld [vmem:[%s13921_s8 + $0x108] sm:$0xff]  ;;  %v4728_v44 = vadd.f32 %v4600_v52, %v4433_v36  ;;  %v10091_v46 = vld [vmem:[#allocation3 + $0x660] sm:$0xf0] }
 0x9c5   : > { %v6989_v19 = vpop.f32.mrf.mxu2  ;;  %v4729_v15 = vadd.f32 %v4601_v3, %v4435_v10  ;;  %v6652_v22 = vadd.f32 %v6651_v50, %v5249_v20  ;;  %v4742_v42 = vadd.f32 %v4614_v30, %v4461_v6  ;;  %v4615_v50 = vld [vmem:[%s13919_s6 + $0x338] sm:$0xff]  ;;  %v4582_v6 = vld [vmem:[%s13919_s6 + $0x230] sm:$0xff]  ;;  %v10129_v10 = vld [vmem:[#allocation3 + $0x688] sm:$0xf] }
 0x9c6   : > { %14015 = vst [vmem:[#allocation37_spill] sm:$0xff] %v12833_v60  ;;  %v7156_v40 = vpop.f32.mrf.mxu3  ;;  %v5212_v63 = vpack.c.bf16 %v4889_v49, %v4888_v0  ;;  %v4583_v0 = vld [vmem:[%s13919_s6 + $0x238] sm:$0xff]  ;;  %v10855_v52 = vld [vmem:[#allocation3 + $0x6a4] sm:$0xf0]  ;;  %v10121_v20 = vld [vmem:[#allocation3 + $0x680] sm:$0xf] }
 0x9c7   : > { %v6818_v5 = vpop.f32.mrf.mxu1  ;;  %v4857_v47 = vmax.f32 %v4729_v15, 0.0 }
 0x9c8   : > { %v6654_v56 = vpop.f32.mrf.mxu0  ;;  %v6819_v16 = vadd.f32 %v6818_v5, %v6650_v9  ;;  %7746 = vmatpush.bf16.msrb.mxu3 %v5212_v63  ;;  %v10842_v5 = vld [vmem:[#allocation3 + $0x644] sm:$0xf] }
 0x9ca   : > { %v6988_v57 = vadd.f32 %v6987_v21, %v6819_v16  ;;  %6857 = vmatmul.bf16.gmra.mxu1 %v10062_v37  ;;  %7031 = vmatmul.bf16.gmra.mxu2 %v10098_v12  ;;  %v4856_v21 = vmax.f32 %v4728_v44, 0.0  ;;  %v5250_v12 = vld [vmem:[%s13921_s8 + $0x110] sm:$0xff]  ;;  %v10854_v44 = vld [vmem:[#allocation3 + $0x69c] sm:$0xf0] }
 0x9cb   : > { %6693 = vmatmul.bf16.gmra.mxu0 %v10090_v14  ;;  %v4463_v3 = vpop.xlane.xlu1 %4462  ;;  %v6655_v36 = vadd.f32 %v6654_v56, %v5250_v12  ;;  %v4631_v12 = vld [vmem:[%s13919_s6 + $0x3b8] sm:$0xff] }
 0x9cc   : > { %v12847_v35 = vadd.f32 %v7156_v40, %v6988_v57  ;;  %v5196_v34 = vpack.c.bf16 %v4857_v47, %v4856_v21  ;;  %v4399_v49 = vpop.xlane.xlu0 %4398  ;;  %v4397_v40 = vpop.xlane.xlu2 %4396  ;;  %v4870_v57 = vmax.f32 %v4742_v42, 0.0  ;;  %v4743_v15 = vadd.f32 %v4615_v50, %v4463_v3  ;;  %v4598_v3 = vld [vmem:[%s13919_s6 + $0x2b0] sm:$0xff] }
 0x9cd   : > { %v6992_v16 = vpop.f32.mrf.mxu2  ;;  %v4711_v8 = vadd.f32 %v4583_v0, %v4399_v49  ;;  %v10094_v21 = vor.u32 %v10842_v5, %v10091_v46  ;;  %v4630_v49 = vld [vmem:[%s13919_s6 + $0x3b0] sm:$0xff]  ;;  %v10851_v0 = vld [vmem:[#allocation3 + $0x68c] sm:$0xf] }
 0x9ce   : > { %14016 = vst [vmem:[#allocation38_spill] sm:$0xff] %v12847_v35  ;;  %v7158_v9 = vpop.f32.mrf.mxu3  ;;  %7408 = vmatpush.bf16.msrb.mxu1 %v5196_v34  ;;  %v4871_v47 = vmax.f32 %v4743_v15, 0.0  ;;  %v10122_v34 = vor.u32 %v10854_v44, %v10121_v20 }
 0x9cf   : > { %v6820_v28 = vpop.f32.mrf.mxu1  ;;  %v4839_v35 = vmax.f32 %v4711_v8, 0.0 }
 0x9d0   : > { %v6656_v27 = vpop.f32.mrf.mxu0  ;;  %v6821_v37 = vadd.f32 %v6820_v28, %v6652_v22  ;;  %v10130_v22 = vor.u32 %v10855_v52, %v10129_v10 }
 0x9d2   : > { %v6990_v14 = vadd.f32 %v6989_v19, %v6821_v37  ;;  %v4710_v19 = vadd.f32 %v4582_v6, %v4397_v40  ;;  %v5203_v37 = vpack.c.bf16 %v4871_v47, %v4870_v57  ;;  %v10131_v6 = vld [vmem:[#allocation3 + $0x6a8] sm:$0xf0] }
 0x9d3   : > { %7200 = vmatmul.bf16.gmra.mxu3 %v10102_v39  ;;  %v4493_v50 = vpop.xlane.xlu1 %4492  ;;  %v10134_v44 = vor.u32 %v10851_v0, %v10131_v6 }
 0x9d4   : > { %v12861_v62 = vadd.f32 %v7158_v9, %v6990_v14  ;;  %v4838_v42 = vmax.f32 %v4710_v19, 0.0  ;;  %7578 = vmatpush.bf16.msrb.mxu2 %v5203_v37  ;;  %v4429_v56 = vpop.xlane.xlu0 %4428  ;;  %v4495_v9 = vpop.xlane.xlu2 %4494  ;;  %v5251_v14 = vld [vmem:[%s13921_s8 + $0x118] sm:$0xff]  ;;  %v4758_v46 = vadd.f32 %v4630_v49, %v4493_v50  ;;  %v10123_v37 = vld [vmem:[#allocation3 + $0x6a0] sm:$0xf0]  ;;  %v10863_v49 = vld [vmem:[#allocation3 + $0x6e4] sm:$0xf0] }
 0x9d5   : > { %v6994_v30 = vpop.f32.mrf.mxu2  ;;  %v4759_v40 = vadd.f32 %v4631_v12, %v4495_v9  ;;  %v6657_v15 = vadd.f32 %v6656_v27, %v5251_v14  ;;  %v4726_v8 = vadd.f32 %v4598_v3, %v4429_v56  ;;  %v4599_v27 = vld [vmem:[%s13919_s6 + $0x2b8] sm:$0xff]  ;;  %v4612_v56 = vld [vmem:[%s13919_s6 + $0x320] sm:$0xff]  ;;  %v10161_v9 = vld [vmem:[#allocation3 + $0x6c8] sm:$0xf] }
 0x9d6   : > { %14017 = vst [vmem:[#allocation39_spill] sm:$0xff] %v12861_v62  ;;  %v7161_v63 = vpop.f32.mrf.mxu3  ;;  %v5187_v52 = vpack.c.bf16 %v4839_v35, %v4838_v42  ;;  %v4613_v42 = vld [vmem:[%s13919_s6 + $0x328] sm:$0xff]  ;;  %v10153_v14 = vld [vmem:[#allocation3 + $0x6c0] sm:$0xf] }
 0x9d7   : > { %v6823_v28 = vpop.f32.mrf.mxu1  ;;  %v4887_v10 = vmax.f32 %v4759_v40, 0.0 }
 0x9d8   : > { %v6659_v39 = vpop.f32.mrf.mxu0  ;;  %v6824_v60 = vadd.f32 %v6823_v28, %v6655_v36  ;;  %7240 = vmatpush.bf16.msrb.mxu0 %v5187_v52  ;;  %v10850_v28 = vld [vmem:[#allocation3 + $0x684] sm:$0xf] }
 0x9da   : > { %v6993_v5 = vadd.f32 %v6992_v16, %v6824_v60  ;;  %6862 = vmatmul.bf16.gmra.mxu1 %v10094_v21  ;;  %7036 = vmatmul.bf16.gmra.mxu2 %v10130_v22  ;;  %v4886_v16 = vmax.f32 %v4758_v46, 0.0  ;;  %v5252_v22 = vld [vmem:[%s13921_s8 + $0x120] sm:$0xff] }
 0x9db   : > { %6698 = vmatmul.bf16.gmra.mxu0 %v10122_v34  ;;  %v4431_v12 = vpop.xlane.xlu1 %4430  ;;  %v6660_v50 = vadd.f32 %v6659_v39, %v5252_v22  ;;  %v10862_v46 = vld [vmem:[#allocation3 + $0x6dc] sm:$0xf0]  ;;  %v4581_v22 = vld [vmem:[%s13919_s6 + $0x228] sm:$0xff] }
 0x9dc   : > { %v12875_v57 = vadd.f32 %v7161_v63, %v6993_v5  ;;  %v5211_v19 = vpack.c.bf16 %v4887_v10, %v4886_v16  ;;  %v4459_v35 = vpop.xlane.xlu0 %4458  ;;  %v4457_v63 = vpop.xlane.xlu2 %4456  ;;  %v4854_v5 = vmax.f32 %v4726_v8, 0.0  ;;  %v4727_v40 = vadd.f32 %v4599_v27, %v4431_v12  ;;  %v4628_v12 = vld [vmem:[%s13919_s6 + $0x3a0] sm:$0xff] }
 0x9dd   : > { %v6997_v60 = vpop.f32.mrf.mxu2  ;;  %v4741_v0 = vadd.f32 %v4613_v42, %v4459_v35  ;;  %v10126_v16 = vor.u32 %v10850_v28, %v10123_v37  ;;  %v4580_v35 = vld [vmem:[%s13919_s6 + $0x220] sm:$0xff]  ;;  %v10859_v42 = vld [vmem:[#allocation3 + $0x6cc] sm:$0xf] }
 0x9de   : > { %14018 = vst [vmem:[#allocation40_spill] sm:$0xff] %v12875_v57  ;;  %v7163_v36 = vpop.f32.mrf.mxu3  ;;  %7747 = vmatpush.bf16.msrb.mxu3 %v5211_v19  ;;  %v4855_v10 = vmax.f32 %v4727_v40, 0.0  ;;  %v10154_v19 = vor.u32 %v10862_v46, %v10153_v14 }
 0x9df   : > { %v6825_v20 = vpop.f32.mrf.mxu1  ;;  %v4869_v62 = vmax.f32 %v4741_v0, 0.0 }
 0x9e0   : > { %v6661_v47 = vpop.f32.mrf.mxu0  ;;  %v6826_v21 = vadd.f32 %v6825_v20, %v6657_v15  ;;  %v10162_v15 = vor.u32 %v10863_v49, %v10161_v9 }
 0x9e2   : > { %v6995_v34 = vadd.f32 %v6994_v30, %v6826_v21  ;;  %v4740_v30 = vadd.f32 %v4612_v56, %v4457_v63  ;;  %v5195_v21 = vpack.c.bf16 %v4855_v10, %v4854_v5  ;;  %v10163_v56 = vld [vmem:[#allocation3 + $0x6e8] sm:$0xf0] }
 0x9e3   : > { %7205 = vmatmul.bf16.gmra.mxu3 %v10134_v44  ;;  %v4393_v27 = vpop.xlane.xlu1 %4392  ;;  %v10166_v46 = vor.u32 %v10859_v42, %v10163_v56 }
 0x9e4   : > { %v12889_v6 = vadd.f32 %v7163_v36, %v6995_v34  ;;  %v4868_v8 = vmax.f32 %v4740_v30, 0.0  ;;  %7409 = vmatpush.bf16.msrb.mxu1 %v5195_v21  ;;  %v4489_v39 = vpop.xlane.xlu0 %4488  ;;  %v4395_v36 = vpop.xlane.xlu2 %4394  ;;  %v5253_v34 = vld [vmem:[%s13921_s8 + $0x128] sm:$0xff]  ;;  %v4708_v37 = vadd.f32 %v4580_v35, %v4393_v27  ;;  %v10155_v21 = vld [vmem:[#allocation3 + $0x6e0] sm:$0xf0] }
 0x9e5   : > { %v6999_v3 = vpop.f32.mrf.mxu2  ;;  %v4709_v63 = vadd.f32 %v4581_v22, %v4395_v36  ;;  %v6662_v40 = vadd.f32 %v6661_v47, %v5253_v34  ;;  %v4756_v0 = vadd.f32 %v4628_v12, %v4489_v39  ;;  %v4629_v47 = vld [vmem:[%s13919_s6 + $0x3a8] sm:$0xff]  ;;  %v4596_v39 = vld [vmem:[%s13919_s6 + $0x2a0] sm:$0xff] }
 0x9e6   : > { %14019 = vst [vmem:[#allocation41_spill] sm:$0xff] %v12889_v6  ;;  %v7166_v52 = vpop.f32.mrf.mxu3  ;;  %v5202_v49 = vpack.c.bf16 %v4869_v62, %v4868_v8  ;;  %v4597_v8 = vld [vmem:[%s13919_s6 + $0x2a8] sm:$0xff]  ;;  %v10185_v34 = vld [vmem:[#allocation3 + $0x700] sm:$0xf] }
 0x9e7   : > { %v6828_v20 = vpop.f32.mrf.mxu1  ;;  %v4837_v9 = vmax.f32 %v4709_v63, 0.0  ;;  %v10193_v36 = vld [vmem:[#allocation3 + $0x708] sm:$0xf] }
 0x9e8   : > { %v6664_v44 = vpop.f32.mrf.mxu0  ;;  %v6829_v57 = vadd.f32 %v6828_v20, %v6660_v50  ;;  %7579 = vmatpush.bf16.msrb.mxu2 %v5202_v49  ;;  %v10858_v20 = vld [vmem:[#allocation3 + $0x6c4] sm:$0xf]  ;;  %v10871_v35 = vld [vmem:[#allocation3 + $0x724] sm:$0xf0] }
 0x9ea   : > { %v6998_v28 = vadd.f32 %v6997_v60, %v6829_v57  ;;  %6867 = vmatmul.bf16.gmra.mxu1 %v10126_v16  ;;  %7041 = vmatmul.bf16.gmra.mxu2 %v10162_v15  ;;  %v4836_v60 = vmax.f32 %v4708_v37, 0.0  ;;  %v5254_v15 = vld [vmem:[%s13921_s8 + $0x130] sm:$0xff]  ;;  %v10870_v37 = vld [vmem:[#allocation3 + $0x71c] sm:$0xf0] }
 0x9eb   : > { %6703 = vmatmul.bf16.gmra.mxu0 %v10154_v19  ;;  %v4491_v22 = vpop.xlane.xlu1 %4490  ;;  %v6665_v27 = vadd.f32 %v6664_v44, %v5254_v15  ;;  %v4611_v15 = vld [vmem:[%s13919_s6 + $0x318] sm:$0xff] }
 0x9ec   : > { %v12903_v5 = vadd.f32 %v7166_v52, %v6998_v28  ;;  %v5186_v30 = vpack.c.bf16 %v4837_v9, %v4836_v60  ;;  %v4427_v62 = vpop.xlane.xlu0 %4426  ;;  %v4425_v52 = vpop.xlane.xlu2 %4424  ;;  %v4884_v28 = vmax.f32 %v4756_v0, 0.0  ;;  %v4757_v63 = vadd.f32 %v4629_v47, %v4491_v22  ;;  %v4578_v22 = vld [vmem:[%s13919_s6 + $0x210] sm:$0xff] }
 0x9ed   : > { %v7002_v57 = vpop.f32.mrf.mxu2  ;;  %v4725_v42 = vadd.f32 %v4597_v8, %v4427_v62  ;;  %v10158_v60 = vor.u32 %v10858_v20, %v10155_v21  ;;  %v4610_v62 = vld [vmem:[%s13919_s6 + $0x310] sm:$0xff]  ;;  %v10867_v8 = vld [vmem:[#allocation3 + $0x70c] sm:$0xf] }
 0x9ee   : > { %14020 = vst [vmem:[#allocation42_spill] sm:$0xff] %v12903_v5  ;;  %v7168_v50 = vpop.f32.mrf.mxu3  ;;  %7241 = vmatpush.bf16.msrb.mxu0 %v5186_v30  ;;  %v4885_v9 = vmax.f32 %v4757_v63, 0.0  ;;  %v10186_v30 = vor.u32 %v10870_v37, %v10185_v34 }
 0x9ef   : > { %v6830_v14 = vpop.f32.mrf.mxu1  ;;  %v4853_v6 = vmax.f32 %v4725_v42, 0.0 }
 0x9f0   : > { %v6666_v10 = vpop.f32.mrf.mxu0  ;;  %v6831_v16 = vadd.f32 %v6830_v14, %v6662_v40  ;;  %v10194_v40 = vor.u32 %v10871_v35, %v10193_v36 }
 0x9f2   : > { %v7000_v19 = vadd.f32 %v6999_v3, %v6831_v16  ;;  %v4724_v3 = vadd.f32 %v4596_v39, %v4425_v52  ;;  %v5210_v16 = vpack.c.bf16 %v4885_v9, %v4884_v28  ;;  %v10195_v39 = vld [vmem:[#allocation3 + $0x728] sm:$0xf0] }
 0x9f3   : > { %7210 = vmatmul.bf16.gmra.mxu3 %v10166_v46  ;;  %v4453_v47 = vpop.xlane.xlu1 %4452  ;;  %v10198_v37 = vor.u32 %v10867_v8, %v10195_v39 }
 0x9f4   : > { %v12917_v56 = vadd.f32 %v7168_v50, %v7000_v19  ;;  %v4852_v0 = vmax.f32 %v4724_v3, 0.0  ;;  %7748 = vmatpush.bf16.msrb.mxu3 %v5210_v16  ;;  %v4389_v44 = vpop.xlane.xlu0 %4388  ;;  %v4455_v50 = vpop.xlane.xlu2 %4454  ;;  %v5255_v19 = vld [vmem:[%s13921_s8 + $0x138] sm:$0xff]  ;;  %v4738_v21 = vadd.f32 %v4610_v62, %v4453_v47  ;;  %v10187_v16 = vld [vmem:[#allocation3 + $0x720] sm:$0xf0]  ;;  %v10879_v62 = vld [vmem:[#allocation3 + $0x764] sm:$0xf0] }
 0x9f5   : > { %v7004_v12 = vpop.f32.mrf.mxu2  ;;  %v4739_v52 = vadd.f32 %v4611_v15, %v4455_v50  ;;  %v6667_v63 = vadd.f32 %v6666_v10, %v5255_v19  ;;  %v4706_v42 = vadd.f32 %v4578_v22, %v4389_v44  ;;  %v4579_v10 = vld [vmem:[%s13919_s6 + $0x218] sm:$0xff]  ;;  %v4626_v44 = vld [vmem:[%s13919_s6 + $0x390] sm:$0xff]  ;;  %v10225_v50 = vld [vmem:[#allocation3 + $0x748] sm:$0xf] }
 0x9f6   : > { %14021 = vst [vmem:[#allocation43_spill] sm:$0xff] %v12917_v56  ;;  %v7171_v49 = vpop.f32.mrf.mxu3  ;;  %v5194_v35 = vpack.c.bf16 %v4853_v6, %v4852_v0  ;;  %v4627_v0 = vld [vmem:[%s13919_s6 + $0x398] sm:$0xff]  ;;  %v10217_v19 = vld [vmem:[#allocation3 + $0x740] sm:$0xf] }
 0x9f7   : > { %v6833_v14 = vpop.f32.mrf.mxu1  ;;  %v4867_v36 = vmax.f32 %v4739_v52, 0.0 }
 0x9f8   : > { %v6669_v46 = vpop.f32.mrf.mxu0  ;;  %v6834_v5 = vadd.f32 %v6833_v14, %v6665_v27  ;;  %7410 = vmatpush.bf16.msrb.mxu1 %v5194_v35  ;;  %v10866_v14 = vld [vmem:[#allocation3 + $0x704] sm:$0xf] }
 0x9fa   : > { %v7003_v20 = vadd.f32 %v7002_v57, %v6834_v5  ;;  %6872 = vmatmul.bf16.gmra.mxu1 %v10158_v60  ;;  %7046 = vmatmul.bf16.gmra.mxu2 %v10194_v40  ;;  %v4866_v57 = vmax.f32 %v4738_v21, 0.0  ;;  %v5256_v40 = vld [vmem:[%s13921_s8 + $0x140] sm:$0xff] }
 0x9fb   : > { %6708 = vmatmul.bf16.gmra.mxu0 %v10186_v30  ;;  %v4391_v15 = vpop.xlane.xlu1 %4390  ;;  %v6670_v47 = vadd.f32 %v6669_v46, %v5256_v40  ;;  %v10878_v21 = vld [vmem:[#allocation3 + $0x75c] sm:$0xf0]  ;;  %v4595_v40 = vld [vmem:[%s13919_s6 + $0x298] sm:$0xff] }
 0x9fc   : > { %v12931_v28 = vadd.f32 %v7171_v49, %v7003_v20  ;;  %v5201_v3 = vpack.c.bf16 %v4867_v36, %v4866_v57  ;;  %v4487_v6 = vpop.xlane.xlu0 %4486  ;;  %v4485_v49 = vpop.xlane.xlu2 %4484  ;;  %v4834_v20 = vmax.f32 %v4706_v42, 0.0  ;;  %v4707_v52 = vadd.f32 %v4579_v10, %v4391_v15  ;;  %v4608_v15 = vld [vmem:[%s13919_s6 + $0x300] sm:$0xff] }
 0x9fd   : > { %v7007_v5 = vpop.f32.mrf.mxu2  ;;  %v4755_v8 = vadd.f32 %v4627_v0, %v4487_v6  ;;  %v10190_v57 = vor.u32 %v10866_v14, %v10187_v16  ;;  %v4594_v6 = vld [vmem:[%s13919_s6 + $0x290] sm:$0xff]  ;;  %v10875_v0 = vld [vmem:[#allocation3 + $0x74c] sm:$0xf] }
 0x9fe   : > { %14022 = vst [vmem:[#allocation44_spill] sm:$0xff] %v12931_v28  ;;  %v7173_v27 = vpop.f32.mrf.mxu3  ;;  %7580 = vmatpush.bf16.msrb.mxu2 %v5201_v3  ;;  %v4835_v36 = vmax.f32 %v4707_v52, 0.0  ;;  %v10218_v3 = vor.u32 %v10878_v21, %v10217_v19 }
 0x9ff   : > { %v6835_v34 = vpop.f32.mrf.mxu1  ;;  %v4883_v56 = vmax.f32 %v4755_v8, 0.0 }
 0xa00   : > { %v6671_v9 = vpop.f32.mrf.mxu0  ;;  %v6836_v60 = vadd.f32 %v6835_v34, %v6667_v63  ;;  %v10226_v63 = vor.u32 %v10879_v62, %v10225_v50 }
 0xa02   : > { %v7005_v30 = vadd.f32 %v7004_v12, %v6836_v60  ;;  %v4754_v12 = vadd.f32 %v4626_v44, %v4485_v49  ;;  %v5185_v60 = vpack.c.bf16 %v4835_v36, %v4834_v20  ;;  %v10227_v44 = vld [vmem:[#allocation3 + $0x768] sm:$0xf0]  ;;  %v5258_v36 = vld [vmem:[%s13921_s8 + $0x150] sm:$0xff] }
 0xa03   : > { %7215 = vmatmul.bf16.gmra.mxu3 %v10198_v37  ;;  %v4421_v10 = vpop.xlane.xlu1 %4420  ;;  %v10230_v21 = vor.u32 %v10875_v0, %v10227_v44  ;;  %v10249_v0 = vld [vmem:[#allocation3 + $0x780] sm:$0xf] }
 0xa04   : > { %v12945_v39 = vadd.f32 %v7173_v27, %v7005_v30  ;;  %v4882_v42 = vmax.f32 %v4754_v12, 0.0  ;;  %7242 = vmatpush.bf16.msrb.mxu0 %v5185_v60  ;;  %v4449_v46 = vpop.xlane.xlu0 %4448  ;;  %v4423_v27 = vpop.xlane.xlu2 %4422  ;;  %v5257_v30 = vld [vmem:[%s13921_s8 + $0x148] sm:$0xff]  ;;  %v4722_v16 = vadd.f32 %v4594_v6, %v4421_v10  ;;  %v10886_v44 = vld [vmem:[#allocation3 + $0x79c] sm:$0xf0] }
 0xa05   : > { %v7009_v22 = vpop.f32.mrf.mxu2  ;;  %v4723_v49 = vadd.f32 %v4595_v40, %v4423_v27  ;;  %v6672_v52 = vadd.f32 %v6671_v9, %v5257_v30  ;;  %v4736_v8 = vadd.f32 %v4608_v15, %v4449_v46  ;;  %v4576_v9 = vld [vmem:[%s13919_s6 + $0x200] sm:$0xff] }
 0xa06   : > { %v7176_v35 = vpop.f32.mrf.mxu3  ;;  %v5209_v62 = vpack.c.bf16 %v4883_v56, %v4882_v42  ;;  %v4577_v56 = vld [vmem:[%s13919_s6 + $0x208] sm:$0xff]  ;;  %v10874_v42 = vld [vmem:[#allocation3 + $0x744] sm:$0xf] }
 0xa07   : > { %v6838_v34 = vpop.f32.mrf.mxu1  ;;  %v4851_v50 = vmax.f32 %v4723_v49, 0.0  ;;  %v10219_v46 = vld [vmem:[#allocation3 + $0x760] sm:$0xf0]  ;;  %v10887_v49 = vld [vmem:[#allocation3 + $0x7a4] sm:$0xf0]  ;;  %v4864_v10 = vmax.f32 %v4736_v8, 0.0 }
 0xa08   : > { %v6674_v37 = vpop.f32.mrf.mxu0  ;;  %v6839_v28 = vadd.f32 %v6838_v34, %v6670_v47  ;;  %7749 = vmatpush.bf16.msrb.mxu3 %v5209_v62 }
 0xa0a   : > { %v7008_v14 = vadd.f32 %v7007_v5, %v6839_v28  ;;  %6877 = vmatmul.bf16.gmra.mxu1 %v10190_v57  ;;  %7051 = vmatmul.bf16.gmra.mxu2 %v10226_v63  ;;  %v4850_v5 = vmax.f32 %v4722_v16, 0.0  ;;  %v6675_v16 = vadd.f32 %v6674_v37, %v5258_v36  ;;  %v4625_v37 = vld [vmem:[%s13919_s6 + $0x388] sm:$0xff] }
 0xa0b   : > { %6713 = vmatmul.bf16.gmra.mxu0 %v10218_v3  ;;  %v4609_v3 = vld [vmem:[%s13919_s6 + $0x308] sm:$0xff]  ;;  %v4451_v6 = vpop.xlane.xlu1 %4450 }
 0xa0c   : > { %v12959_v20 = vadd.f32 %v7176_v35, %v7008_v14  ;;  %v5193_v12 = vpack.c.bf16 %v4851_v50, %v4850_v5  ;;  %v4387_v35 = vpop.xlane.xlu0 %4386  ;;  %v4385_v34 = vpop.xlane.xlu2 %4384  ;;  %v10257_v14 = vld [vmem:[#allocation3 + $0x788] sm:$0xf]  ;;  %v4737_v30 = vadd.f32 %v4609_v3, %v4451_v6 }
 0xa0d   : > { %v7012_v28 = vpop.f32.mrf.mxu2  ;;  %v4705_v40 = vadd.f32 %v4577_v56, %v4387_v35  ;;  %v4704_v27 = vadd.f32 %v4576_v9, %v4385_v34  ;;  %v10250_v35 = vor.u32 %v10886_v44, %v10249_v0 }
 0xa0e   : > { %v7178_v47 = vpop.f32.mrf.mxu3  ;;  %7411 = vmatpush.bf16.msrb.mxu1 %v5193_v12  ;;  %v10258_v12 = vor.u32 %v10887_v49, %v10257_v14 }
 0xa0f   : > { %v6840_v19 = vpop.f32.mrf.mxu1  ;;  %v4833_v15 = vmax.f32 %v4705_v40, 0.0  ;;  %v4832_v50 = vmax.f32 %v4704_v27, 0.0  ;;  %v10883_v40 = vld [vmem:[#allocation3 + $0x78c] sm:$0xf] }
 0xa10   : > { %v6676_v57 = vpop.f32.mrf.mxu0  ;;  %v6841_v63 = vadd.f32 %v6840_v19, %v6672_v52  ;;  %v4865_v52 = vmax.f32 %v4737_v30, 0.0  ;;  %v10222_v19 = vor.u32 %v10874_v42, %v10219_v46  ;;  %v5259_v42 = vld [vmem:[%s13921_s8 + $0x158] sm:$0xff]  ;;  %v10259_v27 = vld [vmem:[#allocation3 + $0x7a8] sm:$0xf0] }
 0xa11   : > { %v6677_v30 = vadd.f32 %v6676_v57, %v5259_v42  ;;  %v10262_v0 = vor.u32 %v10883_v40, %v10259_v27  ;;  %v4593_v57 = vld [vmem:[%s13919_s6 + $0x288] sm:$0xff] }
 0xa12   : > { %v7010_v60 = vadd.f32 %v7009_v22, %v6841_v63  ;;  %v5184_v63 = vpack.c.bf16 %v4833_v15, %v4832_v50 }
 0xa13   : > { %7220 = vmatmul.bf16.gmra.mxu3 %v10230_v21  ;;  %v5200_v21 = vpack.c.bf16 %v4865_v52, %v4864_v10  ;;  %v5260_v52 = vld [vmem:[%s13921_s8 + $0x160] sm:$0xff] }
 0xa14   : > { %v12973_v62 = vadd.f32 %v7178_v47, %v7010_v60  ;;  %7243 = vmatpush.bf16.msrb.mxu0 %v5184_v63  ;;  %v4483_v8 = vpop.xlane.xlu2 %4482  ;;  %v4624_v47 = vld [vmem:[%s13919_s6 + $0x380] sm:$0xff]  ;;  %v4481_v60 = vpop.xlane.xlu1 %4480 }
 0xa15   : > { %v7014_v5 = vpop.f32.mrf.mxu2  ;;  %7581 = vmatpush.bf16.msrb.mxu2 %v5200_v21  ;;  %v4753_v3 = vadd.f32 %v4625_v37, %v4483_v8  ;;  %v4752_v46 = vadd.f32 %v4624_v47, %v4481_v60  ;;  %v10882_v63 = vld [vmem:[#allocation3 + $0x784] sm:$0xf]  ;;  %v10895_v37 = vld [vmem:[#allocation3 + $0x7e4] sm:$0xf0] }
 0xa16   : > { %v7181_v22 = vpop.f32.mrf.mxu3  ;;  %v10251_v21 = vld [vmem:[#allocation3 + $0x7a0] sm:$0xf0] }
 0xa17   : > { %v6843_v56 = vpop.f32.mrf.mxu1  ;;  %v4881_v6 = vmax.f32 %v4753_v3, 0.0  ;;  %v4880_v10 = vmax.f32 %v4752_v46, 0.0  ;;  %v10894_v3 = vld [vmem:[#allocation3 + $0x7dc] sm:$0xf0] }
 0xa18   : > { %v6679_v9 = vpop.f32.mrf.mxu0  ;;  %v6844_v34 = vadd.f32 %v6843_v56, %v6675_v16 }
 0xa19   : > { %v5208_v44 = vpack.c.bf16 %v4881_v6, %v4880_v10  ;;  %v6680_v47 = vadd.f32 %v6679_v9, %v5260_v52  ;;  %v10254_v6 = vor.u32 %v10882_v63, %v10251_v21  ;;  %v5261_v9 = vld [vmem:[%s13921_s8 + $0x168] sm:$0xff] }
 0xa1a   : > { %v7013_v36 = vadd.f32 %v7012_v28, %v6844_v34  ;;  %6882 = vmatmul.bf16.gmra.mxu1 %v10222_v19  ;;  %7056 = vmatmul.bf16.gmra.mxu2 %v10258_v12  ;;  %v4592_v19 = vld [vmem:[%s13919_s6 + $0x280] sm:$0xff]  ;;  %v10289_v34 = vld [vmem:[#allocation3 + $0x7c8] sm:$0xf]  ;;  %v10291_v52 = vld [vmem:[#allocation3 + $0x7e8] sm:$0xf0] }
 0xa1b   : > { %6718 = vmatmul.bf16.gmra.mxu0 %v10250_v35  ;;  %7750 = vmatpush.bf16.msrb.mxu3 %v5208_v44  ;;  %v10290_v10 = vor.u32 %v10895_v37, %v10289_v34  ;;  %v10890_v37 = vld [vmem:[#allocation3 + $0x7c4] sm:$0xf] }
 0xa1c   : > { %v12984_v14 = vadd.f32 %v7181_v22, %v7013_v36  ;;  %v4417_v22 = vpop.xlane.xlu0 %4416  ;;  %v4419_v35 = vpop.xlane.xlu1 %4418  ;;  %v10281_v36 = vld [vmem:[#allocation3 + $0x7c0] sm:$0xf] }
 0xa1d   : > { %v7017_v49 = vpop.f32.mrf.mxu2  ;;  %v4720_v56 = vadd.f32 %v4592_v19, %v4417_v22  ;;  %v4721_v8 = vadd.f32 %v4593_v57, %v4419_v35 }
 0xa1e   : > { %v7183_v16 = vpop.f32.mrf.mxu3 }
 0xa1f   : > { %v6845_v28 = vpop.f32.mrf.mxu1  ;;  %v4848_v60 = vmax.f32 %v4720_v56, 0.0  ;;  %v4849_v40 = vmax.f32 %v4721_v8, 0.0  ;;  %v10283_v8 = vld [vmem:[#allocation3 + $0x7e0] sm:$0xf0] }
 0xa20   : > { %v6681_v15 = vpop.f32.mrf.mxu0  ;;  %v6846_v50 = vadd.f32 %v6845_v28, %v6677_v30  ;;  %v10282_v30 = vor.u32 %v10894_v3, %v10281_v36  ;;  %v10649_v36 = vld [vmem:[#allocation3 + $0x34] sm:$0xf0] }
 0xa21   : > { %v5192_v28 = vpack.c.bf16 %v4849_v40, %v4848_v60  ;;  %v6682_v57 = vadd.f32 %v6681_v15, %v5261_v9  ;;  %v9305_v60 = vld [vmem:[#allocation3 + $0x10] sm:$0xf] }
 0xa22   : > { %v7015_v12 = vadd.f32 %v7014_v5, %v6846_v50  ;;  %v10648_v40 = vld [vmem:[#allocation3 + $0x2c] sm:$0xf0] }
 0xa23   : > { %7225 = vmatmul.bf16.gmra.mxu3 %v10262_v0  ;;  %7412 = vmatpush.bf16.msrb.mxu1 %v5192_v28  ;;  %v9306_v28 = vor.u32 %v10648_v40, %v9305_v60  ;;  %v9337_v40 = vld [vmem:[#allocation3 + $0x50] sm:$0xf] }
 0xa24   : > { %v12995_v42 = vadd.f32 %v7183_v16, %v7015_v12  ;;  %v10891_v16 = vld [vmem:[#allocation3 + $0x7cc] sm:$0xf] }
 0xa25   : > { %v7019_v46 = vpop.f32.mrf.mxu2  ;;  %v10294_v56 = vor.u32 %v10891_v16, %v10291_v52  ;;  %v9315_v16 = vld [vmem:[#allocation3 + $0x38] sm:$0xf0] }
 0xa26   : > { %v7186_v27 = vpop.f32.mrf.mxu3 }
 0xa27   : > { %v6848_v5 = vpop.f32.mrf.mxu1 }
 0xa28   : > { %v6684_v44 = vpop.f32.mrf.mxu0  ;;  %v6849_v0 = vadd.f32 %v6848_v5, %v6680_v47  ;;  %v9313_v47 = vld [vmem:[#allocation3 + $0x18] sm:$0xf] }
 0xa29   : > { %v9314_v5 = vor.u32 %v10649_v36, %v9313_v47  ;;  %v9307_v47 = vld [vmem:[#allocation3 + $0x30] sm:$0xf0]  ;;  %v9345_v36 = vld [vmem:[#allocation3 + $0x58] sm:$0xf] }
 0xa2a   : > { %v7018_v50 = vadd.f32 %v7017_v49, %v6849_v0  ;;  %6887 = vmatmul.bf16.gmra.mxu1 %v10254_v6  ;;  %7061 = vmatmul.bf16.gmra.mxu2 %v10290_v10  ;;  %v5262_v49 = vld [vmem:[%s13921_s8 + $0x170] sm:$0xff]  ;;  %v10286_v10 = vor.u32 %v10890_v37, %v10283_v8 }
 0xa2b   : > { %6723 = vmatmul.bf16.gmra.mxu0 %v10282_v30  ;;  %v6685_v3 = vadd.f32 %v6684_v44, %v5262_v49  ;;  %v10645_v44 = vld [vmem:[#allocation3 + $0x1c] sm:$0xf]  ;;  %v10644_v8 = vld [vmem:[#allocation3 + $0x14] sm:$0xf] }
 0xa2c   : > { %v13000_v19 = vadd.f32 %v7186_v27, %v7018_v50 }
 0xa2d   : > { %v7022_v22 = vpop.f32.mrf.mxu2 }
 0xa2e   : > { %v7188_v12 = vpop.f32.mrf.mxu3 }
 0xa2f   : > { %v6850_v63 = vpop.f32.mrf.mxu1 }
 0xa30   : > { %v6686_v35 = vpop.f32.mrf.mxu0  ;;  %v6851_v21 = vadd.f32 %v6850_v63, %v6682_v57 }
 0xa32   : > { %v7020_v34 = vadd.f32 %v7019_v46, %v6851_v21  ;;  %v5263_v46 = vld [vmem:[%s13921_s8 + $0x178] sm:$0xff]  ;;  %v9318_v21 = vor.u32 %v10645_v44, %v9315_v16 }
 0xa33   : > { %7230 = vmatmul.bf16.gmra.mxu3 %v10294_v56 }
 0xa34   : > { %v13005_v27 = vadd.f32 %v7188_v12, %v7020_v34  ;;  %v6687_v12 = vadd.f32 %v6686_v35, %v5263_v46 }
 0xa35   : > { %v7024_v15 = vpop.f32.mrf.mxu2 }
 0xa36   : > { %v7191_v6 = vpop.f32.mrf.mxu3 }
 0xa37   : > { %v6853_v30 = vpop.f32.mrf.mxu1 }
 0xa38   : > { %v6689_v0 = vpop.f32.mrf.mxu0  ;;  %v6854_v50 = vadd.f32 %v6853_v30, %v6685_v3  ;;  %v10657_v3 = vld [vmem:[#allocation3 + $0x74] sm:$0xf0]  ;;  %v9310_v30 = vor.u32 %v10644_v8, %v9307_v47 }
 0xa3a   : > { %v7023_v9 = vadd.f32 %v7022_v22, %v6854_v50  ;;  %6892 = vmatmul.bf16.gmra.mxu1 %v10286_v10  ;;  %7582 = vmatmul.bf16.vlgmr.msrb.gmra.mxu2 %v9314_v5  ;;  %v5264_v22 = vld [vmem:[%s13921_s8 + $0x180] sm:$0xff] }
 0xa3b   : > { %7244 = vmatmul.bf16.vlgmr.msrb.gmra.mxu0 %v9306_v28  ;;  %v6690_v60 = vadd.f32 %v6689_v0, %v5264_v22  ;;  %v9346_v28 = vor.u32 %v10657_v3, %v9345_v36  ;;  %v10653_v0 = vld [vmem:[#allocation3 + $0x5c] sm:$0xf]  ;;  %v10652_v3 = vld [vmem:[#allocation3 + $0x54] sm:$0xf] }
 0xa3c   : > { %v13010_v52 = vadd.f32 %v7191_v6, %v7023_v9  ;;  %v10656_v6 = vld [vmem:[#allocation3 + $0x6c] sm:$0xf0] }
 0xa3d   : > { %v7027_v57 = vpop.f32.mrf.mxu2  ;;  %v9338_v9 = vor.u32 %v10656_v6, %v9337_v40  ;;  %v9377_v40 = vld [vmem:[#allocation3 + $0x98] sm:$0xf] }
 0xa3e   : > { %v7193_v63 = vpop.f32.mrf.mxu3  ;;  %v10665_v6 = vld [vmem:[#allocation3 + $0xb4] sm:$0xf0] }
 0xa3f   : > { %v6855_v56 = vpop.f32.mrf.mxu1 }
 0xa40   : > { %v6691_v49 = vpop.f32.mrf.mxu0  ;;  %v6856_v34 = vadd.f32 %v6855_v56, %v6687_v12  ;;  %v9347_v12 = vld [vmem:[#allocation3 + $0x78] sm:$0xf0] }
 0xa42   : > { %v7025_v37 = vadd.f32 %v7024_v15, %v6856_v34  ;;  %v5265_v15 = vld [vmem:[%s13921_s8 + $0x188] sm:$0xff] }
 0xa43   : > { %7751 = vmatmul.bf16.vlgmr.msrb.gmra.mxu3 %v9318_v21  ;;  %v6692_v21 = vadd.f32 %v6691_v49, %v5265_v15 }
 0xa44   : > { %v13015_v10 = vadd.f32 %v7193_v63, %v7025_v37  ;;  %v9350_v37 = vor.u32 %v10653_v0, %v9347_v12 }
 0xa45   : > { %v7029_v35 = vpop.f32.mrf.mxu2 }
 0xa46   : > { %v7196_v5 = vpop.f32.mrf.mxu3 }
 0xa47   : > { %v6858_v50 = vpop.f32.mrf.mxu1 }
 0xa48   : > { %v6694_v46 = vpop.f32.mrf.mxu0  ;;  %v6859_v44 = vadd.f32 %v6858_v50, %v6690_v60  ;;  %v9339_v60 = vld [vmem:[#allocation3 + $0x70] sm:$0xf0] }
 0xa4a   : > { %v7028_v16 = vadd.f32 %v7027_v57, %v6859_v44  ;;  %7413 = vmatmul.bf16.vlgmr.msrb.gmra.mxu1 %v9310_v30  ;;  %7587 = vmatmul.bf16.gmra.mxu2 %v9346_v28  ;;  %v5266_v57 = vld [vmem:[%s13921_s8 + $0x190] sm:$0xff]  ;;  %v9342_v44 = vor.u32 %v10652_v3, %v9339_v60 }
 0xa4b   : > { %7249 = vmatmul.bf16.gmra.mxu0 %v9338_v9  ;;  %v6695_v30 = vadd.f32 %v6694_v46, %v5266_v57  ;;  %v10664_v28 = vld [vmem:[#allocation3 + $0xac] sm:$0xf0]  ;;  %v10661_v46 = vld [vmem:[#allocation3 + $0x9c] sm:$0xf] }
 0xa4c   : > { %v13020_v63 = vadd.f32 %v7196_v5, %v7028_v16  ;;  %v9369_v5 = vld [vmem:[#allocation3 + $0x90] sm:$0xf]  ;;  %v9378_v16 = vor.u32 %v10665_v6, %v9377_v40 }
 0xa4d   : > { %v7032_v56 = vpop.f32.mrf.mxu2  ;;  %v9370_v0 = vor.u32 %v10664_v28, %v9369_v5  ;;  %v10660_v5 = vld [vmem:[#allocation3 + $0x94] sm:$0xf] }
 0xa4e   : > { %v7198_v34 = vpop.f32.mrf.mxu3  ;;  %v9371_v28 = vld [vmem:[#allocation3 + $0xb0] sm:$0xf0] }
 0xa4f   : > { %v6860_v22 = vpop.f32.mrf.mxu1 }
 0xa50   : > { %v6696_v8 = vpop.f32.mrf.mxu0  ;;  %v6861_v47 = vadd.f32 %v6860_v22, %v6692_v21 }
 0xa52   : > { %v7030_v36 = vadd.f32 %v7029_v35, %v6861_v47  ;;  %v5267_v35 = vld [vmem:[%s13921_s8 + $0x198] sm:$0xff] }
 0xa53   : > { %7756 = vmatmul.bf16.gmra.mxu3 %v9350_v37  ;;  %v9379_v37 = vld [vmem:[#allocation3 + $0xb8] sm:$0xf0]  ;;  %v6697_v57 = vadd.f32 %v6696_v8, %v5267_v35  ;;  %v9374_v35 = vor.u32 %v10660_v5, %v9371_v28 }
 0xa54   : > { %v13025_v50 = vadd.f32 %v7198_v34, %v7030_v36  ;;  %v9382_v60 = vor.u32 %v10661_v46, %v9379_v37 }
 0xa55   : > { %v7034_v49 = vpop.f32.mrf.mxu2 }
 0xa56   : > { %14023 = vst [vmem:[#allocation45_spill] sm:$0xff] %v13025_v50  ;;  %v7201_v9 = vpop.f32.mrf.mxu3 }
 0xa57   : > { %v6863_v15 = vpop.f32.mrf.mxu1 }
 0xa58   : > { %v6699_v12 = vpop.f32.mrf.mxu0  ;;  %v6864_v21 = vadd.f32 %v6863_v15, %v6695_v30 }
 0xa5a   : > { %v7033_v22 = vadd.f32 %v7032_v56, %v6864_v21  ;;  %7418 = vmatmul.bf16.gmra.mxu1 %v9342_v44  ;;  %7592 = vmatmul.bf16.gmra.mxu2 %v9378_v16  ;;  %v5268_v56 = vld [vmem:[%s13921_s8 + $0x1a0] sm:$0xff]  ;;  %v9409_v44 = vld [vmem:[#allocation3 + $0xd8] sm:$0xf] }
 0xa5b   : > { %7254 = vmatmul.bf16.gmra.mxu0 %v9370_v0  ;;  %v10673_v16 = vld [vmem:[#allocation3 + $0xf4] sm:$0xf0]  ;;  %v6700_v15 = vadd.f32 %v6699_v12, %v5268_v56  ;;  %v10672_v0 = vld [vmem:[#allocation3 + $0xec] sm:$0xf0]  ;;  %v10669_v12 = vld [vmem:[#allocation3 + $0xdc] sm:$0xf] }
 0xa5c   : > { %v13030_v34 = vadd.f32 %v7201_v9, %v7033_v22  ;;  %v9401_v9 = vld [vmem:[#allocation3 + $0xd0] sm:$0xf]  ;;  %v9410_v46 = vor.u32 %v10673_v16, %v9409_v44 }
 0xa5d   : > { %v7037_v47 = vpop.f32.mrf.mxu2 }
 0xa5e   : > { %14024 = vst [vmem:[#allocation46_spill] sm:$0xff] %v13030_v34  ;;  %v7203_v36 = vpop.f32.mrf.mxu3 }
 0xa5f   : > { %v6865_v3 = vpop.f32.mrf.mxu1 }
 0xa60   : > { %v6701_v40 = vpop.f32.mrf.mxu0  ;;  %v6866_v6 = vadd.f32 %v6865_v3, %v6697_v57  ;;  %v9402_v57 = vor.u32 %v10672_v0, %v9401_v9  ;;  %v9403_v9 = vld [vmem:[#allocation3 + $0xf0] sm:$0xf0]  ;;  %v9441_v0 = vld [vmem:[#allocation3 + $0x118] sm:$0xf] }
 0xa62   : > { %v7035_v30 = vadd.f32 %v7034_v49, %v6866_v6  ;;  %v5269_v49 = vld [vmem:[%s13921_s8 + $0x1a8] sm:$0xff] }
 0xa63   : > { %7761 = vmatmul.bf16.gmra.mxu3 %v9382_v60  ;;  %v9411_v60 = vld [vmem:[#allocation3 + $0xf8] sm:$0xf0]  ;;  %v6702_v56 = vadd.f32 %v6701_v40, %v5269_v49 }
 0xa64   : > { %v13035_v21 = vadd.f32 %v7203_v36, %v7035_v30  ;;  %v9414_v28 = vor.u32 %v10669_v12, %v9411_v60 }
 0xa65   : > { %v7039_v8 = vpop.f32.mrf.mxu2 }
 0xa66   : > { %14025 = vst [vmem:[#allocation47_spill] sm:$0xff] %v13035_v21  ;;  %v7206_v22 = vpop.f32.mrf.mxu3 }
 0xa67   : > { %v6868_v37 = vpop.f32.mrf.mxu1 }
 0xa68   : > { %v6704_v3 = vpop.f32.mrf.mxu0  ;;  %v6869_v50 = vadd.f32 %v6868_v37, %v6700_v15  ;;  %v10668_v15 = vld [vmem:[#allocation3 + $0xd4] sm:$0xf] }
 0xa69   : > { %v9406_v49 = vor.u32 %v10668_v15, %v9403_v9 }
 0xa6a   : > { %v7038_v34 = vadd.f32 %v7037_v47, %v6869_v50  ;;  %7423 = vmatmul.bf16.gmra.mxu1 %v9374_v35  ;;  %7597 = vmatmul.bf16.gmra.mxu2 %v9410_v46  ;;  %v5270_v50 = vld [vmem:[%s13921_s8 + $0x1b0] sm:$0xff]  ;;  %v10681_v35 = vld [vmem:[#allocation3 + $0x134] sm:$0xf0] }
 0xa6b   : > { %7259 = vmatmul.bf16.gmra.mxu0 %v9402_v57  ;;  %v6705_v46 = vadd.f32 %v6704_v3, %v5270_v50  ;;  %v9442_v12 = vor.u32 %v10681_v35, %v9441_v0  ;;  %v10677_v3 = vld [vmem:[#allocation3 + $0x11c] sm:$0xf] }
 0xa6c   : > { %v13040_v36 = vadd.f32 %v7206_v22, %v7038_v34  ;;  %v9433_v34 = vld [vmem:[#allocation3 + $0x110] sm:$0xf] }
 0xa6d   : > { %v7042_v6 = vpop.f32.mrf.mxu2  ;;  %v10680_v22 = vld [vmem:[#allocation3 + $0x12c] sm:$0xf0] }
 0xa6e   : > { %14026 = vst [vmem:[#allocation48_spill] sm:$0xff] %v13040_v36  ;;  %v7208_v30 = vpop.f32.mrf.mxu3 }
 0xa6f   : > { %v6870_v5 = vpop.f32.mrf.mxu1 }
 0xa70   : > { %v6706_v44 = vpop.f32.mrf.mxu0  ;;  %v6871_v16 = vadd.f32 %v6870_v5, %v6702_v56  ;;  %v9434_v56 = vor.u32 %v10680_v22, %v9433_v34  ;;  %v9435_v34 = vld [vmem:[#allocation3 + $0x130] sm:$0xf0]  ;;  %v9473_v22 = vld [vmem:[#allocation3 + $0x158] sm:$0xf] }
 0xa72   : > { %v7040_v47 = vadd.f32 %v7039_v8, %v6871_v16  ;;  %v5271_v8 = vld [vmem:[%s13921_s8 + $0x1b8] sm:$0xff] }
 0xa73   : > { %7766 = vmatmul.bf16.gmra.mxu3 %v9414_v28  ;;  %v9443_v28 = vld [vmem:[#allocation3 + $0x138] sm:$0xf0]  ;;  %v6707_v50 = vadd.f32 %v6706_v44, %v5271_v8 }
 0xa74   : > { %v13045_v37 = vadd.f32 %v7208_v30, %v7040_v47  ;;  %v9446_v9 = vor.u32 %v10677_v3, %v9443_v28 }
 0xa75   : > { %v7044_v40 = vpop.f32.mrf.mxu2 }
 0xa76   : > { %14027 = vst [vmem:[#allocation49_spill] sm:$0xff] %v13045_v37  ;;  %v7211_v57 = vpop.f32.mrf.mxu3 }
 0xa77   : > { %v6873_v60 = vpop.f32.mrf.mxu1 }
 0xa78   : > { %v6709_v5 = vpop.f32.mrf.mxu0  ;;  %v6874_v21 = vadd.f32 %v6873_v60, %v6705_v46  ;;  %v10676_v46 = vld [vmem:[#allocation3 + $0x114] sm:$0xf] }
 0xa79   : > { %v9438_v8 = vor.u32 %v10676_v46, %v9435_v34 }
 0xa7a   : > { %v7043_v36 = vadd.f32 %v7042_v6, %v6874_v21  ;;  %7428 = vmatmul.bf16.gmra.mxu1 %v9406_v49  ;;  %7602 = vmatmul.bf16.gmra.mxu2 %v9442_v12  ;;  %v5272_v21 = vld [vmem:[%s13921_s8 + $0x1c0] sm:$0xff]  ;;  %v10689_v49 = vld [vmem:[#allocation3 + $0x174] sm:$0xf0] }
 0xa7b   : > { %7264 = vmatmul.bf16.gmra.mxu0 %v9434_v56  ;;  %v6710_v12 = vadd.f32 %v6709_v5, %v5272_v21  ;;  %v9474_v3 = vor.u32 %v10689_v49, %v9473_v22  ;;  %v10685_v5 = vld [vmem:[#allocation3 + $0x15c] sm:$0xf] }
 0xa7c   : > { %v13050_v30 = vadd.f32 %v7211_v57, %v7043_v36  ;;  %v9465_v36 = vld [vmem:[#allocation3 + $0x150] sm:$0xf] }
 0xa7d   : > { %v7047_v16 = vpop.f32.mrf.mxu2  ;;  %v10688_v57 = vld [vmem:[#allocation3 + $0x16c] sm:$0xf0] }
 0xa7e   : > { %14028 = vst [vmem:[#allocation50_spill] sm:$0xff] %v13050_v30  ;;  %v7213_v47 = vpop.f32.mrf.mxu3 }
 0xa7f   : > { %v6875_v15 = vpop.f32.mrf.mxu1 }
 0xa80   : > { %v6711_v0 = vpop.f32.mrf.mxu0  ;;  %v6876_v35 = vadd.f32 %v6875_v15, %v6707_v50  ;;  %v9466_v50 = vor.u32 %v10688_v57, %v9465_v36  ;;  %v9467_v36 = vld [vmem:[#allocation3 + $0x170] sm:$0xf0]  ;;  %v9505_v57 = vld [vmem:[#allocation3 + $0x198] sm:$0xf] }
 0xa82   : > { %v7045_v6 = vadd.f32 %v7044_v40, %v6876_v35  ;;  %v5273_v40 = vld [vmem:[%s13921_s8 + $0x1c8] sm:$0xff] }
 0xa83   : > { %7771 = vmatmul.bf16.gmra.mxu3 %v9446_v9  ;;  %v9475_v9 = vld [vmem:[#allocation3 + $0x178] sm:$0xf0]  ;;  %v6712_v21 = vadd.f32 %v6711_v0, %v5273_v40 }
 0xa84   : > { %v13055_v60 = vadd.f32 %v7213_v47, %v7045_v6  ;;  %v9478_v34 = vor.u32 %v10685_v5, %v9475_v9 }
 0xa85   : > { %v7049_v44 = vpop.f32.mrf.mxu2 }
 0xa86   : > { %14029 = vst [vmem:[#allocation51_spill] sm:$0xff] %v13055_v60  ;;  %v7216_v56 = vpop.f32.mrf.mxu3 }
 0xa87   : > { %v6878_v28 = vpop.f32.mrf.mxu1 }
 0xa88   : > { %v6714_v15 = vpop.f32.mrf.mxu0  ;;  %v6879_v37 = vadd.f32 %v6878_v28, %v6710_v12  ;;  %v10684_v12 = vld [vmem:[#allocation3 + $0x154] sm:$0xf] }
 0xa89   : > { %v9470_v40 = vor.u32 %v10684_v12, %v9467_v36 }
 0xa8a   : > { %v7048_v30 = vadd.f32 %v7047_v16, %v6879_v37  ;;  %7433 = vmatmul.bf16.gmra.mxu1 %v9438_v8  ;;  %7607 = vmatmul.bf16.gmra.mxu2 %v9474_v3  ;;  %v5274_v37 = vld [vmem:[%s13921_s8 + $0x1d0] sm:$0xff]  ;;  %v10697_v8 = vld [vmem:[#allocation3 + $0x1b4] sm:$0xf0] }
 0xa8b   : > { %7269 = vmatmul.bf16.gmra.mxu0 %v9466_v50  ;;  %v6715_v3 = vadd.f32 %v6714_v15, %v5274_v37  ;;  %v9506_v5 = vor.u32 %v10697_v8, %v9505_v57  ;;  %v10693_v15 = vld [vmem:[#allocation3 + $0x19c] sm:$0xf] }
 0xa8c   : > { %v13060_v47 = vadd.f32 %v7216_v56, %v7048_v30  ;;  %v9497_v30 = vld [vmem:[#allocation3 + $0x190] sm:$0xf] }
 0xa8d   : > { %v7052_v35 = vpop.f32.mrf.mxu2  ;;  %v10696_v56 = vld [vmem:[#allocation3 + $0x1ac] sm:$0xf0] }
 0xa8e   : > { %14030 = vst [vmem:[#allocation52_spill] sm:$0xff] %v13060_v47  ;;  %v7218_v6 = vpop.f32.mrf.mxu3 }
 0xa8f   : > { %v6880_v46 = vpop.f32.mrf.mxu1 }
 0xa90   : > { %v6716_v22 = vpop.f32.mrf.mxu0  ;;  %v6881_v49 = vadd.f32 %v6880_v46, %v6712_v21  ;;  %v9498_v21 = vor.u32 %v10696_v56, %v9497_v30  ;;  %v9499_v30 = vld [vmem:[#allocation3 + $0x1b0] sm:$0xf0]  ;;  %v9537_v56 = vld [vmem:[#allocation3 + $0x1d8] sm:$0xf] }
 0xa92   : > { %v7050_v16 = vadd.f32 %v7049_v44, %v6881_v49  ;;  %v5275_v44 = vld [vmem:[%s13921_s8 + $0x1d8] sm:$0xff] }
 0xa93   : > { %7776 = vmatmul.bf16.gmra.mxu3 %v9478_v34  ;;  %v9507_v34 = vld [vmem:[#allocation3 + $0x1b8] sm:$0xf0]  ;;  %v6717_v37 = vadd.f32 %v6716_v22, %v5275_v44 }
 0xa94   : > { %v13065_v28 = vadd.f32 %v7218_v6, %v7050_v16  ;;  %v9510_v36 = vor.u32 %v10693_v15, %v9507_v34 }
 0xa95   : > { %v7054_v0 = vpop.f32.mrf.mxu2 }
 0xa96   : > { %14031 = vst [vmem:[#allocation53_spill] sm:$0xff] %v13065_v28  ;;  %v7221_v50 = vpop.f32.mrf.mxu3 }
 0xa97   : > { %v6883_v9 = vpop.f32.mrf.mxu1 }
 0xa98   : > { %v6719_v46 = vpop.f32.mrf.mxu0  ;;  %v6884_v60 = vadd.f32 %v6883_v9, %v6715_v3  ;;  %v10692_v3 = vld [vmem:[#allocation3 + $0x194] sm:$0xf] }
 0xa99   : > { %v9502_v44 = vor.u32 %v10692_v3, %v9499_v30 }
 0xa9a   : > { %v7053_v47 = vadd.f32 %v7052_v35, %v6884_v60  ;;  %7438 = vmatmul.bf16.gmra.mxu1 %v9470_v40  ;;  %7612 = vmatmul.bf16.gmra.mxu2 %v9506_v5  ;;  %v5276_v60 = vld [vmem:[%s13921_s8 + $0x1e0] sm:$0xff]  ;;  %v10705_v40 = vld [vmem:[#allocation3 + $0x1f4] sm:$0xf0] }
 0xa9b   : > { %7274 = vmatmul.bf16.gmra.mxu0 %v9498_v21  ;;  %v6720_v5 = vadd.f32 %v6719_v46, %v5276_v60  ;;  %v9538_v15 = vor.u32 %v10705_v40, %v9537_v56  ;;  %v10701_v46 = vld [vmem:[#allocation3 + $0x1dc] sm:$0xf] }
 0xa9c   : > { %v13070_v6 = vadd.f32 %v7221_v50, %v7053_v47  ;;  %v9529_v47 = vld [vmem:[#allocation3 + $0x1d0] sm:$0xf] }
 0xa9d   : > { %v7057_v49 = vpop.f32.mrf.mxu2  ;;  %v10704_v50 = vld [vmem:[#allocation3 + $0x1ec] sm:$0xf0] }
 0xa9e   : > { %14032 = vst [vmem:[#allocation54_spill] sm:$0xff] %v13070_v6  ;;  %v7223_v16 = vpop.f32.mrf.mxu3 }
 0xa9f   : > { %v6885_v12 = vpop.f32.mrf.mxu1 }
 0xaa0   : > { %v6721_v57 = vpop.f32.mrf.mxu0  ;;  %v6886_v8 = vadd.f32 %v6885_v12, %v6717_v37  ;;  %v9530_v37 = vor.u32 %v10704_v50, %v9529_v47  ;;  %v9531_v47 = vld [vmem:[#allocation3 + $0x1f0] sm:$0xf0]  ;;  %v9569_v50 = vld [vmem:[#allocation3 + $0x218] sm:$0xf] }
 0xaa2   : > { %v7055_v35 = vadd.f32 %v7054_v0, %v6886_v8  ;;  %v5277_v0 = vld [vmem:[%s13921_s8 + $0x1e8] sm:$0xff] }
 0xaa3   : > { %7781 = vmatmul.bf16.gmra.mxu3 %v9510_v36  ;;  %v9539_v36 = vld [vmem:[#allocation3 + $0x1f8] sm:$0xf0]  ;;  %v6722_v60 = vadd.f32 %v6721_v57, %v5277_v0 }
 0xaa4   : > { %v13075_v9 = vadd.f32 %v7223_v16, %v7055_v35  ;;  %v9542_v30 = vor.u32 %v10701_v46, %v9539_v36 }
 0xaa5   : > { %v7059_v22 = vpop.f32.mrf.mxu2 }
 0xaa6   : > { %v7226_v21 = vpop.f32.mrf.mxu3 }
 0xaa7   : > { %v6888_v34 = vpop.f32.mrf.mxu1 }
 0xaa8   : > { %v6724_v12 = vpop.f32.mrf.mxu0  ;;  %v6889_v6 = vadd.f32 %v6888_v34, %v6720_v5  ;;  %v10700_v5 = vld [vmem:[#allocation3 + $0x1d4] sm:$0xf] }
 0xaa9   : > { %v9534_v0 = vor.u32 %v10700_v5, %v9531_v47 }
 0xaaa   : > { %v7058_v28 = vadd.f32 %v7057_v49, %v6889_v6  ;;  %7443 = vmatmul.bf16.gmra.mxu1 %v9502_v44  ;;  %7617 = vmatmul.bf16.gmra.mxu2 %v9538_v15  ;;  %v5278_v6 = vld [vmem:[%s13921_s8 + $0x1f0] sm:$0xff]  ;;  %v10713_v44 = vld [vmem:[#allocation3 + $0x234] sm:$0xf0] }
 0xaab   : > { %7279 = vmatmul.bf16.gmra.mxu0 %v9530_v37  ;;  %v6725_v15 = vadd.f32 %v6724_v12, %v5278_v6  ;;  %v9570_v46 = vor.u32 %v10713_v44, %v9569_v50  ;;  %v5279_v12 = vld [vmem:[%s13921_s8 + $0x1f8] sm:$0xff] }
 0xaac   : > { %v13080_v16 = vadd.f32 %v7226_v21, %v7058_v28  ;;  %v9561_v28 = vld [vmem:[#allocation3 + $0x210] sm:$0xf] }
 0xaad   : > { %v7062_v8 = vpop.f32.mrf.mxu2  ;;  %v10712_v21 = vld [vmem:[#allocation3 + $0x22c] sm:$0xf0] }
 0xaae   : > { %14033 = vst [vmem:[#allocation55_spill] sm:$0xff] %v13080_v16  ;;  %v7228_v35 = vpop.f32.mrf.mxu3 }
 0xaaf   : > { %v6890_v3 = vpop.f32.mrf.mxu1 }
 0xab0   : > { %v6726_v56 = vpop.f32.mrf.mxu0  ;;  %v6891_v40 = vadd.f32 %v6890_v3, %v6722_v60  ;;  %v9562_v60 = vor.u32 %v10712_v21, %v9561_v28  ;;  %v9563_v21 = vld [vmem:[#allocation3 + $0x230] sm:$0xf0] }
 0xab1   : > { %v6727_v5 = vadd.f32 %v6726_v56, %v5279_v12 }
 0xab2   : > { %v7060_v49 = vadd.f32 %v7059_v22, %v6891_v40 }
 0xab3   : > { %7786 = vmatmul.bf16.gmra.mxu3 %v9542_v30  ;;  %v9571_v30 = vld [vmem:[#allocation3 + $0x238] sm:$0xf0] }
 0xab4   : > { %v13085_v34 = vadd.f32 %v7228_v35, %v7060_v49  ;;  %v10709_v35 = vld [vmem:[#allocation3 + $0x21c] sm:$0xf] }
 0xab5   : > { %v7064_v57 = vpop.f32.mrf.mxu2  ;;  %v9574_v44 = vor.u32 %v10709_v35, %v9571_v30 }
 0xab6   : > { %14034 = vst [vmem:[#allocation56_spill] sm:$0xff] %v13085_v34  ;;  %v7231_v37 = vpop.f32.mrf.mxu3 }
 0xab7   : > { %v6893_v36 = vpop.f32.mrf.mxu1 }
 0xab8   : > { %v6894_v3 = vadd.f32 %v6893_v36, %v6725_v15  ;;  %v7245_v16 = vpop.f32.mrf.mxu0  ;;  %v9593_v36 = vld [vmem:[#allocation3 + $0x250] sm:$0xf] }
 0xab9   : > { %v7246_v22 = vadd.f32 %v7245_v16, %v12579_v18 }
 0xaba   : > { %v7063_v40 = vadd.f32 %v7062_v8, %v6894_v3  ;;  %7448 = vmatmul.bf16.gmra.mxu1 %v9534_v0  ;;  %7622 = vmatmul.bf16.gmra.mxu2 %v9570_v46  ;;  %v10708_v8 = vld [vmem:[#allocation3 + $0x214] sm:$0xf]  ;;  %v9601_v0 = vld [vmem:[#allocation3 + $0x258] sm:$0xf] }
 0xabb   : > { %7284 = vmatmul.bf16.gmra.mxu0 %v9562_v60  ;;  %v10721_v46 = vld [vmem:[#allocation3 + $0x274] sm:$0xf0]  ;;  %v10720_v60 = vld [vmem:[#allocation3 + $0x26c] sm:$0xf0]  ;;  %v9566_v56 = vor.u32 %v10708_v8, %v9563_v21 }
 0xabc   : > { %v13091_v6 = vadd.f32 %v7231_v37, %v7063_v40  ;;  %v9602_v12 = vor.u32 %v10721_v46, %v9601_v0  ;;  %v9594_v35 = vor.u32 %v10720_v60, %v9593_v36  ;;  %v10716_v46 = vld [vmem:[#allocation3 + $0x254] sm:$0xf]  ;;  %v9625_v36 = vld [vmem:[#allocation3 + $0x290] sm:$0xf] }
 0xabd   : > { %v7583_v49 = vpop.f32.mrf.mxu2  ;;  %v10728_v60 = vld [vmem:[#allocation3 + $0x2ac] sm:$0xf0] }
 0xabe   : > { %14035 = vst [vmem:[#allocation57_spill] sm:$0xff] %v13091_v6  ;;  %v7233_v47 = vpop.f32.mrf.mxu3 }
 0xabf   : > { %v6895_v50 = vpop.f32.mrf.mxu1 }
 0xac0   : > { %v6896_v15 = vadd.f32 %v6895_v50, %v6727_v5  ;;  %v7247_v28 = vpop.f32.mrf.mxu0 }
 0xac1   : > { %v7248_v18 = vadd.f32 %v7247_v28, %v12584_v1 }
 0xac2   : > { %v7065_v16 = vadd.f32 %v7064_v57, %v6896_v15  ;;  %v9603_v15 = vld [vmem:[#allocation3 + $0x278] sm:$0xf0] }
 0xac3   : > { %7791 = vmatmul.bf16.gmra.mxu3 %v9574_v44  ;;  %v10717_v44 = vld [vmem:[#allocation3 + $0x25c] sm:$0xf] }
 0xac4   : > { %v13094_v3 = vadd.f32 %v7233_v47, %v7065_v16 }
 0xac5   : > { %v7585_v37 = vpop.f32.mrf.mxu2 }
 0xac6   : > { %14036 = vst [vmem:[#allocation58_spill] sm:$0xff] %v13094_v3  ;;  %v7752_v40 = vpop.f32.mrf.mxu3  ;;  %v9606_v3 = vor.u32 %v10717_v44, %v9603_v15  ;;  %v9626_v44 = vor.u32 %v10728_v60, %v9625_v36  ;;  %v9627_v36 = vld [vmem:[#allocation3 + $0x2b0] sm:$0xf0] }
 0xac7   : > { %v7414_v6 = vpop.f32.mrf.mxu1 }
 0xac8   : > { %v7250_v30 = vpop.f32.mrf.mxu0  ;;  %v7415_v5 = vadd.f32 %v7414_v6, %v7246_v22  ;;  %v9595_v22 = vld [vmem:[#allocation3 + $0x270] sm:$0xf0]  ;;  %v10729_v6 = vld [vmem:[#allocation3 + $0x2b4] sm:$0xf0] }
 0xac9   : > { %v7251_v1 = vadd.f32 %v7250_v30, %v12589_v26  ;;  %v9633_v26 = vld [vmem:[#allocation3 + $0x298] sm:$0xf] }
 0xaca   : > { %v7584_v57 = vadd.f32 %v7583_v49, %v7415_v5  ;;  %7453 = vmatmul.bf16.gmra.mxu1 %v9566_v56  ;;  %7627 = vmatmul.bf16.gmra.mxu2 %v9602_v12  ;;  %v9634_v30 = vor.u32 %v10729_v6, %v9633_v26 }
 0xacb   : > { %7289 = vmatmul.bf16.gmra.mxu0 %v9594_v35  ;;  %v9598_v35 = vor.u32 %v10716_v46, %v9595_v22 }
 0xacc   : > { %v7753_v50 = vadd.f32 %v7752_v40, %v7584_v57 }
 0xacd   : > { %v7588_v28 = vpop.f32.mrf.mxu2 }
 0xace   : > { %v7754_v47 = vpop.f32.mrf.mxu3  ;;  %v7912_v56 = vmax.f32 %v7753_v50, 0.0 }
 0xacf   : > { %v7416_v16 = vpop.f32.mrf.mxu1 }
 0xad0   : > { %v7252_v34 = vpop.f32.mrf.mxu0  ;;  %v7417_v8 = vadd.f32 %v7416_v16, %v7248_v18  ;;  %v9635_v16 = vld [vmem:[#allocation3 + $0x2b8] sm:$0xf0] }
 0xad1   : > { %v7253_v21 = vadd.f32 %v7252_v34, %v12594_v4 }
 0xad2   : > { %v7586_v0 = vadd.f32 %v7585_v37, %v7417_v8 }
 0xad3   : > { %7796 = vmatmul.bf16.gmra.mxu3 %v9606_v3 }
 0xad4   : > { %v7755_v49 = vadd.f32 %v7754_v47, %v7586_v0  ;;  %v10725_v47 = vld [vmem:[#allocation3 + $0x29c] sm:$0xf] }
 0xad5   : > { %v7590_v40 = vpop.f32.mrf.mxu2  ;;  %v9638_v46 = vor.u32 %v10725_v47, %v9635_v16 }
 0xad6   : > { %v7757_v12 = vpop.f32.mrf.mxu3  ;;  %v7913_v5 = vmax.f32 %v7755_v49, 0.0  ;;  %v10724_v49 = vld [vmem:[#allocation3 + $0x294] sm:$0xf] }
 0xad7   : > { %v7419_v57 = vpop.f32.mrf.mxu1 }
 0xad8   : > { %v7255_v18 = vpop.f32.mrf.mxu0  ;;  %v7420_v15 = vadd.f32 %v7419_v57, %v7251_v1  ;;  %v13098_v4 = vpack.c.bf16 %v7913_v5, %v7912_v56  ;;  %v9657_v56 = vld [vmem:[#allocation3 + $0x2d0] sm:$0xf]  ;;  %v9630_v57 = vor.u32 %v10724_v49, %v9627_v36 }
 0xad9   : > { %v7256_v34 = vadd.f32 %v7255_v18, %v12599_v55  ;;  %v9665_v55 = vld [vmem:[#allocation3 + $0x2d8] sm:$0xf] }
 0xada   : > { %v7589_v3 = vadd.f32 %v7588_v28, %v7420_v15  ;;  %7458 = vmatmul.bf16.gmra.mxu1 %v9598_v35  ;;  %7632 = vmatmul.bf16.gmra.mxu2 %v9634_v30  ;;  %v10737_v28 = vld [vmem:[#allocation3 + $0x2f4] sm:$0xf0]  ;;  %v10736_v35 = vld [vmem:[#allocation3 + $0x2ec] sm:$0xf0] }
 0xadb   : > { %7294 = vmatmul.bf16.gmra.mxu0 %v9626_v44  ;;  %v9666_v44 = vor.u32 %v10737_v28, %v9665_v55  ;;  %v10732_v28 = vld [vmem:[#allocation3 + $0x2d4] sm:$0xf] }
 0xadc   : > { %v7758_v37 = vadd.f32 %v7757_v12, %v7589_v3  ;;  %v9658_v3 = vor.u32 %v10736_v35, %v9657_v56  ;;  %v9689_v35 = vld [vmem:[#allocation3 + $0x310] sm:$0xf] }
 0xadd   : > { %v7593_v50 = vpop.f32.mrf.mxu2 }
 0xade   : > { %v7759_v8 = vpop.f32.mrf.mxu3  ;;  %v7914_v30 = vmax.f32 %v7758_v37, 0.0 }
 0xadf   : > { %v7421_v0 = vpop.f32.mrf.mxu1 }
 0xae0   : > { %v7257_v22 = vpop.f32.mrf.mxu0  ;;  %v7422_v26 = vadd.f32 %v7421_v0, %v7253_v21  ;;  %v10733_v0 = vld [vmem:[#allocation3 + $0x2dc] sm:$0xf] }
 0xae1   : > { %v7258_v6 = vadd.f32 %v7257_v22, %v12604_v53 }
 0xae2   : > { %v7591_v1 = vadd.f32 %v7590_v40, %v7422_v26 }
 0xae3   : > { %7801 = vmatmul.bf16.gmra.mxu3 %v9638_v46  ;;  %v9667_v46 = vld [vmem:[#allocation3 + $0x2f8] sm:$0xf0] }
 0xae4   : > { %v7760_v60 = vadd.f32 %v7759_v8, %v7591_v1  ;;  %v9670_v1 = vor.u32 %v10733_v0, %v9667_v46 }
 0xae5   : > { %v7595_v12 = vpop.f32.mrf.mxu2 }
 0xae6   : > { %v7762_v5 = vpop.f32.mrf.mxu3  ;;  %v7915_v18 = vmax.f32 %v7760_v60, 0.0  ;;  %v9659_v60 = vld [vmem:[#allocation3 + $0x2f0] sm:$0xf0] }
 0xae7   : > { %v7424_v15 = vpop.f32.mrf.mxu1 }
 0xae8   : > { %v7260_v21 = vpop.f32.mrf.mxu0  ;;  %v7425_v47 = vadd.f32 %v7424_v15, %v7256_v34  ;;  %v13102_v53 = vpack.c.bf16 %v7915_v18, %v7914_v30  ;;  %v10744_v30 = vld [vmem:[#allocation3 + $0x32c] sm:$0xf0]  ;;  %v9662_v18 = vor.u32 %v10732_v28, %v9659_v60 }
 0xae9   : > { %v7261_v40 = vadd.f32 %v7260_v21, %v12609_v29  ;;  %v9697_v29 = vld [vmem:[#allocation3 + $0x318] sm:$0xf] }
 0xaea   : > { %v7594_v16 = vadd.f32 %v7593_v50, %v7425_v47  ;;  %7463 = vmatmul.bf16.gmra.mxu1 %v9630_v57  ;;  %7637 = vmatmul.bf16.gmra.mxu2 %v9666_v44  ;;  %v10745_v50 = vld [vmem:[#allocation3 + $0x334] sm:$0xf0]  ;;  %v9690_v47 = vor.u32 %v10744_v30, %v9689_v35  ;;  %v10752_v35 = vld [vmem:[#allocation3 + $0x36c] sm:$0xf0] }
 0xaeb   : > { %7299 = vmatmul.bf16.gmra.mxu0 %v9658_v3  ;;  %v9698_v15 = vor.u32 %v10745_v50, %v9697_v29  ;;  %v10740_v29 = vld [vmem:[#allocation3 + $0x314] sm:$0xf]  ;;  %v9729_v50 = vld [vmem:[#allocation3 + $0x358] sm:$0xf] }
 0xaec   : > { %v7763_v8 = vadd.f32 %v7762_v5, %v7594_v16 }
 0xaed   : > { %v7598_v37 = vpop.f32.mrf.mxu2 }
 0xaee   : > { %v7764_v22 = vpop.f32.mrf.mxu3  ;;  %v7916_v57 = vmax.f32 %v7763_v8, 0.0 }
 0xaef   : > { %v7426_v26 = vpop.f32.mrf.mxu1 }
 0xaf0   : > { %v7262_v49 = vpop.f32.mrf.mxu0  ;;  %v7427_v36 = vadd.f32 %v7426_v26, %v7258_v6  ;;  %v9699_v26 = vld [vmem:[#allocation3 + $0x338] sm:$0xf0] }
 0xaf1   : > { %v7263_v55 = vadd.f32 %v7262_v49, %v12614_v41 }
 0xaf2   : > { %v7596_v34 = vadd.f32 %v7595_v12, %v7427_v36 }
 0xaf3   : > { %7806 = vmatmul.bf16.gmra.mxu3 %v9670_v1 }
 0xaf4   : > { %v7765_v56 = vadd.f32 %v7764_v22, %v7596_v34  ;;  %v10741_v22 = vld [vmem:[#allocation3 + $0x31c] sm:$0xf] }
 0xaf5   : > { %v7600_v5 = vpop.f32.mrf.mxu2  ;;  %v9702_v36 = vor.u32 %v10741_v22, %v9699_v26  ;;  %v10749_v22 = vld [vmem:[#allocation3 + $0x35c] sm:$0xf] }
 0xaf6   : > { %v7767_v44 = vpop.f32.mrf.mxu3  ;;  %v7917_v3 = vmax.f32 %v7765_v56, 0.0  ;;  %v10753_v56 = vld [vmem:[#allocation3 + $0x374] sm:$0xf0]  ;;  %v9731_v26 = vld [vmem:[#allocation3 + $0x378] sm:$0xf0] }
 0xaf7   : > { %v7429_v21 = vpop.f32.mrf.mxu1 }
 0xaf8   : > { %v7265_v6 = vpop.f32.mrf.mxu0  ;;  %v7430_v16 = vadd.f32 %v7429_v21, %v7261_v40  ;;  %v13106_v41 = vpack.c.bf16 %v7917_v3, %v7916_v57  ;;  %v9691_v40 = vld [vmem:[#allocation3 + $0x330] sm:$0xf0] }
 0xaf9   : > { %v7266_v12 = vadd.f32 %v7265_v6, %v12619_v45 }
 0xafa   : > { %v7599_v0 = vadd.f32 %v7598_v37, %v7430_v16  ;;  %7468 = vmatmul.bf16.gmra.mxu1 %v9662_v18  ;;  %7642 = vmatmul.bf16.gmra.mxu2 %v9698_v15  ;;  %v9721_v37 = vld [vmem:[#allocation3 + $0x350] sm:$0xf]  ;;  %v9694_v18 = vor.u32 %v10740_v29, %v9691_v40  ;;  %v9730_v15 = vor.u32 %v10753_v56, %v9729_v50  ;;  %v10748_v50 = vld [vmem:[#allocation3 + $0x354] sm:$0xf]  ;;  %v9761_v56 = vld [vmem:[#allocation3 + $0x398] sm:$0xf] }
 0xafb   : > { %7304 = vmatmul.bf16.gmra.mxu0 %v9690_v47  ;;  %v9722_v47 = vor.u32 %v10752_v35, %v9721_v37  ;;  %v9753_v37 = vld [vmem:[#allocation3 + $0x390] sm:$0xf] }
 0xafc   : > { %v7768_v46 = vadd.f32 %v7767_v44, %v7599_v0  ;;  %v10760_v35 = vld [vmem:[#allocation3 + $0x3ac] sm:$0xf0] }
 0xafd   : > { %v7603_v8 = vpop.f32.mrf.mxu2 }
 0xafe   : > { %v7769_v1 = vpop.f32.mrf.mxu3  ;;  %v7918_v57 = vmax.f32 %v7768_v46, 0.0 }
 0xaff   : > { %v7431_v49 = vpop.f32.mrf.mxu1 }
 0xb00   : > { %v7267_v34 = vpop.f32.mrf.mxu0  ;;  %v7432_v28 = vadd.f32 %v7431_v49, %v7263_v55 }
 0xb01   : > { %v7268_v46 = vadd.f32 %v7267_v34, %v12624_v24 }
 0xb02   : > { %v7601_v60 = vadd.f32 %v7600_v5, %v7432_v28  ;;  %v9734_v28 = vor.u32 %v10749_v22, %v9731_v26  ;;  %v10757_v22 = vld [vmem:[#allocation3 + $0x39c] sm:$0xf] }
 0xb03   : > { %7811 = vmatmul.bf16.gmra.mxu3 %v9702_v36  ;;  %v9763_v26 = vld [vmem:[#allocation3 + $0x3b8] sm:$0xf0] }
 0xb04   : > { %v7770_v45 = vadd.f32 %v7769_v1, %v7601_v60 }
 0xb05   : > { %v7605_v30 = vpop.f32.mrf.mxu2 }
 0xb06   : > { %v7772_v44 = vpop.f32.mrf.mxu3  ;;  %v7919_v3 = vmax.f32 %v7770_v45, 0.0 }
 0xb07   : > { %v7434_v21 = vpop.f32.mrf.mxu1 }
 0xb08   : > { %v7270_v6 = vpop.f32.mrf.mxu0  ;;  %v7435_v16 = vadd.f32 %v7434_v21, %v7266_v12  ;;  %v13109_v55 = vpack.c.bf16 %v7919_v3, %v7918_v57  ;;  %v9723_v12 = vld [vmem:[#allocation3 + $0x370] sm:$0xf0]  ;;  %v9754_v21 = vor.u32 %v10760_v35, %v9753_v37  ;;  %v9785_v35 = vld [vmem:[#allocation3 + $0x3d0] sm:$0xf] }
 0xb0a   : > { %v7604_v5 = vadd.f32 %v7603_v8, %v7435_v16  ;;  %7473 = vmatmul.bf16.gmra.mxu1 %v9694_v18  ;;  %7647 = vmatmul.bf16.gmra.mxu2 %v9730_v15  ;;  %v10761_v8 = vld [vmem:[#allocation3 + $0x3b4] sm:$0xf0]  ;;  %v9726_v15 = vor.u32 %v10748_v50, %v9723_v12 }
 0xb0b   : > { %7309 = vmatmul.bf16.gmra.mxu0 %v9722_v47  ;;  %v9762_v3 = vor.u32 %v10761_v8, %v9761_v56  ;;  %v7271_v47 = vadd.f32 %v7270_v6, %v12629_v31  ;;  %v10756_v6 = vld [vmem:[#allocation3 + $0x394] sm:$0xf]  ;;  %v9793_v8 = vld [vmem:[#allocation3 + $0x3d8] sm:$0xf] }
 0xb0c   : > { %v7773_v0 = vadd.f32 %v7772_v44, %v7604_v5  ;;  %v9755_v56 = vld [vmem:[#allocation3 + $0x3b0] sm:$0xf0] }
 0xb0d   : > { %v7608_v1 = vpop.f32.mrf.mxu2 }
 0xb0e   : > { %v7774_v49 = vpop.f32.mrf.mxu3  ;;  %v7920_v44 = vmax.f32 %v7773_v0, 0.0 }
 0xb0f   : > { %v7436_v36 = vpop.f32.mrf.mxu1 }
 0xb10   : > { %v7272_v60 = vpop.f32.mrf.mxu0  ;;  %v7437_v29 = vadd.f32 %v7436_v36, %v7268_v46 }
 0xb11   : > { %v7273_v0 = vadd.f32 %v7272_v60, %v12634_v58  ;;  %v9758_v58 = vor.u32 %v10756_v6, %v9755_v56  ;;  %v9787_v56 = vld [vmem:[#allocation3 + $0x3f0] sm:$0xf0] }
 0xb12   : > { %v7606_v40 = vadd.f32 %v7605_v30, %v7437_v29  ;;  %v9766_v29 = vor.u32 %v10757_v22, %v9763_v26  ;;  %v10765_v22 = vld [vmem:[#allocation3 + $0x3dc] sm:$0xf] }
 0xb13   : > { %7816 = vmatmul.bf16.gmra.mxu3 %v9734_v28  ;;  %v9795_v26 = vld [vmem:[#allocation3 + $0x3f8] sm:$0xf0] }
 0xb14   : > { %v7775_v45 = vadd.f32 %v7774_v49, %v7606_v40 }
 0xb15   : > { %v7610_v57 = vpop.f32.mrf.mxu2 }
 0xb16   : > { %v7777_v18 = vpop.f32.mrf.mxu3  ;;  %v7921_v24 = vmax.f32 %v7775_v45, 0.0  ;;  %v10769_v45 = vld [vmem:[#allocation3 + $0x3f4] sm:$0xf0] }
 0xb17   : > { %v7439_v34 = vpop.f32.mrf.mxu1 }
 0xb18   : > { %v7275_v16 = vpop.f32.mrf.mxu0  ;;  %v13113_v30 = vpack.c.bf16 %v7921_v24, %v7920_v44  ;;  %v7440_v5 = vadd.f32 %v7439_v34, %v7271_v47  ;;  %v10768_v44 = vld [vmem:[#allocation3 + $0x3ec] sm:$0xf0] }
 0xb19   : > { %v7276_v47 = vadd.f32 %v7275_v16, %v12639_v61  ;;  %v10764_v16 = vld [vmem:[#allocation3 + $0x3d4] sm:$0xf] }
 0xb1a   : > { %7478 = vmatmul.bf16.gmra.mxu1 %v9726_v15  ;;  %7652 = vmatmul.bf16.gmra.mxu2 %v9762_v3  ;;  %v7609_v49 = vadd.f32 %v7608_v1, %v7440_v5  ;;  %v9794_v1 = vor.u32 %v10769_v45, %v9793_v8  ;;  %v9825_v8 = vld [vmem:[#allocation3 + $0x418] sm:$0xf] }
 0xb1b   : > { %7314 = vmatmul.bf16.gmra.mxu0 %v9754_v21  ;;  %v9786_v21 = vor.u32 %v10768_v44, %v9785_v35  ;;  %v10777_v45 = vld [vmem:[#allocation3 + $0x434] sm:$0xf0]  ;;  %v9817_v35 = vld [vmem:[#allocation3 + $0x410] sm:$0xf] }
 0xb1c   : > { %v7778_v12 = vadd.f32 %v7777_v18, %v7609_v49  ;;  %v10776_v44 = vld [vmem:[#allocation3 + $0x42c] sm:$0xf0] }
 0xb1d   : > { %v7613_v46 = vpop.f32.mrf.mxu2 }
 0xb1e   : > { %v7779_v36 = vpop.f32.mrf.mxu3  ;;  %v7922_v3 = vmax.f32 %v7778_v12, 0.0 }
 0xb1f   : > { %v7441_v28 = vpop.f32.mrf.mxu1 }
 0xb20   : > { %v7277_v40 = vpop.f32.mrf.mxu0  ;;  %v7442_v50 = vadd.f32 %v7441_v28, %v7273_v0 }
 0xb21   : > { %v7278_v49 = vadd.f32 %v7277_v40, %v12644_v38  ;;  %v9790_v38 = vor.u32 %v10764_v16, %v9787_v56  ;;  %v10772_v56 = vld [vmem:[#allocation3 + $0x414] sm:$0xf] }
 0xb22   : > { %v7611_v31 = vadd.f32 %v7610_v57, %v7442_v50  ;;  %v9798_v50 = vor.u32 %v10765_v22, %v9795_v26  ;;  %v10773_v22 = vld [vmem:[#allocation3 + $0x41c] sm:$0xf] }
 0xb23   : > { %7821 = vmatmul.bf16.gmra.mxu3 %v9766_v29  ;;  %v9827_v26 = vld [vmem:[#allocation3 + $0x438] sm:$0xf0] }
 0xb24   : > { %v7780_v37 = vadd.f32 %v7779_v36, %v7611_v31 }
 0xb25   : > { %v7615_v15 = vpop.f32.mrf.mxu2 }
 0xb26   : > { %v7782_v24 = vpop.f32.mrf.mxu3  ;;  %v7923_v60 = vmax.f32 %v7780_v37, 0.0 }
 0xb27   : > { %v7444_v34 = vpop.f32.mrf.mxu1 }
 0xb28   : > { %v7280_v18 = vpop.f32.mrf.mxu0  ;;  %v13117_v57 = vpack.c.bf16 %v7923_v60, %v7922_v3  ;;  %v7445_v5 = vadd.f32 %v7444_v34, %v7276_v47  ;;  %v9818_v34 = vor.u32 %v10776_v44, %v9817_v35  ;;  %v9857_v35 = vld [vmem:[#allocation3 + $0x458] sm:$0xf] }
 0xb29   : > { %v10785_v44 = vld [vmem:[#allocation3 + $0x474] sm:$0xf0] }
 0xb2a   : > { %7483 = vmatmul.bf16.gmra.mxu1 %v9758_v58  ;;  %7657 = vmatmul.bf16.gmra.mxu2 %v9794_v1  ;;  %v7614_v36 = vadd.f32 %v7613_v46, %v7445_v5  ;;  %v9826_v46 = vor.u32 %v10777_v45, %v9825_v8  ;;  %v9819_v8 = vld [vmem:[#allocation3 + $0x430] sm:$0xf0] }
 0xb2b   : > { %7319 = vmatmul.bf16.gmra.mxu0 %v9786_v21  ;;  %v7281_v21 = vadd.f32 %v7280_v18, %v12649_v54 }
 0xb2c   : > { %v7783_v6 = vadd.f32 %v7782_v24, %v7614_v36 }
 0xb2d   : > { %v7618_v0 = vpop.f32.mrf.mxu2 }
 0xb2e   : > { %v7784_v28 = vpop.f32.mrf.mxu3  ;;  %v7924_v58 = vmax.f32 %v7783_v6, 0.0 }
 0xb2f   : > { %v7446_v29 = vpop.f32.mrf.mxu1 }
 0xb30   : > { %v7282_v12 = vpop.f32.mrf.mxu0  ;;  %v7447_v31 = vadd.f32 %v7446_v29, %v7278_v49 }
 0xb31   : > { %v7283_v36 = vadd.f32 %v7282_v12, %v12654_v59 }
 0xb32   : > { %v7616_v61 = vadd.f32 %v7615_v15, %v7447_v31  ;;  %v9830_v31 = vor.u32 %v10773_v22, %v9827_v26  ;;  %v9859_v22 = vld [vmem:[#allocation3 + $0x478] sm:$0xf0] }
 0xb33   : > { %7826 = vmatmul.bf16.gmra.mxu3 %v9798_v50 }
 0xb34   : > { %v7785_v37 = vadd.f32 %v7784_v28, %v7616_v61 }
 0xb35   : > { %v7620_v3 = vpop.f32.mrf.mxu2 }
 0xb36   : > { %v7787_v1 = vpop.f32.mrf.mxu3  ;;  %v7925_v40 = vmax.f32 %v7785_v37, 0.0  ;;  %v10784_v37 = vld [vmem:[#allocation3 + $0x46c] sm:$0xf0] }
 0xb37   : > { %v7449_v60 = vpop.f32.mrf.mxu1 }
 0xb38   : > { %v7285_v24 = vpop.f32.mrf.mxu0  ;;  %v8046_v15 = vpack.c.bf16 %v7925_v40, %v7924_v58  ;;  %v7450_v5 = vadd.f32 %v7449_v60, %v7281_v21  ;;  %v9858_v60 = vor.u32 %v10785_v44, %v9857_v35 }
 0xb39   : > { %v7286_v47 = vadd.f32 %v7285_v24, %v12659_v51  ;;  %v9849_v51 = vld [vmem:[#allocation3 + $0x450] sm:$0xf] }
 0xb3a   : > { %7488 = vmatmul.bf16.gmra.mxu1 %v9790_v38  ;;  %7662 = vmatmul.bf16.gmra.mxu2 %v9826_v46  ;;  %v7619_v28 = vadd.f32 %v7618_v0, %v7450_v5  ;;  %v9822_v38 = vor.u32 %v10772_v56, %v9819_v8  ;;  %v9850_v40 = vor.u32 %v10784_v37, %v9849_v51  ;;  %v10781_v5 = vld [vmem:[#allocation3 + $0x45c] sm:$0xf]  ;;  %v9889_v51 = vld [vmem:[#allocation3 + $0x498] sm:$0xf] }
 0xb3b   : > { %7324 = vmatmul.bf16.gmra.mxu0 %v9818_v34  ;;  %v10793_v56 = vld [vmem:[#allocation3 + $0x4b4] sm:$0xf0] }
 0xb3c   : > { %v7788_v18 = vadd.f32 %v7787_v1, %v7619_v28  ;;  %v9890_v44 = vor.u32 %v10793_v56, %v9889_v51  ;;  %v10797_v56 = vld [vmem:[#allocation3 + $0x4dc] sm:$0xf] }
 0xb3d   : > { %v7623_v49 = vpop.f32.mrf.mxu2 }
 0xb3e   : > { %v7789_v29 = vpop.f32.mrf.mxu3  ;;  %v7926_v59 = vmax.f32 %v7788_v18, 0.0 }
 0xb3f   : > { %v7451_v50 = vpop.f32.mrf.mxu1 }
 0xb40   : > { %v7287_v6 = vpop.f32.mrf.mxu0  ;;  %v7452_v61 = vadd.f32 %v7451_v50, %v7283_v36 }
 0xb41   : > { %v7288_v54 = vadd.f32 %v7287_v6, %v12664_v13 }
 0xb42   : > { %v7621_v16 = vadd.f32 %v7620_v3, %v7452_v61  ;;  %v9851_v61 = vld [vmem:[#allocation3 + $0x470] sm:$0xf0] }
 0xb43   : > { %7831 = vmatmul.bf16.gmra.mxu3 %v9830_v31 }
 0xb44   : > { %v7790_v45 = vadd.f32 %v7789_v29, %v7621_v16  ;;  %v9862_v29 = vor.u32 %v10781_v5, %v9859_v22  ;;  %v10792_v16 = vld [vmem:[#allocation3 + $0x4ac] sm:$0xf0]  ;;  %v9883_v5 = vld [vmem:[#allocation3 + $0x4b0] sm:$0xf0] }
 0xb45   : > { %v7625_v58 = vpop.f32.mrf.mxu2 }
 0xb46   : > { %v7927_v0 = vmax.f32 %v7790_v45, 0.0  ;;  %v7792_v12 = vpop.f32.mrf.mxu3 }
 0xb47   : > { %v7454_v46 = vpop.f32.mrf.mxu1 }
 0xb48   : > { %v7290_v34 = vpop.f32.mrf.mxu0  ;;  %v7455_v13 = vadd.f32 %v7454_v46, %v7286_v47  ;;  %v8047_v1 = vpack.c.bf16 %v7927_v0, %v7926_v59  ;;  %v10789_v46 = vld [vmem:[#allocation3 + $0x49c] sm:$0xf] }
 0xb49   : > { %v7291_v3 = vadd.f32 %v7290_v34, %v12669_v11  ;;  %v9881_v11 = vld [vmem:[#allocation3 + $0x490] sm:$0xf] }
 0xb4a   : > { %v7624_v21 = vadd.f32 %v7623_v49, %v7455_v13  ;;  %7493 = vmatmul.bf16.gmra.mxu1 %v9822_v38  ;;  %8424 = vmatpush.bf16.msra.mxu0 %v8047_v1  ;;  %v10780_v49 = vld [vmem:[#allocation3 + $0x454] sm:$0xf] }
 0xb4b   : > { %7329 = vmatmul.bf16.gmra.mxu0 %v9850_v40  ;;  %7667 = vmatmul.bf16.gmra.mxu2 %v9858_v60  ;;  %v9854_v37 = vor.u32 %v10780_v49, %v9851_v61 }
 0xb4c   : > { %v7793_v24 = vadd.f32 %v7792_v12, %v7624_v21 }
 0xb4d   : > { %v7628_v26 = vpop.f32.mrf.mxu2 }
 0xb4e   : > { %v7794_v36 = vpop.f32.mrf.mxu3  ;;  %8425 = vmatpush.bf16.msra.mxu0 %v8046_v15  ;;  %v7928_v45 = vmax.f32 %v7793_v24, 0.0  ;;  %v10788_v24 = vld [vmem:[#allocation3 + $0x494] sm:$0xf] }
 0xb4f   : > { %v7456_v28 = vpop.f32.mrf.mxu1 }
 0xb50   : > { %v7292_v50 = vpop.f32.mrf.mxu0  ;;  %v7457_v31 = vadd.f32 %v7456_v28, %v7288_v54  ;;  %v10801_v28 = vld [vmem:[#allocation3 + $0x4f4] sm:$0xf0] }
 0xb51   : > { %v7293_v47 = vadd.f32 %v7292_v50, %v12674_v33  ;;  %v9882_v33 = vor.u32 %v10792_v16, %v9881_v11 }
 0xb52   : > { %v7626_v6 = vadd.f32 %v7625_v58, %v7457_v31  ;;  %8426 = vmatpush.bf16.msra.mxu0 %v13117_v57  ;;  %v9886_v31 = vor.u32 %v10788_v24, %v9883_v5 }
 0xb53   : > { %7836 = vmatmul.bf16.gmra.mxu3 %v9862_v29 }
 0xb54   : > { %v7795_v18 = vadd.f32 %v7794_v36, %v7626_v6  ;;  %v9921_v36 = vld [vmem:[#allocation3 + $0x4d8] sm:$0xf] }
 0xb55   : > { %v7630_v8 = vpop.f32.mrf.mxu2  ;;  %v9922_v11 = vor.u32 %v10801_v28, %v9921_v36  ;;  %v9955_v36 = vld [vmem:[#allocation3 + $0x538] sm:$0xf0] }
 0xb56   : > { %v7797_v15 = vpop.f32.mrf.mxu3  ;;  %8427 = vmatpush.bf16.msra.mxu0 %v13113_v30  ;;  %v7929_v54 = vmax.f32 %v7795_v18, 0.0  ;;  %v9891_v30 = vld [vmem:[#allocation3 + $0x4b8] sm:$0xf0] }
 0xb57   : > { %v7459_v35 = vpop.f32.mrf.mxu1  ;;  %v9894_v13 = vor.u32 %v10789_v46, %v9891_v30  ;;  %v10809_v46 = vld [vmem:[#allocation3 + $0x534] sm:$0xf0] }
 0xb58   : > { %v7295_v58 = vpop.f32.mrf.mxu0  ;;  %v7460_v57 = vadd.f32 %v7459_v35, %v7291_v3  ;;  %v13128_v59 = vpack.c.bf16 %v7929_v54, %v7928_v45 }
 0xb59   : > { %v7296_v0 = vadd.f32 %v7295_v58, %v12679_v32  ;;  %v9945_v58 = vld [vmem:[#allocation3 + $0x510] sm:$0xf] }
 0xb5a   : > { %v7629_v12 = vadd.f32 %v7628_v26, %v7460_v57  ;;  %7498 = vmatmul.bf16.gmra.mxu1 %v9854_v37  ;;  %8428 = vmatpush.bf16.msra.mxu0 %v13109_v55  ;;  %v9913_v55 = vld [vmem:[#allocation3 + $0x4d0] sm:$0xf]  ;;  %v10796_v57 = vld [vmem:[#allocation3 + $0x4d4] sm:$0xf] }
 0xb5b   : > { %7334 = vmatmul.bf16.gmra.mxu0 %v9882_v33  ;;  %7672 = vmatmul.bf16.gmra.mxu2 %v9890_v44  ;;  %v10800_v26 = vld [vmem:[#allocation3 + $0x4ec] sm:$0xf0] }
 0xb5c   : > { %v7798_v38 = vadd.f32 %v7797_v15, %v7629_v12  ;;  %v10808_v12 = vld [vmem:[#allocation3 + $0x52c] sm:$0xf0] }
 0xb5d   : > { %v7633_v40 = vpop.f32.mrf.mxu2 }
 0xb5e   : > { %v7799_v60 = vpop.f32.mrf.mxu3  ;;  %8429 = vmatpush.bf16.msra.mxu0 %v13106_v41  ;;  %v7930_v50 = vmax.f32 %v7798_v38, 0.0  ;;  %v9953_v38 = vld [vmem:[#allocation3 + $0x518] sm:$0xf] }
 0xb5f   : > { %v7461_v34 = vpop.f32.mrf.mxu1 }
 0xb60   : > { %v7297_v1 = vpop.f32.mrf.mxu0  ;;  %v7462_v3 = vadd.f32 %v7461_v34, %v7293_v47 }
 0xb61   : > { %v7298_v21 = vadd.f32 %v7297_v1, %v12684_v17  ;;  %v9914_v17 = vor.u32 %v10800_v26, %v9913_v55  ;;  %v10805_v26 = vld [vmem:[#allocation3 + $0x51c] sm:$0xf] }
 0xb62   : > { %v7631_v32 = vadd.f32 %v7630_v8, %v7462_v3  ;;  %8430 = vmatpush.bf16.msra.mxu0 %v13102_v53  ;;  %v9923_v8 = vld [vmem:[#allocation3 + $0x4f8] sm:$0xf0]  ;;  %v9946_v3 = vor.u32 %v10808_v12, %v9945_v58 }
 0xb63   : > { %7841 = vmatmul.bf16.gmra.mxu3 %v9894_v13  ;;  %v9926_v37 = vor.u32 %v10797_v56, %v9923_v8 }
 0xb64   : > { %v7800_v22 = vadd.f32 %v7799_v60, %v7631_v32  ;;  %v9954_v32 = vor.u32 %v10809_v46, %v9953_v38 }
 0xb65   : > { %v7635_v29 = vpop.f32.mrf.mxu2 }
 0xb66   : > { %v7802_v41 = vpop.f32.mrf.mxu3  ;;  %8431 = vmatpush.bf16.msra.mxu0 %v13098_v4  ;;  %v7931_v47 = vmax.f32 %v7800_v22, 0.0 }
 0xb67   : > { %v7464_v6 = vpop.f32.mrf.mxu1 }
 0xb68   : > { %v7300_v49 = vpop.f32.mrf.mxu0  ;;  %v7465_v53 = vadd.f32 %v7464_v6, %v7296_v0  ;;  %v13136_v61 = vpack.c.bf16 %v7931_v47, %v7930_v50 }
 0xb69   : > { %v7301_v18 = vadd.f32 %v7300_v49, %v12698_v43  ;;  %v9915_v43 = vld [vmem:[#allocation3 + $0x4f0] sm:$0xf0] }
 0xb6a   : > { %v7634_v16 = vadd.f32 %v7633_v40, %v7465_v53  ;;  %7503 = vmatmul.bf16.gmra.mxu1 %v9886_v31  ;;  %v9918_v34 = vor.u32 %v10796_v57, %v9915_v43  ;;  %v9947_v49 = vld [vmem:[#allocation3 + $0x530] sm:$0xf0]  ;;  %v10813_v43 = vld [vmem:[#allocation3 + $0x55c] sm:$0xf] }
 0xb6b   : > { %7339 = vmatmul.bf16.gmra.mxu0 %v9914_v17  ;;  %7677 = vmatmul.bf16.gmra.mxu2 %v9922_v11  ;;  %v9977_v17 = vld [vmem:[#allocation3 + $0x550] sm:$0xf]  ;;  %v10804_v11 = vld [vmem:[#allocation3 + $0x514] sm:$0xf] }
 0xb6c   : > { %v7803_v51 = vadd.f32 %v7802_v41, %v7634_v16  ;;  %v9958_v41 = vor.u32 %v10805_v26, %v9955_v36  ;;  %v10817_v16 = vld [vmem:[#allocation3 + $0x574] sm:$0xf0] }
 0xb6d   : > { %v7638_v45 = vpop.f32.mrf.mxu2 }
 0xb6e   : > { %v7804_v4 = vpop.f32.mrf.mxu3  ;;  %v7932_v40 = vmax.f32 %v7803_v51, 0.0 }
 0xb6f   : > { %v7466_v15 = vpop.f32.mrf.mxu1 }
 0xb70   : > { %v7302_v54 = vpop.f32.mrf.mxu0  ;;  %v7467_v35 = vadd.f32 %v7466_v15, %v7298_v21 }
 0xb71   : > { %v7303_v33 = vadd.f32 %v7302_v54, %v12714_v23 }
 0xb72   : > { %v7636_v44 = vadd.f32 %v7635_v29, %v7467_v35 }
 0xb73   : > { %7846 = vmatmul.bf16.gmra.mxu3 %v9926_v37 }
 0xb74   : > { %v7805_v0 = vadd.f32 %v7804_v4, %v7636_v44 }
 0xb75   : > { %v7640_v30 = vpop.f32.mrf.mxu2 }
 0xb76   : > { %v7807_v60 = vpop.f32.mrf.mxu3  ;;  %v7933_v13 = vmax.f32 %v7805_v0, 0.0  ;;  %v9987_v0 = vld [vmem:[#allocation3 + $0x578] sm:$0xf0] }
 0xb77   : > { %v7469_v1 = vpop.f32.mrf.mxu1 }
 0xb78   : > { %v7305_v21 = vpop.f32.mrf.mxu0  ;;  %v7470_v55 = vadd.f32 %v7469_v1, %v7301_v18  ;;  %v13140_v23 = vpack.c.bf16 %v7933_v13, %v7932_v40  ;;  %v9985_v18 = vld [vmem:[#allocation3 + $0x558] sm:$0xf]  ;;  %v9990_v40 = vor.u32 %v10813_v43, %v9987_v0  ;;  %v10009_v1 = vld [vmem:[#allocation3 + $0x590] sm:$0xf] }
 0xb79   : > { %v7306_v24 = vadd.f32 %v7305_v21, %v12728_v2  ;;  %v10816_v2 = vld [vmem:[#allocation3 + $0x56c] sm:$0xf0]  ;;  %v9986_v54 = vor.u32 %v10817_v16, %v9985_v18 }
 0xb7a   : > { %v7639_v5 = vadd.f32 %v7638_v45, %v7470_v55  ;;  %7508 = vmatmul.bf16.gmra.mxu1 %v9918_v34  ;;  %v9950_v45 = vor.u32 %v10804_v11, %v9947_v49  ;;  %v9978_v37 = vor.u32 %v10816_v2, %v9977_v17  ;;  %v10824_v55 = vld [vmem:[#allocation3 + $0x5ac] sm:$0xf0]  ;;  %v10821_v11 = vld [vmem:[#allocation3 + $0x59c] sm:$0xf] }
 0xb7b   : > { %7344 = vmatmul.bf16.gmra.mxu0 %v9946_v3  ;;  %7682 = vmatmul.bf16.gmra.mxu2 %v9954_v32  ;;  %v10812_v3 = vld [vmem:[#allocation3 + $0x554] sm:$0xf]  ;;  %v10019_v49 = vld [vmem:[#allocation3 + $0x5b8] sm:$0xf0] }
 0xb7c   : > { %v7808_v22 = vadd.f32 %v7807_v60, %v7639_v5  ;;  %v9979_v32 = vld [vmem:[#allocation3 + $0x570] sm:$0xf0]  ;;  %v10825_v5 = vld [vmem:[#allocation3 + $0x5b4] sm:$0xf0] }
 0xb7d   : > { %v7643_v28 = vpop.f32.mrf.mxu2 }
 0xb7e   : > { %v7809_v29 = vpop.f32.mrf.mxu3  ;;  %v7934_v56 = vmax.f32 %v7808_v22, 0.0 }
 0xb7f   : > { %v7471_v50 = vpop.f32.mrf.mxu1 }
 0xb80   : > { %v7307_v31 = vpop.f32.mrf.mxu0  ;;  %v7472_v47 = vadd.f32 %v7471_v50, %v7303_v33  ;;  %v10010_v50 = vor.u32 %v10824_v55, %v10009_v1 }
 0xb81   : > { %v7308_v38 = vadd.f32 %v7307_v31, %v12745_v48 }
 0xb82   : > { %v7641_v6 = vadd.f32 %v7640_v30, %v7472_v47 }
 0xb83   : > { %7851 = vmatmul.bf16.gmra.mxu3 %v9958_v41 }
 0xb84   : > { %v7810_v53 = vadd.f32 %v7809_v29, %v7641_v6 }
 0xb85   : > { %v7645_v51 = vpop.f32.mrf.mxu2 }
 0xb86   : > { %v7812_v8 = vpop.f32.mrf.mxu3  ;;  %v7935_v4 = vmax.f32 %v7810_v53, 0.0 }
 0xb87   : > { %v7474_v15 = vpop.f32.mrf.mxu1 }
 0xb88   : > { %v7310_v35 = vpop.f32.mrf.mxu0  ;;  %v7475_v44 = vadd.f32 %v7474_v15, %v7306_v24  ;;  %v13143_v33 = vpack.c.bf16 %v7935_v4, %v7934_v56  ;;  %v10017_v24 = vld [vmem:[#allocation3 + $0x598] sm:$0xf]  ;;  %v10022_v56 = vor.u32 %v10821_v11, %v10019_v49  ;;  %v10041_v15 = vld [vmem:[#allocation3 + $0x5d0] sm:$0xf] }
 0xb89   : > { %v10018_v41 = vor.u32 %v10825_v5, %v10017_v24  ;;  %v7311_v31 = vadd.f32 %v7310_v35, %v12759_v7  ;;  %v14038_v24 = vld [vmem:[#allocation35_spill] sm:$0xff]  ;;  %v10840_v49 = vld [vmem:[#allocation3 + $0x62c] sm:$0xf0] }
 0xb8a   : > { %v7644_v58 = vadd.f32 %v7643_v28, %v7475_v44  ;;  %7513 = vmatmul.bf16.gmra.mxu1 %v9950_v45  ;;  %v9982_v28 = vor.u32 %v10812_v3, %v9979_v32  ;;  %v10832_v44 = vld [vmem:[#allocation3 + $0x5ec] sm:$0xf0]  ;;  %v10829_v32 = vld [vmem:[#allocation3 + $0x5dc] sm:$0xf] }
 0xb8b   : > { %7349 = vmatmul.bf16.gmra.mxu0 %v9978_v37  ;;  %7687 = vmatmul.bf16.gmra.mxu2 %v9986_v54  ;;  %v10820_v37 = vld [vmem:[#allocation3 + $0x594] sm:$0xf] }
 0xb8c   : > { %v7813_v57 = vadd.f32 %v7812_v8, %v7644_v58  ;;  %v10011_v54 = vld [vmem:[#allocation3 + $0x5b0] sm:$0xf0]  ;;  %v10049_v58 = vld [vmem:[#allocation3 + $0x5d8] sm:$0xf] }
 0xb8d   : > { %v7648_v12 = vpop.f32.mrf.mxu2 }
 0xb8e   : > { %v7814_v46 = vpop.f32.mrf.mxu3  ;;  %v7936_v26 = vmax.f32 %v7813_v57, 0.0  ;;  %v10833_v57 = vld [vmem:[#allocation3 + $0x5f4] sm:$0xf0] }
 0xb8f   : > { %v7476_v30 = vpop.f32.mrf.mxu1 }
 0xb90   : > { %v7312_v60 = vpop.f32.mrf.mxu0  ;;  %v7477_v34 = vadd.f32 %v7476_v30, %v7308_v38  ;;  %v10042_v30 = vor.u32 %v10832_v44, %v10041_v15  ;;  %v14039_v15 = vld [vmem:[#allocation36_spill] sm:$0xff]  ;;  %v14040_v44 = vld [vmem:[#allocation38_spill] sm:$0xff] }
 0xb91   : > { %v7313_v2 = vadd.f32 %v7312_v60, %v12776_v25  ;;  %v10014_v25 = vor.u32 %v10820_v37, %v10011_v54  ;;  %v14037_v60 = vld [vmem:[#allocation34_spill] sm:$0xff] }
 0xb92   : > { %v7646_v13 = vadd.f32 %v7645_v51, %v7477_v34 }
 0xb93   : > { %7856 = vmatmul.bf16.gmra.mxu3 %v9990_v40  ;;  %v10050_v40 = vor.u32 %v10833_v57, %v10049_v58 }
 0xb94   : > { %v7815_v21 = vadd.f32 %v7814_v46, %v7646_v13 }
 0xb95   : > { %v7650_v22 = vpop.f32.mrf.mxu2 }
 0xb96   : > { %v7817_v36 = vpop.f32.mrf.mxu3  ;;  %v7937_v29 = vmax.f32 %v7815_v21, 0.0  ;;  %v10051_v21 = vld [vmem:[#allocation3 + $0x5f8] sm:$0xf0] }
 0xb97   : > { %v7479_v48 = vpop.f32.mrf.mxu1 }
 0xb98   : > { %v7315_v47 = vpop.f32.mrf.mxu0  ;;  %v13147_v6 = vpack.c.bf16 %v7937_v29, %v7936_v26  ;;  %v7480_v17 = vadd.f32 %v7479_v48, %v7311_v31  ;;  %v10073_v31 = vld [vmem:[#allocation3 + $0x610] sm:$0xf] }
 0xb99   : > { %v7316_v34 = vadd.f32 %v7315_v47, %v14037_v60  ;;  %v10828_v47 = vld [vmem:[#allocation3 + $0x5d4] sm:$0xf] }
 0xb9a   : > { %7518 = vmatmul.bf16.gmra.mxu1 %v9982_v28  ;;  %v7649_v18 = vadd.f32 %v7648_v12, %v7480_v17  ;;  %v10054_v28 = vor.u32 %v10829_v32, %v10051_v21  ;;  %v10043_v17 = vld [vmem:[#allocation3 + $0x5f0] sm:$0xf0] }
 0xb9b   : > { %7354 = vmatmul.bf16.gmra.mxu0 %v10010_v50  ;;  %7692 = vmatmul.bf16.gmra.mxu2 %v10018_v41 }
 0xb9c   : > { %v7818_v4 = vadd.f32 %v7817_v36, %v7649_v18  ;;  %v10841_v18 = vld [vmem:[#allocation3 + $0x634] sm:$0xf0] }
 0xb9d   : > { %v7653_v53 = vpop.f32.mrf.mxu2 }
 0xb9e   : > { %v7819_v16 = vpop.f32.mrf.mxu3  ;;  %v7938_v0 = vmax.f32 %v7818_v4, 0.0  ;;  %v10074_v4 = vor.u32 %v10840_v49, %v10073_v31 }
 0xb9f   : > { %v7481_v51 = vpop.f32.mrf.mxu1 }
 0xba0   : > { %v7317_v8 = vpop.f32.mrf.mxu0  ;;  %v7482_v45 = vadd.f32 %v7481_v51, %v7313_v2  ;;  %v10081_v2 = vld [vmem:[#allocation3 + $0x618] sm:$0xf] }
 0xba1   : > { %v7318_v5 = vadd.f32 %v7317_v8, %v14038_v24  ;;  %v10046_v8 = vor.u32 %v10828_v47, %v10043_v17 }
 0xba2   : > { %v7651_v7 = vadd.f32 %v7650_v22, %v7482_v45 }
 0xba3   : > { %7861 = vmatmul.bf16.gmra.mxu3 %v10022_v56 }
 0xba4   : > { %v7820_v35 = vadd.f32 %v7819_v16, %v7651_v7  ;;  %v10082_v7 = vor.u32 %v10841_v18, %v10081_v2 }
 0xba5   : > { %v7655_v43 = vpop.f32.mrf.mxu2 }
 0xba6   : > { %v7822_v38 = vpop.f32.mrf.mxu3  ;;  %v7939_v12 = vmax.f32 %v7820_v35, 0.0 }
 0xba7   : > { %v7484_v46 = vpop.f32.mrf.mxu1 }
 0xba8   : > { %v7320_v13 = vpop.f32.mrf.mxu0  ;;  %v13151_v1 = vpack.c.bf16 %v7939_v12, %v7938_v0  ;;  %v7485_v3 = vadd.f32 %v7484_v46, %v7316_v34  ;;  %v10083_v0 = vld [vmem:[#allocation3 + $0x638] sm:$0xf0] }
 0xba9   : > { %v7321_v37 = vadd.f32 %v7320_v13, %v14039_v15  ;;  %v14042_v13 = vld [vmem:[#allocation39_spill] sm:$0xff] }
 0xbaa   : > { %7523 = vmatmul.bf16.gmra.mxu1 %v10014_v25  ;;  %v7654_v22 = vadd.f32 %v7653_v53, %v7485_v3  ;;  %v14041_v25 = vld [vmem:[#allocation37_spill] sm:$0xff] }
 0xbab   : > { %7359 = vmatmul.bf16.gmra.mxu0 %v10042_v30  ;;  %7697 = vmatmul.bf16.gmra.mxu2 %v10050_v40 }
 0xbac   : > { %v7823_v50 = vadd.f32 %v7822_v38, %v7654_v22  ;;  %v10075_v22 = vld [vmem:[#allocation3 + $0x630] sm:$0xf0] }
 0xbad   : > { %v7658_v55 = vpop.f32.mrf.mxu2 }
 0xbae   : > { %v7824_v26 = vpop.f32.mrf.mxu3  ;;  %v7940_v51 = vmax.f32 %v7823_v50, 0.0  ;;  %v10113_v50 = vld [vmem:[#allocation3 + $0x658] sm:$0xf] }
 0xbaf   : > { %v7486_v36 = vpop.f32.mrf.mxu1 }
 0xbb0   : > { %v7322_v29 = vpop.f32.mrf.mxu0  ;;  %v7487_v48 = vadd.f32 %v7486_v36, %v7318_v5  ;;  %v10836_v5 = vld [vmem:[#allocation3 + $0x614] sm:$0xf]  ;;  %v10105_v36 = vld [vmem:[#allocation3 + $0x650] sm:$0xf] }
 0xbb1   : > { %v7323_v12 = vadd.f32 %v7322_v29, %v14041_v25  ;;  %v10078_v47 = vor.u32 %v10836_v5, %v10075_v22  ;;  %v10107_v25 = vld [vmem:[#allocation3 + $0x670] sm:$0xf0] }
 0xbb2   : > { %v7656_v41 = vadd.f32 %v7655_v43, %v7487_v48  ;;  %v10837_v43 = vld [vmem:[#allocation3 + $0x61c] sm:$0xf] }
 0xbb3   : > { %7866 = vmatmul.bf16.gmra.mxu3 %v10054_v28  ;;  %v10086_v60 = vor.u32 %v10837_v43, %v10083_v0  ;;  %v10848_v28 = vld [vmem:[#allocation3 + $0x66c] sm:$0xf0] }
 0xbb4   : > { %v7825_v11 = vadd.f32 %v7824_v26, %v7656_v41  ;;  %v10849_v41 = vld [vmem:[#allocation3 + $0x674] sm:$0xf0] }
 0xbb5   : > { %v7660_v16 = vpop.f32.mrf.mxu2 }
 0xbb6   : > { %v7827_v56 = vpop.f32.mrf.mxu3  ;;  %v7941_v53 = vmax.f32 %v7825_v11, 0.0  ;;  %v10106_v11 = vor.u32 %v10848_v28, %v10105_v36  ;;  %v14045_v36 = vld [vmem:[#allocation42_spill] sm:$0xff] }
 0xbb7   : > { %v7489_v45 = vpop.f32.mrf.mxu1 }
 0xbb8   : > { %v7325_v54 = vpop.f32.mrf.mxu0  ;;  %v8054_v35 = vpack.c.bf16 %v7941_v53, %v7940_v51  ;;  %v7490_v57 = vadd.f32 %v7489_v45, %v7321_v37  ;;  %v10114_v51 = vor.u32 %v10849_v41, %v10113_v50  ;;  %v10845_v45 = vld [vmem:[#allocation3 + $0x65c] sm:$0xf] }
 0xbb9   : > { %v7326_v58 = vadd.f32 %v7325_v54, %v14040_v44  ;;  %v10853_v41 = vld [vmem:[#allocation3 + $0x69c] sm:$0xf] }
 0xbba   : > { %7528 = vmatmul.bf16.gmra.mxu1 %v10046_v8  ;;  %v7659_v46 = vadd.f32 %v7658_v55, %v7490_v57 }
 0xbbb   : > { %7364 = vmatmul.bf16.gmra.mxu0 %v10074_v4  ;;  %7702 = vmatmul.bf16.gmra.mxu2 %v10082_v7  ;;  %v10115_v4 = vld [vmem:[#allocation3 + $0x678] sm:$0xf0] }
 0xbbc   : > { %v7828_v21 = vadd.f32 %v7827_v56, %v7659_v46  ;;  %v10118_v54 = vor.u32 %v10845_v45, %v10115_v4  ;;  %v10137_v46 = vld [vmem:[#allocation3 + $0x690] sm:$0xf]  ;;  %v10865_v45 = vld [vmem:[#allocation3 + $0x6f4] sm:$0xf0] }
 0xbbd   : > { %v7663_v38 = vpop.f32.mrf.mxu2 }
 0xbbe   : > { %v7829_v30 = vpop.f32.mrf.mxu3  ;;  %v7942_v29 = vmax.f32 %v7828_v21, 0.0 }
 0xbbf   : > { %v7491_v40 = vpop.f32.mrf.mxu1 }
 0xbc0   : > { %v7327_v34 = vpop.f32.mrf.mxu0  ;;  %v7492_v3 = vadd.f32 %v7491_v40, %v7323_v12  ;;  %v10145_v40 = vld [vmem:[#allocation3 + $0x698] sm:$0xf] }
 0xbc1   : > { %v7328_v32 = vadd.f32 %v7327_v34, %v14042_v13 }
 0xbc2   : > { %v7661_v24 = vadd.f32 %v7660_v16, %v7492_v3  ;;  %v14043_v16 = vld [vmem:[#allocation40_spill] sm:$0xff] }
 0xbc3   : > { %7871 = vmatmul.bf16.gmra.mxu3 %v10086_v60  ;;  %v10857_v60 = vld [vmem:[#allocation3 + $0x6b4] sm:$0xf0] }
 0xbc4   : > { %v7830_v26 = vadd.f32 %v7829_v30, %v7661_v24  ;;  %v10856_v30 = vld [vmem:[#allocation3 + $0x6ac] sm:$0xf0] }
 0xbc5   : > { %v7665_v48 = vpop.f32.mrf.mxu2  ;;  %v10138_v24 = vor.u32 %v10856_v30, %v10137_v46  ;;  %v10861_v46 = vld [vmem:[#allocation3 + $0x6dc] sm:$0xf] }
 0xbc6   : > { %v7943_v55 = vmax.f32 %v7830_v26, 0.0  ;;  %v7832_v31 = vpop.f32.mrf.mxu3  ;;  %v10146_v26 = vor.u32 %v10857_v60, %v10145_v40  ;;  %v10179_v30 = vld [vmem:[#allocation3 + $0x6f8] sm:$0xf0] }
 0xbc7   : > { %v7494_v17 = vpop.f32.mrf.mxu1 }
 0xbc8   : > { %v7330_v49 = vpop.f32.mrf.mxu0  ;;  %v7495_v2 = vadd.f32 %v7494_v17, %v7326_v58  ;;  %v8055_v18 = vpack.c.bf16 %v7943_v55, %v7942_v29  ;;  %v14044_v58 = vld [vmem:[#allocation41_spill] sm:$0xff] }
 0xbc9   : > { %v7331_v56 = vadd.f32 %v7330_v49, %v14043_v16  ;;  %v10147_v29 = vld [vmem:[#allocation3 + $0x6b8] sm:$0xf0]  ;;  %v14046_v49 = vld [vmem:[#allocation43_spill] sm:$0xff] }
 0xbca   : > { %v7664_v8 = vadd.f32 %v7663_v38, %v7495_v2  ;;  %7533 = vmatmul.bf16.gmra.mxu1 %v10078_v47  ;;  %v10844_v38 = vld [vmem:[#allocation3 + $0x654] sm:$0xf]  ;;  %v10150_v47 = vor.u32 %v10853_v41, %v10147_v29 }
 0xbcb   : > { %7369 = vmatmul.bf16.gmra.mxu0 %v10106_v11  ;;  %8513 = vmatpush.bf16.msra.mxu1 %v8055_v18  ;;  %v10110_v13 = vor.u32 %v10844_v38, %v10107_v25 }
 0xbcc   : > { %v7833_v53 = vadd.f32 %v7832_v31, %v7664_v8  ;;  %7707 = vmatmul.bf16.gmra.mxu2 %v10114_v51  ;;  %v10852_v51 = vld [vmem:[#allocation3 + $0x694] sm:$0xf]  ;;  %v10864_v8 = vld [vmem:[#allocation3 + $0x6ec] sm:$0xf0] }
 0xbce   : > { %v7834_v7 = vpop.f32.mrf.mxu3  ;;  %v7668_v15 = vpop.f32.mrf.mxu2  ;;  %v7944_v34 = vmax.f32 %v7833_v53, 0.0  ;;  %v10177_v53 = vld [vmem:[#allocation3 + $0x6d8] sm:$0xf] }
 0xbcf   : > { %8514 = vmatpush.bf16.msra.mxu1 %v8054_v35  ;;  %v7496_v37 = vpop.f32.mrf.mxu1 }
 0xbd0   : > { %v7332_v44 = vpop.f32.mrf.mxu0  ;;  %v7497_v57 = vadd.f32 %v7496_v37, %v7328_v32 }
 0xbd1   : > { %v7333_v43 = vadd.f32 %v7332_v44, %v14044_v58 }
 0xbd2   : > { %v7666_v0 = vadd.f32 %v7665_v48, %v7497_v57 }
 0xbd3   : > { %7876 = vmatmul.bf16.gmra.mxu3 %v10118_v54  ;;  %8515 = vmatpush.bf16.msra.mxu1 %v13151_v1 }
 0xbd4   : > { %v7835_v12 = vadd.f32 %v7834_v7, %v7666_v0  ;;  %v14047_v0 = vld [vmem:[#allocation44_spill] sm:$0xff] }
 0xbd6   : > { %v7837_v3 = vpop.f32.mrf.mxu3  ;;  %v7670_v35 = vpop.f32.mrf.mxu2  ;;  %v7945_v21 = vmax.f32 %v7835_v12, 0.0 }
 0xbd7   : > { %8516 = vmatpush.bf16.msra.mxu1 %v13147_v6  ;;  %v7499_v32 = vpop.f32.mrf.mxu1 }
 0xbd8   : > { %v7335_v5 = vpop.f32.mrf.mxu0  ;;  %v7500_v22 = vadd.f32 %v7499_v32, %v7331_v56  ;;  %v13162_v1 = vpack.c.bf16 %v7945_v21, %v7944_v34  ;;  %v10169_v56 = vld [vmem:[#allocation3 + $0x6d0] sm:$0xf]  ;;  %v10860_v32 = vld [vmem:[#allocation3 + $0x6d4] sm:$0xf] }
 0xbd9   : > { %v7336_v28 = vadd.f32 %v7335_v5, %v14045_v36  ;;  %v10170_v44 = vor.u32 %v10864_v8, %v10169_v56  ;;  %v10209_v36 = vld [vmem:[#allocation3 + $0x718] sm:$0xf] }
 0xbda   : > { %v7669_v48 = vadd.f32 %v7668_v15, %v7500_v22  ;;  %7538 = vmatmul.bf16.gmra.mxu1 %v10110_v13  ;;  %v10201_v22 = vld [vmem:[#allocation3 + $0x710] sm:$0xf] }
 0xbdb   : > { %7374 = vmatmul.bf16.gmra.mxu0 %v10138_v24  ;;  %8517 = vmatpush.bf16.msra.mxu1 %v13143_v33  ;;  %v10139_v33 = vld [vmem:[#allocation3 + $0x6b0] sm:$0xf0] }
 0xbdc   : > { %v7838_v50 = vadd.f32 %v7837_v3, %v7669_v48  ;;  %7712 = vmatmul.bf16.gmra.mxu2 %v10146_v26  ;;  %v10142_v15 = vor.u32 %v10852_v51, %v10139_v33  ;;  %v10171_v24 = vld [vmem:[#allocation3 + $0x6f0] sm:$0xf0]  ;;  %v10872_v26 = vld [vmem:[#allocation3 + $0x72c] sm:$0xf0]  ;;  %v10869_v51 = vld [vmem:[#allocation3 + $0x71c] sm:$0xf] }
 0xbdd   : > { %v10174_v29 = vor.u32 %v10860_v32, %v10171_v24  ;;  %v10211_v33 = vld [vmem:[#allocation3 + $0x738] sm:$0xf0] }
 0xbde   : > { %v7839_v55 = vpop.f32.mrf.mxu3  ;;  %v7673_v6 = vpop.f32.mrf.mxu2  ;;  %v7946_v4 = vmax.f32 %v7838_v50, 0.0 }
 0xbdf   : > { %8518 = vmatpush.bf16.msra.mxu1 %v13140_v23  ;;  %v7501_v31 = vpop.f32.mrf.mxu1 }
 0xbe0   : > { %v7337_v17 = vpop.f32.mrf.mxu0  ;;  %v7502_v11 = vadd.f32 %v7501_v31, %v7333_v43  ;;  %v10178_v43 = vor.u32 %v10865_v45, %v10177_v53  ;;  %v10202_v31 = vor.u32 %v10872_v26, %v10201_v22  ;;  %v10214_v53 = vor.u32 %v10869_v51, %v10211_v33 }
 0xbe1   : > { %v7338_v2 = vadd.f32 %v7337_v17, %v14046_v49 }
 0xbe2   : > { %v7671_v18 = vadd.f32 %v7670_v35, %v7502_v11 }
 0xbe3   : > { %7881 = vmatmul.bf16.gmra.mxu3 %v10150_v47  ;;  %8519 = vmatpush.bf16.msra.mxu1 %v13136_v61 }
 0xbe4   : > { %v7840_v16 = vadd.f32 %v7839_v55, %v7671_v18 }
 0xbe6   : > { %v7842_v7 = vpop.f32.mrf.mxu3  ;;  %v7675_v23 = vpop.f32.mrf.mxu2  ;;  %v7947_v37 = vmax.f32 %v7840_v16, 0.0 }
 0xbe7   : > { %8520 = vmatpush.bf16.msra.mxu1 %v13128_v59  ;;  %v7504_v54 = vpop.f32.mrf.mxu1  ;;  %v10182_v59 = vor.u32 %v10861_v46, %v10179_v30 }
 0xbe8   : > { %v7340_v57 = vpop.f32.mrf.mxu0  ;;  %v7505_v58 = vadd.f32 %v7504_v54, %v7336_v28  ;;  %v13170_v61 = vpack.c.bf16 %v7947_v37, %v7946_v4  ;;  %v10873_v28 = vld [vmem:[#allocation3 + $0x734] sm:$0xf0]  ;;  %v10233_v54 = vld [vmem:[#allocation3 + $0x750] sm:$0xf] }
 0xbe9   : > { %v7341_v38 = vadd.f32 %v7340_v57, %v14047_v0  ;;  %v10210_v11 = vor.u32 %v10873_v28, %v10209_v36  ;;  %v10881_v57 = vld [vmem:[#allocation3 + $0x774] sm:$0xf0] }
 0xbea   : > { %v7674_v25 = vadd.f32 %v7673_v6, %v7505_v58  ;;  %7543 = vmatmul.bf16.gmra.mxu1 %v10142_v15  ;;  %v10203_v15 = vld [vmem:[#allocation3 + $0x730] sm:$0xf0] }
 0xbeb   : > { %7379 = vmatmul.bf16.gmra.mxu0 %v10170_v44  ;;  %v10241_v44 = vld [vmem:[#allocation3 + $0x758] sm:$0xf] }
 0xbec   : > { %v7843_v12 = vadd.f32 %v7842_v7, %v7674_v25  ;;  %7717 = vmatmul.bf16.gmra.mxu2 %v10178_v43 }
 0xbee   : > { %v7844_v40 = vpop.f32.mrf.mxu3  ;;  %v7678_v60 = vpop.f32.mrf.mxu2  ;;  %v7948_v48 = vmax.f32 %v7843_v12, 0.0 }
 0xbef   : > { %v7506_v34 = vpop.f32.mrf.mxu1 }
 0xbf0   : > { %v7342_v3 = vpop.f32.mrf.mxu0  ;;  %v7507_v35 = vadd.f32 %v7506_v34, %v7338_v2 }
 0xbf1   : > { %v7343_v13 = vadd.f32 %v7342_v3, %v12945_v39 }
 0xbf2   : > { %v7676_v21 = vadd.f32 %v7675_v23, %v7507_v35  ;;  %v10868_v23 = vld [vmem:[#allocation3 + $0x714] sm:$0xf]  ;;  %v10877_v35 = vld [vmem:[#allocation3 + $0x75c] sm:$0xf] }
 0xbf3   : > { %7886 = vmatmul.bf16.gmra.mxu3 %v10182_v59 }
 0xbf4   : > { %v7845_v5 = vadd.f32 %v7844_v40, %v7676_v21 }
 0xbf6   : > { %v7847_v50 = vpop.f32.mrf.mxu3  ;;  %v7680_v41 = vpop.f32.mrf.mxu2  ;;  %v7949_v55 = vmax.f32 %v7845_v5, 0.0 }
 0xbf7   : > { %v7509_v6 = vpop.f32.mrf.mxu1 }
 0xbf8   : > { %v7345_v47 = vpop.f32.mrf.mxu0  ;;  %v7510_v17 = vadd.f32 %v7509_v6, %v7341_v38  ;;  %v13174_v39 = vpack.c.bf16 %v7949_v55, %v7948_v48  ;;  %v10206_v38 = vor.u32 %v10868_v23, %v10203_v15  ;;  %v10876_v48 = vld [vmem:[#allocation3 + $0x754] sm:$0xf]  ;;  %v10888_v55 = vld [vmem:[#allocation3 + $0x7ac] sm:$0xf0]  ;;  %v10273_v6 = vld [vmem:[#allocation3 + $0x798] sm:$0xf] }
 0xbf9   : > { %v7346_v49 = vadd.f32 %v7345_v47, %v12959_v20  ;;  %v10880_v20 = vld [vmem:[#allocation3 + $0x76c] sm:$0xf0] }
 0xbfa   : > { %v7679_v2 = vadd.f32 %v7678_v60, %v7510_v17  ;;  %7548 = vmatmul.bf16.gmra.mxu1 %v10174_v29  ;;  %v10234_v46 = vor.u32 %v10880_v20, %v10233_v54  ;;  %v10242_v60 = vor.u32 %v10881_v57, %v10241_v44  ;;  %v10265_v29 = vld [vmem:[#allocation3 + $0x790] sm:$0xf] }
 0xbfb   : > { %7384 = vmatmul.bf16.gmra.mxu0 %v10202_v31  ;;  %v10889_v31 = vld [vmem:[#allocation3 + $0x7b4] sm:$0xf0] }
 0xbfc   : > { %v7848_v18 = vadd.f32 %v7847_v50, %v7679_v2  ;;  %7722 = vmatmul.bf16.gmra.mxu2 %v10210_v11  ;;  %v10235_v50 = vld [vmem:[#allocation3 + $0x770] sm:$0xf0] }
 0xbfe   : > { %v7849_v16 = vpop.f32.mrf.mxu3  ;;  %v7683_v56 = vpop.f32.mrf.mxu2  ;;  %v7950_v58 = vmax.f32 %v7848_v18, 0.0  ;;  %v10266_v18 = vor.u32 %v10888_v55, %v10265_v29 }
 0xbff   : > { %v7511_v8 = vpop.f32.mrf.mxu1 }
 0xc00   : > { %v7347_v45 = vpop.f32.mrf.mxu0  ;;  %v7512_v4 = vadd.f32 %v7511_v8, %v7343_v13  ;;  %v10243_v13 = vld [vmem:[#allocation3 + $0x778] sm:$0xf0] }
 0xc01   : > { %v7348_v21 = vadd.f32 %v7347_v45, %v12973_v62  ;;  %v10246_v22 = vor.u32 %v10877_v35, %v10243_v13  ;;  %v10275_v45 = vld [vmem:[#allocation3 + $0x7b8] sm:$0xf0] }
 0xc02   : > { %v7681_v7 = vadd.f32 %v7680_v41, %v7512_v4 }
 0xc03   : > { %7891 = vmatmul.bf16.gmra.mxu3 %v10214_v53  ;;  %v10885_v53 = vld [vmem:[#allocation3 + $0x79c] sm:$0xf] }
 0xc04   : > { %v7850_v37 = vadd.f32 %v7849_v16, %v7681_v7  ;;  %v10274_v16 = vor.u32 %v10889_v31, %v10273_v6  ;;  %v10278_v54 = vor.u32 %v10885_v53, %v10275_v45 }
 0xc06   : > { %v7852_v43 = vpop.f32.mrf.mxu3  ;;  %v7685_v0 = vpop.f32.mrf.mxu2  ;;  %v7951_v25 = vmax.f32 %v7850_v37, 0.0 }
 0xc07   : > { %v7514_v12 = vpop.f32.mrf.mxu1 }
 0xc08   : > { %v7350_v30 = vpop.f32.mrf.mxu0  ;;  %v7515_v40 = vadd.f32 %v7514_v12, %v7346_v49  ;;  %v13177_v34 = vpack.c.bf16 %v7951_v25, %v7950_v58  ;;  %v10238_v49 = vor.u32 %v10876_v48, %v10235_v50  ;;  %v10884_v58 = vld [vmem:[#allocation3 + $0x794] sm:$0xf]  ;;  %v10896_v25 = vld [vmem:[#allocation3 + $0x7ec] sm:$0xf0]  ;;  %v10305_v12 = vld [vmem:[#allocation3 + $0x7d8] sm:$0xf] }
 0xc09   : > { %v7351_v51 = vadd.f32 %v7350_v30, %v12984_v14 }
 0xc0a   : > { %v7684_v59 = vadd.f32 %v7683_v56, %v7515_v40  ;;  %7553 = vmatmul.bf16.gmra.mxu1 %v10206_v38  ;;  %v10297_v38 = vld [vmem:[#allocation3 + $0x7d0] sm:$0xf] }
 0xc0b   : > { %7389 = vmatmul.bf16.gmra.mxu0 %v10234_v46  ;;  %v10897_v46 = vld [vmem:[#allocation3 + $0x7f4] sm:$0xf0]  ;;  %v10298_v35 = vor.u32 %v10896_v25, %v10297_v38 }
 0xc0c   : > { %v7853_v3 = vadd.f32 %v7852_v43, %v7684_v59  ;;  %7727 = vmatmul.bf16.gmra.mxu2 %v10242_v60  ;;  %v10267_v43 = vld [vmem:[#allocation3 + $0x7b0] sm:$0xf0] }
 0xc0d   : > { %v10270_v60 = vor.u32 %v10884_v58, %v10267_v43 }
 0xc0e   : > { %v7854_v32 = vpop.f32.mrf.mxu3  ;;  %v7688_v24 = vpop.f32.mrf.mxu2  ;;  %v7952_v47 = vmax.f32 %v7853_v3, 0.0 }
 0xc0f   : > { %v7516_v5 = vpop.f32.mrf.mxu1 }
 0xc10   : > { %v7352_v26 = vpop.f32.mrf.mxu0  ;;  %v7517_v36 = vadd.f32 %v7516_v5, %v7348_v21 }
 0xc11   : > { %v7353_v4 = vadd.f32 %v7352_v26, %v12995_v42  ;;  %v10307_v26 = vld [vmem:[#allocation3 + $0x7f8] sm:$0xf0] }
 0xc12   : > { %v7686_v28 = vadd.f32 %v7685_v0, %v7517_v36 }
 0xc13   : > { %7896 = vmatmul.bf16.gmra.mxu3 %v10246_v22  ;;  %v10893_v22 = vld [vmem:[#allocation3 + $0x7dc] sm:$0xf] }
 0xc14   : > { %v7855_v41 = vadd.f32 %v7854_v32, %v7686_v28  ;;  %v10306_v32 = vor.u32 %v10897_v46, %v10305_v12  ;;  %v10310_v29 = vor.u32 %v10893_v22, %v10307_v26  ;;  %v14048_v46 = vld [vmem:[#allocation46_spill] sm:$0xff] }
 0xc16   : > { %v7857_v17 = vpop.f32.mrf.mxu3  ;;  %v7690_v11 = vpop.f32.mrf.mxu2  ;;  %v7953_v62 = vmax.f32 %v7855_v41, 0.0 }
 0xc17   : > { %v7519_v2 = vpop.f32.mrf.mxu1 }
 0xc18   : > { %v7355_v33 = vpop.f32.mrf.mxu0  ;;  %v13181_v56 = vpack.c.bf16 %v7953_v62, %v7952_v47  ;;  %v7520_v8 = vadd.f32 %v7519_v2, %v7351_v51  ;;  %v10892_v47 = vld [vmem:[#allocation3 + $0x7d4] sm:$0xf] }
 0xc19   : > { %v7356_v13 = vadd.f32 %v7355_v33, %v13000_v19 }
 0xc1a   : > { %7558 = vmatmul.bf16.gmra.mxu1 %v10238_v49  ;;  %v7689_v7 = vadd.f32 %v7688_v24, %v7520_v8 }
 0xc1b   : > { %7394 = vmatmul.bf16.gmra.mxu0 %v10266_v18 }
 0xc1c   : > { %7732 = vmatmul.bf16.gmra.mxu2 %v10274_v16  ;;  %v7858_v14 = vadd.f32 %v7857_v17, %v7689_v7  ;;  %v10299_v17 = vld [vmem:[#allocation3 + $0x7f0] sm:$0xf0] }
 0xc1d   : > { %v10302_v18 = vor.u32 %v10892_v47, %v10299_v17  ;;  %v14051_v47 = vld [vmem:[#allocation47_spill] sm:$0xff] }
 0xc1e   : > { %v7859_v23 = vpop.f32.mrf.mxu3  ;;  %v7693_v15 = vpop.f32.mrf.mxu2  ;;  %v7954_v30 = vmax.f32 %v7858_v14, 0.0 }
 0xc1f   : > { %v7521_v37 = vpop.f32.mrf.mxu1 }
 0xc20   : > { %v7357_v20 = vpop.f32.mrf.mxu0  ;;  %v7522_v44 = vadd.f32 %v7521_v37, %v7353_v4 }
 0xc21   : > { %v7358_v36 = vadd.f32 %v7357_v20, %v13005_v27 }
 0xc22   : > { %v7691_v57 = vadd.f32 %v7690_v11, %v7522_v44 }
 0xc23   : > { %7901 = vmatmul.bf16.gmra.mxu3 %v10278_v54 }
 0xc24   : > { %v7860_v0 = vadd.f32 %v7859_v23, %v7691_v57 }
 0xc26   : > { %v7862_v40 = vpop.f32.mrf.mxu3  ;;  %v7695_v42 = vpop.f32.mrf.mxu2  ;;  %v7955_v59 = vmax.f32 %v7860_v0, 0.0 }
 0xc27   : > { %v7524_v3 = vpop.f32.mrf.mxu1 }
 0xc28   : > { %v7360_v21 = vpop.f32.mrf.mxu0  ;;  %v13185_v24 = vpack.c.bf16 %v7955_v59, %v7954_v30  ;;  %v7525_v5 = vadd.f32 %v7524_v3, %v7356_v13 }
 0xc29   : > { %v7361_v27 = vadd.f32 %v7360_v21, %v13010_v52 }
 0xc2a   : > { %7563 = vmatmul.bf16.gmra.mxu1 %v10270_v60  ;;  %v7694_v28 = vadd.f32 %v7693_v15, %v7525_v5 }
 0xc2b   : > { %7399 = vmatmul.bf16.gmra.mxu0 %v10298_v35 }
 0xc2c   : > { %7737 = vmatmul.bf16.gmra.mxu2 %v10306_v32  ;;  %v7863_v19 = vadd.f32 %v7862_v40, %v7694_v28 }
 0xc2e   : > { %v7864_v48 = vpop.f32.mrf.mxu3  ;;  %v7698_v50 = vpop.f32.mrf.mxu2  ;;  %v7956_v49 = vmax.f32 %v7863_v19, 0.0 }
 0xc2f   : > { %v7526_v41 = vpop.f32.mrf.mxu1 }
 0xc30   : > { %v7362_v55 = vpop.f32.mrf.mxu0  ;;  %v7527_v6 = vadd.f32 %v7526_v41, %v7358_v36 }
 0xc31   : > { %v7363_v4 = vadd.f32 %v7362_v55, %v13015_v10  ;;  %v14050_v55 = vld [vmem:[#allocation48_spill] sm:$0xff] }
 0xc32   : > { %v7696_v31 = vadd.f32 %v7695_v42, %v7527_v6  ;;  %v14049_v42 = vld [vmem:[#allocation45_spill] sm:$0xff] }
 0xc33   : > { %7906 = vmatmul.bf16.gmra.mxu3 %v10310_v29 }
 0xc34   : > { %v7865_v11 = vadd.f32 %v7864_v48, %v7696_v31 }
 0xc36   : > { %v7867_v62 = vpop.f32.mrf.mxu3  ;;  %v7700_v2 = vpop.f32.mrf.mxu2  ;;  %v7957_v51 = vmax.f32 %v7865_v11, 0.0 }
 0xc37   : > { %v7529_v33 = vpop.f32.mrf.mxu1 }
 0xc38   : > { %v7365_v16 = vpop.f32.mrf.mxu0  ;;  %v8062_v8 = vpack.c.bf16 %v7957_v51, %v7956_v49  ;;  %v7530_v45 = vadd.f32 %v7529_v33, %v7361_v27 }
 0xc39   : > { %v7366_v53 = vadd.f32 %v7365_v16, %v13020_v63 }
 0xc3a   : > { %7568 = vmatmul.bf16.gmra.mxu1 %v10302_v18  ;;  %v7699_v7 = vadd.f32 %v7698_v50, %v7530_v45 }
 0xc3c   : > { %v7868_v44 = vadd.f32 %v7867_v62, %v7699_v7 }
 0xc3e   : > { %v7869_v23 = vpop.f32.mrf.mxu3  ;;  %v7703_v15 = vpop.f32.mrf.mxu2  ;;  %v7958_v58 = vmax.f32 %v7868_v44, 0.0 }
 0xc3f   : > { %v7531_v37 = vpop.f32.mrf.mxu1 }
 0xc40   : > { %v7367_v54 = vpop.f32.mrf.mxu0  ;;  %v7532_v20 = vadd.f32 %v7531_v37, %v7363_v4 }
 0xc41   : > { %v7368_v60 = vadd.f32 %v7367_v54, %v14049_v42  ;;  %v14055_v42 = vld [vmem:[#allocation51_spill] sm:$0xff] }
 0xc42   : > { %v7701_v14 = vadd.f32 %v7700_v2, %v7532_v20 }
 0xc44   : > { %v7870_v57 = vadd.f32 %v7869_v23, %v7701_v14 }
 0xc46   : > { %v7959_v43 = vmax.f32 %v7870_v57, 0.0  ;;  %v7872_v52 = vpop.f32.mrf.mxu3  ;;  %v7705_v0 = vpop.f32.mrf.mxu2 }
 0xc47   : > { %v7534_v38 = vpop.f32.mrf.mxu1 }
 0xc48   : > { %v7370_v25 = vpop.f32.mrf.mxu0  ;;  %v7535_v63 = vadd.f32 %v7534_v38, %v7366_v53  ;;  %v8063_v12 = vpack.c.bf16 %v7959_v43, %v7958_v58 }
 0xc49   : > { %v7371_v30 = vadd.f32 %v7370_v25, %v14048_v46  ;;  %v14054_v46 = vld [vmem:[#allocation52_spill] sm:$0xff] }
 0xc4a   : > { %v7704_v10 = vadd.f32 %v7703_v15, %v7535_v63  ;;  %8602 = vmatpush.bf16.msra.mxu2 %v8063_v12  ;;  %v14053_v15 = vld [vmem:[#allocation49_spill] sm:$0xff] }
 0xc4c   : > { %v7873_v40 = vadd.f32 %v7872_v52, %v7704_v10 }
 0xc4e   : > { %v7874_v59 = vpop.f32.mrf.mxu3  ;;  %8603 = vmatpush.bf16.msra.mxu2 %v8062_v8  ;;  %v7960_v22 = vmax.f32 %v7873_v40, 0.0 }
 0xc4f   : > { %v7536_v3 = vpop.f32.mrf.mxu1  ;;  %v7708_v35 = vpop.f32.mrf.mxu2 }
 0xc50   : > { %v7372_v13 = vpop.f32.mrf.mxu0  ;;  %v7537_v21 = vadd.f32 %v7536_v3, %v7368_v60 }
 0xc52   : > { %v7706_v32 = vadd.f32 %v7705_v0, %v7537_v21  ;;  %8604 = vmatpush.bf16.msra.mxu2 %v13185_v24  ;;  %v7373_v24 = vadd.f32 %v7372_v13, %v14051_v47 }
 0xc54   : > { %v7875_v5 = vadd.f32 %v7874_v59, %v7706_v32 }
 0xc56   : > { %v7877_v26 = vpop.f32.mrf.mxu3  ;;  %8605 = vmatpush.bf16.msra.mxu2 %v13181_v56  ;;  %v7961_v36 = vmax.f32 %v7875_v5, 0.0 }
 0xc57   : > { %v7539_v28 = vpop.f32.mrf.mxu1  ;;  %v7710_v48 = vpop.f32.mrf.mxu2 }
 0xc58   : > { %v7375_v50 = vpop.f32.mrf.mxu0  ;;  %v7540_v41 = vadd.f32 %v7539_v28, %v7371_v30  ;;  %v13195_v29 = vpack.c.bf16 %v7961_v36, %v7960_v22 }
 0xc59   : > { %v7376_v6 = vadd.f32 %v7375_v50, %v14050_v55 }
 0xc5a   : > { %v7709_v19 = vadd.f32 %v7708_v35, %v7540_v41  ;;  %8606 = vmatpush.bf16.msra.mxu2 %v13177_v34 }
 0xc5c   : > { %v7878_v31 = vadd.f32 %v7877_v26, %v7709_v19 }
 0xc5e   : > { %v7879_v17 = vpop.f32.mrf.mxu3  ;;  %8607 = vmatpush.bf16.msra.mxu2 %v13174_v39  ;;  %v7962_v51 = vmax.f32 %v7878_v31, 0.0  ;;  %v14052_v39 = vld [vmem:[#allocation50_spill] sm:$0xff]  ;;  %v14056_v31 = vld [vmem:[#allocation53_spill] sm:$0xff] }
 0xc5f   : > { %v7541_v11 = vpop.f32.mrf.mxu1  ;;  %v7713_v56 = vpop.f32.mrf.mxu2 }
 0xc60   : > { %v7377_v49 = vpop.f32.mrf.mxu0  ;;  %v7542_v62 = vadd.f32 %v7541_v11, %v7373_v24 }
 0xc61   : > { %v7378_v37 = vadd.f32 %v7377_v49, %v14053_v15 }
 0xc62   : > { %v7711_v2 = vadd.f32 %v7710_v48, %v7542_v62  ;;  %8608 = vmatpush.bf16.msra.mxu2 %v13170_v61 }
 0xc64   : > { %v7880_v18 = vadd.f32 %v7879_v17, %v7711_v2 }
 0xc66   : > { %v7882_v33 = vpop.f32.mrf.mxu3  ;;  %8609 = vmatpush.bf16.msra.mxu2 %v13162_v1  ;;  %v7963_v27 = vmax.f32 %v7880_v18, 0.0 }
 0xc67   : > { %v7544_v34 = vpop.f32.mrf.mxu1  ;;  %v7715_v16 = vpop.f32.mrf.mxu2 }
 0xc68   : > { %v7380_v8 = vpop.f32.mrf.mxu0  ;;  %v7545_v53 = vadd.f32 %v7544_v34, %v7376_v6  ;;  %v13203_v45 = vpack.c.bf16 %v7963_v27, %v7962_v51  ;;  %v14057_v34 = vld [vmem:[#allocation54_spill] sm:$0xff] }
 0xc69   : > { %v7381_v4 = vadd.f32 %v7380_v8, %v14052_v39 }
 0xc6a   : > { %v7714_v7 = vadd.f32 %v7713_v56, %v7545_v53 }
 0xc6c   : > { %v7883_v23 = vadd.f32 %v7882_v33, %v7714_v7 }
 0xc6e   : > { %v7884_v54 = vpop.f32.mrf.mxu3  ;;  %v7964_v58 = vmax.f32 %v7883_v23, 0.0 }
 0xc6f   : > { %v7546_v61 = vpop.f32.mrf.mxu1  ;;  %v7718_v20 = vpop.f32.mrf.mxu2 }
 0xc70   : > { %v7382_v44 = vpop.f32.mrf.mxu0  ;;  %v7547_v14 = vadd.f32 %v7546_v61, %v7378_v37 }
 0xc71   : > { %v7383_v60 = vadd.f32 %v7382_v44, %v14055_v42 }
 0xc72   : > { %v7716_v57 = vadd.f32 %v7715_v16, %v7547_v14 }
 0xc74   : > { %v7885_v1 = vadd.f32 %v7884_v54, %v7716_v57 }
 0xc76   : > { %v7887_v43 = vpop.f32.mrf.mxu3  ;;  %v7965_v52 = vmax.f32 %v7885_v1, 0.0 }
 0xc77   : > { %v7549_v0 = vpop.f32.mrf.mxu1  ;;  %v7720_v38 = vpop.f32.mrf.mxu2 }
 0xc78   : > { %v7385_v25 = vpop.f32.mrf.mxu0  ;;  %v7550_v63 = vadd.f32 %v7549_v0, %v7381_v4  ;;  %v13207_v12 = vpack.c.bf16 %v7965_v52, %v7964_v58  ;;  %v14058_v0 = vld [vmem:[#allocation55_spill] sm:$0xff] }
 0xc79   : > { %v7386_v30 = vadd.f32 %v7385_v25, %v14054_v46 }
 0xc7a   : > { %v7719_v10 = vadd.f32 %v7718_v20, %v7550_v63 }
 0xc7c   : > { %v7888_v40 = vadd.f32 %v7887_v43, %v7719_v10 }
 0xc7e   : > { %v7889_v59 = vpop.f32.mrf.mxu3  ;;  %v7966_v22 = vmax.f32 %v7888_v40, 0.0 }
 0xc7f   : > { %v7551_v3 = vpop.f32.mrf.mxu1  ;;  %v7723_v35 = vpop.f32.mrf.mxu2 }
 0xc80   : > { %v7387_v13 = vpop.f32.mrf.mxu0  ;;  %v7552_v21 = vadd.f32 %v7551_v3, %v7383_v60 }
 0xc81   : > { %v7388_v47 = vadd.f32 %v7387_v13, %v14056_v31  ;;  %v14061_v31 = vld [vmem:[#allocation58_spill] sm:$0xff] }
 0xc82   : > { %v7721_v32 = vadd.f32 %v7720_v38, %v7552_v21 }
 0xc84   : > { %v7890_v5 = vadd.f32 %v7889_v59, %v7721_v32 }
 0xc86   : > { %v7892_v26 = vpop.f32.mrf.mxu3  ;;  %v7967_v36 = vmax.f32 %v7890_v5, 0.0 }
 0xc87   : > { %v7554_v28 = vpop.f32.mrf.mxu1  ;;  %v7725_v48 = vpop.f32.mrf.mxu2 }
 0xc88   : > { %v7555_v50 = vadd.f32 %v7554_v28, %v7386_v30  ;;  %v13211_v41 = vpack.c.bf16 %v7967_v36, %v7966_v22  ;;  %v7390_v55 = vpop.f32.mrf.mxu0  ;;  %v14059_v30 = vld [vmem:[#allocation56_spill] sm:$0xff] }
 0xc89   : > { %v7391_v16 = vadd.f32 %v7390_v55, %v14057_v34 }
 0xc8a   : > { %v7724_v6 = vadd.f32 %v7723_v35, %v7555_v50 }
 0xc8c   : > { %v7893_v19 = vadd.f32 %v7892_v26, %v7724_v6  ;;  %v14060_v26 = vld [vmem:[#allocation57_spill] sm:$0xff]  ;;  %v10321_v6 = vld [vmem:[%s13922_s9 + $0x8] sm:$0xf] }
 0xc8e   : > { %v7894_v24 = vpop.f32.mrf.mxu3  ;;  %v7968_v18 = vmax.f32 %v7893_v19, 0.0  ;;  %v10901_v19 = vld [vmem:[%s13922_s9 + $0x14] sm:$0xf0] }
 0xc8f   : > { %v7556_v17 = vpop.f32.mrf.mxu1  ;;  %v7728_v11 = vpop.f32.mrf.mxu2 }
 0xc90   : > { %v7557_v56 = vadd.f32 %v7556_v17, %v7388_v47  ;;  %v7392_v62 = vpop.f32.mrf.mxu0  ;;  %v10322_v17 = vor.u32 %v10901_v19, %v10321_v6  ;;  %v10355_v6 = vld [vmem:[%s13922_s9 + $0x58] sm:$0xf0] }
 0xc91   : > { %v7393_v7 = vadd.f32 %v7392_v62, %v13075_v9 }
 0xc92   : > { %v7726_v49 = vadd.f32 %v7725_v48, %v7557_v56  ;;  %v10313_v56 = vld [vmem:[%s13922_s9] sm:$0xf]  ;;  %8610 = vmatmul.bf16.vlgmr.msra.gmra.mxu2 %v10322_v17 }
 0xc93   : > { %v10393_v17 = vld [vmem:[%s13922_s9 + $0xa0] sm:$0xf] }
 0xc94   : > { %v7895_v2 = vadd.f32 %v7894_v24, %v7726_v49  ;;  %v10900_v49 = vld [vmem:[%s13922_s9 + $0xc] sm:$0xf0] }
 0xc96   : > { %v7897_v51 = vpop.f32.mrf.mxu3  ;;  %v7969_v33 = vmax.f32 %v7895_v2, 0.0  ;;  %v10314_v2 = vor.u32 %v10900_v49, %v10313_v56 }
 0xc97   : > { %v7559_v27 = vpop.f32.mrf.mxu1  ;;  %v7730_v53 = vpop.f32.mrf.mxu2 }
 0xc98   : > { %v13215_v8 = vpack.c.bf16 %v7969_v33, %v7968_v18  ;;  %v7560_v39 = vadd.f32 %v7559_v27, %v7391_v16  ;;  %v7395_v4 = vpop.f32.mrf.mxu0  ;;  %v10315_v33 = vld [vmem:[%s13922_s9 + $0x10] sm:$0xf0]  ;;  %8432 = vmatmul.bf16.vlgmr.msra.gmra.mxu0 %v10314_v2 }
 0xc99   : > { %v7396_v38 = vadd.f32 %v7395_v4, %v14058_v0  ;;  %v10908_v0 = vld [vmem:[%s13922_s9 + $0x4c] sm:$0xf0]  ;;  %v10395_v2 = vld [vmem:[%s13922_s9 + $0xb0] sm:$0xf0] }
 0xc9a   : > { %v7729_v23 = vadd.f32 %v7728_v11, %v7560_v39 }
 0xc9c   : > { %v7898_v61 = vadd.f32 %v7897_v51, %v7729_v23  ;;  %v10898_v51 = vld [vmem:[%s13922_s9 + $0x4] sm:$0xf] }
 0xc9d   : > { %v10318_v16 = vor.u32 %v10898_v51, %v10315_v33  ;;  %v10371_v51 = vld [vmem:[%s13922_s9 + $0x78] sm:$0xf0] }
 0xc9e   : > { %v7899_v15 = vpop.f32.mrf.mxu3  ;;  %v7970_v57 = vmax.f32 %v7898_v61, 0.0  ;;  %v10904_v61 = vld [vmem:[%s13922_s9 + $0x2c] sm:$0xf0] }
 0xc9f   : > { %v7561_v37 = vpop.f32.mrf.mxu1  ;;  %v7733_v44 = vpop.f32.mrf.mxu2  ;;  %8521 = vmatmul.bf16.vlgmr.msra.gmra.mxu1 %v10318_v16  ;;  %v10925_v16 = vld [vmem:[%s13922_s9 + $0xd4] sm:$0xf0] }
 0xca0   : > { %v7562_v54 = vadd.f32 %v7561_v37, %v7393_v7  ;;  %v7397_v43 = vpop.f32.mrf.mxu0  ;;  %v10905_v37 = vld [vmem:[%s13922_s9 + $0x34] sm:$0xf0] }
 0xca1   : > { %v7398_v9 = vadd.f32 %v7397_v43, %v14059_v30  ;;  %v10909_v43 = vld [vmem:[%s13922_s9 + $0x54] sm:$0xf0] }
 0xca2   : > { %v7731_v20 = vadd.f32 %v7730_v53, %v7562_v54  ;;  %v10329_v54 = vld [vmem:[%s13922_s9 + $0x20] sm:$0xf] }
 0xca4   : > { %v7900_v14 = vadd.f32 %v7899_v15, %v7731_v20  ;;  %v10337_v15 = vld [vmem:[%s13922_s9 + $0x28] sm:$0xf] }
 0xca5   : > { %v10338_v20 = vor.u32 %v10905_v37, %v10337_v15  ;;  %v10411_v15 = vld [vmem:[%s13922_s9 + $0xd0] sm:$0xf0]  ;;  %v10915_v37 = vld [vmem:[%s13922_s9 + $0x8c] sm:$0xf] }
 0xca6   : > { %v7902_v1 = vpop.f32.mrf.mxu3  ;;  %v7971_v58 = vmax.f32 %v7900_v14, 0.0  ;;  %v10902_v14 = vld [vmem:[%s13922_s9 + $0x24] sm:$0xf] }
 0xca7   : > { %v7564_v52 = vpop.f32.mrf.mxu1  ;;  %v7735_v46 = vpop.f32.mrf.mxu2  ;;  %8615 = vmatmul.bf16.gmra.mxu2 %v10338_v20 }
 0xca8   : > { %v8069_v25 = vpack.c.bf16 %v7971_v58, %v7970_v57  ;;  %v7565_v63 = vadd.f32 %v7564_v52, %v7396_v38  ;;  %v7400_v59 = vpop.f32.mrf.mxu0  ;;  %v10331_v57 = vld [vmem:[%s13922_s9 + $0x30] sm:$0xf0]  ;;  %v10353_v58 = vld [vmem:[%s13922_s9 + $0x48] sm:$0xf]  ;;  %v10345_v52 = vld [vmem:[%s13922_s9 + $0x40] sm:$0xf] }
 0xca9   : > { %v7401_v36 = vadd.f32 %v7400_v59, %v14060_v26  ;;  %v10354_v38 = vor.u32 %v10909_v43, %v10353_v58  ;;  %v10363_v59 = vld [vmem:[%s13922_s9 + $0x70] sm:$0xf0]  ;;  %v10916_v26 = vld [vmem:[%s13922_s9 + $0x8c] sm:$0xf0] }
 0xcaa   : > { %v7734_v10 = vadd.f32 %v7733_v44, %v7565_v63  ;;  %v10330_v44 = vor.u32 %v10904_v61, %v10329_v54  ;;  %v10899_v63 = vld [vmem:[%s13922_s9 + $0xc] sm:$0xf]  ;;  %v10387_v54 = vld [vmem:[%s13922_s9 + $0x98] sm:$0xf0] }
 0xcab   : > { %v10390_v20 = vor.u32 %v10915_v37, %v10387_v54 }
 0xcac   : > { %v7903_v3 = vadd.f32 %v7902_v1, %v7734_v10  ;;  %8437 = vmatmul.bf16.gmra.mxu0 %v10330_v44  ;;  %v10334_v1 = vor.u32 %v10902_v14, %v10331_v57  ;;  %v10361_v10 = vld [vmem:[%s13922_s9 + $0x60] sm:$0xf]  ;;  %v10433_v44 = vld [vmem:[%s13922_s9 + $0xe8] sm:$0xf]  ;;  %v10929_v14 = vld [vmem:[%s13922_s9 + $0xf4] sm:$0xf0] }
 0xcad   : > { %v10425_v57 = vld [vmem:[%s13922_s9 + $0xe0] sm:$0xf]  ;;  %v10434_v58 = vor.u32 %v10929_v14, %v10433_v44  ;;  %v10481_v44 = vld [vmem:[%s13922_s9 + $0x148] sm:$0xf]  ;;  %v10941_v14 = vld [vmem:[%s13922_s9 + $0x154] sm:$0xf0] }
 0xcae   : > { %v7904_v40 = vpop.f32.mrf.mxu3  ;;  %v7972_v21 = vmax.f32 %v7903_v3, 0.0  ;;  %v10903_v3 = vld [vmem:[%s13922_s9 + $0x2c] sm:$0xf] }
 0xcaf   : > { %v7566_v42 = vpop.f32.mrf.mxu1  ;;  %v7738_v5 = vpop.f32.mrf.mxu2  ;;  %8526 = vmatmul.bf16.gmra.mxu1 %v10334_v1  ;;  %v10928_v1 = vld [vmem:[%s13922_s9 + $0xec] sm:$0xf0] }
 0xcb0   : > { %v7567_v60 = vadd.f32 %v7566_v42, %v7398_v9  ;;  %v7402_v55 = vpop.f32.mrf.mxu0  ;;  %v10369_v9 = vld [vmem:[%s13922_s9 + $0x68] sm:$0xf]  ;;  %v10426_v43 = vor.u32 %v10928_v1, %v10425_v57  ;;  %v10482_v57 = vor.u32 %v10941_v14, %v10481_v44  ;;  %v10505_v44 = vld [vmem:[%s13922_s9 + $0x180] sm:$0xf] }
 0xcb1   : > { %v7403_v47 = vadd.f32 %v7402_v55, %v14061_v31  ;;  %v10907_v55 = vld [vmem:[%s13922_s9 + $0x4c] sm:$0xf] }
 0xcb2   : > { %v7736_v35 = vadd.f32 %v7735_v46, %v7567_v60  ;;  %v10358_v31 = vor.u32 %v10907_v55, %v10355_v6 }
 0xcb4   : > { %v7905_v13 = vadd.f32 %v7904_v40, %v7736_v35  ;;  %v10912_v40 = vld [vmem:[%s13922_s9 + $0x6c] sm:$0xf0]  ;;  %v10339_v35 = vld [vmem:[%s13922_s9 + $0x38] sm:$0xf0] }
 0xcb5   : > { %v10362_v60 = vor.u32 %v10912_v40, %v10361_v10 }
 0xcb6   : > { %v7973_v32 = vmax.f32 %v7905_v13, 0.0  ;;  %v7907_v48 = vpop.f32.mrf.mxu3 }
 0xcb7   : > { %v7569_v22 = vpop.f32.mrf.mxu1  ;;  %v7740_v18 = vpop.f32.mrf.mxu2  ;;  %8620 = vmatmul.bf16.gmra.mxu2 %v10354_v38  ;;  %v10919_v38 = vld [vmem:[%s13922_s9 + $0xac] sm:$0xf] }
 0xcb8   : > { %v8070_v28 = vpack.c.bf16 %v7973_v32, %v7972_v21  ;;  %v7570_v50 = vadd.f32 %v7569_v22, %v7401_v36  ;;  %v10342_v21 = vor.u32 %v10903_v3, %v10339_v35  ;;  %v10385_v32 = vld [vmem:[%s13922_s9 + $0x88] sm:$0xf]  ;;  %v10377_v22 = vld [vmem:[%s13922_s9 + $0x80] sm:$0xf]  ;;  %v10923_v3 = vld [vmem:[%s13922_s9 + $0xcc] sm:$0xf] }
 0xcb9   : > { %v10419_v35 = vld [vmem:[%s13922_s9 + $0xd8] sm:$0xf0] }
 0xcba   : > { %v7739_v24 = vadd.f32 %v7738_v5, %v7570_v50  ;;  %v10917_v5 = vld [vmem:[%s13922_s9 + $0x94] sm:$0xf0]  ;;  %v10379_v50 = vld [vmem:[%s13922_s9 + $0x90] sm:$0xf0] }
 0xcbb   : > { %v10386_v36 = vor.u32 %v10917_v5, %v10385_v32  ;;  %v10422_v5 = vor.u32 %v10923_v3, %v10419_v35 }
 0xcbc   : > { %v7908_v27 = vadd.f32 %v7907_v48, %v7739_v24  ;;  %v10914_v48 = vld [vmem:[%s13922_s9 + $0x84] sm:$0xf]  ;;  %v10921_v24 = vld [vmem:[%s13922_s9 + $0xb4] sm:$0xf0] }
 0xcbd   : > { %v10382_v19 = vor.u32 %v10914_v48, %v10379_v50 }
 0xcbe   : > { %v7909_v53 = vpop.f32.mrf.mxu3  ;;  %v7974_v4 = vmax.f32 %v7908_v27, 0.0 }
 0xcbf   : > { %v7571_v11 = vpop.f32.mrf.mxu1 }
 0xcc0   : > { %v7572_v62 = vadd.f32 %v7571_v11, %v7403_v47  ;;  %v10401_v47 = vld [vmem:[%s13922_s9 + $0xa8] sm:$0xf]  ;;  %v10920_v11 = vld [vmem:[%s13922_s9 + $0xac] sm:$0xf0] }
 0xcc1   : > { %v10402_v56 = vor.u32 %v10921_v24, %v10401_v47  ;;  %v10394_v49 = vor.u32 %v10920_v11, %v10393_v17  ;;  %v10457_v17 = vld [vmem:[%s13922_s9 + $0x120] sm:$0xf]  ;;  %v10936_v11 = vld [vmem:[%s13922_s9 + $0x12c] sm:$0xf0] }
 0xcc2   : > { %v7741_v34 = vadd.f32 %v7740_v18, %v7572_v62  ;;  %v10918_v62 = vld [vmem:[%s13922_s9 + $0xa4] sm:$0xf]  ;;  %v10911_v18 = vld [vmem:[%s13922_s9 + $0x6c] sm:$0xf] }
 0xcc3   : > { %v10398_v33 = vor.u32 %v10918_v62, %v10395_v2  ;;  %v10374_v27 = vor.u32 %v10911_v18, %v10371_v51  ;;  %v10934_v62 = vld [vmem:[%s13922_s9 + $0x124] sm:$0xf]  ;;  %v10459_v2 = vld [vmem:[%s13922_s9 + $0x130] sm:$0xf0]  ;;  %v10927_v18 = vld [vmem:[%s13922_s9 + $0xec] sm:$0xf] }
 0xcc4   : > { %v7910_v39 = vadd.f32 %v7909_v53, %v7741_v34  ;;  %v10417_v34 = vld [vmem:[%s13922_s9 + $0xc8] sm:$0xf]  ;;  %v10409_v53 = vld [vmem:[%s13922_s9 + $0xc0] sm:$0xf]  ;;  %v10435_v51 = vld [vmem:[%s13922_s9 + $0xf8] sm:$0xf0] }
 0xcc6   : > { %v7975_v7 = vmax.f32 %v7910_v39, 0.0  ;;  %v10924_v39 = vld [vmem:[%s13922_s9 + $0xcc] sm:$0xf0] }
 0xcc8   : > { %v8071_v23 = vpack.c.bf16 %v7975_v7, %v7974_v4  ;;  %v10418_v4 = vor.u32 %v10925_v16, %v10417_v34  ;;  %v10410_v7 = vor.u32 %v10924_v39, %v10409_v53  ;;  %v10438_v34 = vor.u32 %v10927_v18, %v10435_v51  ;;  %v8074_v16 = vld [vmem:[%s13923_s10 + $0x10] sm:$0xff]  ;;  %v8079_v51 = vld [vmem:[%s13923_s10 + $0x38] sm:$0xff] }
 0xcca   : > { %8691 = vmatpush.bf16.msra.mxu3 %v8071_v23  ;;  %v10922_v23 = vld [vmem:[%s13922_s9 + $0xc4] sm:$0xf] }
 0xccb   : > { %v10414_v61 = vor.u32 %v10922_v23, %v10411_v15 }
 0xcce   : > { %8692 = vmatpush.bf16.msra.mxu3 %v8070_v28  ;;  %v10378_v28 = vor.u32 %v10916_v26, %v10377_v22  ;;  %v8073_v22 = vld [vmem:[%s13923_s10 + $0x8] sm:$0xff] }
 0xcd2   : > { %8693 = vmatpush.bf16.msra.mxu3 %v8069_v25  ;;  %v10906_v25 = vld [vmem:[%s13922_s9 + $0x44] sm:$0xf] }
 0xcd6   : > { %8694 = vmatpush.bf16.msra.mxu3 %v13215_v8  ;;  %v10346_v8 = vor.u32 %v10908_v0, %v10345_v52  ;;  %v10926_v52 = vld [vmem:[%s13922_s9 + $0xe4] sm:$0xf]  ;;  %v10427_v0 = vld [vmem:[%s13922_s9 + $0xf0] sm:$0xf0] }
 0xcd8   : > { %8442 = vmatmul.bf16.gmra.mxu0 %v10346_v8  ;;  %v10403_v8 = vld [vmem:[%s13922_s9 + $0xb8] sm:$0xf0] }
 0xcda   : > { %8695 = vmatpush.bf16.msra.mxu3 %v13211_v41  ;;  %v10347_v41 = vld [vmem:[%s13922_s9 + $0x50] sm:$0xf0] }
 0xcdb   : > { %v10350_v46 = vor.u32 %v10906_v25, %v10347_v41  ;;  %v10430_v25 = vor.u32 %v10926_v52, %v10427_v0  ;;  %v10406_v41 = vor.u32 %v10919_v38, %v10403_v8  ;;  %v10938_v38 = vld [vmem:[%s13922_s9 + $0x144] sm:$0xf]  ;;  %v10475_v8 = vld [vmem:[%s13922_s9 + $0x150] sm:$0xf0] }
 0xcdd   : > { %8531 = vmatmul.bf16.gmra.mxu1 %v10350_v46  ;;  %v10441_v46 = vld [vmem:[%s13922_s9 + $0x100] sm:$0xf] }
 0xcde   : > { %8696 = vmatpush.bf16.msra.mxu3 %v13207_v12  ;;  %v10323_v12 = vld [vmem:[%s13922_s9 + $0x18] sm:$0xf0] }
 0xcdf   : > { %v10326_v30 = vor.u32 %v10899_v63, %v10323_v12  ;;  %v10449_v63 = vld [vmem:[%s13922_s9 + $0x108] sm:$0xf]  ;;  %v10933_v12 = vld [vmem:[%s13922_s9 + $0x114] sm:$0xf0] }
 0xce2   : > { %8697 = vmatpush.bf16.msra.mxu3 %v13203_v45  ;;  %v10913_v45 = vld [vmem:[%s13922_s9 + $0x74] sm:$0xf0] }
 0xce3   : > { %v10370_v42 = vor.u32 %v10913_v45, %v10369_v9  ;;  %v10450_v9 = vor.u32 %v10933_v12, %v10449_v63  ;;  %v8072_v45 = vld [vmem:[%s13923_s10] sm:$0xff]  ;;  %v10478_v63 = vor.u32 %v10938_v38, %v10475_v8 }
 0xce5   : > { %8625 = vmatmul.bf16.gmra.mxu2 %v10370_v42 }
 0xce6   : > { %8698 = vmatpush.bf16.msra.mxu3 %v13195_v29  ;;  %v10910_v29 = vld [vmem:[%s13922_s9 + $0x64] sm:$0xf] }
 0xce7   : > { %v10366_v13 = vor.u32 %v10910_v29, %v10363_v59  ;;  %v10930_v29 = vld [vmem:[%s13922_s9 + $0x104] sm:$0xf]  ;;  %v10443_v59 = vld [vmem:[%s13922_s9 + $0x110] sm:$0xf0] }
 0xce8   : > { %8447 = vmatmul.bf16.gmra.mxu0 %v10362_v60 }
 0xce9   : > { %8699 = vmatmul.bf16.vlgmr.msra.gmra.mxu3 %v10326_v30  ;;  %v10932_v30 = vld [vmem:[%s13922_s9 + $0x10c] sm:$0xf0] }
 0xcea   : > { %v10442_v10 = vor.u32 %v10932_v30, %v10441_v46  ;;  %v8076_v30 = vld [vmem:[%s13923_s10 + $0x20] sm:$0xff] }
 0xced   : > { %8536 = vmatmul.bf16.gmra.mxu1 %v10366_v13 }
 0xcf5   : > { %8630 = vmatmul.bf16.gmra.mxu2 %v10386_v36 }
 0xcf8   : > { %8452 = vmatmul.bf16.gmra.mxu0 %v10378_v28 }
 0xcf9   : > { %8704 = vmatmul.bf16.gmra.mxu3 %v10342_v21  ;;  %v10446_v21 = vor.u32 %v10930_v29, %v10443_v59 }
 0xcfd   : > { %8541 = vmatmul.bf16.gmra.mxu1 %v10382_v19  ;;  %v10465_v19 = vld [vmem:[%s13922_s9 + $0x128] sm:$0xf] }
 0xd05   : > { %8635 = vmatmul.bf16.gmra.mxu2 %v10402_v56  ;;  %v10458_v56 = vor.u32 %v10936_v11, %v10457_v17 }
 0xd08   : > { %8457 = vmatmul.bf16.gmra.mxu0 %v10394_v49 }
 0xd09   : > { %8709 = vmatmul.bf16.gmra.mxu3 %v10358_v31  ;;  %v10937_v31 = vld [vmem:[%s13922_s9 + $0x134] sm:$0xf0] }
 0xd0a   : > { %v10466_v47 = vor.u32 %v10937_v31, %v10465_v19  ;;  %v10491_v19 = vld [vmem:[%s13922_s9 + $0x170] sm:$0xf0]  ;;  %v10935_v31 = vld [vmem:[%s13922_s9 + $0x12c] sm:$0xf] }
 0xd0d   : > { %8546 = vmatmul.bf16.gmra.mxu1 %v10398_v33  ;;  %v10462_v33 = vor.u32 %v10934_v62, %v10459_v2  ;;  %v8078_v62 = vld [vmem:[%s13923_s10 + $0x30] sm:$0xff] }
 0xd15   : > { %8640 = vmatmul.bf16.gmra.mxu2 %v10418_v4  ;;  %v8433_v40 = vpop.f32.mrf.mxu0  ;;  %v8611_v32 = vpop.f32.mrf.mxu2  ;;  %v8075_v4 = vld [vmem:[%s13923_s10 + $0x18] sm:$0xff] }
 0xd16   : > { %v8434_v42 = vadd.f32 %v8433_v40, %v8072_v45 }
 0xd18   : > { %8462 = vmatmul.bf16.gmra.mxu0 %v10410_v7 }
 0xd19   : > { %8714 = vmatmul.bf16.gmra.mxu3 %v10374_v27 }
 0xd1c   : > { %v8522_v60 = vpop.f32.mrf.mxu1 }
 0xd1d   : > { %8551 = vmatmul.bf16.gmra.mxu1 %v10414_v61  ;;  %v8523_v13 = vadd.f32 %v8522_v60, %v8434_v42  ;;  %v8435_v26 = vpop.f32.mrf.mxu0  ;;  %v8613_v55 = vpop.f32.mrf.mxu2 }
 0xd1e   : > { %v8436_v36 = vadd.f32 %v8435_v26, %v8073_v22 }
 0xd1f   : > { %v13437_v28 = vadd.f32 %v8611_v32, %v8523_v13  ;;  %v10497_v32 = vld [vmem:[%s13922_s9 + $0x168] sm:$0xf] }
 0xd24   : > { %v8524_v48 = vpop.f32.mrf.mxu1 }
 0xd25   : > { %8645 = vmatmul.bf16.gmra.mxu2 %v10434_v58  ;;  %v8525_v50 = vadd.f32 %v8524_v48, %v8436_v36  ;;  %v10473_v58 = vld [vmem:[%s13922_s9 + $0x140] sm:$0xf] }
 0xd26   : > { %v10489_v36 = vld [vmem:[%s13922_s9 + $0x160] sm:$0xf] }
 0xd27   : > { %v13439_v6 = vadd.f32 %v8613_v55, %v8525_v50  ;;  %v10942_v55 = vld [vmem:[%s13922_s9 + $0x164] sm:$0xf] }
 0xd28   : > { %8467 = vmatmul.bf16.gmra.mxu0 %v10426_v43  ;;  %v10940_v43 = vld [vmem:[%s13922_s9 + $0x14c] sm:$0xf0] }
 0xd29   : > { %8719 = vmatmul.bf16.gmra.mxu3 %v10390_v20  ;;  %v8438_v24 = vpop.f32.mrf.mxu0  ;;  %v10474_v52 = vor.u32 %v10940_v43, %v10473_v58  ;;  %v10507_v58 = vld [vmem:[%s13922_s9 + $0x190] sm:$0xf0]  ;;  %v10939_v43 = vld [vmem:[%s13922_s9 + $0x14c] sm:$0xf] }
 0xd2a   : > { %v8616_v27 = vpop.f32.mrf.mxu2  ;;  %v8439_v39 = vadd.f32 %v8438_v24, %v8074_v16  ;;  %v10494_v24 = vor.u32 %v10942_v55, %v10491_v19 }
 0xd2c   : > { %v8527_v49 = vpop.f32.mrf.mxu1 }
 0xd2d   : > { %8556 = vmatmul.bf16.gmra.mxu1 %v10430_v25  ;;  %v8528_v15 = vadd.f32 %v8527_v49, %v8439_v39  ;;  %v10931_v25 = vld [vmem:[%s13922_s9 + $0x10c] sm:$0xf] }
 0xd2f   : > { %v13471_v61 = vadd.f32 %v8616_v27, %v8528_v15  ;;  %v10949_v15 = vld [vmem:[%s13922_s9 + $0x194] sm:$0xf0] }
 0xd31   : > { %v8440_v53 = vpop.f32.mrf.mxu0 }
 0xd32   : > { %v8441_v7 = vadd.f32 %v8440_v53, %v8075_v4  ;;  %v8618_v54 = vpop.f32.mrf.mxu2 }
 0xd34   : > { %v8529_v23 = vpop.f32.mrf.mxu1 }
 0xd35   : > { %8650 = vmatmul.bf16.gmra.mxu2 %v10450_v9  ;;  %v8530_v37 = vadd.f32 %v8529_v23, %v8441_v7  ;;  %v10513_v23 = vld [vmem:[%s13922_s9 + $0x188] sm:$0xf] }
 0xd37   : > { %v13473_v20 = vadd.f32 %v8618_v54, %v8530_v37  ;;  %v10514_v37 = vor.u32 %v10949_v15, %v10513_v23 }
 0xd38   : > { %8472 = vmatmul.bf16.gmra.mxu0 %v10442_v10  ;;  %v8077_v10 = vld [vmem:[%s13923_s10 + $0x28] sm:$0xff] }
 0xd39   : > { %8724 = vmatmul.bf16.gmra.mxu3 %v10406_v41  ;;  %v10451_v41 = vld [vmem:[%s13922_s9 + $0x118] sm:$0xf0] }
 0xd3a   : > { %v8621_v12 = vpop.f32.mrf.mxu2  ;;  %v10454_v46 = vor.u32 %v10931_v25, %v10451_v41 }
 0xd3d   : > { %8561 = vmatmul.bf16.gmra.mxu1 %v10446_v21 }
 0xd42   : > { %v8623_v59 = vpop.f32.mrf.mxu2 }
 0xd45   : > { %8655 = vmatmul.bf16.gmra.mxu2 %v10466_v47  ;;  %v10467_v47 = vld [vmem:[%s13922_s9 + $0x138] sm:$0xf0] }
 0xd46   : > { %v10470_v49 = vor.u32 %v10935_v31, %v10467_v47 }
 0xd48   : > { %8477 = vmatmul.bf16.gmra.mxu0 %v10458_v56 }
 0xd49   : > { %8729 = vmatmul.bf16.gmra.mxu3 %v10422_v5  ;;  %v10945_v5 = vld [vmem:[%s13922_s9 + $0x174] sm:$0xf0] }
 0xd4a   : > { %v10498_v22 = vor.u32 %v10945_v5, %v10497_v32  ;;  %v10943_v32 = vld [vmem:[%s13922_s9 + $0x16c] sm:$0xf]  ;;  %v10499_v5 = vld [vmem:[%s13922_s9 + $0x178] sm:$0xf0] }
 0xd4d   : > { %8566 = vmatmul.bf16.gmra.mxu1 %v10462_v33 }
 0xd55   : > { %v8443_v1 = vpop.f32.mrf.mxu0  ;;  %8660 = vmatmul.bf16.gmra.mxu2 %v10482_v57 }
 0xd56   : > { %v8444_v45 = vadd.f32 %v8443_v1, %v8076_v30  ;;  %v10946_v1 = vld [vmem:[%s13922_s9 + $0x184] sm:$0xf] }
 0xd58   : > { %8482 = vmatmul.bf16.gmra.mxu0 %v10474_v52  ;;  %v10483_v52 = vld [vmem:[%s13922_s9 + $0x158] sm:$0xf0] }
 0xd59   : > { %8734 = vmatmul.bf16.gmra.mxu3 %v10438_v34  ;;  %v10486_v41 = vor.u32 %v10939_v43, %v10483_v52  ;;  %v10553_v43 = vld [vmem:[%s13922_s9 + $0x1e0] sm:$0xf]  ;;  %v10960_v52 = vld [vmem:[%s13922_s9 + $0x1ec] sm:$0xf0] }
 0xd5a   : > { %v8532_v0 = vpop.f32.mrf.mxu1 }
 0xd5b   : > { %v8533_v60 = vadd.f32 %v8532_v0, %v8444_v45  ;;  %v10510_v0 = vor.u32 %v10946_v1, %v10507_v58  ;;  %v10529_v45 = vld [vmem:[%s13922_s9 + $0x1a8] sm:$0xf]  ;;  %v10961_v1 = vld [vmem:[%s13922_s9 + $0x1f4] sm:$0xf0] }
 0xd5d   : > { %8571 = vmatmul.bf16.gmra.mxu1 %v10478_v63  ;;  %v8445_v9 = vpop.f32.mrf.mxu0  ;;  %v8622_v35 = vadd.f32 %v8621_v12, %v8533_v60  ;;  %v10952_v60 = vld [vmem:[%s13922_s9 + $0x1ac] sm:$0xf0] }
 0xd5e   : > { %v8446_v40 = vadd.f32 %v8445_v9, %v8077_v10 }
 0xd62   : > { %v8534_v42 = vpop.f32.mrf.mxu1 }
 0xd63   : > { %v8535_v29 = vadd.f32 %v8534_v42, %v8446_v40  ;;  %v10521_v42 = vld [vmem:[%s13922_s9 + $0x1a0] sm:$0xf] }
 0xd65   : > { %v13508_v21 = vadd.f32 %v8623_v59, %v8535_v29  ;;  %v8448_v26 = vpop.f32.mrf.mxu0  ;;  %8665 = vmatmul.bf16.gmra.mxu2 %v10498_v22  ;;  %v10522_v29 = vor.u32 %v10952_v60, %v10521_v42 }
 0xd66   : > { %v8449_v18 = vadd.f32 %v8448_v26, %v8078_v62  ;;  %v10956_v62 = vld [vmem:[%s13922_s9 + $0x1cc] sm:$0xf0] }
 0xd68   : > { %v8626_v17 = vpop.f32.mrf.mxu2 }
 0xd69   : > { %8739 = vmatmul.bf16.gmra.mxu3 %v10454_v46 }
 0xd6a   : > { %v8537_v50 = vpop.f32.mrf.mxu1 }
 0xd6b   : > { %v8538_v34 = vadd.f32 %v8537_v50, %v8449_v18 }
 0xd6c   : > { %v8700_v3 = vpop.f32.mrf.mxu3 }
 0xd6d   : > { %v13506_v13 = vadd.f32 %v8700_v3, %v13437_v28  ;;  %v10944_v28 = vld [vmem:[%s13922_s9 + $0x16c] sm:$0xf0]  ;;  %8576 = vmatmul.bf16.gmra.mxu1 %v10494_v24  ;;  %v8450_v2 = vpop.f32.mrf.mxu0  ;;  %v10950_v3 = vld [vmem:[%s13922_s9 + $0x1a4] sm:$0xf]  ;;  %v10545_v24 = vld [vmem:[%s13922_s9 + $0x1c8] sm:$0xf] }
 0xd6e   : > { %v10490_v48 = vor.u32 %v10944_v28, %v10489_v36  ;;  %v8451_v33 = vadd.f32 %v8450_v2, %v8079_v51  ;;  %v10954_v51 = vld [vmem:[%s13922_s9 + $0x1c4] sm:$0xf] }
 0xd70   : > { %8487 = vmatmul.bf16.gmra.mxu0 %v10490_v48  ;;  %v8628_v53 = vpop.f32.mrf.mxu2  ;;  %v10502_v48 = vor.u32 %v10943_v32, %v10499_v5 }
 0xd72   : > { %v8539_v27 = vpop.f32.mrf.mxu1 }
 0xd73   : > { %v8540_v16 = vadd.f32 %v8539_v27, %v8451_v33  ;;  %v10539_v33 = vld [vmem:[%s13922_s9 + $0x1d0] sm:$0xf0]  ;;  %v10947_v27 = vld [vmem:[%s13922_s9 + $0x18c] sm:$0xf] }
 0xd74   : > { %v8702_v11 = vpop.f32.mrf.mxu3 }
 0xd75   : > { %v13535_v56 = vadd.f32 %v8702_v11, %v13439_v6  ;;  %v8627_v6 = vadd.f32 %v8626_v17, %v8538_v34  ;;  %v13546_v7 = vadd.f32 %v8628_v53, %v8540_v16  ;;  %v13554_v54 = vpop.f32.mrf.mxu0  ;;  %8670 = vmatmul.bf16.gmra.mxu2 %v10514_v37  ;;  %v10515_v34 = vld [vmem:[%s13922_s9 + $0x198] sm:$0xf0]  ;;  %v10542_v16 = vor.u32 %v10954_v51, %v10539_v33 }
 0xd76   : > { %v10518_v23 = vor.u32 %v10947_v27, %v10515_v34 }
 0xd78   : > { %v13576_v38 = vpop.f32.mrf.mxu2 }
 0xd79   : > { %8744 = vmatmul.bf16.gmra.mxu3 %v10470_v49  ;;  %v10537_v49 = vld [vmem:[%s13922_s9 + $0x1c0] sm:$0xf] }
 0xd7a   : > { %v13562_v57 = vpop.f32.mrf.mxu1  ;;  %v10538_v2 = vor.u32 %v10956_v62, %v10537_v49  ;;  %v8088_v49 = vld [vmem:[%s13923_s10 + $0x80] sm:$0xff]  ;;  %v8089_v62 = vld [vmem:[%s13923_s10 + $0x88] sm:$0xff] }
 0xd7c   : > { %v8705_v39 = vpop.f32.mrf.mxu3 }
 0xd7d   : > { %v13544_v4 = vadd.f32 %v8705_v39, %v13471_v61  ;;  %v10948_v61 = vld [vmem:[%s13922_s9 + $0x18c] sm:$0xf0]  ;;  %8581 = vmatmul.bf16.gmra.mxu1 %v10510_v0  ;;  %v13581_v63 = vpop.f32.mrf.mxu0  ;;  %v10554_v0 = vor.u32 %v10960_v52, %v10553_v43  ;;  %v10959_v52 = vld [vmem:[%s13922_s9 + $0x1ec] sm:$0xf] }
 0xd7e   : > { %v10506_v14 = vor.u32 %v10948_v61, %v10505_v44 }
 0xd80   : > { %8492 = vmatmul.bf16.gmra.mxu0 %v10506_v14  ;;  %v13585_v46 = vpop.f32.mrf.mxu2  ;;  %v10561_v14 = vld [vmem:[%s13922_s9 + $0x1e8] sm:$0xf] }
 0xd82   : > { %v13583_v12 = vpop.f32.mrf.mxu1 }
 0xd84   : > { %v8707_v8 = vpop.f32.mrf.mxu3 }
 0xd85   : > { %v13579_v25 = vadd.f32 %v8707_v8, %v13473_v20  ;;  %v10953_v20 = vld [vmem:[%s13922_s9 + $0x1b4] sm:$0xf0]  ;;  %v13595_v40 = vpop.f32.mrf.mxu0 }
 0xd86   : > { %v10530_v10 = vor.u32 %v10953_v20, %v10529_v45  ;;  %v10951_v45 = vld [vmem:[%s13922_s9 + $0x1ac] sm:$0xf]  ;;  %v10531_v20 = vld [vmem:[%s13922_s9 + $0x1b8] sm:$0xf0] }
 0xd88   : > { %8675 = vmatmul.bf16.gmra.mxu2 %v10530_v10  ;;  %v13617_v26 = vpop.f32.mrf.mxu2 }
 0xd89   : > { %8749 = vmatmul.bf16.gmra.mxu3 %v10486_v41  ;;  %v10958_v41 = vld [vmem:[%s13922_s9 + $0x1e4] sm:$0xf] }
 0xd8a   : > { %v13603_v59 = vpop.f32.mrf.mxu1 }
 0xd8c   : > { %v8710_v30 = vpop.f32.mrf.mxu3 }
 0xd8d   : > { %v13587_v9 = vadd.f32 %v8710_v30, %v8622_v35  ;;  %v10523_v35 = vld [vmem:[%s13922_s9 + $0x1b0] sm:$0xf0]  ;;  %v13622_v50 = vpop.f32.mrf.mxu0 }
 0xd8e   : > { %v10526_v22 = vor.u32 %v10950_v3, %v10523_v35  ;;  %v10555_v30 = vld [vmem:[%s13922_s9 + $0x1f0] sm:$0xf0] }
 0xd8f   : > { %v10558_v10 = vor.u32 %v10958_v41, %v10555_v30 }
 0xd90   : > { %8497 = vmatmul.bf16.gmra.mxu0 %v10522_v29  ;;  %8586 = vmatmul.bf16.gmra.mxu1 %v10526_v22  ;;  %v13626_v19 = vpop.f32.mrf.mxu2  ;;  %v10534_v29 = vor.u32 %v10951_v45, %v10531_v20  ;;  %v8086_v20 = vld [vmem:[%s13923_s10 + $0x70] sm:$0xff] }
 0xd92   : > { %v13624_v55 = vpop.f32.mrf.mxu1 }
 0xd94   : > { %v8712_v36 = vpop.f32.mrf.mxu3 }
 0xd95   : > { %v13620_v28 = vadd.f32 %v8712_v36, %v13508_v21  ;;  %v10957_v21 = vld [vmem:[%s13922_s9 + $0x1d4] sm:$0xf0]  ;;  %v13636_v11 = vpop.f32.mrf.mxu0 }
 0xd96   : > { %v10546_v17 = vor.u32 %v10957_v21, %v10545_v24 }
 0xd98   : > { %8680 = vmatmul.bf16.gmra.mxu2 %v10546_v17  ;;  %v13658_v53 = vpop.f32.mrf.mxu2 }
 0xd99   : > { %8754 = vmatmul.bf16.gmra.mxu3 %v10502_v48  ;;  %v10955_v48 = vld [vmem:[%s13922_s9 + $0x1cc] sm:$0xf] }
 0xd9a   : > { %v13644_v18 = vpop.f32.mrf.mxu1 }
 0xd9c   : > { %v8715_v31 = vpop.f32.mrf.mxu3 }
 0xd9d   : > { %v13628_v47 = vadd.f32 %v8715_v31, %v8627_v6  ;;  %v13663_v15 = vpop.f32.mrf.mxu0  ;;  %v10547_v31 = vld [vmem:[%s13922_s9 + $0x1d8] sm:$0xf0] }
 0xd9e   : > { %v10550_v17 = vor.u32 %v10955_v48, %v10547_v31 }
 0xda0   : > { %8502 = vmatmul.bf16.gmra.mxu0 %v10538_v2  ;;  %8591 = vmatmul.bf16.gmra.mxu1 %v10542_v16  ;;  %v13667_v44 = vpop.f32.mrf.mxu2 }
 0xda2   : > { %v13665_v37 = vpop.f32.mrf.mxu1 }
 0xda4   : > { %v8717_v39 = vpop.f32.mrf.mxu3 }
 0xda5   : > { %v13661_v6 = vadd.f32 %v8717_v39, %v13546_v7  ;;  %v10562_v7 = vor.u32 %v10961_v1, %v10561_v14  ;;  %v8468_v58 = vpop.f32.mrf.mxu0 }
 0xda8   : > { %8685 = vmatmul.bf16.gmra.mxu2 %v10562_v7  ;;  %v13697_v42 = vpop.f32.mrf.mxu2 }
 0xda9   : > { %8759 = vmatmul.bf16.gmra.mxu3 %v10518_v23 }
 0xdaa   : > { %v13683_v8 = vpop.f32.mrf.mxu1 }
 0xdac   : > { %v13669_v61 = vpop.f32.mrf.mxu3 }
 0xdad   : > { %v8470_v3 = vpop.f32.mrf.mxu0 }
 0xdb0   : > { %8507 = vmatmul.bf16.gmra.mxu0 %v10554_v0  ;;  %8596 = vmatmul.bf16.gmra.mxu1 %v10558_v10  ;;  %v13701_v32 = vpop.f32.mrf.mxu2  ;;  %v10563_v0 = vld [vmem:[%s13922_s9 + $0x1f8] sm:$0xf0]  ;;  %v8090_v10 = vld [vmem:[%s13923_s10 + $0x90] sm:$0xff] }
 0xdb1   : > { %v10566_v45 = vor.u32 %v10959_v52, %v10563_v0 }
 0xdb2   : > { %v8559_v35 = vpop.f32.mrf.mxu1 }
 0xdb4   : > { %v13699_v60 = vpop.f32.mrf.mxu3 }
 0xdb5   : > { %v8473_v22 = vpop.f32.mrf.mxu0 }
 0xdb6   : > { %v8474_v51 = vadd.f32 %v8473_v22, %v8088_v49  ;;  %v8084_v49 = vld [vmem:[%s13923_s10 + $0x60] sm:$0xff] }
 0xdb7   : > { %v8464_v52 = vadd.f32 %v13636_v11, %v8084_v49 }
 0xdb8   : > { %v8651_v24 = vpop.f32.mrf.mxu2 }
 0xdb9   : > { %8764 = vmatmul.bf16.gmra.mxu3 %v10534_v29  ;;  %v8091_v29 = vld [vmem:[%s13923_s10 + $0x98] sm:$0xff]  ;;  %v8553_v11 = vadd.f32 %v13644_v18, %v8464_v52 }
 0xdba   : > { %v8562_v36 = vpop.f32.mrf.mxu1 }
 0xdbb   : > { %v8563_v34 = vadd.f32 %v8562_v36, %v8474_v51  ;;  %v8087_v36 = vld [vmem:[%s13923_s10 + $0x78] sm:$0xff] }
 0xdbc   : > { %v13703_v5 = vpop.f32.mrf.mxu3 }
 0xdbd   : > { %v8475_v2 = vpop.f32.mrf.mxu0  ;;  %v13721_v14 = vadd.f32 %v8651_v24, %v8563_v34  ;;  %v8469_v24 = vadd.f32 %v8468_v58, %v8086_v20  ;;  %v8082_v58 = vld [vmem:[%s13923_s10 + $0x50] sm:$0xff] }
 0xdbe   : > { %v8476_v33 = vadd.f32 %v8475_v2, %v8089_v62  ;;  %v8085_v62 = vld [vmem:[%s13923_s10 + $0x68] sm:$0xff] }
 0xdc0   : > { %v8653_v39 = vpop.f32.mrf.mxu2 }
 0xdc2   : > { %v8564_v27 = vpop.f32.mrf.mxu1 }
 0xdc3   : > { %v8565_v16 = vadd.f32 %v8564_v27, %v8476_v33  ;;  %v8471_v33 = vadd.f32 %v8470_v3, %v8087_v36  ;;  %v8558_v3 = vadd.f32 %v13683_v8, %v8469_v24 }
 0xdc4   : > { %v13711_v21 = vpop.f32.mrf.mxu3 }
 0xdc5   : > { %v13723_v1 = vadd.f32 %v8653_v39, %v8565_v16  ;;  %v8478_v7 = vpop.f32.mrf.mxu0  ;;  %v8560_v0 = vadd.f32 %v8559_v35, %v8471_v33  ;;  %v8647_v8 = vadd.f32 %v13697_v42, %v8558_v3 }
 0xdc6   : > { %v8479_v48 = vadd.f32 %v8478_v7, %v8090_v10  ;;  %v8083_v7 = vld [vmem:[%s13923_s10 + $0x58] sm:$0xff]  ;;  %v8080_v10 = vld [vmem:[%s13923_s10 + $0x40] sm:$0xff] }
 0xdc7   : > { %v8461_v20 = vadd.f32 %v13622_v50, %v8083_v7  ;;  %v8454_v50 = vadd.f32 %v13554_v54, %v8080_v10  ;;  %v8093_v54 = vld [vmem:[%s13923_s10 + $0xa8] sm:$0xff] }
 0xdc8   : > { %v8656_v41 = vpop.f32.mrf.mxu2 }
 0xdc9   : > { %8769 = vmatmul.bf16.gmra.mxu3 %v10550_v17 }
 0xdca   : > { %v8567_v43 = vpop.f32.mrf.mxu1 }
 0xdcb   : > { %v8568_v2 = vadd.f32 %v8567_v43, %v8479_v48  ;;  %v8466_v43 = vadd.f32 %v13663_v15, %v8085_v62 }
 0xdcc   : > { %v13719_v23 = vpop.f32.mrf.mxu3 }
 0xdcd   : > { %v8480_v22 = vpop.f32.mrf.mxu0  ;;  %v13749_v16 = vadd.f32 %v8656_v41, %v8568_v2  ;;  %v8459_v41 = vadd.f32 %v13595_v40, %v8082_v58  ;;  %v8555_v15 = vadd.f32 %v13665_v37, %v8466_v43 }
 0xdce   : > { %v8481_v31 = vadd.f32 %v8480_v22, %v8091_v29  ;;  %v8081_v29 = vld [vmem:[%s13923_s10 + $0x48] sm:$0xff]  ;;  %v8649_v22 = vadd.f32 %v13701_v32, %v8560_v0  ;;  %v8092_v32 = vld [vmem:[%s13923_s10 + $0xa0] sm:$0xff] }
 0xdcf   : > { %v8456_v36 = vadd.f32 %v13581_v63, %v8081_v29  ;;  %v8548_v48 = vadd.f32 %v13603_v59, %v8459_v41  ;;  %v8644_v18 = vadd.f32 %v13667_v44, %v8555_v15  ;;  %v8543_v59 = vadd.f32 %v13562_v57, %v8454_v50 }
 0xdd0   : > { %v8658_v27 = vpop.f32.mrf.mxu2 }
 0xdd1   : > { %v8637_v44 = vadd.f32 %v13617_v26, %v8548_v48  ;;  %v8785_v48 = vmax.f32 %v13620_v28, 0.0  ;;  %v8781_v28 = vmax.f32 %v13535_v56, 0.0 }
 0xdd2   : > { %v8569_v17 = vpop.f32.mrf.mxu1 }
 0xdd3   : > { %v8570_v51 = vadd.f32 %v8569_v17, %v8481_v31  ;;  %v8550_v31 = vadd.f32 %v13624_v55, %v8461_v20  ;;  %v8642_v17 = vadd.f32 %v13658_v53, %v8553_v11  ;;  %v8545_v55 = vadd.f32 %v13583_v12, %v8456_v36 }
 0xdd4   : > { %v8732_v30 = vpop.f32.mrf.mxu3  ;;  %v8632_v12 = vadd.f32 %v13576_v38, %v8543_v59  ;;  %v8726_v3 = vadd.f32 %v13703_v5, %v8637_v44 }
 0xdd5   : > { %v13751_v39 = vadd.f32 %v8658_v27, %v8570_v51  ;;  %v8733_v42 = vadd.f32 %v8732_v30, %v8644_v18  ;;  %v8639_v30 = vadd.f32 %v13626_v19, %v8550_v31  ;;  %v8731_v51 = vadd.f32 %v13719_v23, %v8642_v17 }
 0xdd6   : > { %v8634_v23 = vadd.f32 %v13585_v46, %v8545_v55  ;;  %v8721_v20 = vadd.f32 %v13669_v61, %v8632_v12  ;;  %v8790_v10 = vmax.f32 %v8726_v3, 0.0  ;;  %v8094_v61 = vld [vmem:[%s13923_s10 + $0xb0] sm:$0xff] }
 0xdd7   : > { %v8728_v7 = vadd.f32 %v13711_v21, %v8639_v30  ;;  %v8793_v52 = vmax.f32 %v8733_v42, 0.0  ;;  %v8792_v0 = vmax.f32 %v8731_v51, 0.0  ;;  %v8782_v42 = vmax.f32 %v13544_v4, 0.0  ;;  %v8096_v4 = vld [vmem:[%s13923_s10 + $0xc0] sm:$0xff] }
 0xdd8   : > { %v8661_v40 = vpop.f32.mrf.mxu2  ;;  %v8723_v21 = vadd.f32 %v13699_v60, %v8634_v23  ;;  %v8788_v11 = vmax.f32 %v8721_v20, 0.0  ;;  %v8787_v60 = vmax.f32 %v13661_v6, 0.0 }
 0xdd9   : > { %8774 = vmatmul.bf16.gmra.mxu3 %v10566_v45  ;;  %v8483_v45 = vpop.f32.mrf.mxu0  ;;  %v8791_v41 = vmax.f32 %v8728_v7, 0.0 }
 0xdda   : > { %v8572_v35 = vpop.f32.mrf.mxu1  ;;  %v8484_v53 = vadd.f32 %v8483_v45, %v8092_v32  ;;  %v8789_v29 = vmax.f32 %v8723_v21, 0.0 }
 0xddc   : > { %v8735_v34 = vpop.f32.mrf.mxu3 }
 0xddd   : > { %v8736_v37 = vadd.f32 %v8735_v34, %v8647_v8  ;;  %v8573_v34 = vadd.f32 %v8572_v35, %v8484_v53  ;;  %v8095_v8 = vld [vmem:[%s13923_s10 + $0xb8] sm:$0xff] }
 0xddf   : > { %v8794_v33 = vmax.f32 %v8736_v37, 0.0  ;;  %v13793_v26 = vadd.f32 %v8661_v40, %v8573_v34  ;;  %v8784_v37 = vmax.f32 %v13587_v9, 0.0  ;;  %v8780_v9 = vmax.f32 %v13506_v13, 0.0 }
 0xde0   : > { %v8663_v57 = vpop.f32.mrf.mxu2 }
 0xde1   : > { %v8485_v63 = vpop.f32.mrf.mxu0 }
 0xde2   : > { %v8486_v2 = vadd.f32 %v8485_v63, %v8093_v54  ;;  %v8574_v27 = vpop.f32.mrf.mxu1 }
 0xde4   : > { %v8737_v24 = vpop.f32.mrf.mxu3  ;;  %v8575_v58 = vadd.f32 %v8574_v27, %v8486_v2 }
 0xde5   : > { %v8738_v49 = vadd.f32 %v8737_v24, %v8649_v22 }
 0xde6   : > { %v13795_v19 = vadd.f32 %v8663_v57, %v8575_v58 }
 0xde7   : > { %v8795_v62 = vmax.f32 %v8738_v49, 0.0 }
 0xde8   : > { %v8666_v5 = vpop.f32.mrf.mxu2 }
 0xde9   : > { %8818 = vmatpush.msrb.mxu0 %v8795_v62  ;;  %10962 = vmatpush.msrb.mxu2 %v8795_v62 }
 0xdea   : > { %v8577_v46 = vpop.f32.mrf.mxu1 }
 0xdeb   : > { %8819 = vmatpush.msrb.mxu0 %v8794_v33  ;;  %10963 = vmatpush.msrb.mxu2 %v8794_v33 }
 0xdec   : > { %v8740_v43 = vpop.f32.mrf.mxu3 }
 0xded   : > { %v13800_v45 = vadd.f32 %v8740_v43, %v13721_v14  ;;  %8820 = vmatpush.msrb.mxu0 %v8793_v52  ;;  %10964 = vmatpush.msrb.mxu2 %v8793_v52  ;;  %v8488_v38 = vpop.f32.mrf.mxu0 }
 0xdee   : > { %v8489_v22 = vadd.f32 %v8488_v38, %v8094_v61 }
 0xdef   : > { %8821 = vmatpush.msrb.mxu0 %v8792_v0  ;;  %10965 = vmatpush.msrb.mxu2 %v8792_v0 }
 0xdf0   : > { %v8578_v36 = vadd.f32 %v8577_v46, %v8489_v22  ;;  %v8668_v31 = vpop.f32.mrf.mxu2 }
 0xdf1   : > { %8822 = vmatpush.msrb.mxu0 %v8791_v41  ;;  %10966 = vmatpush.msrb.mxu2 %v8791_v41 }
 0xdf2   : > { %v8579_v50 = vpop.f32.mrf.mxu1  ;;  %v8667_v17 = vadd.f32 %v8666_v5, %v8578_v36 }
 0xdf3   : > { %8823 = vmatpush.msrb.mxu0 %v8790_v10  ;;  %10967 = vmatpush.msrb.mxu2 %v8790_v10 }
 0xdf4   : > { %v8742_v14 = vpop.f32.mrf.mxu3 }
 0xdf5   : > { %v13805_v15 = vadd.f32 %v8742_v14, %v13723_v1  ;;  %8824 = vmatpush.msrb.mxu0 %v8789_v29  ;;  %10968 = vmatpush.msrb.mxu2 %v8789_v29  ;;  %v8490_v35 = vpop.f32.mrf.mxu0  ;;  %v8786_v1 = vmax.f32 %v13628_v47, 0.0  ;;  %v8783_v47 = vmax.f32 %v13579_v25, 0.0 }
 0xdf6   : > { %v8491_v40 = vadd.f32 %v8490_v35, %v8095_v8  ;;  %v8103_v8 = vld [vmem:[%s13923_s10 + $0xf8] sm:$0xff] }
 0xdf7   : > { %8825 = vmatpush.msrb.mxu0 %v8788_v11  ;;  %10969 = vmatpush.msrb.mxu2 %v8788_v11 }
 0xdf8   : > { %v8580_v6 = vadd.f32 %v8579_v50, %v8491_v40  ;;  %v8671_v63 = vpop.f32.mrf.mxu2  ;;  %v8100_v40 = vld [vmem:[%s13923_s10 + $0xe0] sm:$0xff] }
 0xdf9   : > { %8826 = vmatpush.msrb.mxu0 %v8787_v60  ;;  %10970 = vmatpush.msrb.mxu2 %v8787_v60  ;;  %v8102_v60 = vld [vmem:[%s13923_s10 + $0xf0] sm:$0xff] }
 0xdfa   : > { %v8669_v18 = vadd.f32 %v8668_v31, %v8580_v6  ;;  %v8582_v54 = vpop.f32.mrf.mxu1  ;;  %v8099_v31 = vld [vmem:[%s13923_s10 + $0xd8] sm:$0xff] }
 0xdfb   : > { %8827 = vmatpush.msrb.mxu0 %v8786_v1  ;;  %10971 = vmatpush.msrb.mxu2 %v8786_v1  ;;  %v8101_v1 = vld [vmem:[%s13923_s10 + $0xe8] sm:$0xff] }
 0xdfc   : > { %v8745_v24 = vpop.f32.mrf.mxu3 }
 0xdfd   : > { %v13818_v49 = vadd.f32 %v8745_v24, %v13749_v16  ;;  %8828 = vmatpush.msrb.mxu0 %v8785_v48  ;;  %10972 = vmatpush.msrb.mxu2 %v8785_v48  ;;  %v8493_v25 = vpop.f32.mrf.mxu0  ;;  %v8098_v48 = vld [vmem:[%s13923_s10 + $0xd0] sm:$0xff] }
 0xdfe   : > { %v8494_v32 = vadd.f32 %v8493_v25, %v8096_v4 }
 0xdff   : > { %8829 = vmatpush.msrb.mxu0 %v8784_v37  ;;  %10973 = vmatpush.msrb.mxu2 %v8784_v37 }
 0xe00   : > { %v8583_v56 = vadd.f32 %v8582_v54, %v8494_v32  ;;  %v13838_v27 = vpop.f32.mrf.mxu2 }
 0xe01   : > { %8830 = vmatpush.msrb.mxu0 %v8783_v47  ;;  %10974 = vmatpush.msrb.mxu2 %v8783_v47 }
 0xe02   : > { %v8672_v55 = vadd.f32 %v8671_v63, %v8583_v56  ;;  %v8584_v51 = vpop.f32.mrf.mxu1 }
 0xe03   : > { %8831 = vmatpush.msrb.mxu0 %v8782_v42  ;;  %10975 = vmatpush.msrb.mxu2 %v8782_v42 }
 0xe04   : > { %v8747_v62 = vpop.f32.mrf.mxu3 }
 0xe05   : > { %v13825_v16 = vadd.f32 %v8747_v62, %v13751_v39  ;;  %8832 = vmatpush.msrb.mxu0 %v8781_v28  ;;  %10976 = vmatpush.msrb.mxu2 %v8781_v28  ;;  %v8495_v44 = vpop.f32.mrf.mxu0  ;;  %v8097_v62 = vld [vmem:[%s13923_s10 + $0xc8] sm:$0xff] }
 0xe06   : > { %v8496_v54 = vadd.f32 %v8495_v44, %v8097_v62 }
 0xe07   : > { %8833 = vmatpush.msrb.mxu0 %v8780_v9  ;;  %10977 = vmatpush.msrb.mxu2 %v8780_v9 }
 0xe0b   : > { %v8676_v12 = vpop.f32.mrf.mxu2 }
 0xe0c   : > { %v8750_v59 = vpop.f32.mrf.mxu3 }
 0xe0d   : > { %v13831_v13 = vadd.f32 %v8750_v59, %v13793_v26  ;;  %v8498_v58 = vpop.f32.mrf.mxu0  ;;  %v8587_v7 = vpop.f32.mrf.mxu1 }
 0xe0e   : > { %v8499_v47 = vadd.f32 %v8498_v58, %v8098_v48  ;;  %v8814_v58 = vld [vmem:[%s13924_s11 + $0x10] sm:$0x1] }
 0xe0f   : > { %8837 = vmatmul.f32.vlgmr.msrb.gmra.mxu2 %v8814_v58 }
 0xe10   : > { %v8588_v56 = vadd.f32 %v8587_v7, %v8499_v47 }
 0xe12   : > { %v8677_v44 = vadd.f32 %v8676_v12, %v8588_v56 }
 0xe13   : > { %v8678_v23 = vpop.f32.mrf.mxu2 }
 0xe14   : > { %v8752_v39 = vpop.f32.mrf.mxu3 }
 0xe15   : > { %v13834_v53 = vadd.f32 %v8752_v39, %v13795_v19  ;;  %v8500_v43 = vpop.f32.mrf.mxu0  ;;  %v8589_v19 = vpop.f32.mrf.mxu1 }
 0xe16   : > { %v8501_v42 = vadd.f32 %v8500_v43, %v8099_v31 }
 0xe18   : > { %v8590_v63 = vadd.f32 %v8589_v19, %v8501_v42 }
 0xe1a   : > { %v8679_v7 = vadd.f32 %v8678_v23, %v8590_v63 }
 0xe1b   : > { %v8681_v41 = vpop.f32.mrf.mxu2 }
 0xe1c   : > { %v8755_v2 = vpop.f32.mrf.mxu3 }
 0xe1d   : > { %v13836_v30 = vadd.f32 %v8755_v2, %v8667_v17  ;;  %v8503_v3 = vpop.f32.mrf.mxu0  ;;  %v8592_v21 = vpop.f32.mrf.mxu1 }
 0xe1e   : > { %v8504_v24 = vadd.f32 %v8503_v3, %v8100_v40  ;;  %v8585_v3 = vadd.f32 %v8584_v51, %v8496_v54 }
 0xe20   : > { %v8593_v9 = vadd.f32 %v8592_v21, %v8504_v24  ;;  %v8812_v21 = vld [vmem:[%s13924_s11] sm:$0xff] }
 0xe21   : > { %8834 = vmatmul.f32.vlgmr.msrb.gmra.mxu0 %v8812_v21 }
 0xe23   : > { %v8683_v29 = vpop.f32.mrf.mxu2 }
 0xe24   : > { %v8757_v33 = vpop.f32.mrf.mxu3 }
 0xe25   : > { %v13840_v34 = vadd.f32 %v8757_v33, %v8669_v18  ;;  %v8505_v20 = vpop.f32.mrf.mxu0  ;;  %v8594_v10 = vpop.f32.mrf.mxu1 }
 0xe26   : > { %v8506_v17 = vadd.f32 %v8505_v20, %v8101_v1 }
 0xe28   : > { %v8595_v4 = vadd.f32 %v8594_v10, %v8506_v17 }
 0xe2a   : > { %v8684_v39 = vadd.f32 %v8683_v29, %v8595_v4  ;;  %v8674_v29 = vadd.f32 %v13838_v27, %v8585_v3  ;;  %v8803_v27 = vmax.f32 %v13840_v34, 0.0  ;;  %v8798_v34 = vmax.f32 %v13818_v49, 0.0 }
 0xe2b   : > { %v8686_v61 = vpop.f32.mrf.mxu2 }
 0xe2c   : > { %v8760_v52 = vpop.f32.mrf.mxu3 }
 0xe2d   : > { %v13842_v57 = vadd.f32 %v8760_v52, %v8672_v55  ;;  %v8508_v5 = vpop.f32.mrf.mxu0  ;;  %v8597_v14 = vpop.f32.mrf.mxu1  ;;  %v8682_v55 = vadd.f32 %v8681_v41, %v8593_v9 }
 0xe2e   : > { %v8509_v22 = vadd.f32 %v8508_v5, %v8102_v60  ;;  %v8817_v60 = vld [vmem:[%s13925_s12 + $0x8] sm:$0x1] }
 0xe30   : > { %v8598_v18 = vadd.f32 %v8597_v14, %v8509_v22 }
 0xe32   : > { %v8687_v25 = vadd.f32 %v8686_v61, %v8598_v18 }
 0xe33   : > { %v8688_v28 = vpop.f32.mrf.mxu2 }
 0xe34   : > { %v13844_v26 = vpop.f32.mrf.mxu3 }
 0xe35   : > { %v8510_v35 = vpop.f32.mrf.mxu0  ;;  %v8599_v6 = vpop.f32.mrf.mxu1  ;;  %v8763_v51 = vadd.f32 %v13844_v26, %v8674_v29  ;;  %v8801_v26 = vmax.f32 %v13834_v53, 0.0  ;;  %v8796_v53 = vmax.f32 %v13800_v45, 0.0  ;;  %v8816_v45 = vld [vmem:[%s13925_s12] sm:$0xff] }
 0xe36   : > { %v8511_v50 = vadd.f32 %v8510_v35, %v8103_v8 }
 0xe37   : > { %v8805_v23 = vmax.f32 %v8763_v51, 0.0 }
 0xe38   : > { %v8600_v37 = vadd.f32 %v8599_v6, %v8511_v50 }
 0xe3a   : > { %v8689_v32 = vadd.f32 %v8688_v28, %v8600_v37 }
 0xe3c   : > { %v8765_v0 = vpop.f32.mrf.mxu3 }
 0xe3d   : > { %v8766_v5 = vadd.f32 %v8765_v0, %v8677_v44  ;;  %v8802_v0 = vmax.f32 %v13836_v30, 0.0  ;;  %v8797_v30 = vmax.f32 %v13805_v15, 0.0 }
 0xe3f   : > { %v8806_v12 = vmax.f32 %v8766_v5, 0.0 }
 0xe44   : > { %v8767_v38 = vpop.f32.mrf.mxu3 }
 0xe45   : > { %v8768_v41 = vadd.f32 %v8767_v38, %v8679_v7  ;;  %v8804_v38 = vmax.f32 %v13842_v57, 0.0  ;;  %v8799_v57 = vmax.f32 %v13825_v16, 0.0  ;;  %v8813_v16 = vld [vmem:[%s13924_s11 + $0x8] sm:$0xff] }
 0xe4c   : > { %v8770_v46 = vpop.f32.mrf.mxu3 }
 0xe4d   : > { %v8771_v19 = vadd.f32 %v8770_v46, %v8682_v55  ;;  %v8800_v46 = vmax.f32 %v13831_v13, 0.0  ;;  %v8815_v13 = vld [vmem:[%s13924_s11 + $0x18] sm:$0x1] }
 0xe4f   : > { %v8808_v14 = vmax.f32 %v8771_v19, 0.0 }
 0xe54   : > { %v8772_v11 = vpop.f32.mrf.mxu3 }
 0xe55   : > { %v8773_v52 = vadd.f32 %v8772_v11, %v8684_v39  ;;  %v8807_v11 = vmax.f32 %v8768_v41, 0.0 }
 0xe57   : > { %v8809_v10 = vmax.f32 %v8773_v52, 0.0 }
 0xe5c   : > { %v8775_v36 = vpop.f32.mrf.mxu3 }
 0xe5d   : > { %v8776_v2 = vadd.f32 %v8775_v36, %v8687_v25 }
 0xe5f   : > { %v8810_v20 = vmax.f32 %v8776_v2, 0.0 }
 0xe64   : > { %v8777_v59 = vpop.f32.mrf.mxu3 }
 0xe65   : > { %v8778_v33 = vadd.f32 %v8777_v59, %v8689_v32 }
 0xe67   : > { %v8811_v43 = vmax.f32 %v8778_v33, 0.0 }
 0xe69   : > { %8841 = vmatpush.msrb.mxu1 %v8811_v43  ;;  %10978 = vmatpush.msrb.mxu3 %v8811_v43 }
 0xe6b   : > { %8842 = vmatpush.msrb.mxu1 %v8810_v20  ;;  %10979 = vmatpush.msrb.mxu3 %v8810_v20 }
 0xe6d   : > { %8843 = vmatpush.msrb.mxu1 %v8809_v10  ;;  %10980 = vmatpush.msrb.mxu3 %v8809_v10 }
 0xe6f   : > { %8844 = vmatpush.msrb.mxu1 %v8808_v14  ;;  %10981 = vmatpush.msrb.mxu3 %v8808_v14 }
 0xe71   : > { %8845 = vmatpush.msrb.mxu1 %v8807_v11  ;;  %10982 = vmatpush.msrb.mxu3 %v8807_v11 }
 0xe73   : > { %8846 = vmatpush.msrb.mxu1 %v8806_v12  ;;  %10983 = vmatpush.msrb.mxu3 %v8806_v12 }
 0xe75   : > { %8847 = vmatpush.msrb.mxu1 %v8805_v23  ;;  %10984 = vmatpush.msrb.mxu3 %v8805_v23 }
 0xe77   : > { %8848 = vmatpush.msrb.mxu1 %v8804_v38  ;;  %10985 = vmatpush.msrb.mxu3 %v8804_v38 }
 0xe79   : > { %8849 = vmatpush.msrb.mxu1 %v8803_v27  ;;  %10986 = vmatpush.msrb.mxu3 %v8803_v27 }
 0xe7b   : > { %8850 = vmatpush.msrb.mxu1 %v8802_v0  ;;  %10987 = vmatpush.msrb.mxu3 %v8802_v0 }
 0xe7d   : > { %8851 = vmatpush.msrb.mxu1 %v8801_v26  ;;  %10988 = vmatpush.msrb.mxu3 %v8801_v26 }
 0xe7f   : > { %8852 = vmatpush.msrb.mxu1 %v8800_v46  ;;  %10989 = vmatpush.msrb.mxu3 %v8800_v46 }
 0xe81   : > { %8853 = vmatpush.msrb.mxu1 %v8799_v57  ;;  %10990 = vmatpush.msrb.mxu3 %v8799_v57 }
 0xe83   : > { %8854 = vmatpush.msrb.mxu1 %v8798_v34  ;;  %10991 = vmatpush.msrb.mxu3 %v8798_v34 }
 0xe85   : > { %8855 = vmatpush.msrb.mxu1 %v8797_v30  ;;  %10992 = vmatpush.msrb.mxu3 %v8797_v30 }
 0xe87   : > { %8856 = vmatpush.msrb.mxu1 %v8796_v53  ;;  %10993 = vmatpush.msrb.mxu3 %v8796_v53 }
 0xe88   : > { %8860 = vmatmul.f32.vlgmr.msrb.gmra.mxu3 %v8815_v13  ;;  %8857 = vmatmul.f32.vlgmr.msrb.gmra.mxu1 %v8813_v16 }
 0xe92   : > { %v8838_v61 = vpop.f32.mrf.mxu2 }
 0xe93   : > { %v8839_v22 = vadd.f32 %v8838_v61, %v8817_v60 }
 0xe9e   : > { %v8835_v15 = vpop.f32.mrf.mxu0 }
 0xe9f   : > { %v8836_v49 = vadd.f32 %v8835_v15, %v8816_v45 }
 0xf05   : > { %v8858_v8 = vpop.f32.mrf.mxu1 }
 0xf06   : > { %v8859_v35 = vadd.f32 %v8858_v8, %v8836_v49 }
 0xf08   : > { %8865 = vst.msk [vmem:[%s11285_s22] sm:$0xff] %vm8864_vm1, %v8859_v35 }
 0xf0b   : > { %v8861_v40 = vpop.f32.mrf.mxu3 }
 0xf0c   : > { %v8862_v1 = vadd.f32 %v8861_v40, %v8839_v22 }
 0xf0e   : > { %8867 = vst.msk [vmem:[%s11285_s22 + $0x8] sm:$0x1] %vm8866_vm2, %v8862_v1 }
 0xf0f PF: > { %s24_s29 = sadd.s32 1, %s11144_s29   ;;  %s14062_s25 = smov %s11136_s27 }
 0xf10   : > { %p21_p12 = scmp.ge.s32.totalorder %s24_s29, 6   ;;  %s14063_s26 = smov %s11140_s28 }
 0xf11   : > { %s14064_s27 = smov %s14067_s14  ;;  %s14065_s28 = smov %s14071_s15 }
 0xf12   :  { %23 = sbr.rel (!%p21_p12) target bundleno = 5 (0x5), region = 115 }
 0xf17   :  { %8889 = vsyncpa [#allocation4], 1 }
 0xf18   :  { %8891 = vsyncpa [#allocation4 + $0x1], 1 }

</bundles_post_ra>
